<compile_context>
chip_gen: v6e
topology: v6e:2x2x1
jax: 0.10.0
libtpu: 0.0.40
codegen_flags: <defaults>
</compile_context>

<pallas_src>
import functools

import jax
import jax.numpy as jnp
from jax.experimental import pallas as pl
from jax.experimental.pallas import tpu as pltpu

LRELU_SLOPE = 0.2
BN_EPS = 1e-5
LANE = 128        # output channels padded to a multiple of this (lane-dense)
TM_CONV1 = 1024   # conv1 M-tile: grid=2 -> both TensorCores busy on v7x


def _round_up(x, m):
    return (x + m - 1) // m * m


def _cparams(semantics):
    return pltpu.CompilerParams(
        dimension_semantics=semantics,
        vmem_limit_bytes=32 * 1024 * 1024,
    )


# ----------------------------- Pallas kernels -------------------------------
def _conv_bias_lrelu_kernel(x_ref, w_ref, b_ref, o_ref):
    # conv1: y = x @ w + b, LeakyReLU(0.2).
    # x:(TM,K) bf16, w:(K,Np) bf16, b:(1,Np) f32, o:(TM,Np) bf16.
    y = jnp.dot(x_ref[...], w_ref[...], preferred_element_type=jnp.float32)
    y = y + b_ref[...]
    o_ref[...] = jnp.where(y > 0, y, LRELU_SLOPE * y).astype(o_ref.dtype)


def _conv_bn_lrelu_kernel(x_ref, w_ref, g_ref, b_ref, o_ref, *, m_true):
    # conv2/conv3: matmul + BatchNorm(batch stats) + LeakyReLU fused in one
    # kernel.  Conv bias is dropped (cancels under BN).  Zero-padded rows /
    # channels contribute 0 to the sums; dividing by m_true keeps stats exact.
    y = jnp.dot(x_ref[...], w_ref[...], preferred_element_type=jnp.float32)
    s1 = jnp.sum(y, axis=0, keepdims=True)            # (1, Np)
    s2 = jnp.sum(y * y, axis=0, keepdims=True)        # (1, Np)
    mean = s1 * (1.0 / m_true)
    var = jnp.maximum(s2 * (1.0 / m_true) - mean * mean, 0.0)
    scale = g_ref[...] * jax.lax.rsqrt(var + BN_EPS)
    shift = b_ref[...] - mean * scale
    z = y * scale + shift
    o_ref[...] = jnp.where(z > 0, z, LRELU_SLOPE * z).astype(o_ref.dtype)


def _conv_bn_lrelu_conv5_kernel(x_ref, w_ref, g_ref, b_ref, w5_ref, b5_ref,
                                o_ref, *, m_true, batch, taps):
    # conv4 (matmul + BN + LeakyReLU) with conv5 (4x4 "valid" conv == full
    # reduce over the 4x4 map) + sigmoid fused into the epilogue.  The conv4
    # activation stays in f32 and never leaves VMEM.
    y = jnp.dot(x_ref[...], w_ref[...], preferred_element_type=jnp.float32)
    s1 = jnp.sum(y, axis=0, keepdims=True)
    s2 = jnp.sum(y * y, axis=0, keepdims=True)
    mean = s1 * (1.0 / m_true)
    var = jnp.maximum(s2 * (1.0 / m_true) - mean * mean, 0.0)
    scale = g_ref[...] * jax.lax.rsqrt(var + BN_EPS)
    shift = b_ref[...] - mean * scale
    a = y * scale + shift
    a = jnp.where(a > 0, a, LRELU_SLOPE * a)           # (m_pad, Np) f32
    a = a[: batch * taps]                              # drop pad rows (no-op here)
    a3 = a.reshape(batch, taps, a.shape[-1])           # (B, 16, Np)
    s = jnp.sum(a3 * w5_ref[...][None], axis=2)        # (B, 16)
    z = jnp.sum(s, axis=1, keepdims=True) + b5_ref[...]  # (B, 1)
    # Exact sigmoid: exp on the EUP; the divide is 2 elements (free) and
    # avoids the approx-reciprocal error on the final probability.
    o_ref[...] = 1.0 / (1.0 + jnp.exp(-z))


# --------------------------- pallas_call wrappers ----------------------------
def _conv1_call(patches, w, b, *, tm):
    m_pad, k = patches.shape
    n_pad = w.shape[1]
    return pl.pallas_call(
        _conv_bias_lrelu_kernel,
        out_shape=jax.ShapeDtypeStruct((m_pad, n_pad), jnp.bfloat16),
        grid=(m_pad // tm,),
        in_specs=[
            pl.BlockSpec((tm, k), lambda i: (i, 0)),
            pl.BlockSpec((k, n_pad), lambda i: (0, 0)),
            pl.BlockSpec((1, n_pad), lambda i: (0, 0)),
        ],
        out_specs=pl.BlockSpec((tm, n_pad), lambda i: (i, 0)),
        compiler_params=_cparams(("parallel",)),
    )(patches, w, b)


def _conv_bn_call(patches, w, gamma, beta, *, m_true):
    m_pad, k = patches.shape
    n_pad = w.shape[1]
    return pl.pallas_call(
        functools.partial(_conv_bn_lrelu_kernel, m_true=m_true),
        out_shape=jax.ShapeDtypeStruct((m_pad, n_pad), jnp.bfloat16),
        grid=(1,),
        in_specs=[
            pl.BlockSpec((m_pad, k), lambda i: (0, 0)),
            pl.BlockSpec((k, n_pad), lambda i: (0, 0)),
            pl.BlockSpec((1, n_pad), lambda i: (0, 0)),
            pl.BlockSpec((1, n_pad), lambda i: (0, 0)),
        ],
        out_specs=pl.BlockSpec((m_pad, n_pad), lambda i: (0, 0)),
        compiler_params=_cparams(("arbitrary",)),
    )(patches, w, gamma, beta)


def _conv_bn_conv5_call(patches, w, gamma, beta, w5, b5, *, m_true, batch, taps):
    m_pad, k = patches.shape
    n_pad = w.shape[1]
    return pl.pallas_call(
        functools.partial(_conv_bn_lrelu_conv5_kernel,
                          m_true=m_true, batch=batch, taps=taps),
        out_shape=jax.ShapeDtypeStruct((batch, 1), jnp.float32),
        grid=(1,),
        in_specs=[
            pl.BlockSpec((m_pad, k), lambda i: (0, 0)),
            pl.BlockSpec((k, n_pad), lambda i: (0, 0)),
            pl.BlockSpec((1, n_pad), lambda i: (0, 0)),
            pl.BlockSpec((1, n_pad), lambda i: (0, 0)),
            pl.BlockSpec((taps, n_pad), lambda i: (0, 0)),
            pl.BlockSpec((1, 1), lambda i: (0, 0)),
        ],
        out_specs=pl.BlockSpec((batch, 1), lambda i: (0, 0)),
        compiler_params=_cparams(("arbitrary",)),
    )(patches, w, gamma, beta, w5, b5)


# ------------------------------- JAX glue -----------------------------------
def _im2col_nhwc(x, kh, kw, stride, pad):
    # x: (B, H, W, C) channels-last.  Patch column ordering: (kh, kw, C).
    # TODO(synk): move into the kernels (implicit-GEMM tap gather via strided
    # pl.ds loads or pl.ANY + make_async_copy) to drop the kh*kw x HBM
    # expansion and allow fusing the whole forward into one pallas_call.
    B, H, W, C = x.shape
    xp = jnp.pad(x, ((0, 0), (pad, pad), (pad, pad), (0, 0)))
    ho = (H + 2 * pad - kh) // stride + 1
    wo = (W + 2 * pad - kw) // stride + 1
    cols = [
        xp[:, i:i + stride * ho:stride, j:j + stride * wo:stride, :]
        for i in range(kh) for j in range(kw)
    ]
    patches = jnp.concatenate(cols, axis=-1)              # (B, ho, wo, kh*kw*C)
    return patches.reshape(B * ho * wo, kh * kw * C), ho, wo


def _pack_conv_weight(w, c_in_from, n_out):
    # (C_out, C_in, kh, kw) -> (kh*kw*c_in_from, n_out) bf16.  Zero K-rows for
    # the lane-padding channels of the incoming activation, zero columns for
    # the lane-padding output channels.
    c_out, c_in, kh, kw = w.shape
    wk = jnp.transpose(w, (2, 3, 1, 0))                    # (kh, kw, C_in, C_out)
    wk = jnp.pad(wk, ((0, 0), (0, 0), (0, c_in_from - c_in), (0, n_out - c_out)))
    return wk.reshape(kh * kw * c_in_from, n_out).astype(jnp.bfloat16)


def _pad_vec(v, n_out):
    return jnp.pad(v.astype(jnp.float32), (0, n_out - v.shape[0])).reshape(1, -1)


def discriminator_forward(x_nchw, params):
    B = x_nchw.shape[0]
    x = jnp.transpose(x_nchw, (0, 2, 3, 1)).astype(jnp.bfloat16)   # NHWC bf16

    # conv1: matmul + bias + LeakyReLU, M-tiled (grid >= 2 for megacore).
    w1, b1, _, _ = params["conv1"]
    n1 = _round_up(w1.shape[0], LANE)
    patches, ho, wo = _im2col_nhwc(x, 4, 4, 2, 1)
    m = patches.shape[0]
    tm = min(TM_CONV1, _round_up(m, 8))
    m_pad = _round_up(m, tm)
    patches = jnp.pad(patches, ((0, m_pad - m), (0, 0)))
    a = _conv1_call(patches, _pack_conv_weight(w1, x.shape[-1], n1),
                    _pad_vec(b1, n1), tm=tm)
    a = a[:m].reshape(B, ho, wo, n1)        # stays lane-padded; dead channels = 0

    # conv2, conv3: one fused matmul + BN + LeakyReLU kernel each (grid = 1).
    for name in ("conv2", "conv3"):
        w, _, g, be = params[name]          # conv bias cancels under BN
        n_out = _round_up(w.shape[0], LANE)
        patches, ho, wo = _im2col_nhwc(a, 4, 4, 2, 1)
        m = patches.shape[0]
        m_pad = _round_up(m, 8)
        patches = jnp.pad(patches, ((0, m_pad - m), (0, 0)))
        a = _conv_bn_call(patches, _pack_conv_weight(w, a.shape[-1], n_out),
                          _pad_vec(g, n_out), _pad_vec(be, n_out), m_true=m)
        a = a[:m].reshape(B, ho, wo, n_out)

    # conv4 + conv5: matmul + BN + LeakyReLU + full-map conv5 + sigmoid, fused.
    w4, _, g4, be4 = params["conv4"]
    w5, b5, _, _ = params["conv5"]
    n4 = _round_up(w4.shape[0], LANE)
    patches, ho, wo = _im2col_nhwc(a, 4, 4, 2, 1)
    assert (ho, wo) == (w5.shape[2], w5.shape[3]), "conv5 must cover the full map"
    taps = ho * wo
    m = patches.shape[0]
    m_pad = _round_up(m, 8)
    patches = jnp.pad(patches, ((0, m_pad - m), (0, 0)))
    w5m = jnp.transpose(w5[0], (1, 2, 0))                  # (kh, kw, C4)
    w5m = jnp.pad(w5m, ((0, 0), (0, 0), (0, n4 - w5.shape[1])))
    w5m = w5m.reshape(taps, n4).astype(jnp.float32)
    out = _conv_bn_conv5_call(
        patches, _pack_conv_weight(w4, a.shape[-1], n4),
        _pad_vec(g4, n4), _pad_vec(be4, n4),
        w5m, b5.astype(jnp.float32).reshape(1, 1),
        m_true=m, batch=B, taps=taps)
    return out.reshape(B, 1, 1, 1)                         # NCHW f32


def init_params(key, d=16):
    # Mirrors Discriminator.__init__ + weight_init(0.0, 0.02):
    #   conv weights ~ N(0, 0.02), conv biases = 0, BN gamma = 1, beta = 0.
    keys = jax.random.split(key, 5)
    io_shapes = [(d, 1), (2 * d, d), (4 * d, 2 * d), (8 * d, 4 * d), (1, 8 * d)]
    params = {}
    for idx, ((co, ci), k_) in enumerate(zip(io_shapes, keys), start=1):
        w = 0.02 * jax.random.normal(k_, (co, ci, 4, 4), jnp.float32)
        b = jnp.zeros((co,), jnp.float32)
        gamma = jnp.ones((co,), jnp.float32)
        beta = jnp.zeros((co,), jnp.float32)
        params[f"conv{idx}"] = (w, b, gamma, beta)
    return params


# ------------------------- pure-JAX reference check -------------------------
def _ref_conv(x, w, b, stride, pad):
    y = jax.lax.conv_general_dilated(
        x, w, (stride, stride), [(pad, pad), (pad, pad)],
        dimension_numbers=("NCHW", "OIHW", "NCHW"),
        precision=jax.lax.Precision.HIGHEST)
    return y + b.reshape(1, -1, 1, 1)


def _ref_bn(x, gamma, beta):
    mean = x.mean(axis=(0, 2, 3), keepdims=True)
    var = ((x - mean) ** 2).mean(axis=(0, 2, 3), keepdims=True)
    xh = (x - mean) * jax.lax.rsqrt(var + BN_EPS)
    return xh * gamma.reshape(1, -1, 1, 1) + beta.reshape(1, -1, 1, 1)


def reference_forward(x, params):
    lrelu = lambda v: jnp.where(v > 0, v, LRELU_SLOPE * v)
    w, b, _, _ = params["conv1"]
    x = lrelu(_ref_conv(x, w, b, 2, 1))
    for name in ("conv2", "conv3", "conv4"):
        w, b, g, be = params[name]
        x = lrelu(_ref_bn(_ref_conv(x, w, b, 2, 1), g, be))
    w, b, _, _ = params["conv5"]
    return jax.nn.sigmoid(_ref_conv(x, w, b, 1, 0))


# --------------------------------- main --------------------------------------
if __name__ == "__main__":
    key = jax.random.PRNGKey(0)
    k_param, k_x = jax.random.split(key)
    d = 16                                    # small d (PyTorch default is 128)
    x = jax.random.normal(k_x, (2, 1, 64, 64), jnp.float32)  # NCHW DCGAN input

    params = init_params(k_param, d=d)
    out = jax.block_until_ready(jax.jit(discriminator_forward)(x, params))
    ref = jax.block_until_ready(jax.jit(reference_forward)(x, params))

    assert out.shape == (2, 1, 1, 1), out.shape
    assert bool(jnp.all(jnp.isfinite(out)))
    assert bool(jnp.allclose(out, ref, atol=3e-2, rtol=3e-2)), (out, ref)
    print("KERNEL_OK")
</pallas_src>

<mosaic_0001>
module attributes {stable_mosaic.version = 11 : i64} {
  func.func @_conv_bias_lrelu_kernel(%arg0: i32, %arg1: memref<1024x16xbf16, #tpu.memory_space<vmem>>, %arg2: memref<16x128xbf16, #tpu.memory_space<vmem>>, %arg3: memref<1x128xf32, #tpu.memory_space<vmem>>, %arg4: memref<1024x128xbf16, #tpu.memory_space<vmem>>) attributes {dimension_semantics = [#tpu.dimension_semantics<parallel>], iteration_bounds = array<i64: 2>, scalar_prefetch = 0 : i64, scratch_operands = 0 : i64, tpu.core_type = #tpu.core_type<tc>, window_params = [{transform_indices = @transform_0, window_bounds = array<i64: 1024, 16>}, {pipeline_mode = #tpu.pipeline_mode<synchronous>, transform_indices = @transform_1, window_bounds = array<i64: 16, 128>}, {pipeline_mode = #tpu.pipeline_mode<synchronous>, transform_indices = @transform_2, window_bounds = array<i64: 1, 128>}, {transform_indices = @transform_3, window_bounds = array<i64: 1024, 128>}]} {
    %c0 = arith.constant 0 : index
    %c0_0 = arith.constant 0 : index
    %0 = vector.load %arg1[%c0, %c0_0] : memref<1024x16xbf16, #tpu.memory_space<vmem>>, vector<1024x16xbf16>
    %c0_1 = arith.constant 0 : index
    %c0_2 = arith.constant 0 : index
    %1 = vector.load %arg2[%c0_1, %c0_2] : memref<16x128xbf16, #tpu.memory_space<vmem>>, vector<16x128xbf16>
    %cst = arith.constant dense<0.000000e+00> : vector<1024x128xf32>
    %2 = tpu.matmul %0, %1, %cst {dimension_numbers = #tpu.dot_dimension_numbers<[1], [0], [0], [1], [0, 0, 1, 1], [], []>} : vector<1024x16xbf16>, vector<16x128xbf16>, vector<1024x128xf32> -> vector<1024x128xf32>
    %c0_3 = arith.constant 0 : index
    %c0_4 = arith.constant 0 : index
    %3 = vector.load %arg3[%c0_3, %c0_4] : memref<1x128xf32, #tpu.memory_space<vmem>>, vector<1x128xf32>
    %4 = vector.broadcast %3 : vector<1x128xf32> to vector<1024x128xf32>
    %5 = arith.addf %2, %4 : vector<1024x128xf32>
    %cst_5 = arith.constant 0.000000e+00 : f32
    %6 = vector.broadcast %cst_5 : f32 to vector<1024x128xf32>
    %7 = arith.cmpf ogt, %5, %6 : vector<1024x128xf32>
    %cst_6 = arith.constant 2.000000e-01 : f32
    %8 = vector.broadcast %cst_6 : f32 to vector<1024x128xf32>
    %9 = arith.mulf %8, %5 : vector<1024x128xf32>
    %10 = arith.select %7, %5, %9 : vector<1024x128xi1>, vector<1024x128xf32>
    %11 = arith.truncf %10 : vector<1024x128xf32> to vector<1024x128xbf16>
    %c0_7 = arith.constant 0 : index
    %c0_8 = arith.constant 0 : index
    %12 = vector.load %arg4[%c0_7, %c0_8] : memref<1024x128xbf16, #tpu.memory_space<vmem>>, vector<1024x128xbf16>
    tpu.vector_store %arg4[%c0_7, %c0_8], %11 {strides = array<i32>} : memref<1024x128xbf16, #tpu.memory_space<vmem>>, vector<1024x128xbf16>,
    return
  }
  func.func @transform_0(%arg0: i32) -> (i32, i32) {
    %c0_i32 = arith.constant 0 : i32
    %c0_i32_0 = arith.constant 0 : i32
    return %arg0, %c0_i32 : i32, i32
  }
  func.func @transform_1(%arg0: i32) -> (i32, i32) {
    %c0_i32 = arith.constant 0 : i32
    %c0_i32_0 = arith.constant 0 : i32
    %c0_i32_1 = arith.constant 0 : i32
    return %c0_i32, %c0_i32_0 : i32, i32
  }
  func.func @transform_2(%arg0: i32) -> (i32, i32) {
    %c0_i32 = arith.constant 0 : i32
    %c0_i32_0 = arith.constant 0 : i32
    %c0_i32_1 = arith.constant 0 : i32
    return %c0_i32, %c0_i32_0 : i32, i32
  }
  func.func @transform_3(%arg0: i32) -> (i32, i32) {
    %c0_i32 = arith.constant 0 : i32
    %c0_i32_0 = arith.constant 0 : i32
    return %arg0, %c0_i32 : i32, i32
  }
}

module attributes {stable_mosaic.version = 11 : i64} {
  func.func @_conv_bn_lrelu_kernel(%arg0: i32, %arg1: memref<512x2048xbf16, #tpu.memory_space<vmem>>, %arg2: memref<2048x128xbf16, #tpu.memory_space<vmem>>, %arg3: memref<1x128xf32, #tpu.memory_space<vmem>>, %arg4: memref<1x128xf32, #tpu.memory_space<vmem>>, %arg5: memref<512x128xbf16, #tpu.memory_space<vmem>>) attributes {dimension_semantics = [#tpu.dimension_semantics<arbitrary>], iteration_bounds = array<i64: 1>, scalar_prefetch = 0 : i64, scratch_operands = 0 : i64, tpu.core_type = #tpu.core_type<tc>, window_params = [{pipeline_mode = #tpu.pipeline_mode<synchronous>, transform_indices = @transform_0, window_bounds = array<i64: 512, 2048>}, {pipeline_mode = #tpu.pipeline_mode<synchronous>, transform_indices = @transform_1, window_bounds = array<i64: 2048, 128>}, {pipeline_mode = #tpu.pipeline_mode<synchronous>, transform_indices = @transform_2, window_bounds = array<i64: 1, 128>}, {pipeline_mode = #tpu.pipeline_mode<synchronous>, transform_indices = @transform_3, window_bounds = array<i64: 1, 128>}, {pipeline_mode = #tpu.pipeline_mode<synchronous>, transform_indices = @transform_4, window_bounds = array<i64: 512, 128>}]} {
    %c0 = arith.constant 0 : index
    %c0_0 = arith.constant 0 : index
    %0 = vector.load %arg1[%c0, %c0_0] : memref<512x2048xbf16, #tpu.memory_space<vmem>>, vector<512x2048xbf16>
    %c0_1 = arith.constant 0 : index
    %c0_2 = arith.constant 0 : index
    %1 = vector.load %arg2[%c0_1, %c0_2] : memref<2048x128xbf16, #tpu.memory_space<vmem>>, vector<2048x128xbf16>
    %cst = arith.constant dense<0.000000e+00> : vector<512x128xf32>
    %2 = tpu.matmul %0, %1, %cst {dimension_numbers = #tpu.dot_dimension_numbers<[1], [0], [0], [1], [0, 0, 1, 1], [], []>} : vector<512x2048xbf16>, vector<2048x128xbf16>, vector<512x128xf32> -> vector<512x128xf32>
    %cst_3 = arith.constant dense<0.000000e+00> : vector<128xf32>
    %3 = vector.multi_reduction <add>, %2, %cst_3 [0] : vector<512x128xf32> to vector<128xf32>
    %4 = vector.shape_cast %3 : vector<128xf32> to vector<1x128xf32>
    %5 = arith.mulf %2, %2 : vector<512x128xf32>
    %cst_4 = arith.constant dense<0.000000e+00> : vector<128xf32>
    %6 = vector.multi_reduction <add>, %5, %cst_4 [0] : vector<512x128xf32> to vector<128xf32>
    %7 = vector.shape_cast %6 : vector<128xf32> to vector<1x128xf32>
    %cst_5 = arith.constant 0.001953125 : f32
    %8 = vector.broadcast %cst_5 : f32 to vector<1x128xf32>
    %9 = arith.mulf %4, %8 : vector<1x128xf32>
    %cst_6 = arith.constant 0.001953125 : f32
    %10 = vector.broadcast %cst_6 : f32 to vector<1x128xf32>
    %11 = arith.mulf %7, %10 : vector<1x128xf32>
    %12 = arith.mulf %9, %9 : vector<1x128xf32>
    %13 = arith.subf %11, %12 : vector<1x128xf32>
    %cst_7 = arith.constant 0.000000e+00 : f32
    %14 = vector.broadcast %cst_7 : f32 to vector<1x128xf32>
    %15 = arith.maximumf %13, %14 : vector<1x128xf32>
    %c0_8 = arith.constant 0 : index
    %c0_9 = arith.constant 0 : index
    %16 = vector.load %arg3[%c0_8, %c0_9] : memref<1x128xf32, #tpu.memory_space<vmem>>, vector<1x128xf32>
    %cst_10 = arith.constant 9.99999974E-6 : f32
    %17 = vector.broadcast %cst_10 : f32 to vector<1x128xf32>
    %18 = arith.addf %15, %17 : vector<1x128xf32>
    %19 = math.rsqrt %18 : vector<1x128xf32>
    %20 = arith.mulf %16, %19 : vector<1x128xf32>
    %c0_11 = arith.constant 0 : index
    %c0_12 = arith.constant 0 : index
    %21 = vector.load %arg4[%c0_11, %c0_12] : memref<1x128xf32, #tpu.memory_space<vmem>>, vector<1x128xf32>
    %22 = arith.mulf %9, %20 : vector<1x128xf32>
    %23 = arith.subf %21, %22 : vector<1x128xf32>
    %24 = vector.broadcast %20 : vector<1x128xf32> to vector<512x128xf32>
    %25 = arith.mulf %2, %24 : vector<512x128xf32>
    %26 = vector.broadcast %23 : vector<1x128xf32> to vector<512x128xf32>
    %27 = arith.addf %25, %26 : vector<512x128xf32>
    %cst_13 = arith.constant 0.000000e+00 : f32
    %28 = vector.broadcast %cst_13 : f32 to vector<512x128xf32>
    %29 = arith.cmpf ogt, %27, %28 : vector<512x128xf32>
    %cst_14 = arith.constant 2.000000e-01 : f32
    %30 = vector.broadcast %cst_14 : f32 to vector<512x128xf32>
    %31 = arith.mulf %30, %27 : vector<512x128xf32>
    %32 = arith.select %29, %27, %31 : vector<512x128xi1>, vector<512x128xf32>
    %33 = arith.truncf %32 : vector<512x128xf32> to vector<512x128xbf16>
    %c0_15 = arith.constant 0 : index
    %c0_16 = arith.constant 0 : index
    %34 = vector.load %arg5[%c0_15, %c0_16] : memref<512x128xbf16, #tpu.memory_space<vmem>>, vector<512x128xbf16>
    tpu.vector_store %arg5[%c0_15, %c0_16], %33 {strides = array<i32>} : memref<512x128xbf16, #tpu.memory_space<vmem>>, vector<512x128xbf16>,
    return
  }
  func.func @transform_0(%arg0: i32) -> (i32, i32) {
    %c0_i32 = arith.constant 0 : i32
    %c0_i32_0 = arith.constant 0 : i32
    %c0_i32_1 = arith.constant 0 : i32
    return %c0_i32, %c0_i32_0 : i32, i32
  }
  func.func @transform_1(%arg0: i32) -> (i32, i32) {
    %c0_i32 = arith.constant 0 : i32
    %c0_i32_0 = arith.constant 0 : i32
    %c0_i32_1 = arith.constant 0 : i32
    return %c0_i32, %c0_i32_0 : i32, i32
  }
  func.func @transform_2(%arg0: i32) -> (i32, i32) {
    %c0_i32 = arith.constant 0 : i32
    %c0_i32_0 = arith.constant 0 : i32
    %c0_i32_1 = arith.constant 0 : i32
    return %c0_i32, %c0_i32_0 : i32, i32
  }
  func.func @transform_3(%arg0: i32) -> (i32, i32) {
    %c0_i32 = arith.constant 0 : i32
    %c0_i32_0 = arith.constant 0 : i32
    %c0_i32_1 = arith.constant 0 : i32
    return %c0_i32, %c0_i32_0 : i32, i32
  }
  func.func @transform_4(%arg0: i32) -> (i32, i32) {
    %c0_i32 = arith.constant 0 : i32
    %c0_i32_0 = arith.constant 0 : i32
    %c0_i32_1 = arith.constant 0 : i32
    return %c0_i32, %c0_i32_0 : i32, i32
  }
}

module attributes {stable_mosaic.version = 11 : i64} {
  func.func @_conv_bn_lrelu_kernel(%arg0: i32, %arg1: memref<128x2048xbf16, #tpu.memory_space<vmem>>, %arg2: memref<2048x128xbf16, #tpu.memory_space<vmem>>, %arg3: memref<1x128xf32, #tpu.memory_space<vmem>>, %arg4: memref<1x128xf32, #tpu.memory_space<vmem>>, %arg5: memref<128x128xbf16, #tpu.memory_space<vmem>>) attributes {dimension_semantics = [#tpu.dimension_semantics<arbitrary>], iteration_bounds = array<i64: 1>, scalar_prefetch = 0 : i64, scratch_operands = 0 : i64, tpu.core_type = #tpu.core_type<tc>, window_params = [{pipeline_mode = #tpu.pipeline_mode<synchronous>, transform_indices = @transform_0, window_bounds = array<i64: 128, 2048>}, {pipeline_mode = #tpu.pipeline_mode<synchronous>, transform_indices = @transform_1, window_bounds = array<i64: 2048, 128>}, {pipeline_mode = #tpu.pipeline_mode<synchronous>, transform_indices = @transform_2, window_bounds = array<i64: 1, 128>}, {pipeline_mode = #tpu.pipeline_mode<synchronous>, transform_indices = @transform_3, window_bounds = array<i64: 1, 128>}, {pipeline_mode = #tpu.pipeline_mode<synchronous>, transform_indices = @transform_4, window_bounds = array<i64: 128, 128>}]} {
    %c0 = arith.constant 0 : index
    %c0_0 = arith.constant 0 : index
    %0 = vector.load %arg1[%c0, %c0_0] : memref<128x2048xbf16, #tpu.memory_space<vmem>>, vector<128x2048xbf16>
    %c0_1 = arith.constant 0 : index
    %c0_2 = arith.constant 0 : index
    %1 = vector.load %arg2[%c0_1, %c0_2] : memref<2048x128xbf16, #tpu.memory_space<vmem>>, vector<2048x128xbf16>
    %cst = arith.constant dense<0.000000e+00> : vector<128x128xf32>
    %2 = tpu.matmul %0, %1, %cst {dimension_numbers = #tpu.dot_dimension_numbers<[1], [0], [0], [1], [0, 0, 1, 1], [], []>} : vector<128x2048xbf16>, vector<2048x128xbf16>, vector<128x128xf32> -> vector<128x128xf32>
    %cst_3 = arith.constant dense<0.000000e+00> : vector<128xf32>
    %3 = vector.multi_reduction <add>, %2, %cst_3 [0] : vector<128x128xf32> to vector<128xf32>
    %4 = vector.shape_cast %3 : vector<128xf32> to vector<1x128xf32>
    %5 = arith.mulf %2, %2 : vector<128x128xf32>
    %cst_4 = arith.constant dense<0.000000e+00> : vector<128xf32>
    %6 = vector.multi_reduction <add>, %5, %cst_4 [0] : vector<128x128xf32> to vector<128xf32>
    %7 = vector.shape_cast %6 : vector<128xf32> to vector<1x128xf32>
    %cst_5 = arith.constant 7.812500e-03 : f32
    %8 = vector.broadcast %cst_5 : f32 to vector<1x128xf32>
    %9 = arith.mulf %4, %8 : vector<1x128xf32>
    %cst_6 = arith.constant 7.812500e-03 : f32
    %10 = vector.broadcast %cst_6 : f32 to vector<1x128xf32>
    %11 = arith.mulf %7, %10 : vector<1x128xf32>
    %12 = arith.mulf %9, %9 : vector<1x128xf32>
    %13 = arith.subf %11, %12 : vector<1x128xf32>
    %cst_7 = arith.constant 0.000000e+00 : f32
    %14 = vector.broadcast %cst_7 : f32 to vector<1x128xf32>
    %15 = arith.maximumf %13, %14 : vector<1x128xf32>
    %c0_8 = arith.constant 0 : index
    %c0_9 = arith.constant 0 : index
    %16 = vector.load %arg3[%c0_8, %c0_9] : memref<1x128xf32, #tpu.memory_space<vmem>>, vector<1x128xf32>
    %cst_10 = arith.constant 9.99999974E-6 : f32
    %17 = vector.broadcast %cst_10 : f32 to vector<1x128xf32>
    %18 = arith.addf %15, %17 : vector<1x128xf32>
    %19 = math.rsqrt %18 : vector<1x128xf32>
    %20 = arith.mulf %16, %19 : vector<1x128xf32>
    %c0_11 = arith.constant 0 : index
    %c0_12 = arith.constant 0 : index
    %21 = vector.load %arg4[%c0_11, %c0_12] : memref<1x128xf32, #tpu.memory_space<vmem>>, vector<1x128xf32>
    %22 = arith.mulf %9, %20 : vector<1x128xf32>
    %23 = arith.subf %21, %22 : vector<1x128xf32>
    %24 = vector.broadcast %20 : vector<1x128xf32> to vector<128x128xf32>
    %25 = arith.mulf %2, %24 : vector<128x128xf32>
    %26 = vector.broadcast %23 : vector<1x128xf32> to vector<128x128xf32>
    %27 = arith.addf %25, %26 : vector<128x128xf32>
    %cst_13 = arith.constant 0.000000e+00 : f32
    %28 = vector.broadcast %cst_13 : f32 to vector<128x128xf32>
    %29 = arith.cmpf ogt, %27, %28 : vector<128x128xf32>
    %cst_14 = arith.constant 2.000000e-01 : f32
    %30 = vector.broadcast %cst_14 : f32 to vector<128x128xf32>
    %31 = arith.mulf %30, %27 : vector<128x128xf32>
    %32 = arith.select %29, %27, %31 : vector<128x128xi1>, vector<128x128xf32>
    %33 = arith.truncf %32 : vector<128x128xf32> to vector<128x128xbf16>
    %c0_15 = arith.constant 0 : index
    %c0_16 = arith.constant 0 : index
    %34 = vector.load %arg5[%c0_15, %c0_16] : memref<128x128xbf16, #tpu.memory_space<vmem>>, vector<128x128xbf16>
    tpu.vector_store %arg5[%c0_15, %c0_16], %33 {strides = array<i32>} : memref<128x128xbf16, #tpu.memory_space<vmem>>, vector<128x128xbf16>,
    return
  }
  func.func @transform_0(%arg0: i32) -> (i32, i32) {
    %c0_i32 = arith.constant 0 : i32
    %c0_i32_0 = arith.constant 0 : i32
    %c0_i32_1 = arith.constant 0 : i32
    return %c0_i32, %c0_i32_0 : i32, i32
  }
  func.func @transform_1(%arg0: i32) -> (i32, i32) {
    %c0_i32 = arith.constant 0 : i32
    %c0_i32_0 = arith.constant 0 : i32
    %c0_i32_1 = arith.constant 0 : i32
    return %c0_i32, %c0_i32_0 : i32, i32
  }
  func.func @transform_2(%arg0: i32) -> (i32, i32) {
    %c0_i32 = arith.constant 0 : i32
    %c0_i32_0 = arith.constant 0 : i32
    %c0_i32_1 = arith.constant 0 : i32
    return %c0_i32, %c0_i32_0 : i32, i32
  }
  func.func @transform_3(%arg0: i32) -> (i32, i32) {
    %c0_i32 = arith.constant 0 : i32
    %c0_i32_0 = arith.constant 0 : i32
    %c0_i32_1 = arith.constant 0 : i32
    return %c0_i32, %c0_i32_0 : i32, i32
  }
  func.func @transform_4(%arg0: i32) -> (i32, i32) {
    %c0_i32 = arith.constant 0 : i32
    %c0_i32_0 = arith.constant 0 : i32
    %c0_i32_1 = arith.constant 0 : i32
    return %c0_i32, %c0_i32_0 : i32, i32
  }
}

module attributes {stable_mosaic.version = 11 : i64} {
  func.func @_conv_bn_lrelu_conv5_kernel(%arg0: i32, %arg1: memref<32x2048xbf16, #tpu.memory_space<vmem>>, %arg2: memref<2048x128xbf16, #tpu.memory_space<vmem>>, %arg3: memref<1x128xf32, #tpu.memory_space<vmem>>, %arg4: memref<1x128xf32, #tpu.memory_space<vmem>>, %arg5: memref<16x128xf32, #tpu.memory_space<vmem>>, %arg6: memref<1x1xf32, #tpu.memory_space<vmem>>, %arg7: memref<2x1xf32, #tpu.memory_space<vmem>>) attributes {dimension_semantics = [#tpu.dimension_semantics<arbitrary>], iteration_bounds = array<i64: 1>, scalar_prefetch = 0 : i64, scratch_operands = 0 : i64, tpu.core_type = #tpu.core_type<tc>, window_params = [{pipeline_mode = #tpu.pipeline_mode<synchronous>, transform_indices = @transform_0, window_bounds = array<i64: 32, 2048>}, {pipeline_mode = #tpu.pipeline_mode<synchronous>, transform_indices = @transform_1, window_bounds = array<i64: 2048, 128>}, {pipeline_mode = #tpu.pipeline_mode<synchronous>, transform_indices = @transform_2, window_bounds = array<i64: 1, 128>}, {pipeline_mode = #tpu.pipeline_mode<synchronous>, transform_indices = @transform_3, window_bounds = array<i64: 1, 128>}, {pipeline_mode = #tpu.pipeline_mode<synchronous>, transform_indices = @transform_4, window_bounds = array<i64: 16, 128>}, {pipeline_mode = #tpu.pipeline_mode<synchronous>, transform_indices = @transform_5, window_bounds = array<i64: 1, 1>}, {pipeline_mode = #tpu.pipeline_mode<synchronous>, transform_indices = @transform_6, window_bounds = array<i64: 2, 1>}]} {
    %c0 = arith.constant 0 : index
    %c0_0 = arith.constant 0 : index
    %0 = vector.load %arg1[%c0, %c0_0] : memref<32x2048xbf16, #tpu.memory_space<vmem>>, vector<32x2048xbf16>
    %c0_1 = arith.constant 0 : index
    %c0_2 = arith.constant 0 : index
    %1 = vector.load %arg2[%c0_1, %c0_2] : memref<2048x128xbf16, #tpu.memory_space<vmem>>, vector<2048x128xbf16>
    %cst = arith.constant dense<0.000000e+00> : vector<32x128xf32>
    %2 = tpu.matmul %0, %1, %cst {dimension_numbers = #tpu.dot_dimension_numbers<[1], [0], [0], [1], [0, 0, 1, 1], [], []>} : vector<32x2048xbf16>, vector<2048x128xbf16>, vector<32x128xf32> -> vector<32x128xf32>
    %cst_3 = arith.constant dense<0.000000e+00> : vector<128xf32>
    %3 = vector.multi_reduction <add>, %2, %cst_3 [0] : vector<32x128xf32> to vector<128xf32>
    %4 = vector.shape_cast %3 : vector<128xf32> to vector<1x128xf32>
    %5 = arith.mulf %2, %2 : vector<32x128xf32>
    %cst_4 = arith.constant dense<0.000000e+00> : vector<128xf32>
    %6 = vector.multi_reduction <add>, %5, %cst_4 [0] : vector<32x128xf32> to vector<128xf32>
    %7 = vector.shape_cast %6 : vector<128xf32> to vector<1x128xf32>
    %cst_5 = arith.constant 3.125000e-02 : f32
    %8 = vector.broadcast %cst_5 : f32 to vector<1x128xf32>
    %9 = arith.mulf %4, %8 : vector<1x128xf32>
    %cst_6 = arith.constant 3.125000e-02 : f32
    %10 = vector.broadcast %cst_6 : f32 to vector<1x128xf32>
    %11 = arith.mulf %7, %10 : vector<1x128xf32>
    %12 = arith.mulf %9, %9 : vector<1x128xf32>
    %13 = arith.subf %11, %12 : vector<1x128xf32>
    %cst_7 = arith.constant 0.000000e+00 : f32
    %14 = vector.broadcast %cst_7 : f32 to vector<1x128xf32>
    %15 = arith.maximumf %13, %14 : vector<1x128xf32>
    %c0_8 = arith.constant 0 : index
    %c0_9 = arith.constant 0 : index
    %16 = vector.load %arg3[%c0_8, %c0_9] : memref<1x128xf32, #tpu.memory_space<vmem>>, vector<1x128xf32>
    %cst_10 = arith.constant 9.99999974E-6 : f32
    %17 = vector.broadcast %cst_10 : f32 to vector<1x128xf32>
    %18 = arith.addf %15, %17 : vector<1x128xf32>
    %19 = math.rsqrt %18 : vector<1x128xf32>
    %20 = arith.mulf %16, %19 : vector<1x128xf32>
    %c0_11 = arith.constant 0 : index
    %c0_12 = arith.constant 0 : index
    %21 = vector.load %arg4[%c0_11, %c0_12] : memref<1x128xf32, #tpu.memory_space<vmem>>, vector<1x128xf32>
    %22 = arith.mulf %9, %20 : vector<1x128xf32>
    %23 = arith.subf %21, %22 : vector<1x128xf32>
    %24 = vector.broadcast %20 : vector<1x128xf32> to vector<32x128xf32>
    %25 = arith.mulf %2, %24 : vector<32x128xf32>
    %26 = vector.broadcast %23 : vector<1x128xf32> to vector<32x128xf32>
    %27 = arith.addf %25, %26 : vector<32x128xf32>
    %cst_13 = arith.constant 0.000000e+00 : f32
    %28 = vector.broadcast %cst_13 : f32 to vector<32x128xf32>
    %29 = arith.cmpf ogt, %27, %28 : vector<32x128xf32>
    %cst_14 = arith.constant 2.000000e-01 : f32
    %30 = vector.broadcast %cst_14 : f32 to vector<32x128xf32>
    %31 = arith.mulf %30, %27 : vector<32x128xf32>
    %32 = arith.select %29, %27, %31 : vector<32x128xi1>, vector<32x128xf32>
    %33 = vector.shape_cast %32 : vector<32x128xf32> to vector<2x16x128xf32>
    %c0_15 = arith.constant 0 : index
    %c0_16 = arith.constant 0 : index
    %34 = vector.load %arg5[%c0_15, %c0_16] : memref<16x128xf32, #tpu.memory_space<vmem>>, vector<16x128xf32>
    %35 = vector.shape_cast %34 : vector<16x128xf32> to vector<1x16x128xf32>
    %36 = vector.broadcast %35 : vector<1x16x128xf32> to vector<2x16x128xf32>
    %37 = arith.mulf %33, %36 : vector<2x16x128xf32>
    %cst_17 = arith.constant dense<0.000000e+00> : vector<2x16xf32>
    %38 = vector.multi_reduction <add>, %37, %cst_17 [2] : vector<2x16x128xf32> to vector<2x16xf32>
    %cst_18 = arith.constant dense<0.000000e+00> : vector<2xf32>
    %39 = vector.multi_reduction <add>, %38, %cst_18 [1] : vector<2x16xf32> to vector<2xf32>
    %40 = vector.shape_cast %39 : vector<2xf32> to vector<2x1xf32>
    %c0_19 = arith.constant 0 : index
    %c0_20 = arith.constant 0 : index
    %41 = vector.load %arg6[%c0_19, %c0_20] : memref<1x1xf32, #tpu.memory_space<vmem>>, vector<1x1xf32>
    %42 = vector.broadcast %41 : vector<1x1xf32> to vector<2x1xf32>
    %43 = arith.addf %40, %42 : vector<2x1xf32>
    %cst_21 = arith.constant 0.000000e+00 : f32
    %44 = vector.broadcast %cst_21 : f32 to vector<2x1xf32>
    %45 = arith.subf %44, %43 : vector<2x1xf32>
    %46 = math.exp %45 : vector<2x1xf32>
    %cst_22 = arith.constant 1.000000e+00 : f32
    %47 = vector.broadcast %cst_22 : f32 to vector<2x1xf32>
    %48 = arith.addf %47, %46 : vector<2x1xf32>
    %cst_23 = arith.constant 1.000000e+00 : f32
    %49 = vector.broadcast %cst_23 : f32 to vector<2x1xf32>
    %50 = arith.divf %49, %48 : vector<2x1xf32>
    %c0_24 = arith.constant 0 : index
    %c0_25 = arith.constant 0 : index
    %51 = vector.load %arg7[%c0_24, %c0_25] : memref<2x1xf32, #tpu.memory_space<vmem>>, vector<2x1xf32>
    tpu.vector_store %arg7[%c0_24, %c0_25], %50 {strides = array<i32>} : memref<2x1xf32, #tpu.memory_space<vmem>>, vector<2x1xf32>,
    return
  }
  func.func @transform_0(%arg0: i32) -> (i32, i32) {
    %c0_i32 = arith.constant 0 : i32
    %c0_i32_0 = arith.constant 0 : i32
    %c0_i32_1 = arith.constant 0 : i32
    return %c0_i32, %c0_i32_0 : i32, i32
  }
  func.func @transform_1(%arg0: i32) -> (i32, i32) {
    %c0_i32 = arith.constant 0 : i32
    %c0_i32_0 = arith.constant 0 : i32
    %c0_i32_1 = arith.constant 0 : i32
    return %c0_i32, %c0_i32_0 : i32, i32
  }
  func.func @transform_2(%arg0: i32) -> (i32, i32) {
    %c0_i32 = arith.constant 0 : i32
    %c0_i32_0 = arith.constant 0 : i32
    %c0_i32_1 = arith.constant 0 : i32
    return %c0_i32, %c0_i32_0 : i32, i32
  }
  func.func @transform_3(%arg0: i32) -> (i32, i32) {
    %c0_i32 = arith.constant 0 : i32
    %c0_i32_0 = arith.constant 0 : i32
    %c0_i32_1 = arith.constant 0 : i32
    return %c0_i32, %c0_i32_0 : i32, i32
  }
  func.func @transform_4(%arg0: i32) -> (i32, i32) {
    %c0_i32 = arith.constant 0 : i32
    %c0_i32_0 = arith.constant 0 : i32
    %c0_i32_1 = arith.constant 0 : i32
    return %c0_i32, %c0_i32_0 : i32, i32
  }
  func.func @transform_5(%arg0: i32) -> (i32, i32) {
    %c0_i32 = arith.constant 0 : i32
    %c0_i32_0 = arith.constant 0 : i32
    %c0_i32_1 = arith.constant 0 : i32
    return %c0_i32, %c0_i32_0 : i32, i32
  }
  func.func @transform_6(%arg0: i32) -> (i32, i32) {
    %c0_i32 = arith.constant 0 : i32
    %c0_i32_0 = arith.constant 0 : i32
    %c0_i32_1 = arith.constant 0 : i32
    return %c0_i32, %c0_i32_0 : i32, i32
  }
}

</mosaic_0001>

<bundles_post_ra>
// kernel: discriminator_forward.4
= control target key start
LH: loop header
LB: loop body
LE: loop exit
PB: predicated region body
PF: predicated region fallthrough
CT: control target
= control target key end

     0   :  { %s3535_s12 = smov 0   ;;  %s3972_s0 = inlined_call_operand.vmem [shape: bf16[2048,16], index: 0, kind: input, shape index: {}]   ;;  %s3973_s1 = inlined_call_operand.vmem [shape: bf16[16,128], index: 1, kind: input, shape index: {}]   ;;  %s3974_s2 = inlined_call_operand.vmem [shape: f32[1,128], index: 2, kind: input, shape index: {}]   ;;  %s3975_s3 = inlined_call_operand.vmem [shape: bf16[2048,128], index: 3, kind: output, shape index: {}]  }
   0x1 LB: > { %s2456_s13 = sadd.s32 4294967295, %s3513_s12   ;;  %p2460_p0 = scmp.ge.s32.totalorder %s3513_s12, 1  ;;  %s3513_s12 = sphi %s3535_s12, %s13_s12  }
   0x2   : > { %p138_p1 = scmp.lt.s32.totalorder %s3513_s12, 3 }
   0x4   : > { %p139_p2 = pnand %p2460_p0, %p138_p1 }
   0x5   : > { %s2461_s16 = sshll.u32 (!%p139_p2), %s2456_s13, 7 }
   0x6   : > { %142 = sbr.rel (%p139_p2) target bundleno = 360 (0x168), region = 32  ;;  %p163_p3 = scmp.lt.s32.totalorder (!%p139_p2), %s2461_s16, 255 }
   0xb   : > { %v3441_v0 = vld [vmem:[%s3973_s1] sm:$0xff]   ;;  %s3977_s16 = smov (!%p163_p3, %s2461_s16), 255  ;;  %vm638_vm0 = vcmask 130048  }
   0xc   : > { %3301 = vmatprep.subr.bf16.mxu0 %v3441_v0  ;;  %3431 = vmatprep.subr.bf16.mxu1 %v3441_v0  ;;  %s2462_s17 = sshll.u32 %s3977_s16, 2 }
   0xd   : > { %3302 = vmatpush3.bf16.msra.mxu0 %v3441_v0  ;;  %3432 = vmatpush3.bf16.msra.mxu1 %v3441_v0  ;;  %s3554_s20 = scalar_lea.vmem %s3972_s0, %s2462_s17  ;;  %s3702_s25 = scalar_lea.vmem %s3975_s3, %s2462_s17 }
   0xe   : > { %v3442_v1 = vld [vmem:[%s3554_s20] sm:$0xff]   ;;  %v3444_v3 = vld [vmem:[%s3554_s20 + $0x8] sm:$0xff]   ;;  %v3446_v5 = vld [vmem:[%s3554_s20 + $0x10] sm:$0xff]  }
   0xf   : > { %v3443_v2 = vld [vmem:[%s3554_s20 + $0x100] sm:$0xff]   ;;  %3303 = vmatprep.mubr.msk.bf16.mxu0 %vm638_vm0, %v3442_v1  ;;  %v3445_v4 = vld [vmem:[%s3554_s20 + $0x108] sm:$0xff]   ;;  %v3447_v6 = vld [vmem:[%s3554_s20 + $0x110] sm:$0xff]  }
  0x10   : > { %3367 = vmatprep.mubr.msk.bf16.mxu1 %vm638_vm0, %v3443_v2  ;;  %3304 = vmatmul.mubr.msk.bf16.vlgmr.msra.gmra.mxu0 %vm638_vm0, %v3444_v3  ;;  %v3448_v7 = vld [vmem:[%s3554_s20 + $0x18] sm:$0xff]   ;;  %v3450_v9 = vld [vmem:[%s3554_s20 + $0x20] sm:$0xff]   ;;  %v3452_v11 = vld [vmem:[%s3554_s20 + $0x28] sm:$0xff]  }
  0x11   : > { %3368 = vmatmul.mubr.msk.bf16.vlgmr.msra.gmra.mxu1 %vm638_vm0, %v3445_v4  ;;  %3307 = vmatprep.mubr.msk.bf16.mxu0 %vm638_vm0, %v3446_v5  ;;  %v3449_v8 = vld [vmem:[%s3554_s20 + $0x118] sm:$0xff]   ;;  %v3451_v10 = vld [vmem:[%s3554_s20 + $0x120] sm:$0xff]   ;;  %v3453_v12 = vld [vmem:[%s3554_s20 + $0x128] sm:$0xff]  }
  0x12   : > { %3371 = vmatprep.mubr.msk.bf16.mxu1 %vm638_vm0, %v3447_v6  ;;  %v3454_v13 = vld [vmem:[%s3554_s20 + $0x30] sm:$0xff]   ;;  %v3456_v15 = vld [vmem:[%s3554_s20 + $0x38] sm:$0xff]   ;;  %v3458_v17 = vld [vmem:[%s3554_s20 + $0x40] sm:$0xff]  }
  0x13   : > { %v3455_v14 = vld [vmem:[%s3554_s20 + $0x130] sm:$0xff]   ;;  %v3457_v16 = vld [vmem:[%s3554_s20 + $0x138] sm:$0xff]   ;;  %v3459_v18 = vld [vmem:[%s3554_s20 + $0x140] sm:$0xff]  }
  0x14   : > { %v3460_v19 = vld [vmem:[%s3554_s20 + $0x48] sm:$0xff]   ;;  %v3462_v21 = vld [vmem:[%s3554_s20 + $0x50] sm:$0xff]   ;;  %v3464_v23 = vld [vmem:[%s3554_s20 + $0x58] sm:$0xff]  }
  0x15   : > { %v3461_v20 = vld [vmem:[%s3554_s20 + $0x148] sm:$0xff]   ;;  %v3463_v22 = vld [vmem:[%s3554_s20 + $0x150] sm:$0xff]   ;;  %v3465_v24 = vld [vmem:[%s3554_s20 + $0x158] sm:$0xff]  }
  0x16   : > { %v3466_v25 = vld [vmem:[%s3554_s20 + $0x60] sm:$0xff]   ;;  %v3468_v27 = vld [vmem:[%s3554_s20 + $0x68] sm:$0xff]   ;;  %v3470_v29 = vld [vmem:[%s3554_s20 + $0x70] sm:$0xff]  }
  0x17   : > { %v3467_v26 = vld [vmem:[%s3554_s20 + $0x160] sm:$0xff]   ;;  %v3469_v28 = vld [vmem:[%s3554_s20 + $0x168] sm:$0xff]   ;;  %v3471_v30 = vld [vmem:[%s3554_s20 + $0x170] sm:$0xff]  }
  0x18   : > { %3308 = vmatmul.mubr.msk.bf16.gmra.mxu0 %vm638_vm0, %v3448_v7  ;;  %v3472_v31 = vld [vmem:[%s3554_s20 + $0x78] sm:$0xff]   ;;  %v3474_v33 = vld [vmem:[%s3554_s20 + $0x80] sm:$0xff]   ;;  %v3476_v35 = vld [vmem:[%s3554_s20 + $0x88] sm:$0xff]  }
  0x19   : > { %3372 = vmatmul.mubr.msk.bf16.gmra.mxu1 %vm638_vm0, %v3449_v8  ;;  %3311 = vmatprep.mubr.msk.bf16.mxu0 %vm638_vm0, %v3450_v9  ;;  %v3473_v32 = vld [vmem:[%s3554_s20 + $0x178] sm:$0xff]   ;;  %v3475_v34 = vld [vmem:[%s3554_s20 + $0x180] sm:$0xff]   ;;  %v3477_v36 = vld [vmem:[%s3554_s20 + $0x188] sm:$0xff]  }
  0x1a   : > { %3375 = vmatprep.mubr.msk.bf16.mxu1 %vm638_vm0, %v3451_v10  ;;  %v3478_v37 = vld [vmem:[%s3554_s20 + $0x90] sm:$0xff]   ;;  %v3480_v39 = vld [vmem:[%s3554_s20 + $0x98] sm:$0xff]   ;;  %v3482_v41 = vld [vmem:[%s3554_s20 + $0xa0] sm:$0xff]  }
  0x1b   : > { %v3479_v38 = vld [vmem:[%s3554_s20 + $0x190] sm:$0xff]   ;;  %v3481_v40 = vld [vmem:[%s3554_s20 + $0x198] sm:$0xff]   ;;  %v3483_v42 = vld [vmem:[%s3554_s20 + $0x1a0] sm:$0xff]  }
  0x1c   : > { %v3484_v43 = vld [vmem:[%s3554_s20 + $0xa8] sm:$0xff]   ;;  %v3486_v45 = vld [vmem:[%s3554_s20 + $0xb0] sm:$0xff]   ;;  %v3488_v47 = vld [vmem:[%s3554_s20 + $0xb8] sm:$0xff]  }
  0x1d   : > { %v3485_v44 = vld [vmem:[%s3554_s20 + $0x1a8] sm:$0xff]   ;;  %v3487_v46 = vld [vmem:[%s3554_s20 + $0x1b0] sm:$0xff]   ;;  %v3489_v48 = vld [vmem:[%s3554_s20 + $0x1b8] sm:$0xff]  }
  0x1e   : > { %v3490_v49 = vld [vmem:[%s3554_s20 + $0xc0] sm:$0xff]   ;;  %v3492_v51 = vld [vmem:[%s3554_s20 + $0xc8] sm:$0xff]   ;;  %v3494_v53 = vld [vmem:[%s3554_s20 + $0xd0] sm:$0xff]  }
  0x1f   : > { %v3491_v50 = vld [vmem:[%s3554_s20 + $0x1c0] sm:$0xff]   ;;  %v3493_v52 = vld [vmem:[%s3554_s20 + $0x1c8] sm:$0xff]   ;;  %v3495_v54 = vld [vmem:[%s3554_s20 + $0x1d0] sm:$0xff]  }
  0x20   : > { %3312 = vmatmul.mubr.msk.bf16.gmra.mxu0 %vm638_vm0, %v3452_v11  ;;  %v3496_v55 = vld [vmem:[%s3554_s20 + $0xd8] sm:$0xff]   ;;  %v3498_v57 = vld [vmem:[%s3554_s20 + $0xe0] sm:$0xff]   ;;  %v3500_v59 = vld [vmem:[%s3554_s20 + $0xe8] sm:$0xff]  }
  0x21   : > { %3376 = vmatmul.mubr.msk.bf16.gmra.mxu1 %vm638_vm0, %v3453_v12  ;;  %3315 = vmatprep.mubr.msk.bf16.mxu0 %vm638_vm0, %v3454_v13  ;;  %v3497_v56 = vld [vmem:[%s3554_s20 + $0x1d8] sm:$0xff]   ;;  %v3499_v58 = vld [vmem:[%s3554_s20 + $0x1e0] sm:$0xff]   ;;  %v3501_v60 = vld [vmem:[%s3554_s20 + $0x1e8] sm:$0xff]  }
  0x22   : > { %3379 = vmatprep.mubr.msk.bf16.mxu1 %vm638_vm0, %v3455_v14  ;;  %v3502_v61 = vld [vmem:[%s3554_s20 + $0xf0] sm:$0xff]   ;;  %v3504_v63 = vld [vmem:[%s3554_s20 + $0xf8] sm:$0xff]   ;;  %v3687_v1 = vld [vmem:[%s3974_s2] ss:$0 sm:$0xff] }
  0x23   : > { %v3503_v62 = vld [vmem:[%s3554_s20 + $0x1f0] sm:$0xff]   ;;  %v3505_v0 = vld [vmem:[%s3554_s20 + $0x1f8] sm:$0xff]  }
  0x28   : > { %3316 = vmatmul.mubr.msk.bf16.gmra.mxu0 %vm638_vm0, %v3456_v15 }
  0x29   : > { %3380 = vmatmul.mubr.msk.bf16.gmra.mxu1 %vm638_vm0, %v3457_v16  ;;  %3319 = vmatprep.mubr.msk.bf16.mxu0 %vm638_vm0, %v3458_v17 }
  0x2a   : > { %3383 = vmatprep.mubr.msk.bf16.mxu1 %vm638_vm0, %v3459_v18 }
  0x30   : > { %3320 = vmatmul.mubr.msk.bf16.gmra.mxu0 %vm638_vm0, %v3460_v19 }
  0x31   : > { %3384 = vmatmul.mubr.msk.bf16.gmra.mxu1 %vm638_vm0, %v3461_v20  ;;  %3323 = vmatprep.mubr.msk.bf16.mxu0 %vm638_vm0, %v3462_v21 }
  0x32   : > { %3387 = vmatprep.mubr.msk.bf16.mxu1 %vm638_vm0, %v3463_v22 }
  0x38   : > { %3324 = vmatmul.mubr.msk.bf16.gmra.mxu0 %vm638_vm0, %v3464_v23 }
  0x39   : > { %3388 = vmatmul.mubr.msk.bf16.gmra.mxu1 %vm638_vm0, %v3465_v24  ;;  %3327 = vmatprep.mubr.msk.bf16.mxu0 %vm638_vm0, %v3466_v25 }
  0x3a   : > { %3391 = vmatprep.mubr.msk.bf16.mxu1 %vm638_vm0, %v3467_v26 }
  0x40   : > { %3328 = vmatmul.mubr.msk.bf16.gmra.mxu0 %vm638_vm0, %v3468_v27 }
  0x41   : > { %3392 = vmatmul.mubr.msk.bf16.gmra.mxu1 %vm638_vm0, %v3469_v28  ;;  %3331 = vmatprep.mubr.msk.bf16.mxu0 %vm638_vm0, %v3470_v29 }
  0x42   : > { %3395 = vmatprep.mubr.msk.bf16.mxu1 %vm638_vm0, %v3471_v30 }
  0x48   : > { %3332 = vmatmul.mubr.msk.bf16.gmra.mxu0 %vm638_vm0, %v3472_v31 }
  0x49   : > { %3396 = vmatmul.mubr.msk.bf16.gmra.mxu1 %vm638_vm0, %v3473_v32  ;;  %3335 = vmatprep.mubr.msk.bf16.mxu0 %vm638_vm0, %v3474_v33 }
  0x4a   : > { %3399 = vmatprep.mubr.msk.bf16.mxu1 %vm638_vm0, %v3475_v34 }
  0x50   : > { %3336 = vmatmul.mubr.msk.bf16.gmra.mxu0 %vm638_vm0, %v3476_v35 }
  0x51   : > { %3400 = vmatmul.mubr.msk.bf16.gmra.mxu1 %vm638_vm0, %v3477_v36  ;;  %3339 = vmatprep.mubr.msk.bf16.mxu0 %vm638_vm0, %v3478_v37 }
  0x52   : > { %3403 = vmatprep.mubr.msk.bf16.mxu1 %vm638_vm0, %v3479_v38 }
  0x58   : > { %3340 = vmatmul.mubr.msk.bf16.gmra.mxu0 %vm638_vm0, %v3480_v39 }
  0x59   : > { %3404 = vmatmul.mubr.msk.bf16.gmra.mxu1 %vm638_vm0, %v3481_v40  ;;  %3343 = vmatprep.mubr.msk.bf16.mxu0 %vm638_vm0, %v3482_v41 }
  0x5a   : > { %3407 = vmatprep.mubr.msk.bf16.mxu1 %vm638_vm0, %v3483_v42 }
  0x60   : > { %3344 = vmatmul.mubr.msk.bf16.gmra.mxu0 %vm638_vm0, %v3484_v43 }
  0x61   : > { %3408 = vmatmul.mubr.msk.bf16.gmra.mxu1 %vm638_vm0, %v3485_v44  ;;  %3347 = vmatprep.mubr.msk.bf16.mxu0 %vm638_vm0, %v3486_v45 }
  0x62   : > { %3411 = vmatprep.mubr.msk.bf16.mxu1 %vm638_vm0, %v3487_v46 }
  0x68   : > { %3348 = vmatmul.mubr.msk.bf16.gmra.mxu0 %vm638_vm0, %v3488_v47 }
  0x69   : > { %3412 = vmatmul.mubr.msk.bf16.gmra.mxu1 %vm638_vm0, %v3489_v48  ;;  %3351 = vmatprep.mubr.msk.bf16.mxu0 %vm638_vm0, %v3490_v49 }
  0x6a   : > { %3415 = vmatprep.mubr.msk.bf16.mxu1 %vm638_vm0, %v3491_v50 }
  0x70   : > { %3352 = vmatmul.mubr.msk.bf16.gmra.mxu0 %vm638_vm0, %v3492_v51 }
  0x71   : > { %3416 = vmatmul.mubr.msk.bf16.gmra.mxu1 %vm638_vm0, %v3493_v52  ;;  %3355 = vmatprep.mubr.msk.bf16.mxu0 %vm638_vm0, %v3494_v53 }
  0x72   : > { %3419 = vmatprep.mubr.msk.bf16.mxu1 %vm638_vm0, %v3495_v54 }
  0x78   : > { %3356 = vmatmul.mubr.msk.bf16.gmra.mxu0 %vm638_vm0, %v3496_v55 }
  0x79   : > { %3420 = vmatmul.mubr.msk.bf16.gmra.mxu1 %vm638_vm0, %v3497_v56  ;;  %3359 = vmatprep.mubr.msk.bf16.mxu0 %vm638_vm0, %v3498_v57 }
  0x7a   : > { %3423 = vmatprep.mubr.msk.bf16.mxu1 %vm638_vm0, %v3499_v58 }
  0x80   : > { %3360 = vmatmul.mubr.msk.bf16.gmra.mxu0 %vm638_vm0, %v3500_v59 }
  0x81   : > { %3424 = vmatmul.mubr.msk.bf16.gmra.mxu1 %vm638_vm0, %v3501_v60  ;;  %3363 = vmatprep.mubr.msk.bf16.mxu0 %vm638_vm0, %v3502_v61 }
  0x82   : > { %3427 = vmatprep.mubr.msk.bf16.mxu1 %vm638_vm0, %v3503_v62 }
  0x88   : > { %3364 = vmatmul.mubr.msk.bf16.gmra.mxu0 %vm638_vm0, %v3504_v63 }
  0x89   : > { %3428 = vmatmul.mubr.msk.bf16.gmra.mxu1 %vm638_vm0, %v3505_v0 }
  0xd0   : > { %v3305_v2 = vpop.f32.mrf.mxu0 }
  0xd1   : > { %v874_v3 = vadd.f32 %v3305_v2, %v3687_v1  ;;  %v3369_v4 = vpop.f32.mrf.mxu1 }
  0xd2   : > { %v1130_v5 = vadd.f32 %v3369_v4, %v3687_v1  ;;  %v865_v6 = vpop.f32.mrf.mxu0 }
  0xd3   : > { %vm1378_vm1 = vcmp.gt.f32.partialorder %v874_v3, 0.0  ;;  %v1506_v7 = vmul.f32 0.2, %v874_v3  ;;  %v866_v8 = vadd.f32 %v3687_v1, %v865_v6  ;;  %v1121_v9 = vpop.f32.mrf.mxu1 }
  0xd4   : > { %vm1442_vm2 = vcmp.gt.f32.partialorder %v1130_v5, 0.0  ;;  %v1570_v10 = vmul.f32 0.2, %v1130_v5  ;;  %v1122_v11 = vadd.f32 %v3687_v1, %v1121_v9  ;;  %v3306_v12 = vpop.f32.mrf.mxu0 }
  0xd5   : > { %v1634_v13 = vsel %vm1378_vm1, %v874_v3, %v1506_v7  ;;  %vm1376_vm3 = vcmp.gt.f32.partialorder %v866_v8, 0.0  ;;  %v1504_v14 = vmul.f32 0.2, %v866_v8  ;;  %v877_v15 = vadd.f32 %v3306_v12, %v3687_v1  ;;  %v3370_v16 = vpop.f32.mrf.mxu1 }
  0xd6   : > { %v1698_v17 = vsel %vm1442_vm2, %v1130_v5, %v1570_v10  ;;  %vm1440_vm4 = vcmp.gt.f32.partialorder %v1122_v11, 0.0  ;;  %v1568_v18 = vmul.f32 0.2, %v1122_v11  ;;  %v1133_v19 = vadd.f32 %v3370_v16, %v3687_v1  ;;  %v868_v20 = vpop.f32.mrf.mxu0 }
  0xd7   : > { %v1632_v21 = vsel %vm1376_vm3, %v866_v8, %v1504_v14  ;;  %vm1379_vm5 = vcmp.gt.f32.partialorder %v877_v15, 0.0  ;;  %v1507_v22 = vmul.f32 0.2, %v877_v15  ;;  %v869_v23 = vadd.f32 %v3687_v1, %v868_v20  ;;  %v1124_v24 = vpop.f32.mrf.mxu1 }
  0xd8   : > { %v1696_v25 = vsel %vm1440_vm4, %v1122_v11, %v1568_v18  ;;  %vm1443_vm6 = vcmp.gt.f32.partialorder %v1133_v19, 0.0  ;;  %v1571_v26 = vmul.f32 0.2, %v1133_v19  ;;  %v1125_v27 = vadd.f32 %v3687_v1, %v1124_v24  ;;  %v3309_v28 = vpop.f32.mrf.mxu0 }
  0xd9   : > { %v1635_v29 = vsel %vm1379_vm5, %v877_v15, %v1507_v22  ;;  %vm1377_vm7 = vcmp.gt.f32.partialorder %v869_v23, 0.0  ;;  %v1505_v30 = vmul.f32 0.2, %v869_v23  ;;  %v890_v31 = vadd.f32 %v3309_v28, %v3687_v1  ;;  %v3373_v32 = vpop.f32.mrf.mxu1 }
  0xda   : > { %v2861_v33 = vpack.c.bf16 %v1635_v29, %v1634_v13  ;;  %v1699_v34 = vsel %vm1443_vm6, %v1133_v19, %v1571_v26  ;;  %vm1441_vm8 = vcmp.gt.f32.partialorder %v1125_v27, 0.0  ;;  %v1569_v35 = vmul.f32 0.2, %v1125_v27  ;;  %v881_v36 = vpop.f32.mrf.mxu0 }
  0xdb   : > { %v3021_v37 = vpack.c.bf16 %v1699_v34, %v1698_v17  ;;  %v1633_v38 = vsel %vm1377_vm7, %v869_v23, %v1505_v30  ;;  %vm1382_vm9 = vcmp.gt.f32.partialorder %v890_v31, 0.0  ;;  %v1510_v39 = vmul.f32 0.2, %v890_v31  ;;  %v1137_v40 = vpop.f32.mrf.mxu1 }
  0xdc   : > { %3173 = vst [vmem:[%s3702_s25 + $0x8] sm:$0xff] %v2861_v33   ;;  %v2856_v41 = vpack.c.bf16 %v1633_v38, %v1632_v21  ;;  %v1697_v42 = vsel %vm1441_vm8, %v1125_v27, %v1569_v35  ;;  %v1146_v43 = vadd.f32 %v3373_v32, %v3687_v1  ;;  %v882_v44 = vadd.f32 %v3687_v1, %v881_v36  ;;  %v3310_v45 = vpop.f32.mrf.mxu0 }
  0xdd   : > { %3205 = vst [vmem:[%s3702_s25 + $0x108] sm:$0xff] %v3021_v37   ;;  %v3016_v46 = vpack.c.bf16 %v1697_v42, %v1696_v25  ;;  %v1638_v47 = vsel %vm1382_vm9, %v890_v31, %v1510_v39  ;;  %v1138_v48 = vadd.f32 %v3687_v1, %v1137_v40  ;;  %v893_v49 = vadd.f32 %v3310_v45, %v3687_v1  ;;  %v3374_v50 = vpop.f32.mrf.mxu1 }
  0xde   : > { %2857 = vst [vmem:[%s3702_s25] sm:$0xff] %v2856_v41   ;;  %vm1446_vm10 = vcmp.gt.f32.partialorder %v1146_v43, 0.0  ;;  %v1574_v51 = vmul.f32 0.2, %v1146_v43  ;;  %vm1380_vm11 = vcmp.gt.f32.partialorder %v882_v44, 0.0  ;;  %v1508_v52 = vmul.f32 0.2, %v882_v44  ;;  %v884_v53 = vpop.f32.mrf.mxu0 }
  0xdf   : > { %3204 = vst [vmem:[%s3702_s25 + $0x100] sm:$0xff] %v3016_v46   ;;  %vm1444_vm12 = vcmp.gt.f32.partialorder %v1138_v48, 0.0  ;;  %v1572_v54 = vmul.f32 0.2, %v1138_v48  ;;  %vm1383_vm13 = vcmp.gt.f32.partialorder %v893_v49, 0.0  ;;  %v1140_v56 = vpop.f32.mrf.mxu1  ;;  %v1149_v59 = vadd.f32 %v3374_v50, %v3687_v1 }
  0xe0   : > { %v1511_v55 = vmul.f32 0.2, %v893_v49  ;;  %v1702_v57 = vsel %vm1446_vm10, %v1146_v43, %v1574_v51  ;;  %v1636_v58 = vsel %vm1380_vm11, %v882_v44, %v1508_v52  ;;  %v885_v60 = vadd.f32 %v3687_v1, %v884_v53  ;;  %v3313_v61 = vpop.f32.mrf.mxu0 }
  0xe1   : > { %v1700_v62 = vsel %vm1444_vm12, %v1138_v48, %v1572_v54  ;;  %v1141_v0 = vadd.f32 %v3687_v1, %v1140_v56  ;;  %v906_v2 = vadd.f32 %v3313_v61, %v3687_v1  ;;  %v3377_v3 = vpop.f32.mrf.mxu1  ;;  %vm1447_vm14 = vcmp.gt.f32.partialorder %v1149_v59, 0.0 }
  0xe2   : > { %v1639_v63 = vsel %vm1383_vm13, %v893_v49, %v1511_v55  ;;  %v1575_v5 = vmul.f32 0.2, %v1149_v59  ;;  %vm1381_vm15 = vcmp.gt.f32.partialorder %v885_v60, 0.0  ;;  %v897_v6 = vpop.f32.mrf.mxu0  ;;  %v1509_v7 = vmul.f32 0.2, %v885_v60 }
  0xe3   : > { %v2871_v4 = vpack.c.bf16 %v1639_v63, %v1638_v47  ;;  %vm1445_vm0 = vcmp.gt.f32.partialorder %v1141_v0, 0.0  ;;  %v1573_v8 = vmul.f32 0.2, %v1141_v0  ;;  %vm1386_vm1 = vcmp.gt.f32.partialorder %v906_v2, 0.0  ;;  %v1153_v9 = vpop.f32.mrf.mxu1 }
  0xe4   : > { %v1703_v10 = vsel %vm1447_vm14, %v1149_v59, %v1575_v5  ;;  %v1514_v11 = vmul.f32 0.2, %v906_v2  ;;  %v1162_v12 = vadd.f32 %v3377_v3, %v3687_v1  ;;  %v898_v13 = vadd.f32 %v3687_v1, %v897_v6  ;;  %v3314_v14 = vpop.f32.mrf.mxu0 }
  0xe5   : > { %3175 = vst [vmem:[%s3702_s25 + $0x18] sm:$0xff] %v2871_v4   ;;  %v3031_v15 = vpack.c.bf16 %v1703_v10, %v1702_v57  ;;  %v1637_v16 = vsel %vm1381_vm15, %v885_v60, %v1509_v7  ;;  %v1701_v17 = vsel %vm1445_vm0, %v1141_v0, %v1573_v8  ;;  %v1154_v18 = vadd.f32 %v3687_v1, %v1153_v9  ;;  %v3378_v19 = vpop.f32.mrf.mxu1 }
  0xe6   : > { %v2866_v20 = vpack.c.bf16 %v1637_v16, %v1636_v58  ;;  %v3026_v21 = vpack.c.bf16 %v1701_v17, %v1700_v62  ;;  %v1642_v22 = vsel %vm1386_vm1, %v906_v2, %v1514_v11  ;;  %vm1450_vm2 = vcmp.gt.f32.partialorder %v1162_v12, 0.0  ;;  %v900_v23 = vpop.f32.mrf.mxu0 }
  0xe7   : > { %3207 = vst [vmem:[%s3702_s25 + $0x118] sm:$0xff] %v3031_v15   ;;  %v1578_v24 = vmul.f32 0.2, %v1162_v12  ;;  %vm1384_vm3 = vcmp.gt.f32.partialorder %v898_v13, 0.0  ;;  %v1512_v25 = vmul.f32 0.2, %v898_v13  ;;  %v1156_v26 = vpop.f32.mrf.mxu1  ;;  %v909_v28 = vadd.f32 %v3314_v14, %v3687_v1 }
  0xe8   : > { %vm1448_vm4 = vcmp.gt.f32.partialorder %v1154_v18, 0.0  ;;  %3174 = vst [vmem:[%s3702_s25 + $0x10] sm:$0xff] %v2866_v20   ;;  %3206 = vst [vmem:[%s3702_s25 + $0x110] sm:$0xff] %v3026_v21   ;;  %v1576_v27 = vmul.f32 0.2, %v1154_v18  ;;  %v1165_v29 = vadd.f32 %v3378_v19, %v3687_v1  ;;  %v901_v30 = vadd.f32 %v3687_v1, %v900_v23  ;;  %v3317_v31 = vpop.f32.mrf.mxu0 }
  0xe9   : > { %v1706_v32 = vsel %vm1450_vm2, %v1162_v12, %v1578_v24  ;;  %v1640_v33 = vsel %vm1384_vm3, %v898_v13, %v1512_v25  ;;  %v1157_v34 = vadd.f32 %v3687_v1, %v1156_v26  ;;  %v922_v35 = vadd.f32 %v3317_v31, %v3687_v1  ;;  %v3381_v36 = vpop.f32.mrf.mxu1 }
  0xea   : > { %v1704_v37 = vsel %vm1448_vm4, %v1154_v18, %v1576_v27  ;;  %vm1387_vm5 = vcmp.gt.f32.partialorder %v909_v28, 0.0  ;;  %v1515_v38 = vmul.f32 0.2, %v909_v28  ;;  %vm1451_vm6 = vcmp.gt.f32.partialorder %v1165_v29, 0.0  ;;  %v913_v39 = vpop.f32.mrf.mxu0 }
  0xeb   : > { %v1579_v40 = vmul.f32 0.2, %v1165_v29  ;;  %vm1385_vm7 = vcmp.gt.f32.partialorder %v901_v30, 0.0  ;;  %v1513_v41 = vmul.f32 0.2, %v901_v30  ;;  %vm1449_vm8 = vcmp.gt.f32.partialorder %v1157_v34, 0.0  ;;  %v1169_v42 = vpop.f32.mrf.mxu1 }
  0xec   : > { %v1643_v43 = vsel %vm1387_vm5, %v909_v28, %v1515_v38  ;;  %v1577_v44 = vmul.f32 0.2, %v1157_v34  ;;  %vm1390_vm9 = vcmp.gt.f32.partialorder %v922_v35, 0.0  ;;  %v1518_v45 = vmul.f32 0.2, %v922_v35  ;;  %v3318_v46 = vpop.f32.mrf.mxu0 }
  0xed   : > { %v2881_v47 = vpack.c.bf16 %v1643_v43, %v1642_v22  ;;  %v1707_v48 = vsel %vm1451_vm6, %v1165_v29, %v1579_v40  ;;  %v1641_v49 = vsel %vm1385_vm7, %v901_v30, %v1513_v41  ;;  %v1178_v50 = vadd.f32 %v3381_v36, %v3687_v1  ;;  %v3382_v51 = vpop.f32.mrf.mxu1 }
  0xee   : > { %v3041_v52 = vpack.c.bf16 %v1707_v48, %v1706_v32  ;;  %v2876_v53 = vpack.c.bf16 %v1641_v49, %v1640_v33  ;;  %v1705_v54 = vsel %vm1449_vm8, %v1157_v34, %v1577_v44  ;;  %v1646_v55 = vsel %vm1390_vm9, %v922_v35, %v1518_v45  ;;  %v916_v56 = vpop.f32.mrf.mxu0 }
  0xef   : > { %3177 = vst [vmem:[%s3702_s25 + $0x28] sm:$0xff] %v2881_v47   ;;  %v3036_v57 = vpack.c.bf16 %v1705_v54, %v1704_v37  ;;  %vm1454_vm10 = vcmp.gt.f32.partialorder %v1178_v50, 0.0  ;;  %v1582_v58 = vmul.f32 0.2, %v1178_v50  ;;  %v914_v59 = vadd.f32 %v3687_v1, %v913_v39  ;;  %v1172_v60 = vpop.f32.mrf.mxu1 }
  0xf0   : > { %3209 = vst [vmem:[%s3702_s25 + $0x128] sm:$0xff] %v3041_v52   ;;  %3176 = vst [vmem:[%s3702_s25 + $0x20] sm:$0xff] %v2876_v53   ;;  %v1170_v61 = vadd.f32 %v3687_v1, %v1169_v42  ;;  %v925_v62 = vadd.f32 %v3318_v46, %v3687_v1  ;;  %v1181_v63 = vadd.f32 %v3382_v51, %v3687_v1  ;;  %v3321_v2 = vpop.f32.mrf.mxu0 }
  0xf1   : > { %v917_v0 = vadd.f32 %v3687_v1, %v916_v56  ;;  %3208 = vst [vmem:[%s3702_s25 + $0x120] sm:$0xff] %v3036_v57   ;;  %v1710_v3 = vsel %vm1454_vm10, %v1178_v50, %v1582_v58  ;;  %vm1388_vm11 = vcmp.gt.f32.partialorder %v914_v59, 0.0  ;;  %v1516_v4 = vmul.f32 0.2, %v914_v59  ;;  %v3385_v6 = vpop.f32.mrf.mxu1 }
  0xf2   : > { %v1173_v5 = vadd.f32 %v3687_v1, %v1172_v60  ;;  %vm1452_vm12 = vcmp.gt.f32.partialorder %v1170_v61, 0.0  ;;  %v1580_v7 = vmul.f32 0.2, %v1170_v61  ;;  %vm1391_vm13 = vcmp.gt.f32.partialorder %v925_v62, 0.0  ;;  %v929_v9 = vpop.f32.mrf.mxu0 }
  0xf3   : > { %v1519_v8 = vmul.f32 0.2, %v925_v62  ;;  %v1644_v10 = vsel %vm1388_vm11, %v914_v59, %v1516_v4  ;;  %vm1455_vm14 = vcmp.gt.f32.partialorder %v1181_v63, 0.0  ;;  %v1583_v11 = vmul.f32 0.2, %v1181_v63  ;;  %v1185_v12 = vpop.f32.mrf.mxu1 }
  0xf4   : > { %vm1389_vm15 = vcmp.gt.f32.partialorder %v917_v0, 0.0  ;;  %v1708_v13 = vsel %vm1452_vm12, %v1170_v61, %v1580_v7  ;;  %v1517_v15 = vmul.f32 0.2, %v917_v0  ;;  %vm1453_vm0 = vcmp.gt.f32.partialorder %v1173_v5, 0.0  ;;  %v3322_v16 = vpop.f32.mrf.mxu0 }
  0xf5   : > { %v1647_v14 = vsel %vm1391_vm13, %v925_v62, %v1519_v8  ;;  %v1711_v18 = vsel %vm1455_vm14, %v1181_v63, %v1583_v11  ;;  %v1581_v19 = vmul.f32 0.2, %v1173_v5  ;;  %v938_v20 = vadd.f32 %v3321_v2, %v3687_v1  ;;  %v3386_v21 = vpop.f32.mrf.mxu1 }
  0xf6   : > { %v2891_v17 = vpack.c.bf16 %v1647_v14, %v1646_v55  ;;  %v3051_v22 = vpack.c.bf16 %v1711_v18, %v1710_v3  ;;  %v1645_v23 = vsel %vm1389_vm15, %v917_v0, %v1517_v15  ;;  %v1194_v24 = vadd.f32 %v3385_v6, %v3687_v1  ;;  %v932_v26 = vpop.f32.mrf.mxu0 }
  0xf7   : > { %v930_v25 = vadd.f32 %v3687_v1, %v929_v9  ;;  %v2886_v27 = vpack.c.bf16 %v1645_v23, %v1644_v10  ;;  %v1709_v28 = vsel %vm1453_vm0, %v1173_v5, %v1581_v19  ;;  %vm1394_vm1 = vcmp.gt.f32.partialorder %v938_v20, 0.0  ;;  %v1188_v30 = vpop.f32.mrf.mxu1 }
  0xf8   : > { %3179 = vst [vmem:[%s3702_s25 + $0x38] sm:$0xff] %v2891_v17   ;;  %v1522_v29 = vmul.f32 0.2, %v938_v20  ;;  %3211 = vst [vmem:[%s3702_s25 + $0x138] sm:$0xff] %v3051_v22   ;;  %v3046_v31 = vpack.c.bf16 %v1709_v28, %v1708_v13  ;;  %vm1458_vm2 = vcmp.gt.f32.partialorder %v1194_v24, 0.0  ;;  %v3325_v33 = vpop.f32.mrf.mxu0  ;;  %v1186_v36 = vadd.f32 %v3687_v1, %v1185_v12 }
  0xf9   : > { %v1586_v32 = vmul.f32 0.2, %v1194_v24  ;;  %vm1392_vm3 = vcmp.gt.f32.partialorder %v930_v25, 0.0  ;;  %3178 = vst [vmem:[%s3702_s25 + $0x30] sm:$0xff] %v2886_v27   ;;  %v1520_v35 = vmul.f32 0.2, %v930_v25  ;;  %v941_v37 = vadd.f32 %v3322_v16, %v3687_v1  ;;  %v3389_v38 = vpop.f32.mrf.mxu1 }
  0xfa   : > { %v1650_v34 = vsel %vm1394_vm1, %v938_v20, %v1522_v29  ;;  %3210 = vst [vmem:[%s3702_s25 + $0x130] sm:$0xff] %v3046_v31   ;;  %v1197_v40 = vadd.f32 %v3386_v21, %v3687_v1  ;;  %v933_v41 = vadd.f32 %v3687_v1, %v932_v26  ;;  %v1189_v42 = vadd.f32 %v3687_v1, %v1188_v30  ;;  %v945_v43 = vpop.f32.mrf.mxu0 }
  0xfb   : > { %v1714_v39 = vsel %vm1458_vm2, %v1194_v24, %v1586_v32  ;;  %v1648_v44 = vsel %vm1392_vm3, %v930_v25, %v1520_v35  ;;  %vm1456_vm4 = vcmp.gt.f32.partialorder %v1186_v36, 0.0  ;;  %v1584_v45 = vmul.f32 0.2, %v1186_v36  ;;  %v1201_v46 = vpop.f32.mrf.mxu1 }
  0xfc   : > { %vm1395_vm5 = vcmp.gt.f32.partialorder %v941_v37, 0.0  ;;  %v1523_v47 = vmul.f32 0.2, %v941_v37  ;;  %vm1459_vm6 = vcmp.gt.f32.partialorder %v1197_v40, 0.0  ;;  %v1587_v48 = vmul.f32 0.2, %v1197_v40  ;;  %v3326_v49 = vpop.f32.mrf.mxu0 }
  0xfd   : > { %vm1393_vm7 = vcmp.gt.f32.partialorder %v933_v41, 0.0  ;;  %v1712_v50 = vsel %vm1456_vm4, %v1186_v36, %v1584_v45  ;;  %v1521_v51 = vmul.f32 0.2, %v933_v41  ;;  %vm1457_vm8 = vcmp.gt.f32.partialorder %v1189_v42, 0.0  ;;  %v3390_v53 = vpop.f32.mrf.mxu1 }
  0xfe   : > { %v1585_v52 = vmul.f32 0.2, %v1189_v42  ;;  %v1651_v54 = vsel %vm1395_vm5, %v941_v37, %v1523_v47  ;;  %v1715_v55 = vsel %vm1459_vm6, %v1197_v40, %v1587_v48  ;;  %v954_v56 = vadd.f32 %v3325_v33, %v3687_v1  ;;  %v948_v58 = vpop.f32.mrf.mxu0 }
  0xff   : > { %v1210_v57 = vadd.f32 %v3389_v38, %v3687_v1  ;;  %v2901_v59 = vpack.c.bf16 %v1651_v54, %v1650_v34  ;;  %v3061_v60 = vpack.c.bf16 %v1715_v55, %v1714_v39  ;;  %v1649_v61 = vsel %vm1393_vm7, %v933_v41, %v1521_v51  ;;  %v1204_v63 = vpop.f32.mrf.mxu1 }
 0x100   : > { %v1713_v62 = vsel %vm1457_vm8, %v1189_v42, %v1585_v52  ;;  %v2896_v0 = vpack.c.bf16 %v1649_v61, %v1648_v44  ;;  %vm1398_vm9 = vcmp.gt.f32.partialorder %v954_v56, 0.0  ;;  %v1526_v3 = vmul.f32 0.2, %v954_v56  ;;  %v3329_v4 = vpop.f32.mrf.mxu0 }
 0x101   : > { %v3056_v2 = vpack.c.bf16 %v1713_v62, %v1712_v50  ;;  %3181 = vst [vmem:[%s3702_s25 + $0x48] sm:$0xff] %v2901_v59   ;;  %3213 = vst [vmem:[%s3702_s25 + $0x148] sm:$0xff] %v3061_v60   ;;  %vm1462_vm10 = vcmp.gt.f32.partialorder %v1210_v57, 0.0  ;;  %v1590_v5 = vmul.f32 0.2, %v1210_v57  ;;  %v946_v6 = vadd.f32 %v3687_v1, %v945_v43  ;;  %v3393_v8 = vpop.f32.mrf.mxu1 }
 0x102   : > { %v1202_v7 = vadd.f32 %v3687_v1, %v1201_v46  ;;  %3180 = vst [vmem:[%s3702_s25 + $0x40] sm:$0xff] %v2896_v0   ;;  %v1654_v9 = vsel %vm1398_vm9, %v954_v56, %v1526_v3  ;;  %v957_v10 = vadd.f32 %v3326_v49, %v3687_v1  ;;  %v1213_v11 = vadd.f32 %v3390_v53, %v3687_v1  ;;  %v961_v13 = vpop.f32.mrf.mxu0 }
 0x103   : > { %3212 = vst [vmem:[%s3702_s25 + $0x140] sm:$0xff] %v3056_v2   ;;  %v949_v12 = vadd.f32 %v3687_v1, %v948_v58  ;;  %v1718_v14 = vsel %vm1462_vm10, %v1210_v57, %v1590_v5  ;;  %vm1396_vm11 = vcmp.gt.f32.partialorder %v946_v6, 0.0  ;;  %v1524_v15 = vmul.f32 0.2, %v946_v6  ;;  %v1217_v16 = vpop.f32.mrf.mxu1 }
 0x104   : > { %vm1460_vm12 = vcmp.gt.f32.partialorder %v1202_v7, 0.0  ;;  %v1588_v17 = vmul.f32 0.2, %v1202_v7  ;;  %vm1399_vm13 = vcmp.gt.f32.partialorder %v957_v10, 0.0  ;;  %v1527_v18 = vmul.f32 0.2, %v957_v10  ;;  %v3330_v19 = vpop.f32.mrf.mxu0 }
 0x105   : > { %vm1463_vm14 = vcmp.gt.f32.partialorder %v1213_v11, 0.0  ;;  %v1652_v20 = vsel %vm1396_vm11, %v946_v6, %v1524_v15  ;;  %v1591_v21 = vmul.f32 0.2, %v1213_v11  ;;  %vm1397_vm15 = vcmp.gt.f32.partialorder %v949_v12, 0.0  ;;  %v3394_v23 = vpop.f32.mrf.mxu1 }
 0x106   : > { %v1525_v22 = vmul.f32 0.2, %v949_v12  ;;  %v1716_v24 = vsel %vm1460_vm12, %v1202_v7, %v1588_v17  ;;  %v1655_v25 = vsel %vm1399_vm13, %v957_v10, %v1527_v18  ;;  %v1205_v26 = vadd.f32 %v3687_v1, %v1204_v63  ;;  %v964_v28 = vpop.f32.mrf.mxu0 }
 0x107   : > { %v970_v27 = vadd.f32 %v3329_v4, %v3687_v1  ;;  %v2911_v29 = vpack.c.bf16 %v1655_v25, %v1654_v9  ;;  %v1719_v30 = vsel %vm1463_vm14, %v1213_v11, %v1591_v21  ;;  %v1226_v32 = vadd.f32 %v3393_v8, %v3687_v1  ;;  %v1220_v33 = vpop.f32.mrf.mxu1 }
 0x108   : > { %v1653_v31 = vsel %vm1397_vm15, %v949_v12, %v1525_v22  ;;  %v3071_v34 = vpack.c.bf16 %v1719_v30, %v1718_v14  ;;  %vm1461_vm0 = vcmp.gt.f32.partialorder %v1205_v26, 0.0  ;;  %v1589_v36 = vmul.f32 0.2, %v1205_v26  ;;  %v3333_v37 = vpop.f32.mrf.mxu0 }
 0x109   : > { %v2906_v35 = vpack.c.bf16 %v1653_v31, %v1652_v20  ;;  %3183 = vst [vmem:[%s3702_s25 + $0x58] sm:$0xff] %v2911_v29   ;;  %vm1402_vm1 = vcmp.gt.f32.partialorder %v970_v27, 0.0  ;;  %v1530_v38 = vmul.f32 0.2, %v970_v27  ;;  %vm1466_vm2 = vcmp.gt.f32.partialorder %v1226_v32, 0.0  ;;  %v3397_v40 = vpop.f32.mrf.mxu1 }
 0x10a   : > { %v1594_v39 = vmul.f32 0.2, %v1226_v32  ;;  %3215 = vst [vmem:[%s3702_s25 + $0x158] sm:$0xff] %v3071_v34   ;;  %v1717_v41 = vsel %vm1461_vm0, %v1205_v26, %v1589_v36  ;;  %v962_v42 = vadd.f32 %v3687_v1, %v961_v13  ;;  %v1218_v43 = vadd.f32 %v3687_v1, %v1217_v16  ;;  %v977_v45 = vpop.f32.mrf.mxu0 }
 0x10b   : > { %3182 = vst [vmem:[%s3702_s25 + $0x50] sm:$0xff] %v2906_v35   ;;  %v973_v44 = vadd.f32 %v3330_v19, %v3687_v1  ;;  %v3066_v46 = vpack.c.bf16 %v1717_v41, %v1716_v24  ;;  %v1658_v47 = vsel %vm1402_vm1, %v970_v27, %v1530_v38  ;;  %v1229_v49 = vadd.f32 %v3394_v23, %v3687_v1  ;;  %v1233_v50 = vpop.f32.mrf.mxu1 }
 0x10c   : > { %v1722_v48 = vsel %vm1466_vm2, %v1226_v32, %v1594_v39  ;;  %vm1400_vm3 = vcmp.gt.f32.partialorder %v962_v42, 0.0  ;;  %v1528_v51 = vmul.f32 0.2, %v962_v42  ;;  %vm1464_vm4 = vcmp.gt.f32.partialorder %v1218_v43, 0.0  ;;  %v3334_v53 = vpop.f32.mrf.mxu0 }
 0x10d   : > { %v1592_v52 = vmul.f32 0.2, %v1218_v43  ;;  %3214 = vst [vmem:[%s3702_s25 + $0x150] sm:$0xff] %v3066_v46   ;;  %vm1403_vm5 = vcmp.gt.f32.partialorder %v973_v44, 0.0  ;;  %v1531_v54 = vmul.f32 0.2, %v973_v44  ;;  %v3398_v56 = vpop.f32.mrf.mxu1  ;;  %v965_v59 = vadd.f32 %v3687_v1, %v964_v28 }
 0x10e   : > { %vm1467_vm6 = vcmp.gt.f32.partialorder %v1229_v49, 0.0  ;;  %v1595_v55 = vmul.f32 0.2, %v1229_v49  ;;  %v1656_v57 = vsel %vm1400_vm3, %v962_v42, %v1528_v51  ;;  %v1221_v60 = vadd.f32 %v3687_v1, %v1220_v33  ;;  %v980_v61 = vpop.f32.mrf.mxu0 }
 0x10f   : > { %v1720_v58 = vsel %vm1464_vm4, %v1218_v43, %v1592_v52  ;;  %v1659_v62 = vsel %vm1403_vm5, %v973_v44, %v1531_v54  ;;  %v986_v0 = vadd.f32 %v3333_v37, %v3687_v1  ;;  %v1242_v2 = vadd.f32 %v3397_v40, %v3687_v1  ;;  %v1236_v3 = vpop.f32.mrf.mxu1 }
 0x110   : > { %v1723_v63 = vsel %vm1467_vm6, %v1229_v49, %v1595_v55  ;;  %v2921_v4 = vpack.c.bf16 %v1659_v62, %v1658_v47  ;;  %vm1401_vm7 = vcmp.gt.f32.partialorder %v965_v59, 0.0  ;;  %v1529_v6 = vmul.f32 0.2, %v965_v59  ;;  %v3337_v7 = vpop.f32.mrf.mxu0 }
 0x111   : > { %v3081_v5 = vpack.c.bf16 %v1723_v63, %v1722_v48  ;;  %vm1465_vm8 = vcmp.gt.f32.partialorder %v1221_v60, 0.0  ;;  %v1593_v8 = vmul.f32 0.2, %v1221_v60  ;;  %vm1406_vm9 = vcmp.gt.f32.partialorder %v986_v0, 0.0  ;;  %v3401_v10 = vpop.f32.mrf.mxu1 }
 0x112   : > { %v1534_v9 = vmul.f32 0.2, %v986_v0  ;;  %3185 = vst [vmem:[%s3702_s25 + $0x68] sm:$0xff] %v2921_v4   ;;  %v1657_v11 = vsel %vm1401_vm7, %v965_v59, %v1529_v6  ;;  %vm1470_vm10 = vcmp.gt.f32.partialorder %v1242_v2, 0.0  ;;  %v1598_v12 = vmul.f32 0.2, %v1242_v2  ;;  %v993_v14 = vpop.f32.mrf.mxu0 }
 0x113   : > { %3217 = vst [vmem:[%s3702_s25 + $0x168] sm:$0xff] %v3081_v5   ;;  %v978_v13 = vadd.f32 %v3687_v1, %v977_v45  ;;  %v2916_v15 = vpack.c.bf16 %v1657_v11, %v1656_v57  ;;  %v1721_v16 = vsel %vm1465_vm8, %v1221_v60, %v1593_v8  ;;  %v1234_v18 = vadd.f32 %v3687_v1, %v1233_v50  ;;  %v1249_v19 = vpop.f32.mrf.mxu1 }
 0x114   : > { %v1662_v17 = vsel %vm1406_vm9, %v986_v0, %v1534_v9  ;;  %v3076_v20 = vpack.c.bf16 %v1721_v16, %v1720_v58  ;;  %v1726_v21 = vsel %vm1470_vm10, %v1242_v2, %v1598_v12  ;;  %v3338_v23 = vpop.f32.mrf.mxu0  ;;  %v989_v25 = vadd.f32 %v3334_v53, %v3687_v1 }
 0x115   : > { %vm1404_vm11 = vcmp.gt.f32.partialorder %v978_v13, 0.0  ;;  %v1532_v22 = vmul.f32 0.2, %v978_v13  ;;  %3184 = vst [vmem:[%s3702_s25 + $0x60] sm:$0xff] %v2916_v15   ;;  %vm1468_vm12 = vcmp.gt.f32.partialorder %v1234_v18, 0.0  ;;  %v1245_v26 = vadd.f32 %v3398_v56, %v3687_v1  ;;  %v3402_v27 = vpop.f32.mrf.mxu1 }
 0x116   : > { %v1596_v24 = vmul.f32 0.2, %v1234_v18  ;;  %3216 = vst [vmem:[%s3702_s25 + $0x160] sm:$0xff] %v3076_v20   ;;  %v981_v29 = vadd.f32 %v3687_v1, %v980_v61  ;;  %v1237_v30 = vadd.f32 %v3687_v1, %v1236_v3  ;;  %v1002_v31 = vadd.f32 %v3337_v7, %v3687_v1  ;;  %v996_v32 = vpop.f32.mrf.mxu0 }
 0x117   : > { %v1660_v28 = vsel %vm1404_vm11, %v978_v13, %v1532_v22  ;;  %vm1407_vm13 = vcmp.gt.f32.partialorder %v989_v25, 0.0  ;;  %v1535_v34 = vmul.f32 0.2, %v989_v25  ;;  %vm1471_vm14 = vcmp.gt.f32.partialorder %v1245_v26, 0.0  ;;  %v1252_v35 = vpop.f32.mrf.mxu1 }
 0x118   : > { %v1724_v33 = vsel %vm1468_vm12, %v1234_v18, %v1596_v24  ;;  %v1599_v36 = vmul.f32 0.2, %v1245_v26  ;;  %vm1405_vm15 = vcmp.gt.f32.partialorder %v981_v29, 0.0  ;;  %v1533_v37 = vmul.f32 0.2, %v981_v29  ;;  %v3341_v38 = vpop.f32.mrf.mxu0 }
 0x119   : > { %vm1469_vm0 = vcmp.gt.f32.partialorder %v1237_v30, 0.0  ;;  %v1663_v39 = vsel %vm1407_vm13, %v989_v25, %v1535_v34  ;;  %v1597_v40 = vmul.f32 0.2, %v1237_v30  ;;  %vm1410_vm1 = vcmp.gt.f32.partialorder %v1002_v31, 0.0  ;;  %v3405_v42 = vpop.f32.mrf.mxu1 }
 0x11a   : > { %v1538_v41 = vmul.f32 0.2, %v1002_v31  ;;  %v2931_v43 = vpack.c.bf16 %v1663_v39, %v1662_v17  ;;  %v1727_v44 = vsel %vm1471_vm14, %v1245_v26, %v1599_v36  ;;  %v1661_v45 = vsel %vm1405_vm15, %v981_v29, %v1533_v37  ;;  %v1009_v47 = vpop.f32.mrf.mxu0 }
 0x11b   : > { %v1258_v46 = vadd.f32 %v3401_v10, %v3687_v1  ;;  %v3091_v48 = vpack.c.bf16 %v1727_v44, %v1726_v21  ;;  %v2926_v49 = vpack.c.bf16 %v1661_v45, %v1660_v28  ;;  %v1725_v50 = vsel %vm1469_vm0, %v1237_v30, %v1597_v40  ;;  %v1265_v52 = vpop.f32.mrf.mxu1 }
 0x11c   : > { %v1666_v51 = vsel %vm1410_vm1, %v1002_v31, %v1538_v41  ;;  %3187 = vst [vmem:[%s3702_s25 + $0x78] sm:$0xff] %v2931_v43   ;;  %v3086_v53 = vpack.c.bf16 %v1725_v50, %v1724_v33  ;;  %v994_v55 = vadd.f32 %v3687_v1, %v993_v14  ;;  %v3342_v56 = vpop.f32.mrf.mxu0  ;;  %v1250_v57 = vadd.f32 %v3687_v1, %v1249_v19 }
 0x11d   : > { %vm1474_vm2 = vcmp.gt.f32.partialorder %v1258_v46, 0.0  ;;  %v1602_v54 = vmul.f32 0.2, %v1258_v46  ;;  %3219 = vst [vmem:[%s3702_s25 + $0x178] sm:$0xff] %v3091_v48   ;;  %3186 = vst [vmem:[%s3702_s25 + $0x70] sm:$0xff] %v2926_v49   ;;  %v1005_v58 = vadd.f32 %v3338_v23, %v3687_v1  ;;  %v1261_v59 = vadd.f32 %v3402_v27, %v3687_v1  ;;  %v3406_v61 = vpop.f32.mrf.mxu1 }
 0x11e   : > { %v997_v60 = vadd.f32 %v3687_v1, %v996_v32  ;;  %3218 = vst [vmem:[%s3702_s25 + $0x170] sm:$0xff] %v3086_v53   ;;  %vm1408_vm3 = vcmp.gt.f32.partialorder %v994_v55, 0.0  ;;  %v1536_v63 = vmul.f32 0.2, %v994_v55  ;;  %v1253_v0 = vadd.f32 %v3687_v1, %v1252_v35  ;;  %v1012_v2 = vpop.f32.mrf.mxu0 }
 0x11f   : > { %v1730_v62 = vsel %vm1474_vm2, %v1258_v46, %v1602_v54  ;;  %vm1472_vm4 = vcmp.gt.f32.partialorder %v1250_v57, 0.0  ;;  %v1600_v3 = vmul.f32 0.2, %v1250_v57  ;;  %vm1411_vm5 = vcmp.gt.f32.partialorder %v1005_v58, 0.0  ;;  %v1268_v5 = vpop.f32.mrf.mxu1 }
 0x120   : > { %v1539_v4 = vmul.f32 0.2, %v1005_v58  ;;  %v1664_v6 = vsel %vm1408_vm3, %v994_v55, %v1536_v63  ;;  %vm1475_vm6 = vcmp.gt.f32.partialorder %v1261_v59, 0.0  ;;  %v1603_v7 = vmul.f32 0.2, %v1261_v59  ;;  %v3345_v8 = vpop.f32.mrf.mxu0 }
 0x121   : > { %vm1409_vm7 = vcmp.gt.f32.partialorder %v997_v60, 0.0  ;;  %v1728_v9 = vsel %vm1472_vm4, %v1250_v57, %v1600_v3  ;;  %v1537_v11 = vmul.f32 0.2, %v997_v60  ;;  %vm1473_vm8 = vcmp.gt.f32.partialorder %v1253_v0, 0.0  ;;  %v3409_v12 = vpop.f32.mrf.mxu1 }
 0x122   : > { %v1667_v10 = vsel %vm1411_vm5, %v1005_v58, %v1539_v4  ;;  %v1731_v14 = vsel %vm1475_vm6, %v1261_v59, %v1603_v7  ;;  %v1601_v15 = vmul.f32 0.2, %v1253_v0  ;;  %v1018_v16 = vadd.f32 %v3341_v38, %v3687_v1  ;;  %v3801_v17 = vpop.f32.mrf.mxu0 }
 0x123   : > { %v2941_v13 = vpack.c.bf16 %v1667_v10, %v1666_v51  ;;  %v3101_v18 = vpack.c.bf16 %v1731_v14, %v1730_v62  ;;  %v1665_v19 = vsel %vm1409_vm7, %v997_v60, %v1537_v11  ;;  %v1274_v20 = vadd.f32 %v3405_v42, %v3687_v1  ;;  %v1281_v22 = vpop.f32.mrf.mxu1 }
 0x124   : > { %v1010_v21 = vadd.f32 %v3687_v1, %v1009_v47  ;;  %v2936_v23 = vpack.c.bf16 %v1665_v19, %v1664_v6  ;;  %v1729_v24 = vsel %vm1473_vm8, %v1253_v0, %v1601_v15  ;;  %vm1414_vm9 = vcmp.gt.f32.partialorder %v1018_v16, 0.0  ;;  %v3346_v26 = vpop.f32.mrf.mxu0 }
 0x125   : > { %3189 = vst [vmem:[%s3702_s25 + $0x88] sm:$0xff] %v2941_v13   ;;  %v1542_v25 = vmul.f32 0.2, %v1018_v16  ;;  %3221 = vst [vmem:[%s3702_s25 + $0x188] sm:$0xff] %v3101_v18   ;;  %v3096_v27 = vpack.c.bf16 %v1729_v24, %v1728_v9  ;;  %vm1478_vm10 = vcmp.gt.f32.partialorder %v1274_v20, 0.0  ;;  %v3410_v29 = vpop.f32.mrf.mxu1  ;;  %v1266_v32 = vadd.f32 %v3687_v1, %v1265_v52 }
 0x126   : > { %v1606_v28 = vmul.f32 0.2, %v1274_v20  ;;  %vm1412_vm11 = vcmp.gt.f32.partialorder %v1010_v21, 0.0  ;;  %3188 = vst [vmem:[%s3702_s25 + $0x80] sm:$0xff] %v2936_v23   ;;  %v1540_v31 = vmul.f32 0.2, %v1010_v21  ;;  %v1021_v33 = vadd.f32 %v3342_v56, %v3687_v1  ;;  %v1028_v34 = vpop.f32.mrf.mxu0 }
 0x127   : > { %v1670_v30 = vsel %vm1414_vm9, %v1018_v16, %v1542_v25  ;;  %3220 = vst [vmem:[%s3702_s25 + $0x180] sm:$0xff] %v3096_v27   ;;  %v1277_v36 = vadd.f32 %v3406_v61, %v3687_v1  ;;  %v1013_v37 = vadd.f32 %v3687_v1, %v1012_v2  ;;  %v1269_v38 = vadd.f32 %v3687_v1, %v1268_v5  ;;  %v3814_v39 = vpop.f32.mrf.mxu1 }
 0x128   : > { %v1734_v35 = vsel %vm1478_vm10, %v1274_v20, %v1606_v28  ;;  %v1668_v40 = vsel %vm1412_vm11, %v1010_v21, %v1540_v31  ;;  %vm1476_vm12 = vcmp.gt.f32.partialorder %v1266_v32, 0.0  ;;  %v1604_v41 = vmul.f32 0.2, %v1266_v32  ;;  %v3349_v42 = vpop.f32.mrf.mxu0  ;;  %v3845_v21 = vld [vmem:[%s3974_s2] ss:$0 sm:$0xff] }
 0x129   : > { %vm1415_vm13 = vcmp.gt.f32.partialorder %v1021_v33, 0.0  ;;  %v1543_v43 = vmul.f32 0.2, %v1021_v33  ;;  %vm1479_vm14 = vcmp.gt.f32.partialorder %v1277_v36, 0.0  ;;  %v1607_v44 = vmul.f32 0.2, %v1277_v36  ;;  %v3413_v45 = vpop.f32.mrf.mxu1 }
 0x12a   : > { %vm1413_vm15 = vcmp.gt.f32.partialorder %v1013_v37, 0.0  ;;  %v1732_v46 = vsel %vm1476_vm12, %v1266_v32, %v1604_v41  ;;  %v1541_v47 = vmul.f32 0.2, %v1013_v37  ;;  %vm1477_vm0 = vcmp.gt.f32.partialorder %v1269_v38, 0.0  ;;  %v3816_v49 = vpop.f32.mrf.mxu0 }
 0x12b   : > { %v1605_v48 = vmul.f32 0.2, %v1269_v38  ;;  %v1671_v50 = vsel %vm1415_vm13, %v1021_v33, %v1543_v43  ;;  %v1735_v51 = vsel %vm1479_vm14, %v1277_v36, %v1607_v44  ;;  %v1034_v52 = vadd.f32 %v3345_v8, %v3687_v1  ;;  %v3820_v54 = vpop.f32.mrf.mxu1 }
 0x12c   : > { %v1290_v53 = vadd.f32 %v3409_v12, %v3687_v1  ;;  %v2951_v55 = vpack.c.bf16 %v1671_v50, %v1670_v30  ;;  %v3111_v56 = vpack.c.bf16 %v1735_v51, %v1734_v35  ;;  %v1669_v57 = vsel %vm1413_vm15, %v1013_v37, %v1541_v47  ;;  %v3350_v59 = vpop.f32.mrf.mxu0 }
 0x12d   : > { %v1733_v58 = vsel %vm1477_vm0, %v1269_v38, %v1605_v48  ;;  %v2946_v60 = vpack.c.bf16 %v1669_v57, %v1668_v40  ;;  %vm1418_vm1 = vcmp.gt.f32.partialorder %v1034_v52, 0.0  ;;  %v1546_v62 = vmul.f32 0.2, %v1034_v52  ;;  %v3822_v63 = vpop.f32.mrf.mxu1 }
 0x12e   : > { %v3106_v61 = vpack.c.bf16 %v1733_v58, %v1732_v46  ;;  %3191 = vst [vmem:[%s3702_s25 + $0x98] sm:$0xff] %v2951_v55   ;;  %3223 = vst [vmem:[%s3702_s25 + $0x198] sm:$0xff] %v3111_v56   ;;  %vm1482_vm2 = vcmp.gt.f32.partialorder %v1290_v53, 0.0  ;;  %v1610_v0 = vmul.f32 0.2, %v1290_v53  ;;  %v1026_v2 = vadd.f32 %v3687_v1, %v3801_v17  ;;  %v3829_v4 = vpop.f32.mrf.mxu0 }
 0x12f   : > { %v1282_v3 = vadd.f32 %v3687_v1, %v1281_v22  ;;  %3190 = vst [vmem:[%s3702_s25 + $0x90] sm:$0xff] %v2946_v60   ;;  %v1674_v5 = vsel %vm1418_vm1, %v1034_v52, %v1546_v62  ;;  %v1037_v6 = vadd.f32 %v3346_v26, %v3687_v1  ;;  %v1293_v7 = vadd.f32 %v3410_v29, %v3687_v1  ;;  %v3836_v9 = vpop.f32.mrf.mxu1 }
 0x130   : > { %3222 = vst [vmem:[%s3702_s25 + $0x190] sm:$0xff] %v3106_v61   ;;  %v1029_v8 = vadd.f32 %v3687_v1, %v1028_v34  ;;  %v1738_v10 = vsel %vm1482_vm2, %v1290_v53, %v1610_v0  ;;  %vm1416_vm3 = vcmp.gt.f32.partialorder %v1026_v2, 0.0  ;;  %v1544_v11 = vmul.f32 0.2, %v1026_v2  ;;  %v3838_v12 = vpop.f32.mrf.mxu0 }
 0x131   : > { %vm1480_vm4 = vcmp.gt.f32.partialorder %v1282_v3, 0.0  ;;  %v1608_v13 = vmul.f32 0.2, %v1282_v3  ;;  %vm1419_vm5 = vcmp.gt.f32.partialorder %v1037_v6, 0.0  ;;  %v1547_v14 = vmul.f32 0.2, %v1037_v6  ;;  %v3417_v15 = vpop.f32.mrf.mxu1 }
 0x132   : > { %vm1483_vm6 = vcmp.gt.f32.partialorder %v1293_v7, 0.0  ;;  %v1672_v16 = vsel %vm1416_vm3, %v1026_v2, %v1544_v11  ;;  %v1611_v17 = vmul.f32 0.2, %v1293_v7  ;;  %vm1417_vm7 = vcmp.gt.f32.partialorder %v1029_v8, 0.0  ;;  %v3840_v19 = vpop.f32.mrf.mxu0 }
 0x133   : > { %v1545_v18 = vmul.f32 0.2, %v1029_v8  ;;  %v1736_v1 = vsel %vm1480_vm4, %v1282_v3, %v1608_v13  ;;  %v1675_v20 = vsel %vm1419_vm5, %v1037_v6, %v1547_v14  ;;  %v1285_v22 = vadd.f32 %v3845_v21, %v3814_v39  ;;  %v3850_v24 = vpop.f32.mrf.mxu1 }
 0x134   : > { %v1050_v23 = vadd.f32 %v3845_v21, %v3349_v42  ;;  %v2961_v25 = vpack.c.bf16 %v1675_v20, %v1674_v5  ;;  %v1739_v26 = vsel %vm1483_vm6, %v1293_v7, %v1611_v17  ;;  %v1306_v28 = vadd.f32 %v3845_v21, %v3413_v45  ;;  %v3853_v29 = vpop.f32.mrf.mxu0 }
 0x135   : > { %v1673_v27 = vsel %vm1417_vm7, %v1029_v8, %v1545_v18  ;;  %v3121_v30 = vpack.c.bf16 %v1739_v26, %v1738_v10  ;;  %vm1481_vm8 = vcmp.gt.f32.partialorder %v1285_v22, 0.0  ;;  %v1609_v32 = vmul.f32 0.2, %v1285_v22  ;;  %v3855_v33 = vpop.f32.mrf.mxu1 }
 0x136   : > { %v2956_v31 = vpack.c.bf16 %v1673_v27, %v1672_v16  ;;  %3193 = vst [vmem:[%s3702_s25 + $0xa8] sm:$0xff] %v2961_v25   ;;  %vm1422_vm9 = vcmp.gt.f32.partialorder %v1050_v23, 0.0  ;;  %v1550_v34 = vmul.f32 0.2, %v1050_v23  ;;  %vm1486_vm10 = vcmp.gt.f32.partialorder %v1306_v28, 0.0  ;;  %v3858_v36 = vpop.f32.mrf.mxu0 }
 0x137   : > { %v1614_v35 = vmul.f32 0.2, %v1306_v28  ;;  %3225 = vst [vmem:[%s3702_s25 + $0x1a8] sm:$0xff] %v3121_v30   ;;  %v1737_v37 = vsel %vm1481_vm8, %v1285_v22, %v1609_v32  ;;  %v1042_v38 = vadd.f32 %v3845_v21, %v3816_v49  ;;  %v1298_v39 = vadd.f32 %v3845_v21, %v3820_v54  ;;  %v3867_v41 = vpop.f32.mrf.mxu1 }
 0x138   : > { %3192 = vst [vmem:[%s3702_s25 + $0xa0] sm:$0xff] %v2956_v31   ;;  %v1053_v40 = vadd.f32 %v3845_v21, %v3350_v59  ;;  %v3116_v42 = vpack.c.bf16 %v1737_v37, %v1736_v1  ;;  %v1678_v43 = vsel %vm1422_vm9, %v1050_v23, %v1550_v34  ;;  %v1309_v45 = vadd.f32 %v3845_v21, %v3822_v63  ;;  %v3357_v46 = vpop.f32.mrf.mxu0 }
 0x139   : > { %v1742_v44 = vsel %vm1486_vm10, %v1306_v28, %v1614_v35  ;;  %vm1420_vm11 = vcmp.gt.f32.partialorder %v1042_v38, 0.0  ;;  %v1548_v47 = vmul.f32 0.2, %v1042_v38  ;;  %vm1484_vm12 = vcmp.gt.f32.partialorder %v1298_v39, 0.0  ;;  %v3871_v50 = vpop.f32.mrf.mxu1 }
 0x13a   : > { %v1612_v48 = vmul.f32 0.2, %v1298_v39  ;;  %3224 = vst [vmem:[%s3702_s25 + $0x1a0] sm:$0xff] %v3116_v42   ;;  %vm1423_vm13 = vcmp.gt.f32.partialorder %v1053_v40, 0.0  ;;  %v1551_v49 = vmul.f32 0.2, %v1053_v40  ;;  %v3874_v52 = vpop.f32.mrf.mxu0  ;;  %v1045_v55 = vadd.f32 %v3845_v21, %v3829_v4 }
 0x13b   : > { %vm1487_vm14 = vcmp.gt.f32.partialorder %v1309_v45, 0.0  ;;  %v1615_v51 = vmul.f32 0.2, %v1309_v45  ;;  %v1676_v53 = vsel %vm1420_vm11, %v1042_v38, %v1548_v47  ;;  %v1301_v56 = vadd.f32 %v3845_v21, %v3836_v9  ;;  %v3880_v57 = vpop.f32.mrf.mxu1 }
 0x13c   : > { %v1740_v54 = vsel %vm1484_vm12, %v1298_v39, %v1612_v48  ;;  %v1679_v58 = vsel %vm1423_vm13, %v1053_v40, %v1551_v49  ;;  %v1066_v60 = vadd.f32 %v3845_v21, %v3838_v12  ;;  %v1322_v61 = vadd.f32 %v3845_v21, %v3417_v15  ;;  %v3885_v62 = vpop.f32.mrf.mxu0 }
 0x13d   : > { %v1743_v59 = vsel %vm1487_vm14, %v1309_v45, %v1615_v51  ;;  %v2971_v63 = vpack.c.bf16 %v1679_v58, %v1678_v43  ;;  %vm1421_vm15 = vcmp.gt.f32.partialorder %v1045_v55, 0.0  ;;  %v1549_v2 = vmul.f32 0.2, %v1045_v55  ;;  %v3887_v3 = vpop.f32.mrf.mxu1 }
 0x13e   : > { %v3131_v0 = vpack.c.bf16 %v1743_v59, %v1742_v44  ;;  %vm1485_vm0 = vcmp.gt.f32.partialorder %v1301_v56, 0.0  ;;  %v1613_v4 = vmul.f32 0.2, %v1301_v56  ;;  %vm1426_vm1 = vcmp.gt.f32.partialorder %v1066_v60, 0.0  ;;  %v3889_v6 = vpop.f32.mrf.mxu0 }
 0x13f   : > { %v1554_v5 = vmul.f32 0.2, %v1066_v60  ;;  %3195 = vst [vmem:[%s3702_s25 + $0xb8] sm:$0xff] %v2971_v63   ;;  %v1677_v7 = vsel %vm1421_vm15, %v1045_v55, %v1549_v2  ;;  %vm1490_vm2 = vcmp.gt.f32.partialorder %v1322_v61, 0.0  ;;  %v1618_v8 = vmul.f32 0.2, %v1322_v61  ;;  %v1332_v10 = vpop.f32.mrf.mxu1 }
 0x140   : > { %3227 = vst [vmem:[%s3702_s25 + $0x1b8] sm:$0xff] %v3131_v0   ;;  %v1058_v9 = vadd.f32 %v3845_v21, %v3840_v19  ;;  %v2966_v11 = vpack.c.bf16 %v1677_v7, %v1676_v53  ;;  %v1741_v12 = vsel %vm1485_vm0, %v1301_v56, %v1613_v4  ;;  %v1314_v14 = vadd.f32 %v3845_v21, %v3850_v24  ;;  %v3897_v15 = vpop.f32.mrf.mxu0 }
 0x141   : > { %v1682_v13 = vsel %vm1426_vm1, %v1066_v60, %v1554_v5  ;;  %v3126_v16 = vpack.c.bf16 %v1741_v12, %v1740_v54  ;;  %v1746_v17 = vsel %vm1490_vm2, %v1322_v61, %v1618_v8  ;;  %v3899_v1 = vpop.f32.mrf.mxu1  ;;  %v1069_v19 = vadd.f32 %v3845_v21, %v3853_v29 }
 0x142   : > { %vm1424_vm3 = vcmp.gt.f32.partialorder %v1058_v9, 0.0  ;;  %v1552_v18 = vmul.f32 0.2, %v1058_v9  ;;  %3194 = vst [vmem:[%s3702_s25 + $0xb0] sm:$0xff] %v2966_v11   ;;  %vm1488_vm4 = vcmp.gt.f32.partialorder %v1314_v14, 0.0  ;;  %v1325_v22 = vadd.f32 %v3845_v21, %v3855_v33  ;;  %v3906_v23 = vpop.f32.mrf.mxu0 }
 0x143   : > { %v1616_v20 = vmul.f32 0.2, %v1314_v14  ;;  %3226 = vst [vmem:[%s3702_s25 + $0x1b0] sm:$0xff] %v3126_v16   ;;  %v1061_v25 = vadd.f32 %v3845_v21, %v3858_v36  ;;  %v1317_v26 = vadd.f32 %v3845_v21, %v3867_v41  ;;  %v1082_v27 = vadd.f32 %v3845_v21, %v3357_v46  ;;  %v3914_v32 = vpop.f32.mrf.mxu1 }
 0x144   : > { %v1680_v24 = vsel %vm1424_vm3, %v1058_v9, %v1552_v18  ;;  %vm1427_vm5 = vcmp.gt.f32.partialorder %v1069_v19, 0.0  ;;  %v1555_v30 = vmul.f32 0.2, %v1069_v19  ;;  %vm1491_vm6 = vcmp.gt.f32.partialorder %v1325_v22, 0.0  ;;  %v3916_v33 = vpop.f32.mrf.mxu0 }
 0x145   : > { %v1744_v28 = vsel %vm1488_vm4, %v1314_v14, %v1616_v20  ;;  %v1619_v29 = vmul.f32 0.2, %v1325_v22  ;;  %vm1425_vm7 = vcmp.gt.f32.partialorder %v1061_v25, 0.0  ;;  %v1553_v31 = vmul.f32 0.2, %v1061_v25  ;;  %v3426_v48 = vpop.f32.mrf.mxu1 }
 0x146   : > { %vm1489_vm8 = vcmp.gt.f32.partialorder %v1317_v26, 0.0  ;;  %v1683_v34 = vsel %vm1427_vm5, %v1069_v19, %v1555_v30  ;;  %v1617_v35 = vmul.f32 0.2, %v1317_v26  ;;  %vm1430_vm9 = vcmp.gt.f32.partialorder %v1082_v27, 0.0  ;;  %v1092_v49 = vpop.f32.mrf.mxu0 }
 0x147   : > { %v1558_v36 = vmul.f32 0.2, %v1082_v27  ;;  %v2981_v37 = vpack.c.bf16 %v1683_v34, %v1682_v13  ;;  %v1747_v38 = vsel %vm1491_vm6, %v1325_v22, %v1619_v29  ;;  %v1681_v39 = vsel %vm1425_vm7, %v1061_v25, %v1553_v31  ;;  %v1348_v61 = vpop.f32.mrf.mxu1 }
 0x148   : > { %v1338_v40 = vadd.f32 %v3845_v21, %v3871_v50  ;;  %v3141_v41 = vpack.c.bf16 %v1747_v38, %v1746_v17  ;;  %v2976_v42 = vpack.c.bf16 %v1681_v39, %v1680_v24  ;;  %v1745_v43 = vsel %vm1489_vm8, %v1317_v26, %v1617_v35 }
 0x149   : > { %v1686_v44 = vsel %vm1430_vm9, %v1082_v27, %v1558_v36  ;;  %3197 = vst [vmem:[%s3702_s25 + $0xc8] sm:$0xff] %v2981_v37   ;;  %v3136_v45 = vpack.c.bf16 %v1745_v43, %v1744_v28  ;;  %v1074_v47 = vadd.f32 %v3845_v21, %v3874_v52  ;;  %v1330_v51 = vadd.f32 %v3845_v21, %v3880_v57  ;;  %v3429_v14 = vpop.f32.mrf.mxu1 }
 0x14a   : > { %vm1494_vm10 = vcmp.gt.f32.partialorder %v1338_v40, 0.0  ;;  %v1622_v46 = vmul.f32 0.2, %v1338_v40  ;;  %3229 = vst [vmem:[%s3702_s25 + $0x1c8] sm:$0xff] %v3141_v41   ;;  %3196 = vst [vmem:[%s3702_s25 + $0xc0] sm:$0xff] %v2976_v42   ;;  %v1085_v50 = vadd.f32 %v3845_v21, %v3885_v62  ;;  %v1341_v53 = vadd.f32 %v3845_v21, %v3887_v3  ;;  %v3365_v62 = vpop.f32.mrf.mxu0 }
 0x14b   : > { %v1077_v54 = vadd.f32 %v3845_v21, %v3889_v6  ;;  %3228 = vst [vmem:[%s3702_s25 + $0x1c0] sm:$0xff] %v3136_v45   ;;  %vm1428_vm11 = vcmp.gt.f32.partialorder %v1074_v47, 0.0  ;;  %v1556_v52 = vmul.f32 0.2, %v1074_v47  ;;  %v1333_v56 = vadd.f32 %v3845_v21, %v1332_v10  ;;  %v1361_v28 = vpop.f32.mrf.mxu1 }
 0x14c   : > { %v1750_v55 = vsel %vm1494_vm10, %v1338_v40, %v1622_v46  ;;  %vm1492_vm12 = vcmp.gt.f32.partialorder %v1330_v51, 0.0  ;;  %v1620_v58 = vmul.f32 0.2, %v1330_v51  ;;  %vm1431_vm13 = vcmp.gt.f32.partialorder %v1085_v50, 0.0  ;;  %v1105_v16 = vpop.f32.mrf.mxu0 }
 0x14d   : > { %v1559_v59 = vmul.f32 0.2, %v1085_v50  ;;  %v1684_v57 = vsel %vm1428_vm11, %v1074_v47, %v1556_v52  ;;  %vm1495_vm14 = vcmp.gt.f32.partialorder %v1341_v53, 0.0  ;;  %v1623_v60 = vmul.f32 0.2, %v1341_v53  ;;  %v3430_v43 = vpop.f32.mrf.mxu1 }
 0x14e   : > { %vm1429_vm15 = vcmp.gt.f32.partialorder %v1077_v54, 0.0  ;;  %v1748_v63 = vsel %vm1492_vm12, %v1330_v51, %v1620_v58  ;;  %v1557_v2 = vmul.f32 0.2, %v1077_v54  ;;  %vm1493_vm0 = vcmp.gt.f32.partialorder %v1333_v56, 0.0  ;;  %v3366_v30 = vpop.f32.mrf.mxu0 }
 0x14f   : > { %v1687_v0 = vsel %vm1431_vm13, %v1085_v50, %v1559_v59  ;;  %v1751_v4 = vsel %vm1495_vm14, %v1341_v53, %v1623_v60  ;;  %v1621_v5 = vmul.f32 0.2, %v1333_v56  ;;  %v1098_v6 = vadd.f32 %v3845_v21, %v3897_v15 }
 0x150   : > { %v2991_v3 = vpack.c.bf16 %v1687_v0, %v1686_v44  ;;  %v3151_v7 = vpack.c.bf16 %v1751_v4, %v1750_v55  ;;  %v1685_v8 = vsel %vm1429_vm15, %v1077_v54, %v1557_v2  ;;  %v1354_v9 = vadd.f32 %v3845_v21, %v3899_v1  ;;  %v1108_v44 = vpop.f32.mrf.mxu0 }
 0x151   : > { %v1090_v10 = vadd.f32 %v3845_v21, %v3906_v23  ;;  %v2986_v11 = vpack.c.bf16 %v1685_v8, %v1684_v57  ;;  %v1749_v12 = vsel %vm1493_vm0, %v1333_v56, %v1621_v5  ;;  %vm1434_vm1 = vcmp.gt.f32.partialorder %v1098_v6, 0.0  ;;  %v1364_v56 = vpop.f32.mrf.mxu1 }
 0x152   : > { %3199 = vst [vmem:[%s3702_s25 + $0xd8] sm:$0xff] %v2991_v3   ;;  %v1562_v13 = vmul.f32 0.2, %v1098_v6  ;;  %3231 = vst [vmem:[%s3702_s25 + $0x1d8] sm:$0xff] %v3151_v7   ;;  %v3146_v17 = vpack.c.bf16 %v1749_v12, %v1748_v63  ;;  %vm1498_vm2 = vcmp.gt.f32.partialorder %v1354_v9, 0.0  ;;  %v1346_v1 = vadd.f32 %v3845_v21, %v3914_v32 }
 0x153   : > { %v1626_v15 = vmul.f32 0.2, %v1354_v9  ;;  %vm1432_vm3 = vcmp.gt.f32.partialorder %v1090_v10, 0.0  ;;  %3198 = vst [vmem:[%s3702_s25 + $0xd0] sm:$0xff] %v2986_v11   ;;  %v1560_v20 = vmul.f32 0.2, %v1090_v10  ;;  %v1101_v19 = vadd.f32 %v3845_v21, %v3916_v33 }
 0x154   : > { %v1690_v18 = vsel %vm1434_vm1, %v1098_v6, %v1562_v13  ;;  %3230 = vst [vmem:[%s3702_s25 + $0x1d0] sm:$0xff] %v3146_v17   ;;  %v1357_v23 = vadd.f32 %v3845_v21, %v3426_v48  ;;  %v1093_v24 = vadd.f32 %v3845_v21, %v1092_v49  ;;  %v1349_v25 = vadd.f32 %v3845_v21, %v1348_v61 }
 0x155   : > { %v1754_v22 = vsel %vm1498_vm2, %v1354_v9, %v1626_v15  ;;  %v1688_v26 = vsel %vm1432_vm3, %v1090_v10, %v1560_v20  ;;  %vm1496_vm4 = vcmp.gt.f32.partialorder %v1346_v1, 0.0  ;;  %v1624_v27 = vmul.f32 0.2, %v1346_v1 }
 0x156   : > { %vm1435_vm5 = vcmp.gt.f32.partialorder %v1101_v19, 0.0  ;;  %v1563_v29 = vmul.f32 0.2, %v1101_v19  ;;  %vm1499_vm6 = vcmp.gt.f32.partialorder %v1357_v23, 0.0  ;;  %v1627_v31 = vmul.f32 0.2, %v1357_v23 }
 0x157   : > { %vm1433_vm7 = vcmp.gt.f32.partialorder %v1093_v24, 0.0  ;;  %v1752_v32 = vsel %vm1496_vm4, %v1346_v1, %v1624_v27  ;;  %v1561_v33 = vmul.f32 0.2, %v1093_v24  ;;  %vm1497_vm8 = vcmp.gt.f32.partialorder %v1349_v25, 0.0 }
 0x158   : > { %v1625_v34 = vmul.f32 0.2, %v1349_v25  ;;  %v1691_v35 = vsel %vm1435_vm5, %v1101_v19, %v1563_v29  ;;  %v1755_v36 = vsel %vm1499_vm6, %v1357_v23, %v1627_v31  ;;  %v1114_v37 = vadd.f32 %v3845_v21, %v3365_v62 }
 0x159   : > { %v1370_v38 = vadd.f32 %v3845_v21, %v3429_v14  ;;  %v3001_v39 = vpack.c.bf16 %v1691_v35, %v1690_v18  ;;  %v3161_v40 = vpack.c.bf16 %v1755_v36, %v1754_v22  ;;  %v1689_v41 = vsel %vm1433_vm7, %v1093_v24, %v1561_v33 }
 0x15a   : > { %v1753_v42 = vsel %vm1497_vm8, %v1349_v25, %v1625_v34  ;;  %v2996_v45 = vpack.c.bf16 %v1689_v41, %v1688_v26  ;;  %vm1438_vm9 = vcmp.gt.f32.partialorder %v1114_v37, 0.0  ;;  %v1566_v47 = vmul.f32 0.2, %v1114_v37 }
 0x15b   : > { %v3156_v46 = vpack.c.bf16 %v1753_v42, %v1752_v32  ;;  %3201 = vst [vmem:[%s3702_s25 + $0xe8] sm:$0xff] %v3001_v39   ;;  %3233 = vst [vmem:[%s3702_s25 + $0x1e8] sm:$0xff] %v3161_v40   ;;  %vm1502_vm10 = vcmp.gt.f32.partialorder %v1370_v38, 0.0  ;;  %v1630_v48 = vmul.f32 0.2, %v1370_v38  ;;  %v1106_v49 = vadd.f32 %v3845_v21, %v1105_v16 }
 0x15c   : > { %3200 = vst [vmem:[%s3702_s25 + $0xe0] sm:$0xff] %v2996_v45   ;;  %v1362_v51 = vadd.f32 %v3845_v21, %v1361_v28  ;;  %v1117_v50 = vadd.f32 %v3845_v21, %v3366_v30  ;;  %v1373_v53 = vadd.f32 %v3845_v21, %v3430_v43  ;;  %v1109_v54 = vadd.f32 %v3845_v21, %v1108_v44 }
 0x15d   : > { %3232 = vst [vmem:[%s3702_s25 + $0x1e0] sm:$0xff] %v3156_v46   ;;  %v1694_v55 = vsel %vm1438_vm9, %v1114_v37, %v1566_v47  ;;  %v1564_v52 = vmul.f32 0.2, %v1106_v49  ;;  %vm1436_vm11 = vcmp.gt.f32.partialorder %v1106_v49, 0.0  ;;  %v1758_v59 = vsel %vm1502_vm10, %v1370_v38, %v1630_v48 }
 0x15e   : > { %vm1439_vm12 = vcmp.gt.f32.partialorder %v1117_v50, 0.0  ;;  %v1567_v58 = vmul.f32 0.2, %v1117_v50  ;;  %vm1503_vm13 = vcmp.gt.f32.partialorder %v1373_v53, 0.0  ;;  %v1631_v57 = vmul.f32 0.2, %v1373_v53 }
 0x15f   : > { %vm1437_vm14 = vcmp.gt.f32.partialorder %v1109_v54, 0.0  ;;  %v1565_v60 = vmul.f32 0.2, %v1109_v54  ;;  %vm1500_vm15 = vcmp.gt.f32.partialorder %v1362_v51, 0.0  ;;  %v1628_v61 = vmul.f32 0.2, %v1362_v51 }
 0x160   : > { %v1695_v62 = vsel %vm1439_vm12, %v1117_v50, %v1567_v58  ;;  %v1365_v63 = vadd.f32 %v3845_v21, %v1364_v56  ;;  %v1692_v0 = vsel %vm1436_vm11, %v1106_v49, %v1564_v52  ;;  %v1759_v3 = vsel %vm1503_vm13, %v1373_v53, %v1631_v57 }
 0x161   : > { %v3011_v2 = vpack.c.bf16 %v1695_v62, %v1694_v55  ;;  %v1693_v4 = vsel %vm1437_vm14, %v1109_v54, %v1565_v60  ;;  %v3171_v5 = vpack.c.bf16 %v1759_v3, %v1758_v59  ;;  %v1756_v8 = vsel %vm1500_vm15, %v1362_v51, %v1628_v61 }
 0x162   : > { %v3006_v6 = vpack.c.bf16 %v1693_v4, %v1692_v0  ;;  %vm1501_vm0 = vcmp.gt.f32.partialorder %v1365_v63, 0.0  ;;  %v1629_v7 = vmul.f32 0.2, %v1365_v63 }
 0x163   : > { %3203 = vst [vmem:[%s3702_s25 + $0xf8] sm:$0xff] %v3011_v2   ;;  %3235 = vst [vmem:[%s3702_s25 + $0x1f8] sm:$0xff] %v3171_v5  }
 0x164   : > { %3202 = vst [vmem:[%s3702_s25 + $0xf0] sm:$0xff] %v3006_v6   ;;  %v1757_v9 = vsel %vm1501_vm0, %v1365_v63, %v1629_v7 }
 0x165   : > { %v3166_v10 = vpack.c.bf16 %v1757_v9, %v1756_v8 }
 0x167   : > { %3234 = vst [vmem:[%s3702_s25 + $0x1f0] sm:$0xff] %v3166_v10  }
 0x168 PF: > { %s13_s12 = sadd.s32 1, %s3513_s12  }
 0x169   : > { %p10_p4 = scmp.ge.s32.totalorder %s13_s12, 4  }
 0x16b   :  { %12 = sbr.rel (!%p10_p4) target bundleno = 1 (0x1), region = 62 }

// kernel: discriminator_forward.6
= control target key start
LH: loop header
LB: loop body
LE: loop exit
PB: predicated region body
PF: predicated region fallthrough
CT: control target
= control target key end

     0   :  { %s4885_s1 = inlined_call_operand.vmem [shape: bf16[2048,128], index: 1, kind: input, shape index: {}]   ;;  %s4886_s0 = inlined_call_operand.vmem [shape: bf16[128,2048], index: 0, kind: input, shape index: {}]   ;;  %s4887_s2 = inlined_call_operand.vmem [shape: f32[1,128], index: 2, kind: input, shape index: {}]   ;;  %s4888_s3 = inlined_call_operand.vmem [shape: f32[1,128], index: 3, kind: input, shape index: {}]   ;;  %s4889_s4 = inlined_call_operand.vmem [shape: bf16[128,128], index: 4, kind: output, shape index: {}]  }
   0x1   :  { %v3679_v0 = vld [vmem:[%s4885_s1 + $0x78] sm:$0xff]   ;;  %v3683_v4 = vld [vmem:[%s4885_s1 + $0x70] sm:$0xff]   ;;  %v3687_v8 = vld [vmem:[%s4885_s1 + $0x68] sm:$0xff]  }
   0x2   :  { %v3680_v1 = vld [vmem:[%s4885_s1 + $0xf8] sm:$0xff]   ;;  %3167 = vmatprep.subr.bf16.mxu0 %v3679_v0  ;;  %v3684_v5 = vld [vmem:[%s4885_s1 + $0xf0] sm:$0xff]   ;;  %v3688_v9 = vld [vmem:[%s4885_s1 + $0xe8] sm:$0xff]  }
   0x3   :  { %v3681_v2 = vld [vmem:[%s4885_s1 + $0x38] sm:$0xff]   ;;  %3231 = vmatprep.subr.bf16.mxu1 %v3680_v1  ;;  %v3685_v6 = vld [vmem:[%s4885_s1 + $0x30] sm:$0xff]   ;;  %v3689_v10 = vld [vmem:[%s4885_s1 + $0x28] sm:$0xff]  }
   0x4   :  { %v3682_v3 = vld [vmem:[%s4885_s1 + $0xb8] sm:$0xff]   ;;  %3168 = vmatpush3.bf16.msra.mxu0 %v3681_v2  ;;  %v3686_v7 = vld [vmem:[%s4885_s1 + $0xb0] sm:$0xff]   ;;  %v3690_v11 = vld [vmem:[%s4885_s1 + $0xa8] sm:$0xff]  }
   0x5   :  { %3232 = vmatpush3.bf16.msra.mxu1 %v3682_v3  ;;  %3169 = vmatprep.subr.bf16.mxu0 %v3683_v4  ;;  %v3691_v12 = vld [vmem:[%s4885_s1 + $0x60] sm:$0xff]   ;;  %v3695_v16 = vld [vmem:[%s4885_s1 + $0x58] sm:$0xff]   ;;  %v3699_v20 = vld [vmem:[%s4885_s1 + $0x50] sm:$0xff]  }
   0x6   :  { %3233 = vmatprep.subr.bf16.mxu1 %v3684_v5  ;;  %v3692_v13 = vld [vmem:[%s4885_s1 + $0xe0] sm:$0xff]   ;;  %v3696_v17 = vld [vmem:[%s4885_s1 + $0xd8] sm:$0xff]   ;;  %v3700_v21 = vld [vmem:[%s4885_s1 + $0xd0] sm:$0xff]  }
   0x7   :  { %v3693_v14 = vld [vmem:[%s4885_s1 + $0x20] sm:$0xff]   ;;  %v3697_v18 = vld [vmem:[%s4885_s1 + $0x18] sm:$0xff]   ;;  %v3701_v22 = vld [vmem:[%s4885_s1 + $0x10] sm:$0xff]  }
   0x8   :  { %3170 = vmatpush3.bf16.msra.mxu0 %v3685_v6  ;;  %v3694_v15 = vld [vmem:[%s4885_s1 + $0xa0] sm:$0xff]   ;;  %v3698_v19 = vld [vmem:[%s4885_s1 + $0x98] sm:$0xff]   ;;  %v3702_v23 = vld [vmem:[%s4885_s1 + $0x90] sm:$0xff]  }
   0x9   :  { %3234 = vmatpush3.bf16.msra.mxu1 %v3686_v7  ;;  %3171 = vmatprep.subr.bf16.mxu0 %v3687_v8  ;;  %v3703_v24 = vld [vmem:[%s4885_s1 + $0x48] sm:$0xff]   ;;  %v3707_v28 = vld [vmem:[%s4885_s1 + $0x40] sm:$0xff]   ;;  %v3711_v40 = vld [vmem:[%s4885_s1 + $0x178] sm:$0xff]  }
   0xa   :  { %3235 = vmatprep.subr.bf16.mxu1 %v3688_v9  ;;  %v3704_v25 = vld [vmem:[%s4885_s1 + $0xc8] sm:$0xff]   ;;  %v3708_v29 = vld [vmem:[%s4885_s1 + $0xc0] sm:$0xff]   ;;  %v3712_v41 = vld [vmem:[%s4885_s1 + $0x138] sm:$0xff]  }
   0xb   :  { %v3705_v26 = vld [vmem:[%s4885_s1 + $0x8] sm:$0xff]   ;;  %v3709_v30 = vld [vmem:[%s4885_s1] sm:$0xff]   ;;  %v3713_v42 = vld [vmem:[%s4885_s1 + $0x1f8] sm:$0xff]  }
   0xc   :  { %3172 = vmatpush3.bf16.msra.mxu0 %v3689_v10  ;;  %v3706_v27 = vld [vmem:[%s4885_s1 + $0x88] sm:$0xff]   ;;  %v3710_v31 = vld [vmem:[%s4885_s1 + $0x80] sm:$0xff]   ;;  %v3714_v43 = vld [vmem:[%s4885_s1 + $0x1b8] sm:$0xff]  }
   0xd   :  { %3236 = vmatpush3.bf16.msra.mxu1 %v3690_v11  ;;  %3173 = vmatprep.subr.bf16.mxu0 %v3691_v12  ;;  %v18_v32 = vld [vmem:[%s4886_s0] sm:$0xff]  ;;  %v19_v34 = vld [vmem:[%s4886_s0 + $0x8] sm:$0xff]  ;;  %v3715_v50 = vld [vmem:[%s4885_s1 + $0x170] sm:$0xff]  }
   0xe   :  { %3237 = vmatprep.subr.bf16.mxu1 %v3692_v13  ;;  %v26_v33 = vld [vmem:[%s4886_s0 + $0x40] sm:$0xff]  ;;  %v27_v37 = vld [vmem:[%s4886_s0 + $0x48] sm:$0xff]  ;;  %v3716_v52 = vld [vmem:[%s4885_s1 + $0x130] sm:$0xff]  }
   0xf   :  { %v2832_v35 = vcombine.low %v18_v32, %v26_v33  ;;  %v2833_v36 = vcombine.high %v18_v32, %v26_v33  ;;  %v2834_v38 = vcombine.low %v19_v34, %v27_v37  ;;  %v2835_v39 = vcombine.high %v19_v34, %v27_v37  ;;  %v34_v44 = vld [vmem:[%s4886_s0 + $0x80] sm:$0xff]  ;;  %v35_v47 = vld [vmem:[%s4886_s0 + $0x88] sm:$0xff]  ;;  %v3717_v54 = vld [vmem:[%s4885_s1 + $0x1f0] sm:$0xff]  }
  0x10   :  { %3174 = vmatpush3.bf16.msra.mxu0 %v3693_v14  ;;  %v42_v45 = vld [vmem:[%s4886_s0 + $0xc0] sm:$0xff]  ;;  %v43_v48 = vld [vmem:[%s4886_s0 + $0xc8] sm:$0xff]  ;;  %v3718_v55 = vld [vmem:[%s4885_s1 + $0x1b0] sm:$0xff]  }
  0x11   :  { %3238 = vmatpush3.bf16.msra.mxu1 %v3694_v15  ;;  %3175 = vmatprep.subr.bf16.mxu0 %v3695_v16  ;;  %v2849_v46 = vcombine.high %v34_v44, %v42_v45  ;;  %v2851_v49 = vcombine.high %v35_v47, %v43_v48  ;;  %v2848_v51 = vcombine.low %v34_v44, %v42_v45  ;;  %v50_v56 = vld [vmem:[%s4886_s0 + $0x100] sm:$0xff]  ;;  %v51_v58 = vld [vmem:[%s4886_s0 + $0x108] sm:$0xff]  ;;  %v3733_v32 = vld [vmem:[%s4885_s1 + $0x1d0] sm:$0xff]  }
  0x12   :  { %3239 = vmatprep.subr.bf16.mxu1 %v3696_v17  ;;  %1842 = vmatprep.mubr.bf16.mxu0 %v2833_v36  ;;  %v2850_v53 = vcombine.low %v35_v47, %v43_v48  ;;  %v58_v57 = vld [vmem:[%s4886_s0 + $0x140] sm:$0xff]  ;;  %v59_v59 = vld [vmem:[%s4886_s0 + $0x148] sm:$0xff]  ;;  %v3734_v33 = vld [vmem:[%s4885_s1 + $0x190] sm:$0xff]  }
  0x13   :  { %1939 = vmatprep.mubr.bf16.mxu1 %v2835_v39  ;;  %v2865_v60 = vcombine.high %v50_v56, %v58_v57  ;;  %v2867_v61 = vcombine.high %v51_v58, %v59_v59  ;;  %v3719_v62 = vld [vmem:[%s4885_s1 + $0x168] sm:$0xff]   ;;  %v2864_v2 = vcombine.low %v50_v56, %v58_v57  ;;  %v66_v3 = vld [vmem:[%s4886_s0 + $0x180] sm:$0xff]  ;;  %v2866_v6 = vcombine.low %v51_v58, %v59_v59  ;;  %v3743_v56 = vld [vmem:[%s4885_s1 + $0x278] sm:$0xff]  }
  0x14   :  { %3176 = vmatpush3.bf16.msra.mxu0 %v3697_v18  ;;  %v3720_v63 = vld [vmem:[%s4885_s1 + $0x128] sm:$0xff]   ;;  %v74_v4 = vld [vmem:[%s4886_s0 + $0x1c0] sm:$0xff]  ;;  %v3727_v18 = vld [vmem:[%s4885_s1 + $0x158] sm:$0xff]  }
  0x15   :  { %3240 = vmatpush3.bf16.msra.mxu1 %v3698_v19  ;;  %3177 = vmatprep.subr.bf16.mxu0 %v3699_v20  ;;  %v3721_v0 = vld [vmem:[%s4885_s1 + $0x1e8] sm:$0xff]   ;;  %v2881_v7 = vcombine.high %v66_v3, %v74_v4  ;;  %v3723_v10 = vld [vmem:[%s4885_s1 + $0x160] sm:$0xff]   ;;  %v2880_v19 = vcombine.low %v66_v3, %v74_v4  ;;  %v3728_v20 = vld [vmem:[%s4885_s1 + $0x118] sm:$0xff]  }
  0x16   :  { %3241 = vmatprep.subr.bf16.mxu1 %v3700_v21  ;;  %v3722_v1 = vld [vmem:[%s4885_s1 + $0x1a8] sm:$0xff]   ;;  %v3724_v11 = vld [vmem:[%s4885_s1 + $0x120] sm:$0xff]   ;;  %v3745_v58 = vld [vmem:[%s4885_s1 + $0x2f8] sm:$0xff]  }
  0x17   :  { %v67_v5 = vld [vmem:[%s4886_s0 + $0x188] sm:$0xff]  ;;  %v3725_v12 = vld [vmem:[%s4885_s1 + $0x1e0] sm:$0xff]   ;;  %v29_v3 = vld [vmem:[%s4886_s0 + $0x58] sm:$0xff] }
  0x18   :  { %3178 = vmatpush3.bf16.msra.mxu0 %v3701_v22  ;;  %v75_v8 = vld [vmem:[%s4886_s0 + $0x1c8] sm:$0xff]  ;;  %v3726_v13 = vld [vmem:[%s4885_s1 + $0x1a0] sm:$0xff]  }
  0x19   :  { %3242 = vmatpush3.bf16.msra.mxu1 %v3702_v23  ;;  %3179 = vmatprep.subr.bf16.mxu0 %v3703_v24  ;;  %v2883_v9 = vcombine.high %v67_v5, %v75_v8  ;;  %v82_v14 = vld [vmem:[%s4886_s0 + $0x200] sm:$0xff]  ;;  %v83_v16 = vld [vmem:[%s4886_s0 + $0x208] sm:$0xff]  ;;  %v2882_v21 = vcombine.low %v67_v5, %v75_v8  ;;  %v3729_v23 = vld [vmem:[%s4885_s1 + $0x1d8] sm:$0xff]  }
  0x1a   :  { %3243 = vmatprep.subr.bf16.mxu1 %v3704_v25  ;;  %v90_v15 = vld [vmem:[%s4886_s0 + $0x240] sm:$0xff]  ;;  %v91_v17 = vld [vmem:[%s4886_s0 + $0x248] sm:$0xff]  ;;  %v3730_v25 = vld [vmem:[%s4885_s1 + $0x198] sm:$0xff]  }
  0x1b   :  { %v2897_v22 = vcombine.high %v82_v14, %v90_v15  ;;  %v2899_v24 = vcombine.high %v83_v16, %v91_v17  ;;  %v2896_v34 = vcombine.low %v82_v14, %v90_v15  ;;  %v3736_v39 = vld [vmem:[%s4885_s1 + $0x108] sm:$0xff]   ;;  %v3740_v48 = vld [vmem:[%s4885_s1 + $0x100] sm:$0xff]   ;;  %v36_v8 = vld [vmem:[%s4886_s0 + $0x90] sm:$0xff] }
  0x1c   :  { %3180 = vmatpush3.bf16.msra.mxu0 %v3705_v26  ;;  %v98_v26 = vld [vmem:[%s4886_s0 + $0x280] sm:$0xff]  ;;  %v115_v44 = vld [vmem:[%s4886_s0 + $0x308] sm:$0xff]  ;;  %v3746_v15 = vld [vmem:[%s4885_s1 + $0x2b8] sm:$0xff]  }
  0x1d   :  { %3244 = vmatpush3.bf16.msra.mxu1 %v3706_v27  ;;  %3181 = vmatprep.subr.bf16.mxu0 %v3707_v28  ;;  %v106_v27 = vld [vmem:[%s4886_s0 + $0x2c0] sm:$0xff]  ;;  %v3731_v28 = vld [vmem:[%s4885_s1 + $0x150] sm:$0xff]   ;;  %v123_v45 = vld [vmem:[%s4886_s0 + $0x348] sm:$0xff] }
  0x1e   :  { %3245 = vmatprep.subr.bf16.mxu1 %v3708_v29  ;;  %v99_v29 = vld [vmem:[%s4886_s0 + $0x288] sm:$0xff]  ;;  %v2913_v36 = vcombine.high %v98_v26, %v106_v27  ;;  %v2912_v47 = vcombine.low %v98_v26, %v106_v27 }
  0x1f   :  { %v131_v57 = vld [vmem:[%s4886_s0 + $0x388] sm:$0xff] }
  0x20   :  { %3182 = vmatpush3.bf16.msra.mxu0 %v3709_v30  ;;  %v107_v30 = vld [vmem:[%s4886_s0 + $0x2c8] sm:$0xff] }
  0x21   :  { %3246 = vmatpush3.bf16.msra.mxu1 %v3710_v31  ;;  %3295 = vmatprep.subr.bf16.mxu0 %v3711_v40  ;;  %v3732_v31 = vld [vmem:[%s4885_s1 + $0x110] sm:$0xff]   ;;  %v2915_v37 = vcombine.high %v99_v29, %v107_v30  ;;  %v3737_v40 = vld [vmem:[%s4885_s1 + $0x1c8] sm:$0xff]  }
  0x22   :  { %3359 = vmatprep.subr.bf16.mxu1 %v3713_v42  ;;  %v122_v42 = vld [vmem:[%s4886_s0 + $0x340] sm:$0xff]  ;;  %v139_v59 = vld [vmem:[%s4886_s0 + $0x3c8] sm:$0xff] }
  0x23   :  { %1843 = vmatmul.mubr.bf16.vlgmr.msra.gmra.mxu0 %v2832_v35  ;;  %v2898_v35 = vcombine.low %v83_v16, %v91_v17  ;;  %v2946_v5 = vcombine.low %v131_v57, %v139_v59  ;;  %v3747_v17 = vld [vmem:[%s4885_s1 + $0x270] sm:$0xff]   ;;  %v3751_v26 = vld [vmem:[%s4885_s1 + $0x268] sm:$0xff]  }
  0x24   :  { %1940 = vmatmul.mubr.bf16.vlgmr.msra.gmra.mxu1 %v2834_v38  ;;  %3296 = vmatpush3.bf16.msra.mxu0 %v3712_v41  ;;  %v3735_v38 = vld [vmem:[%s4885_s1 + $0x148] sm:$0xff]   ;;  %v114_v41 = vld [vmem:[%s4886_s0 + $0x300] sm:$0xff] }
  0x25   :  { %3360 = vmatpush3.bf16.msra.mxu1 %v3714_v43  ;;  %1850 = vmatprep.mubr.bf16.mxu0 %v2849_v46  ;;  %v3738_v43 = vld [vmem:[%s4885_s1 + $0x188] sm:$0xff]   ;;  %v3739_v46 = vld [vmem:[%s4885_s1 + $0x140] sm:$0xff]  }
  0x26   :  { %1947 = vmatprep.mubr.bf16.mxu1 %v2851_v49  ;;  %3297 = vmatprep.subr.bf16.mxu0 %v3715_v50  ;;  %v2914_v49 = vcombine.low %v99_v29, %v107_v30  ;;  %v2929_v50 = vcombine.high %v114_v41, %v122_v42  ;;  %v3753_v27 = vld [vmem:[%s4885_s1 + $0x2e8] sm:$0xff]  }
  0x27   :  { %3361 = vmatprep.subr.bf16.mxu1 %v3717_v54  ;;  %v130_v54 = vld [vmem:[%s4886_s0 + $0x380] sm:$0xff] }
  0x28   :  { %3298 = vmatpush3.bf16.msra.mxu0 %v3716_v52  ;;  %v2931_v52 = vcombine.high %v115_v44, %v123_v45 }
  0x29   :  { %3362 = vmatpush3.bf16.msra.mxu1 %v3718_v55  ;;  %3299 = vmatprep.subr.bf16.mxu0 %v3719_v62  ;;  %v138_v55 = vld [vmem:[%s4886_s0 + $0x3c0] sm:$0xff] }
  0x2a   :  { %3363 = vmatprep.subr.bf16.mxu1 %v3721_v0  ;;  %v2945_v62 = vcombine.high %v130_v54, %v138_v55  ;;  %v20_v0 = vld [vmem:[%s4886_s0 + $0x10] sm:$0xff]  ;;  %v2944_v4 = vcombine.low %v130_v54, %v138_v55  ;;  %v85_v54 = vld [vmem:[%s4886_s0 + $0x218] sm:$0xff] }
  0x2b   :  { %1851 = vmatmul.mubr.bf16.gmra.mxu0 %v2848_v51  ;;  %v3741_v51 = vld [vmem:[%s4885_s1 + $0x1c0] sm:$0xff]   ;;  %v93_v55 = vld [vmem:[%s4886_s0 + $0x258] sm:$0xff] }
  0x2c   :  { %1948 = vmatmul.mubr.bf16.gmra.mxu1 %v2850_v53  ;;  %1858 = vmatprep.mubr.bf16.mxu0 %v2865_v60  ;;  %v3742_v53 = vld [vmem:[%s4885_s1 + $0x180] sm:$0xff]   ;;  %v2928_v60 = vcombine.low %v114_v41, %v122_v42  ;;  %v3759_v42 = vld [vmem:[%s4885_s1 + $0x258] sm:$0xff]  }
  0x2d   :  { %1955 = vmatprep.mubr.bf16.mxu1 %v2867_v61  ;;  %3300 = vmatpush3.bf16.msra.mxu0 %v3720_v63  ;;  %v2930_v61 = vcombine.low %v115_v44, %v123_v45  ;;  %v2947_v63 = vcombine.high %v131_v57, %v139_v59  ;;  %v3758_v41 = vld [vmem:[%s4885_s1 + $0x2a0] sm:$0xff]   ;;  %v3761_v44 = vld [vmem:[%s4885_s1 + $0x2d8] sm:$0xff]   ;;  %v3766_v57 = vld [vmem:[%s4885_s1 + $0x290] sm:$0xff]  }
  0x2e   :  { %3364 = vmatpush3.bf16.msra.mxu1 %v3722_v1  ;;  %3301 = vmatprep.subr.bf16.mxu0 %v3723_v10  ;;  %v28_v1 = vld [vmem:[%s4886_s0 + $0x50] sm:$0xff] }
  0x2f   :  { %3365 = vmatprep.subr.bf16.mxu1 %v3725_v12  ;;  %v2836_v10 = vcombine.low %v20_v0, %v28_v1  ;;  %v37_v12 = vld [vmem:[%s4886_s0 + $0x98] sm:$0xff] }
  0x31   :  { %3302 = vmatpush3.bf16.msra.mxu0 %v3724_v11  ;;  %v3744_v11 = vld [vmem:[%s4885_s1 + $0x238] sm:$0xff]  }
  0x32   :  { %3366 = vmatpush3.bf16.msra.mxu1 %v3726_v13  ;;  %3303 = vmatprep.subr.bf16.mxu0 %v3727_v18  ;;  %v45_v13 = vld [vmem:[%s4886_s0 + $0xd8] sm:$0xff] }
  0x33   :  { %1859 = vmatmul.mubr.bf16.gmra.mxu0 %v2864_v2  ;;  %3367 = vmatprep.subr.bf16.mxu1 %v3729_v23  ;;  %v21_v2 = vld [vmem:[%s4886_s0 + $0x18] sm:$0xff]  ;;  %v2855_v18 = vcombine.high %v37_v12, %v45_v13  ;;  %v60_v23 = vld [vmem:[%s4886_s0 + $0x150] sm:$0xff]  ;;  %v2854_v29 = vcombine.low %v37_v12, %v45_v13  ;;  %v2902_v13 = vcombine.low %v85_v54, %v93_v55 }
  0x34   :  { %1956 = vmatmul.mubr.bf16.gmra.mxu1 %v2866_v6  ;;  %1866 = vmatprep.mubr.bf16.mxu0 %v2881_v7  ;;  %v2837_v6 = vcombine.high %v20_v0, %v28_v1  ;;  %v2839_v7 = vcombine.high %v21_v2, %v29_v3  ;;  %v2838_v14 = vcombine.low %v21_v2, %v29_v3  ;;  %v3768_v0 = vld [vmem:[%s4885_s1 + $0x208] sm:$0xff]   ;;  %v3771_v2 = vld [vmem:[%s4885_s1 + $0x240] sm:$0xff]   ;;  %v100_v3 = vld [vmem:[%s4886_s0 + $0x290] sm:$0xff] }
  0x35   :  { %1963 = vmatprep.mubr.bf16.mxu1 %v2883_v9  ;;  %3304 = vmatpush3.bf16.msra.mxu0 %v3728_v20  ;;  %v44_v9 = vld [vmem:[%s4886_s0 + $0xd0] sm:$0xff]  ;;  %v3770_v1 = vld [vmem:[%s4885_s1 + $0x288] sm:$0xff]   ;;  %v3777_v12 = vld [vmem:[%s4885_s1 + $0x3f8] sm:$0xff]  }
  0x36   :  { %3368 = vmatpush3.bf16.msra.mxu1 %v3730_v25  ;;  %3305 = vmatprep.subr.bf16.mxu0 %v3731_v28  ;;  %v2853_v16 = vcombine.high %v36_v8, %v44_v9  ;;  %v3749_v20 = vld [vmem:[%s4885_s1 + $0x2f0] sm:$0xff]   ;;  %v61_v25 = vld [vmem:[%s4886_s0 + $0x158] sm:$0xff]  ;;  %v2852_v28 = vcombine.low %v36_v8, %v44_v9  ;;  %v3772_v8 = vld [vmem:[%s4885_s1 + $0x200] sm:$0xff]  }
  0x37   :  { %3369 = vmatprep.subr.bf16.mxu1 %v3733_v32  ;;  %v3752_v32 = vld [vmem:[%s4885_s1 + $0x228] sm:$0xff]   ;;  %v3774_v9 = vld [vmem:[%s4885_s1 + $0x280] sm:$0xff]  }
  0x39   :  { %3306 = vmatpush3.bf16.msra.mxu0 %v3732_v31 }
  0x3a   :  { %3370 = vmatpush3.bf16.msra.mxu1 %v3734_v33  ;;  %3307 = vmatprep.subr.bf16.mxu0 %v3735_v38  ;;  %v3754_v33 = vld [vmem:[%s4885_s1 + $0x2a8] sm:$0xff]   ;;  %v69_v38 = vld [vmem:[%s4886_s0 + $0x198] sm:$0xff] }
  0x3b   :  { %1867 = vmatmul.mubr.bf16.gmra.mxu0 %v2880_v19  ;;  %3371 = vmatprep.subr.bf16.mxu1 %v3737_v40  ;;  %v3748_v19 = vld [vmem:[%s4885_s1 + $0x230] sm:$0xff]   ;;  %v3756_v40 = vld [vmem:[%s4885_s1 + $0x220] sm:$0xff]  }
  0x3c   :  { %1964 = vmatmul.mubr.bf16.gmra.mxu1 %v2882_v21  ;;  %1874 = vmatprep.mubr.bf16.mxu0 %v2897_v22  ;;  %v3750_v21 = vld [vmem:[%s4885_s1 + $0x2b0] sm:$0xff]  }
  0x3d   :  { %1971 = vmatprep.mubr.bf16.mxu1 %v2899_v24  ;;  %3308 = vmatpush3.bf16.msra.mxu0 %v3736_v39  ;;  %v52_v22 = vld [vmem:[%s4886_s0 + $0x110] sm:$0xff]  ;;  %v53_v24 = vld [vmem:[%s4886_s0 + $0x118] sm:$0xff] }
  0x3e   :  { %3372 = vmatpush3.bf16.msra.mxu1 %v3738_v43  ;;  %3309 = vmatprep.subr.bf16.mxu0 %v3739_v46  ;;  %v2869_v30 = vcombine.high %v52_v22, %v60_v23  ;;  %v2871_v31 = vcombine.high %v53_v24, %v61_v25  ;;  %v77_v39 = vld [vmem:[%s4886_s0 + $0x1d8] sm:$0xff]  ;;  %v2868_v43 = vcombine.low %v52_v22, %v60_v23 }
  0x3f   :  { %3373 = vmatprep.subr.bf16.mxu1 %v3741_v51  ;;  %v2870_v45 = vcombine.low %v53_v24, %v61_v25  ;;  %v84_v51 = vld [vmem:[%s4886_s0 + $0x210] sm:$0xff] }
  0x40   :  { %v132_v24 = vld [vmem:[%s4886_s0 + $0x390] sm:$0xff] }
  0x41   :  { %3310 = vmatpush3.bf16.msra.mxu0 %v3740_v48  ;;  %v2887_v48 = vcombine.high %v69_v38, %v77_v39  ;;  %v140_v25 = vld [vmem:[%s4886_s0 + $0x3d0] sm:$0xff] }
  0x42   :  { %3374 = vmatpush3.bf16.msra.mxu1 %v3742_v53  ;;  %3423 = vmatprep.subr.bf16.mxu0 %v3743_v56  ;;  %v92_v53 = vld [vmem:[%s4886_s0 + $0x250] sm:$0xff] }
  0x43   :  { %1875 = vmatmul.mubr.bf16.gmra.mxu0 %v2896_v34  ;;  %3487 = vmatprep.subr.bf16.mxu1 %v3745_v58  ;;  %v3755_v34 = vld [vmem:[%s4885_s1 + $0x260] sm:$0xff]   ;;  %v3764_v56 = vld [vmem:[%s4885_s1 + $0x210] sm:$0xff]   ;;  %v3767_v58 = vld [vmem:[%s4885_s1 + $0x248] sm:$0xff]  }
  0x44   :  { %1972 = vmatmul.mubr.bf16.gmra.mxu1 %v2898_v35  ;;  %1882 = vmatprep.mubr.bf16.mxu0 %v2913_v36  ;;  %v68_v35 = vld [vmem:[%s4886_s0 + $0x190] sm:$0xff] }
  0x45   :  { %1979 = vmatprep.mubr.bf16.mxu1 %v2915_v37  ;;  %v76_v36 = vld [vmem:[%s4886_s0 + $0x1d0] sm:$0xff]  ;;  %v3757_v37 = vld [vmem:[%s4885_s1 + $0x2e0] sm:$0xff]  }
  0x46   :  { %v2885_v46 = vcombine.high %v68_v35, %v76_v36  ;;  %v2884_v59 = vcombine.low %v68_v35, %v76_v36  ;;  %v31_v35 = vld [vmem:[%s4886_s0 + $0x68] sm:$0xff]  ;;  %v2948_v36 = vcombine.low %v132_v24, %v140_v25 }
  0x4b   :  { %1883 = vmatmul.mubr.bf16.gmra.mxu0 %v2912_v47  ;;  %v3760_v47 = vld [vmem:[%s4885_s1 + $0x218] sm:$0xff]  }
  0x4c   :  { %1980 = vmatmul.mubr.bf16.gmra.mxu1 %v2914_v49  ;;  %1890 = vmatprep.mubr.bf16.mxu0 %v2929_v50  ;;  %v3762_v49 = vld [vmem:[%s4885_s1 + $0x298] sm:$0xff]   ;;  %v3763_v50 = vld [vmem:[%s4885_s1 + $0x250] sm:$0xff]  }
  0x4d   :  { %1987 = vmatprep.mubr.bf16.mxu1 %v2931_v52  ;;  %v3765_v52 = vld [vmem:[%s4885_s1 + $0x2d0] sm:$0xff]  }
  0x53   :  { %1891 = vmatmul.mubr.bf16.gmra.mxu0 %v2928_v60  ;;  %v3769_v60 = vld [vmem:[%s4885_s1 + $0x2c8] sm:$0xff]  }
  0x54   :  { %1988 = vmatmul.mubr.bf16.gmra.mxu1 %v2930_v61  ;;  %1898 = vmatprep.mubr.bf16.mxu0 %v2945_v62  ;;  %v2886_v61 = vcombine.low %v69_v38, %v77_v39  ;;  %v2901_v62 = vcombine.high %v84_v51, %v92_v53 }
  0x55   :  { %1995 = vmatprep.mubr.bf16.mxu1 %v2947_v63  ;;  %v2903_v63 = vcombine.high %v85_v54, %v93_v55  ;;  %v54_v54 = vld [vmem:[%s4886_s0 + $0x120] sm:$0xff] }
  0x56   :  { %v62_v55 = vld [vmem:[%s4886_s0 + $0x160] sm:$0xff] }
  0x5b   :  { %1899 = vmatmul.mubr.bf16.gmra.mxu0 %v2944_v4  ;;  %v108_v4 = vld [vmem:[%s4886_s0 + $0x2d0] sm:$0xff] }
  0x5c   :  { %1996 = vmatmul.mubr.bf16.gmra.mxu1 %v2946_v5  ;;  %2036 = vmatprep.mubr.bf16.mxu0 %v2837_v6  ;;  %v3773_v5 = vld [vmem:[%s4885_s1 + $0x2c0] sm:$0xff]   ;;  %v101_v6 = vld [vmem:[%s4886_s0 + $0x298] sm:$0xff] }
  0x5d   :  { %2133 = vmatprep.mubr.bf16.mxu1 %v2839_v7  ;;  %v109_v7 = vld [vmem:[%s4886_s0 + $0x2d8] sm:$0xff] }
  0x63   :  { %2037 = vmatmul.mubr.bf16.vlgmr.msra.gmra.mxu0 %v2836_v10  ;;  %v3775_v10 = vld [vmem:[%s4885_s1 + $0x378] sm:$0xff]  }
  0x64   :  { %2134 = vmatmul.mubr.bf16.vlgmr.msra.gmra.mxu1 %v2838_v14  ;;  %3424 = vmatpush3.bf16.msra.mxu0 %v3744_v11  ;;  %v2900_v11 = vcombine.low %v84_v51, %v92_v53  ;;  %v2917_v14 = vcombine.high %v100_v3, %v108_v4  ;;  %v3781_v51 = vld [vmem:[%s4885_s1 + $0x3f0] sm:$0xff]  }
  0x65   :  { %3488 = vmatpush3.bf16.msra.mxu1 %v3746_v15  ;;  %2044 = vmatprep.mubr.bf16.mxu0 %v2853_v16  ;;  %v2919_v15 = vcombine.high %v101_v6, %v109_v7  ;;  %v116_v16 = vld [vmem:[%s4886_s0 + $0x310] sm:$0xff] }
  0x66   :  { %2141 = vmatprep.mubr.bf16.mxu1 %v2855_v18  ;;  %3425 = vmatprep.subr.bf16.mxu0 %v3747_v17  ;;  %v124_v17 = vld [vmem:[%s4886_s0 + $0x350] sm:$0xff]  ;;  %v117_v18 = vld [vmem:[%s4886_s0 + $0x318] sm:$0xff] }
  0x67   :  { %3489 = vmatprep.subr.bf16.mxu1 %v3749_v20  ;;  %v2916_v20 = vcombine.low %v100_v3, %v108_v4  ;;  %v2933_v22 = vcombine.high %v116_v16, %v124_v17  ;;  %v3782_v53 = vld [vmem:[%s4885_s1 + $0x3b0] sm:$0xff]   ;;  %v3789_v3 = vld [vmem:[%s4885_s1 + $0x3e0] sm:$0xff]  }
  0x68   :  { %3426 = vmatpush3.bf16.msra.mxu0 %v3748_v19  ;;  %v125_v19 = vld [vmem:[%s4886_s0 + $0x358] sm:$0xff]  ;;  %v70_v4 = vld [vmem:[%s4886_s0 + $0x1a0] sm:$0xff] }
  0x69   :  { %3490 = vmatpush3.bf16.msra.mxu1 %v3750_v21  ;;  %3427 = vmatprep.subr.bf16.mxu0 %v3751_v26  ;;  %v2918_v21 = vcombine.low %v101_v6, %v109_v7  ;;  %v2935_v23 = vcombine.high %v117_v18, %v125_v19  ;;  %v133_v26 = vld [vmem:[%s4886_s0 + $0x398] sm:$0xff]  ;;  %v71_v6 = vld [vmem:[%s4886_s0 + $0x1a8] sm:$0xff]  ;;  %v3788_v7 = vld [vmem:[%s4885_s1 + $0x320] sm:$0xff]  }
  0x6a   :  { %3491 = vmatprep.subr.bf16.mxu1 %v3753_v27  ;;  %v141_v27 = vld [vmem:[%s4886_s0 + $0x3d8] sm:$0xff] }
  0x6b   :  { %2045 = vmatmul.mubr.bf16.gmra.mxu0 %v2852_v28  ;;  %v2932_v28 = vcombine.low %v116_v16, %v124_v17  ;;  %v3792_v16 = vld [vmem:[%s4885_s1 + $0x318] sm:$0xff]  }
  0x6c   :  { %2142 = vmatmul.mubr.bf16.gmra.mxu1 %v2854_v29  ;;  %2052 = vmatprep.mubr.bf16.mxu0 %v2869_v30  ;;  %v2934_v29 = vcombine.low %v117_v18, %v125_v19  ;;  %v2949_v30 = vcombine.high %v132_v24, %v140_v25  ;;  %v3794_v17 = vld [vmem:[%s4885_s1 + $0x398] sm:$0xff]   ;;  %v3795_v18 = vld [vmem:[%s4885_s1 + $0x350] sm:$0xff]   ;;  %v95_v24 = vld [vmem:[%s4886_s0 + $0x268] sm:$0xff] }
  0x6d   :  { %2149 = vmatprep.mubr.bf16.mxu1 %v2871_v31  ;;  %3428 = vmatpush3.bf16.msra.mxu0 %v3752_v32  ;;  %v2951_v31 = vcombine.high %v133_v26, %v141_v27  ;;  %v22_v32 = vld [vmem:[%s4886_s0 + $0x20] sm:$0xff]  ;;  %v3797_v19 = vld [vmem:[%s4885_s1 + $0x3d0] sm:$0xff]  }
  0x6e   :  { %3492 = vmatpush3.bf16.msra.mxu1 %v3754_v33  ;;  %3429 = vmatprep.subr.bf16.mxu0 %v3755_v34  ;;  %v30_v33 = vld [vmem:[%s4886_s0 + $0x60] sm:$0xff]  ;;  %v23_v34 = vld [vmem:[%s4886_s0 + $0x28] sm:$0xff]  ;;  %v3798_v25 = vld [vmem:[%s4885_s1 + $0x390] sm:$0xff]  }
  0x6f   :  { %3493 = vmatprep.subr.bf16.mxu1 %v3757_v37  ;;  %v2950_v37 = vcombine.low %v133_v26, %v141_v27  ;;  %v2841_v38 = vcombine.high %v22_v32, %v30_v33  ;;  %v2843_v39 = vcombine.high %v23_v34, %v31_v35  ;;  %v3799_v26 = vld [vmem:[%s4885_s1 + $0x348] sm:$0xff]  }
  0x71   :  { %3430 = vmatpush3.bf16.msra.mxu0 %v3756_v40  ;;  %v38_v40 = vld [vmem:[%s4886_s0 + $0xa0] sm:$0xff] }
  0x72   :  { %3494 = vmatpush3.bf16.msra.mxu1 %v3758_v41  ;;  %3431 = vmatprep.subr.bf16.mxu0 %v3759_v42  ;;  %v46_v41 = vld [vmem:[%s4886_s0 + $0xe0] sm:$0xff]  ;;  %v2840_v42 = vcombine.low %v22_v32, %v30_v33  ;;  %v3800_v32 = vld [vmem:[%s4885_s1 + $0x308] sm:$0xff]  }
  0x73   :  { %2053 = vmatmul.mubr.bf16.gmra.mxu0 %v2868_v43  ;;  %3495 = vmatprep.subr.bf16.mxu1 %v3761_v44  ;;  %v39_v43 = vld [vmem:[%s4886_s0 + $0xa8] sm:$0xff] }
  0x74   :  { %2150 = vmatmul.mubr.bf16.gmra.mxu1 %v2870_v45  ;;  %2060 = vmatprep.mubr.bf16.mxu0 %v2885_v46  ;;  %v47_v44 = vld [vmem:[%s4886_s0 + $0xe8] sm:$0xff]  ;;  %v2842_v45 = vcombine.low %v23_v34, %v31_v35  ;;  %v3776_v46 = vld [vmem:[%s4885_s1 + $0x338] sm:$0xff]   ;;  %v3803_v34 = vld [vmem:[%s4885_s1 + $0x340] sm:$0xff]  }
  0x75   :  { %2157 = vmatprep.mubr.bf16.mxu1 %v2887_v48  ;;  %3432 = vmatpush3.bf16.msra.mxu0 %v3760_v47  ;;  %v3778_v47 = vld [vmem:[%s4885_s1 + $0x3b8] sm:$0xff]   ;;  %v2857_v48 = vcombine.high %v38_v40, %v46_v41  ;;  %v3802_v33 = vld [vmem:[%s4885_s1 + $0x388] sm:$0xff]   ;;  %v3805_v35 = vld [vmem:[%s4885_s1 + $0x3c0] sm:$0xff]  }
  0x76   :  { %3496 = vmatpush3.bf16.msra.mxu1 %v3762_v49  ;;  %3433 = vmatprep.subr.bf16.mxu0 %v3763_v50  ;;  %v2859_v49 = vcombine.high %v39_v43, %v47_v44  ;;  %v3779_v50 = vld [vmem:[%s4885_s1 + $0x370] sm:$0xff]  }
  0x77   :  { %3497 = vmatprep.subr.bf16.mxu1 %v3765_v52  ;;  %v3780_v52 = vld [vmem:[%s4885_s1 + $0x330] sm:$0xff]  }
  0x79   :  { %3434 = vmatpush3.bf16.msra.mxu0 %v3764_v56  ;;  %v3783_v56 = vld [vmem:[%s4885_s1 + $0x368] sm:$0xff]  }
  0x7a   :  { %3498 = vmatpush3.bf16.msra.mxu1 %v3766_v57  ;;  %3435 = vmatprep.subr.bf16.mxu0 %v3767_v58  ;;  %v55_v57 = vld [vmem:[%s4886_s0 + $0x128] sm:$0xff] }
  0x7b   :  { %2061 = vmatmul.mubr.bf16.gmra.mxu0 %v2884_v59  ;;  %3499 = vmatprep.subr.bf16.mxu1 %v3769_v60  ;;  %v63_v58 = vld [vmem:[%s4886_s0 + $0x168] sm:$0xff]  ;;  %v2856_v60 = vcombine.low %v38_v40, %v46_v41  ;;  %v3806_v41 = vld [vmem:[%s4885_s1 + $0x380] sm:$0xff]  }
  0x7c   :  { %2158 = vmatmul.mubr.bf16.gmra.mxu1 %v2886_v61  ;;  %2068 = vmatprep.mubr.bf16.mxu0 %v2901_v62  ;;  %v3785_v59 = vld [vmem:[%s4885_s1 + $0x3e8] sm:$0xff]   ;;  %v2858_v61 = vcombine.low %v39_v43, %v47_v44  ;;  %v2873_v62 = vcombine.high %v54_v54, %v62_v55 }
  0x7d   :  { %2165 = vmatprep.mubr.bf16.mxu1 %v2903_v63  ;;  %3436 = vmatpush3.bf16.msra.mxu0 %v3768_v0  ;;  %v2875_v63 = vcombine.high %v55_v57, %v63_v58  ;;  %v3784_v0 = vld [vmem:[%s4885_s1 + $0x328] sm:$0xff]  }
  0x7e   :  { %3500 = vmatpush3.bf16.msra.mxu1 %v3770_v1  ;;  %3437 = vmatprep.subr.bf16.mxu0 %v3771_v2  ;;  %v3786_v1 = vld [vmem:[%s4885_s1 + $0x3a8] sm:$0xff]   ;;  %v3787_v2 = vld [vmem:[%s4885_s1 + $0x360] sm:$0xff]  }
  0x7f   :  { %3501 = vmatprep.subr.bf16.mxu1 %v3773_v5  ;;  %v78_v5 = vld [vmem:[%s4886_s0 + $0x1e0] sm:$0xff]  ;;  %v111_v40 = vld [vmem:[%s4886_s0 + $0x2e8] sm:$0xff] }
  0x80   :  { %v2888_v27 = vcombine.low %v70_v4, %v78_v5 }
  0x81   :  { %3438 = vmatpush3.bf16.msra.mxu0 %v3772_v8  ;;  %v79_v8 = vld [vmem:[%s4886_s0 + $0x1e8] sm:$0xff] }
  0x82   :  { %3502 = vmatpush3.bf16.msra.mxu1 %v3774_v9  ;;  %3551 = vmatprep.subr.bf16.mxu0 %v3775_v10  ;;  %v3790_v9 = vld [vmem:[%s4885_s1 + $0x3a0] sm:$0xff]   ;;  %v3791_v10 = vld [vmem:[%s4885_s1 + $0x358] sm:$0xff]  }
  0x83   :  { %2069 = vmatmul.mubr.bf16.gmra.mxu0 %v2900_v11  ;;  %3615 = vmatprep.subr.bf16.mxu1 %v3777_v12  ;;  %v2872_v11 = vcombine.low %v54_v54, %v62_v55  ;;  %v3793_v12 = vld [vmem:[%s4885_s1 + $0x3d8] sm:$0xff]   ;;  %v134_v54 = vld [vmem:[%s4886_s0 + $0x3a0] sm:$0xff] }
  0x84   :  { %2166 = vmatmul.mubr.bf16.gmra.mxu1 %v2902_v13  ;;  %2076 = vmatprep.mubr.bf16.mxu0 %v2917_v14  ;;  %v2874_v13 = vcombine.low %v55_v57, %v63_v58  ;;  %v2889_v14 = vcombine.high %v70_v4, %v78_v5  ;;  %v142_v55 = vld [vmem:[%s4886_s0 + $0x3e0] sm:$0xff]  ;;  %v143_v57 = vld [vmem:[%s4886_s0 + $0x3e8] sm:$0xff] }
  0x85   :  { %2173 = vmatprep.mubr.bf16.mxu1 %v2919_v15  ;;  %v2891_v15 = vcombine.high %v71_v6, %v79_v8 }
  0x8b   :  { %2077 = vmatmul.mubr.bf16.gmra.mxu0 %v2916_v20  ;;  %v86_v20 = vld [vmem:[%s4886_s0 + $0x220] sm:$0xff] }
  0x8c   :  { %2174 = vmatmul.mubr.bf16.gmra.mxu1 %v2918_v21  ;;  %2084 = vmatprep.mubr.bf16.mxu0 %v2933_v22  ;;  %v94_v21 = vld [vmem:[%s4886_s0 + $0x260] sm:$0xff]  ;;  %v87_v22 = vld [vmem:[%s4886_s0 + $0x228] sm:$0xff] }
  0x8d   :  { %2181 = vmatprep.mubr.bf16.mxu1 %v2935_v23  ;;  %v3796_v23 = vld [vmem:[%s4885_s1 + $0x310] sm:$0xff]   ;;  %v2906_v43 = vcombine.low %v87_v22, %v95_v24 }
  0x93   :  { %2085 = vmatmul.mubr.bf16.gmra.mxu0 %v2932_v28  ;;  %v3801_v28 = vld [vmem:[%s4885_s1 + $0x3c8] sm:$0xff]  }
  0x94   :  { %2182 = vmatmul.mubr.bf16.gmra.mxu1 %v2934_v29  ;;  %2092 = vmatprep.mubr.bf16.mxu0 %v2949_v30  ;;  %v2890_v29 = vcombine.low %v71_v6, %v79_v8  ;;  %v2905_v30 = vcombine.high %v86_v20, %v94_v21  ;;  %v40_v6 = vld [vmem:[%s4886_s0 + $0xb0] sm:$0xff]  ;;  %v41_v8 = vld [vmem:[%s4886_s0 + $0xb8] sm:$0xff] }
  0x95   :  { %2189 = vmatprep.mubr.bf16.mxu1 %v2951_v31  ;;  %v2907_v31 = vcombine.high %v87_v22, %v95_v24  ;;  %v65_v22 = vld [vmem:[%s4886_s0 + $0x178] sm:$0xff] }
  0x9b   :  { %2093 = vmatmul.mubr.bf16.gmra.mxu0 %v2948_v36  ;;  %v102_v36 = vld [vmem:[%s4886_s0 + $0x2a0] sm:$0xff] }
  0x9c   :  { %2190 = vmatmul.mubr.bf16.gmra.mxu1 %v2950_v37  ;;  %2230 = vmatprep.mubr.bf16.mxu0 %v2841_v38  ;;  %v110_v37 = vld [vmem:[%s4886_s0 + $0x2e0] sm:$0xff] }
  0x9d   :  { %2327 = vmatprep.mubr.bf16.mxu1 %v2843_v39  ;;  %v3804_v38 = vld [vmem:[%s4885_s1 + $0x300] sm:$0xff]   ;;  %v103_v39 = vld [vmem:[%s4886_s0 + $0x2a8] sm:$0xff]  ;;  %v2921_v44 = vcombine.high %v102_v36, %v110_v37 }
  0xa3   :  { %2231 = vmatmul.mubr.bf16.vlgmr.msra.gmra.mxu0 %v2840_v42  ;;  %v2904_v42 = vcombine.low %v86_v20, %v94_v21  ;;  %v57_v21 = vld [vmem:[%s4886_s0 + $0x138] sm:$0xff] }
  0xa4   :  { %2328 = vmatmul.mubr.bf16.vlgmr.msra.gmra.mxu1 %v2842_v45  ;;  %3552 = vmatpush3.bf16.msra.mxu0 %v3776_v46  ;;  %v2923_v45 = vcombine.high %v103_v39, %v111_v40  ;;  %v118_v46 = vld [vmem:[%s4886_s0 + $0x320] sm:$0xff] }
  0xa5   :  { %3616 = vmatpush3.bf16.msra.mxu1 %v3778_v47  ;;  %2238 = vmatprep.mubr.bf16.mxu0 %v2857_v48  ;;  %v126_v47 = vld [vmem:[%s4886_s0 + $0x360] sm:$0xff]  ;;  %v119_v48 = vld [vmem:[%s4886_s0 + $0x328] sm:$0xff] }
  0xa6   :  { %2335 = vmatprep.mubr.bf16.mxu1 %v2859_v49  ;;  %3553 = vmatprep.subr.bf16.mxu0 %v3779_v50  ;;  %v127_v49 = vld [vmem:[%s4886_s0 + $0x368] sm:$0xff]  ;;  %v2920_v50 = vcombine.low %v102_v36, %v110_v37  ;;  %v2936_v58 = vcombine.low %v118_v46, %v126_v47 }
  0xa7   :  { %3617 = vmatprep.subr.bf16.mxu1 %v3781_v51  ;;  %v2922_v51 = vcombine.low %v103_v39, %v111_v40  ;;  %v72_v39 = vld [vmem:[%s4886_s0 + $0x1b0] sm:$0xff] }
  0xa8   :  { %3554 = vmatpush3.bf16.msra.mxu0 %v3780_v52  ;;  %v2937_v52 = vcombine.high %v118_v46, %v126_v47  ;;  %v80_v40 = vld [vmem:[%s4886_s0 + $0x1f0] sm:$0xff] }
  0xa9   :  { %3618 = vmatpush3.bf16.msra.mxu1 %v3782_v53  ;;  %3555 = vmatprep.subr.bf16.mxu0 %v3783_v56  ;;  %v2939_v53 = vcombine.high %v119_v48, %v127_v49  ;;  %v135_v56 = vld [vmem:[%s4886_s0 + $0x3a8] sm:$0xff] }
  0xaa   :  { %3619 = vmatprep.subr.bf16.mxu1 %v3785_v59  ;;  %v2938_v59 = vcombine.low %v119_v48, %v127_v49  ;;  %v2878_v49 = vcombine.low %v57_v21, %v65_v22 }
  0xab   :  { %2239 = vmatmul.mubr.bf16.gmra.mxu0 %v2856_v60  ;;  %v2953_v60 = vcombine.high %v134_v54, %v142_v55 }
  0xac   :  { %2336 = vmatmul.mubr.bf16.gmra.mxu1 %v2858_v61  ;;  %2246 = vmatprep.mubr.bf16.mxu0 %v2873_v62  ;;  %v2955_v61 = vcombine.high %v135_v56, %v143_v57  ;;  %v24_v62 = vld [vmem:[%s4886_s0 + $0x30] sm:$0xff] }
  0xad   :  { %2343 = vmatprep.mubr.bf16.mxu1 %v2875_v63  ;;  %3556 = vmatpush3.bf16.msra.mxu0 %v3784_v0  ;;  %v32_v63 = vld [vmem:[%s4886_s0 + $0x70] sm:$0xff]  ;;  %v25_v0 = vld [vmem:[%s4886_s0 + $0x38] sm:$0xff] }
  0xae   :  { %3620 = vmatpush3.bf16.msra.mxu1 %v3786_v1  ;;  %3557 = vmatprep.subr.bf16.mxu0 %v3787_v2  ;;  %v33_v1 = vld [vmem:[%s4886_s0 + $0x78] sm:$0xff]  ;;  %v2952_v2 = vcombine.low %v134_v54, %v142_v55  ;;  %v2845_v4 = vcombine.high %v24_v62, %v32_v63 }
  0xaf   :  { %3621 = vmatprep.subr.bf16.mxu1 %v3789_v3  ;;  %v2954_v3 = vcombine.low %v135_v56, %v143_v57  ;;  %v2847_v5 = vcombine.high %v25_v0, %v33_v1 }
  0xb1   :  { %3558 = vmatpush3.bf16.msra.mxu0 %v3788_v7  ;;  %v48_v7 = vld [vmem:[%s4886_s0 + $0xf0] sm:$0xff] }
  0xb2   :  { %3622 = vmatpush3.bf16.msra.mxu1 %v3790_v9  ;;  %3559 = vmatprep.subr.bf16.mxu0 %v3791_v10  ;;  %v49_v9 = vld [vmem:[%s4886_s0 + $0xf8] sm:$0xff]  ;;  %v2844_v10 = vcombine.low %v24_v62, %v32_v63  ;;  %v96_v62 = vld [vmem:[%s4886_s0 + $0x270] sm:$0xff] }
  0xb3   :  { %2247 = vmatmul.mubr.bf16.gmra.mxu0 %v2872_v11  ;;  %3623 = vmatprep.subr.bf16.mxu1 %v3793_v12  ;;  %v2846_v11 = vcombine.low %v25_v0, %v33_v1  ;;  %v2861_v12 = vcombine.high %v40_v6, %v48_v7  ;;  %v89_v1 = vld [vmem:[%s4886_s0 + $0x238] sm:$0xff] }
  0xb4   :  { %2344 = vmatmul.mubr.bf16.gmra.mxu1 %v2874_v13  ;;  %2254 = vmatprep.mubr.bf16.mxu0 %v2889_v14  ;;  %v2863_v13 = vcombine.high %v41_v8, %v49_v9 }
  0xb5   :  { %2351 = vmatprep.mubr.bf16.mxu1 %v2891_v15  ;;  %3560 = vmatpush3.bf16.msra.mxu0 %v3792_v16 }
  0xb6   :  { %3624 = vmatpush3.bf16.msra.mxu1 %v3794_v17  ;;  %3561 = vmatprep.subr.bf16.mxu0 %v3795_v18  ;;  %v56_v17 = vld [vmem:[%s4886_s0 + $0x130] sm:$0xff] }
  0xb7   :  { %3625 = vmatprep.subr.bf16.mxu1 %v3797_v19  ;;  %v64_v18 = vld [vmem:[%s4886_s0 + $0x170] sm:$0xff] }
  0xb8   :  { %v2876_v47 = vcombine.low %v56_v17, %v64_v18 }
  0xb9   :  { %3562 = vmatpush3.bf16.msra.mxu0 %v3796_v23 }
  0xba   :  { %3626 = vmatpush3.bf16.msra.mxu1 %v3798_v25  ;;  %3563 = vmatprep.subr.bf16.mxu0 %v3799_v26  ;;  %v2860_v25 = vcombine.low %v40_v6, %v48_v7 }
  0xbb   :  { %2255 = vmatmul.mubr.bf16.gmra.mxu0 %v2888_v27  ;;  %3627 = vmatprep.subr.bf16.mxu1 %v3801_v28  ;;  %v2862_v27 = vcombine.low %v41_v8, %v49_v9  ;;  %v2877_v28 = vcombine.high %v56_v17, %v64_v18 }
  0xbc   :  { %2352 = vmatmul.mubr.bf16.gmra.mxu1 %v2890_v29  ;;  %2262 = vmatprep.mubr.bf16.mxu0 %v2905_v30 }
  0xbd   :  { %2359 = vmatprep.mubr.bf16.mxu1 %v2907_v31  ;;  %3564 = vmatpush3.bf16.msra.mxu0 %v3800_v32  ;;  %v2879_v31 = vcombine.high %v57_v21, %v65_v22 }
  0xbe   :  { %3628 = vmatpush3.bf16.msra.mxu1 %v3802_v33  ;;  %3565 = vmatprep.subr.bf16.mxu0 %v3803_v34 }
  0xbf   :  { %3629 = vmatprep.subr.bf16.mxu1 %v3805_v35 }
  0xc1   :  { %3566 = vmatpush3.bf16.msra.mxu0 %v3804_v38 }
  0xc2   :  { %3630 = vmatpush3.bf16.msra.mxu1 %v3806_v41 }
  0xc3   :  { %2263 = vmatmul.mubr.bf16.gmra.mxu0 %v2904_v42 }
  0xc4   :  { %2360 = vmatmul.mubr.bf16.gmra.mxu1 %v2906_v43  ;;  %2270 = vmatprep.mubr.bf16.mxu0 %v2921_v44  ;;  %v73_v43 = vld [vmem:[%s4886_s0 + $0x1b8] sm:$0xff] }
  0xc5   :  { %2367 = vmatprep.mubr.bf16.mxu1 %v2923_v45  ;;  %v81_v44 = vld [vmem:[%s4886_s0 + $0x1f8] sm:$0xff] }
  0xc6   :  { %v2894_v7 = vcombine.low %v73_v43, %v81_v44 }
  0xcb   :  { %2271 = vmatmul.mubr.bf16.gmra.mxu0 %v2920_v50  ;;  %v2893_v50 = vcombine.high %v72_v39, %v80_v40 }
  0xcc   :  { %2368 = vmatmul.mubr.bf16.gmra.mxu1 %v2922_v51  ;;  %2278 = vmatprep.mubr.bf16.mxu0 %v2937_v52 }
  0xcd   :  { %2375 = vmatprep.mubr.bf16.mxu1 %v2939_v53  ;;  %v2895_v53 = vcombine.high %v73_v43, %v81_v44  ;;  %v120_v43 = vld [vmem:[%s4886_s0 + $0x330] sm:$0xff] }
  0xce   :  { %v128_v44 = vld [vmem:[%s4886_s0 + $0x370] sm:$0xff] }
  0xd3   :  { %2279 = vmatmul.mubr.bf16.gmra.mxu0 %v2936_v58 }
  0xd4   :  { %2376 = vmatmul.mubr.bf16.gmra.mxu1 %v2938_v59  ;;  %2286 = vmatprep.mubr.bf16.mxu0 %v2953_v60 }
  0xd5   :  { %2383 = vmatprep.mubr.bf16.mxu1 %v2955_v61  ;;  %v88_v61 = vld [vmem:[%s4886_s0 + $0x230] sm:$0xff] }
  0xd6   :  { %v2909_v8 = vcombine.high %v88_v61, %v96_v62 }
  0xdb   :  { %2287 = vmatmul.mubr.bf16.gmra.mxu0 %v2952_v2  ;;  %v97_v2 = vld [vmem:[%s4886_s0 + $0x278] sm:$0xff] }
  0xdc   :  { %2384 = vmatmul.mubr.bf16.gmra.mxu1 %v2954_v3  ;;  %2424 = vmatprep.mubr.bf16.mxu0 %v2845_v4 }
  0xdd   :  { %2521 = vmatprep.mubr.bf16.mxu1 %v2847_v5  ;;  %v2892_v5 = vcombine.low %v72_v39, %v80_v40 }
  0xe3   :  { %v3183_v14 = vpop.f32.mrf.mxu0  ;;  %2425 = vmatmul.mubr.bf16.vlgmr.msra.gmra.mxu0 %v2844_v10 }
  0xe4   :  { %v3247_v15 = vpop.f32.mrf.mxu1  ;;  %2522 = vmatmul.mubr.bf16.vlgmr.msra.gmra.mxu1 %v2846_v11  ;;  %2432 = vmatprep.mubr.bf16.mxu0 %v2861_v12  ;;  %v2911_v11 = vcombine.high %v89_v1, %v97_v2 }
  0xe5   :  { %v3184_v16 = vpop.f32.mrf.mxu0  ;;  %2529 = vmatprep.mubr.bf16.mxu1 %v2863_v13 }
  0xe6   :  { %v3185_v19 = vadd.f32 %v3184_v16, %v3183_v14  ;;  %v3248_v20 = vpop.f32.mrf.mxu1 }
  0xe7   :  { %v3249_v23 = vadd.f32 %v3248_v20, %v3247_v15  ;;  %v3186_v24 = vpop.f32.mrf.mxu0  ;;  %v112_v20 = vld [vmem:[%s4886_s0 + $0x2f0] sm:$0xff] }
  0xe8   :  { %v3250_v26 = vpop.f32.mrf.mxu1 }
  0xe9   :  { %v4542_v29 = vadd.f32 %v3249_v23, %v3185_v19  ;;  %v3187_v30 = vpop.f32.mrf.mxu0  ;;  %v104_v19 = vld [vmem:[%s4886_s0 + $0x2b0] sm:$0xff]  ;;  %v105_v23 = vld [vmem:[%s4886_s0 + $0x2b8] sm:$0xff] }
  0xea   :  { %v3188_v32 = vadd.f32 %v3187_v30, %v3186_v24  ;;  %v3251_v33 = vpop.f32.mrf.mxu1  ;;  %v113_v24 = vld [vmem:[%s4886_s0 + $0x2f8] sm:$0xff]  ;;  %v2910_v30 = vcombine.low %v89_v1, %v97_v2 }
  0xeb   :  { %v3252_v34 = vadd.f32 %v3251_v33, %v3250_v26  ;;  %v3189_v35 = vpop.f32.mrf.mxu0  ;;  %2433 = vmatmul.mubr.bf16.gmra.mxu0 %v2860_v25 }
  0xec   :  { %v3253_v36 = vpop.f32.mrf.mxu1  ;;  %2530 = vmatmul.mubr.bf16.gmra.mxu1 %v2862_v27  ;;  %2440 = vmatprep.mubr.bf16.mxu0 %v2877_v28  ;;  %v2908_v27 = vcombine.low %v88_v61, %v96_v62 }
  0xed   :  { %v4544_v37 = vadd.f32 %v3252_v34, %v3188_v32  ;;  %v3190_v38 = vpop.f32.mrf.mxu0  ;;  %2537 = vmatprep.mubr.bf16.mxu1 %v2879_v31  ;;  %v2925_v31 = vcombine.high %v104_v19, %v112_v20  ;;  %v2927_v34 = vcombine.high %v105_v23, %v113_v24 }
  0xee   :  { %v3191_v41 = vadd.f32 %v3190_v38, %v3189_v35  ;;  %v3254_v42 = vpop.f32.mrf.mxu1 }
  0xef   :  { %v3255_v45 = vadd.f32 %v3254_v42, %v3253_v36  ;;  %v3192_v46 = vpop.f32.mrf.mxu0 }
  0xf0   :  { %v3256_v48 = vpop.f32.mrf.mxu1 }
  0xf1   :  { %v4558_v51 = vadd.f32 %v3255_v45, %v3191_v41  ;;  %v3193_v52 = vpop.f32.mrf.mxu0 }
  0xf2   :  { %v3194_v54 = vadd.f32 %v3193_v52, %v3192_v46  ;;  %v3257_v55 = vpop.f32.mrf.mxu1  ;;  %v2924_v52 = vcombine.low %v104_v19, %v112_v20 }
  0xf3   :  { %v3258_v56 = vadd.f32 %v3257_v55, %v3256_v48  ;;  %v3195_v57 = vpop.f32.mrf.mxu0  ;;  %2441 = vmatmul.mubr.bf16.gmra.mxu0 %v2876_v47  ;;  %v121_v47 = vld [vmem:[%s4886_s0 + $0x338] sm:$0xff]  ;;  %v2941_v55 = vcombine.high %v120_v43, %v128_v44 }
  0xf4   :  { %v3259_v58 = vpop.f32.mrf.mxu1  ;;  %2538 = vmatmul.mubr.bf16.gmra.mxu1 %v2878_v49  ;;  %2448 = vmatprep.mubr.bf16.mxu0 %v2893_v50  ;;  %v129_v48 = vld [vmem:[%s4886_s0 + $0x378] sm:$0xff] }
  0xf5   :  { %v4560_v59 = vadd.f32 %v3258_v56, %v3194_v54  ;;  %v3196_v60 = vpop.f32.mrf.mxu0  ;;  %2545 = vmatprep.mubr.bf16.mxu1 %v2895_v53  ;;  %v2926_v54 = vcombine.low %v105_v23, %v113_v24 }
  0xf6   :  { %v3197_v63 = vadd.f32 %v3196_v60, %v3195_v57  ;;  %v3260_v0 = vpop.f32.mrf.mxu1 }
  0xf7   :  { %v3261_v3 = vadd.f32 %v3260_v0, %v3259_v58  ;;  %v3198_v4 = vpop.f32.mrf.mxu0  ;;  %v2943_v58 = vcombine.high %v121_v47, %v129_v48 }
  0xf8   :  { %v3262_v6 = vpop.f32.mrf.mxu1 }
  0xf9   :  { %v4574_v9 = vadd.f32 %v3261_v3, %v3197_v63  ;;  %v3199_v10 = vpop.f32.mrf.mxu0  ;;  %v136_v3 = vld [vmem:[%s4886_s0 + $0x3b0] sm:$0xff] }
  0xfa   :  { %v3200_v12 = vadd.f32 %v3199_v10, %v3198_v4  ;;  %v3263_v13 = vpop.f32.mrf.mxu1  ;;  %v144_v4 = vld [vmem:[%s4886_s0 + $0x3f0] sm:$0xff] }
  0xfb   :  { %v3264_v14 = vadd.f32 %v3263_v13, %v3262_v6  ;;  %v3201_v15 = vpop.f32.mrf.mxu0  ;;  %2449 = vmatmul.mubr.bf16.gmra.mxu0 %v2892_v5 }
  0xfc   :  { %v3265_v16 = vpop.f32.mrf.mxu1  ;;  %2546 = vmatmul.mubr.bf16.gmra.mxu1 %v2894_v7  ;;  %2456 = vmatprep.mubr.bf16.mxu0 %v2909_v8  ;;  %v137_v7 = vld [vmem:[%s4886_s0 + $0x3b8] sm:$0xff] }
  0xfd   :  { %v4576_v17 = vadd.f32 %v3264_v14, %v3200_v12  ;;  %v3202_v18 = vpop.f32.mrf.mxu0  ;;  %2553 = vmatprep.mubr.bf16.mxu1 %v2911_v11  ;;  %v145_v8 = vld [vmem:[%s4886_s0 + $0x3f8] sm:$0xff]  ;;  %v2940_v12 = vcombine.low %v120_v43, %v128_v44  ;;  %v2942_v14 = vcombine.low %v121_v47, %v129_v48 }
  0xfe   :  { %v3203_v21 = vadd.f32 %v3202_v18, %v3201_v15  ;;  %v3266_v22 = vpop.f32.mrf.mxu1  ;;  %v2957_v15 = vcombine.high %v136_v3, %v144_v4  ;;  %v2959_v19 = vcombine.high %v137_v7, %v145_v8 }
  0xff   :  { %v3267_v25 = vadd.f32 %v3266_v22, %v3265_v16  ;;  %v3204_v26 = vpop.f32.mrf.mxu0 }
 0x100   :  { %v3268_v28 = vpop.f32.mrf.mxu1 }
 0x101   :  { %v4590_v32 = vadd.f32 %v3267_v25, %v3203_v21  ;;  %v3205_v33 = vpop.f32.mrf.mxu0 }
 0x102   :  { %v3206_v35 = vadd.f32 %v3205_v33, %v3204_v26  ;;  %v3269_v36 = vpop.f32.mrf.mxu1  ;;  %v2956_v33 = vcombine.low %v136_v3, %v144_v4 }
 0x103   :  { %v3270_v38 = vadd.f32 %v3269_v36, %v3268_v28  ;;  %v3207_v39 = vpop.f32.mrf.mxu0  ;;  %2457 = vmatmul.mubr.bf16.gmra.mxu0 %v2908_v27 }
 0x104   :  { %v3271_v40 = vpop.f32.mrf.mxu1  ;;  %2554 = vmatmul.mubr.bf16.gmra.mxu1 %v2910_v30  ;;  %2464 = vmatprep.mubr.bf16.mxu0 %v2925_v31 }
 0x105   :  { %v4592_v41 = vadd.f32 %v3270_v38, %v3206_v35  ;;  %v3208_v42 = vpop.f32.mrf.mxu0  ;;  %2561 = vmatprep.mubr.bf16.mxu1 %v2927_v34  ;;  %v2958_v35 = vcombine.low %v137_v7, %v145_v8 }
 0x106   :  { %v3209_v45 = vadd.f32 %v3208_v42, %v3207_v39  ;;  %v3272_v46 = vpop.f32.mrf.mxu1 }
 0x107   :  { %v3273_v49 = vadd.f32 %v3272_v46, %v3271_v40  ;;  %v3210_v50 = vpop.f32.mrf.mxu0 }
 0x108   :  { %v3274_v53 = vpop.f32.mrf.mxu1 }
 0x109   :  { %v4606_v56 = vadd.f32 %v3273_v49, %v3209_v45  ;;  %v3211_v57 = vpop.f32.mrf.mxu0 }
 0x10a   :  { %v3212_v60 = vadd.f32 %v3211_v57, %v3210_v50  ;;  %v3275_v61 = vpop.f32.mrf.mxu1 }
 0x10b   :  { %v3276_v62 = vadd.f32 %v3275_v61, %v3274_v53  ;;  %v3213_v63 = vpop.f32.mrf.mxu0  ;;  %2465 = vmatmul.mubr.bf16.gmra.mxu0 %v2924_v52 }
 0x10c   :  { %v3277_v0 = vpop.f32.mrf.mxu1  ;;  %2562 = vmatmul.mubr.bf16.gmra.mxu1 %v2926_v54  ;;  %2472 = vmatprep.mubr.bf16.mxu0 %v2941_v55 }
 0x10d   :  { %v4608_v1 = vadd.f32 %v3276_v62, %v3212_v60  ;;  %v3214_v2 = vpop.f32.mrf.mxu0  ;;  %2569 = vmatprep.mubr.bf16.mxu1 %v2943_v58 }
 0x10e   :  { %v3215_v5 = vadd.f32 %v3214_v2, %v3213_v63  ;;  %v3278_v6 = vpop.f32.mrf.mxu1 }
 0x10f   :  { %v3279_v10 = vadd.f32 %v3278_v6, %v3277_v0  ;;  %v3216_v11 = vpop.f32.mrf.mxu0 }
 0x110   :  { %v3280_v13 = vpop.f32.mrf.mxu1 }
 0x111   :  { %v4622_v16 = vadd.f32 %v3279_v10, %v3215_v5  ;;  %v3217_v18 = vpop.f32.mrf.mxu0 }
 0x112   :  { %v3218_v20 = vadd.f32 %v3217_v18, %v3216_v11  ;;  %v3281_v21 = vpop.f32.mrf.mxu1 }
 0x113   :  { %v3282_v22 = vadd.f32 %v3281_v21, %v3280_v13  ;;  %v3219_v23 = vpop.f32.mrf.mxu0  ;;  %2473 = vmatmul.mubr.bf16.gmra.mxu0 %v2940_v12 }
 0x114   :  { %v3283_v24 = vpop.f32.mrf.mxu1  ;;  %2570 = vmatmul.mubr.bf16.gmra.mxu1 %v2942_v14  ;;  %2480 = vmatprep.mubr.bf16.mxu0 %v2957_v15 }
 0x115   :  { %v4624_v25 = vadd.f32 %v3282_v22, %v3218_v20  ;;  %v3220_v26 = vpop.f32.mrf.mxu0  ;;  %2577 = vmatprep.mubr.bf16.mxu1 %v2959_v19 }
 0x116   :  { %v3221_v27 = vadd.f32 %v3220_v26, %v3219_v23  ;;  %v3284_v28 = vpop.f32.mrf.mxu1 }
 0x117   :  { %v3285_v30 = vadd.f32 %v3284_v28, %v3283_v24  ;;  %v3222_v31 = vpop.f32.mrf.mxu0 }
 0x118   :  { %v3286_v34 = vpop.f32.mrf.mxu1 }
 0x119   :  { %v4626_v36 = vadd.f32 %v3285_v30, %v3221_v27  ;;  %v3223_v38 = vpop.f32.mrf.mxu0 }
 0x11a   :  { %v3224_v39 = vadd.f32 %v3223_v38, %v3222_v31  ;;  %v3287_v40 = vpop.f32.mrf.mxu1 }
 0x11b   :  { %v3288_v42 = vadd.f32 %v3287_v40, %v3286_v34  ;;  %v3225_v43 = vpop.f32.mrf.mxu0  ;;  %2481 = vmatmul.mubr.bf16.gmra.mxu0 %v2956_v33 }
 0x11c   :  { %v3289_v44 = vpop.f32.mrf.mxu1  ;;  %2578 = vmatmul.mubr.bf16.gmra.mxu1 %v2958_v35 }
 0x11d   :  { %v4628_v45 = vadd.f32 %v3288_v42, %v3224_v39  ;;  %v3226_v46 = vpop.f32.mrf.mxu0 }
 0x11e   :  { %v3227_v47 = vadd.f32 %v3226_v46, %v3225_v43  ;;  %v3290_v48 = vpop.f32.mrf.mxu1 }
 0x11f   :  { %v3291_v49 = vadd.f32 %v3290_v48, %v3289_v44  ;;  %v3228_v50 = vpop.f32.mrf.mxu0 }
 0x120   :  { %v3292_v52 = vpop.f32.mrf.mxu1 }
 0x121   :  { %v4630_v53 = vadd.f32 %v3291_v49, %v3227_v47  ;;  %v3229_v54 = vpop.f32.mrf.mxu0 }
 0x122   :  { %v3230_v55 = vadd.f32 %v3229_v54, %v3228_v50  ;;  %v3293_v57 = vpop.f32.mrf.mxu1 }
 0x123   :  { %v3294_v58 = vadd.f32 %v3293_v57, %v3292_v52  ;;  %v3311_v60 = vpop.f32.mrf.mxu0 }
 0x124   :  { %v3375_v61 = vpop.f32.mrf.mxu1 }
 0x125   :  { %v4632_v62 = vadd.f32 %v3294_v58, %v3230_v55  ;;  %v3312_v63 = vpop.f32.mrf.mxu0 }
 0x126   :  { %v3313_v0 = vadd.f32 %v3312_v63, %v3311_v60  ;;  %v3376_v2 = vpop.f32.mrf.mxu1 }
 0x127   :  { %v3377_v3 = vadd.f32 %v3376_v2, %v3375_v61  ;;  %v3314_v4 = vpop.f32.mrf.mxu0 }
 0x128   :  { %v2039_v5 = vadd.f32 %v3313_v0, %v4542_v29  ;;  %v3378_v6 = vpop.f32.mrf.mxu1 }
 0x129   :  { %v3315_v7 = vpop.f32.mrf.mxu0 }
 0x12a   :  { %v4635_v8 = vadd.f32 %v3377_v3, %v2039_v5  ;;  %v3316_v10 = vadd.f32 %v3315_v7, %v3314_v4  ;;  %v3379_v11 = vpop.f32.mrf.mxu1 }
 0x12b   :  { %v3380_v12 = vadd.f32 %v3379_v11, %v3378_v6  ;;  %v3317_v13 = vpop.f32.mrf.mxu0 }
 0x12c   :  { %v2042_v14 = vadd.f32 %v3316_v10, %v4544_v37  ;;  %v3381_v15 = vpop.f32.mrf.mxu1 }
 0x12d   :  { %v3318_v18 = vpop.f32.mrf.mxu0 }
 0x12e   :  { %v4638_v19 = vadd.f32 %v3380_v12, %v2042_v14  ;;  %v3319_v20 = vadd.f32 %v3318_v18, %v3317_v13  ;;  %v3382_v21 = vpop.f32.mrf.mxu1 }
 0x12f   :  { %v3383_v22 = vadd.f32 %v3382_v21, %v3381_v15  ;;  %v3320_v23 = vpop.f32.mrf.mxu0 }
 0x130   :  { %v2047_v29 = vadd.f32 %v3319_v20, %v4558_v51  ;;  %v3384_v24 = vpop.f32.mrf.mxu1 }
 0x131   :  { %v3321_v26 = vpop.f32.mrf.mxu0 }
 0x132   :  { %v4641_v27 = vadd.f32 %v3383_v22, %v2047_v29  ;;  %v3322_v28 = vadd.f32 %v3321_v26, %v3320_v23  ;;  %v3385_v30 = vpop.f32.mrf.mxu1 }
 0x133   :  { %v3386_v31 = vadd.f32 %v3385_v30, %v3384_v24  ;;  %v3323_v33 = vpop.f32.mrf.mxu0 }
 0x134   :  { %v2050_v37 = vadd.f32 %v3322_v28, %v4560_v59  ;;  %v3387_v34 = vpop.f32.mrf.mxu1 }
 0x135   :  { %v3324_v35 = vpop.f32.mrf.mxu0 }
 0x136   :  { %v4644_v38 = vadd.f32 %v3386_v31, %v2050_v37  ;;  %v3325_v39 = vadd.f32 %v3324_v35, %v3323_v33  ;;  %v3388_v40 = vpop.f32.mrf.mxu1 }
 0x137   :  { %v3389_v42 = vadd.f32 %v3388_v40, %v3387_v34  ;;  %v3326_v43 = vpop.f32.mrf.mxu0 }
 0x138   :  { %v2055_v51 = vadd.f32 %v3325_v39, %v4574_v9  ;;  %v3390_v44 = vpop.f32.mrf.mxu1 }
 0x139   :  { %v3327_v46 = vpop.f32.mrf.mxu0 }
 0x13a   :  { %v4647_v47 = vadd.f32 %v3389_v42, %v2055_v51  ;;  %v3328_v48 = vadd.f32 %v3327_v46, %v3326_v43  ;;  %v3391_v49 = vpop.f32.mrf.mxu1 }
 0x13b   :  { %v3392_v50 = vadd.f32 %v3391_v49, %v3390_v44  ;;  %v3329_v52 = vpop.f32.mrf.mxu0 }
 0x13c   :  { %v2058_v59 = vadd.f32 %v3328_v48, %v4576_v17  ;;  %v3393_v54 = vpop.f32.mrf.mxu1 }
 0x13d   :  { %v3330_v55 = vpop.f32.mrf.mxu0 }
 0x13e   :  { %v4650_v57 = vadd.f32 %v3392_v50, %v2058_v59  ;;  %v3331_v58 = vadd.f32 %v3330_v55, %v3329_v52  ;;  %v3394_v60 = vpop.f32.mrf.mxu1 }
 0x13f   :  { %v3395_v61 = vadd.f32 %v3394_v60, %v3393_v54  ;;  %v3332_v63 = vpop.f32.mrf.mxu0 }
 0x140   :  { %v2063_v9 = vadd.f32 %v3331_v58, %v4590_v32  ;;  %v3396_v0 = vpop.f32.mrf.mxu1 }
 0x141   :  { %v3333_v2 = vpop.f32.mrf.mxu0 }
 0x142   :  { %v4653_v3 = vadd.f32 %v3395_v61, %v2063_v9  ;;  %v3334_v4 = vadd.f32 %v3333_v2, %v3332_v63  ;;  %v3397_v5 = vpop.f32.mrf.mxu1 }
 0x143   :  { %v3398_v6 = vadd.f32 %v3397_v5, %v3396_v0  ;;  %v3335_v7 = vpop.f32.mrf.mxu0 }
 0x144   :  { %v2066_v17 = vadd.f32 %v3334_v4, %v4592_v41  ;;  %v3399_v10 = vpop.f32.mrf.mxu1 }
 0x145   :  { %v3336_v11 = vpop.f32.mrf.mxu0 }
 0x146   :  { %v4656_v12 = vadd.f32 %v3398_v6, %v2066_v17  ;;  %v3337_v13 = vadd.f32 %v3336_v11, %v3335_v7  ;;  %v3400_v14 = vpop.f32.mrf.mxu1 }
 0x147   :  { %v3401_v15 = vadd.f32 %v3400_v14, %v3399_v10  ;;  %v3338_v18 = vpop.f32.mrf.mxu0 }
 0x148   :  { %v2071_v32 = vadd.f32 %v3337_v13, %v4606_v56  ;;  %v3402_v20 = vpop.f32.mrf.mxu1 }
 0x149   :  { %v3339_v21 = vpop.f32.mrf.mxu0 }
 0x14a   :  { %v4659_v22 = vadd.f32 %v3401_v15, %v2071_v32  ;;  %v3340_v23 = vadd.f32 %v3339_v21, %v3338_v18  ;;  %v3403_v29 = vpop.f32.mrf.mxu1 }
 0x14b   :  { %v3404_v24 = vadd.f32 %v3403_v29, %v3402_v20  ;;  %v3341_v26 = vpop.f32.mrf.mxu0 }
 0x14c   :  { %v2074_v41 = vadd.f32 %v3340_v23, %v4608_v1  ;;  %v3405_v28 = vpop.f32.mrf.mxu1 }
 0x14d   :  { %v3342_v30 = vpop.f32.mrf.mxu0 }
 0x14e   :  { %v4662_v31 = vadd.f32 %v3404_v24, %v2074_v41  ;;  %v3343_v33 = vadd.f32 %v3342_v30, %v3341_v26  ;;  %v3406_v37 = vpop.f32.mrf.mxu1 }
 0x14f   :  { %v3407_v34 = vadd.f32 %v3406_v37, %v3405_v28  ;;  %v3344_v35 = vpop.f32.mrf.mxu0 }
 0x150   :  { %v2079_v56 = vadd.f32 %v3343_v33, %v4622_v16  ;;  %v3408_v39 = vpop.f32.mrf.mxu1 }
 0x151   :  { %v3345_v40 = vpop.f32.mrf.mxu0 }
 0x152   :  { %v4665_v42 = vadd.f32 %v3407_v34, %v2079_v56  ;;  %v3346_v43 = vadd.f32 %v3345_v40, %v3344_v35  ;;  %v3409_v51 = vpop.f32.mrf.mxu1 }
 0x153   :  { %v3410_v44 = vadd.f32 %v3409_v51, %v3408_v39  ;;  %v3347_v46 = vpop.f32.mrf.mxu0 }
 0x154   :  { %v2082_v1 = vadd.f32 %v3346_v43, %v4624_v25  ;;  %v3411_v48 = vpop.f32.mrf.mxu1 }
 0x155   :  { %v3348_v49 = vpop.f32.mrf.mxu0 }
 0x156   :  { %v4668_v50 = vadd.f32 %v3410_v44, %v2082_v1  ;;  %v3349_v52 = vadd.f32 %v3348_v49, %v3347_v46  ;;  %v3412_v59 = vpop.f32.mrf.mxu1 }
 0x157   :  { %v3413_v54 = vadd.f32 %v3412_v59, %v3411_v48  ;;  %v3350_v55 = vpop.f32.mrf.mxu0 }
 0x158   :  { %v2087_v16 = vadd.f32 %v3349_v52, %v4626_v36  ;;  %v3414_v58 = vpop.f32.mrf.mxu1 }
 0x159   :  { %v3351_v60 = vpop.f32.mrf.mxu0 }
 0x15a   :  { %v4671_v61 = vadd.f32 %v3413_v54, %v2087_v16  ;;  %v3352_v63 = vadd.f32 %v3351_v60, %v3350_v55  ;;  %v3415_v9 = vpop.f32.mrf.mxu1 }
 0x15b   :  { %v3416_v0 = vadd.f32 %v3415_v9, %v3414_v58  ;;  %v3353_v2 = vpop.f32.mrf.mxu0 }
 0x15c   :  { %v2090_v25 = vadd.f32 %v3352_v63, %v4628_v45  ;;  %v3417_v4 = vpop.f32.mrf.mxu1 }
 0x15d   :  { %v3354_v5 = vpop.f32.mrf.mxu0 }
 0x15e   :  { %v4674_v6 = vadd.f32 %v3416_v0, %v2090_v25  ;;  %v3355_v7 = vadd.f32 %v3354_v5, %v3353_v2  ;;  %v3418_v17 = vpop.f32.mrf.mxu1 }
 0x15f   :  { %v3419_v10 = vadd.f32 %v3418_v17, %v3417_v4  ;;  %v3356_v11 = vpop.f32.mrf.mxu0 }
 0x160   :  { %v2095_v36 = vadd.f32 %v3355_v7, %v4630_v53  ;;  %v3420_v13 = vpop.f32.mrf.mxu1 }
 0x161   :  { %v3357_v14 = vpop.f32.mrf.mxu0 }
 0x162   :  { %v4677_v15 = vadd.f32 %v3419_v10, %v2095_v36  ;;  %v3358_v18 = vadd.f32 %v3357_v14, %v3356_v11  ;;  %v3421_v32 = vpop.f32.mrf.mxu1 }
 0x163   :  { %v3422_v20 = vadd.f32 %v3421_v32, %v3420_v13  ;;  %v3439_v21 = vpop.f32.mrf.mxu0 }
 0x164   :  { %v2098_v45 = vadd.f32 %v3358_v18, %v4632_v62  ;;  %v3503_v23 = vpop.f32.mrf.mxu1 }
 0x165   :  { %v3440_v29 = vpop.f32.mrf.mxu0 }
 0x166   :  { %v4680_v24 = vadd.f32 %v3422_v20, %v2098_v45  ;;  %v3441_v26 = vadd.f32 %v3440_v29, %v3439_v21  ;;  %v3504_v41 = vpop.f32.mrf.mxu1 }
 0x167   :  { %v3505_v28 = vadd.f32 %v3504_v41, %v3503_v23  ;;  %v3442_v30 = vpop.f32.mrf.mxu0 }
 0x168   :  { %v2233_v53 = vadd.f32 %v3441_v26, %v4635_v8  ;;  %v3506_v33 = vpop.f32.mrf.mxu1 }
 0x169   :  { %v3443_v37 = vpop.f32.mrf.mxu0 }
 0x16a   :  { %v4683_v34 = vadd.f32 %v3505_v28, %v2233_v53  ;;  %v3444_v35 = vadd.f32 %v3443_v37, %v3442_v30  ;;  %v3507_v56 = vpop.f32.mrf.mxu1 }
 0x16b   :  { %v3508_v39 = vadd.f32 %v3507_v56, %v3506_v33  ;;  %v3445_v40 = vpop.f32.mrf.mxu0 }
 0x16c   :  { %v2236_v62 = vadd.f32 %v3444_v35, %v4638_v19  ;;  %v3509_v43 = vpop.f32.mrf.mxu1 }
 0x16d   :  { %v3446_v51 = vpop.f32.mrf.mxu0 }
 0x16e   :  { %v4686_v44 = vadd.f32 %v3508_v39, %v2236_v62  ;;  %v3447_v46 = vadd.f32 %v3446_v51, %v3445_v40  ;;  %v3510_v1 = vpop.f32.mrf.mxu1 }
 0x16f   :  { %v3511_v48 = vadd.f32 %v3510_v1, %v3509_v43  ;;  %v3448_v49 = vpop.f32.mrf.mxu0 }
 0x170   :  { %v2241_v8 = vadd.f32 %v3447_v46, %v4641_v27  ;;  %v3512_v52 = vpop.f32.mrf.mxu1 }
 0x171   :  { %v3449_v59 = vpop.f32.mrf.mxu0 }
 0x172   :  { %v4689_v54 = vadd.f32 %v3511_v48, %v2241_v8  ;;  %v3450_v55 = vadd.f32 %v3449_v59, %v3448_v49  ;;  %v3513_v16 = vpop.f32.mrf.mxu1 }
 0x173   :  { %v3514_v58 = vadd.f32 %v3513_v16, %v3512_v52  ;;  %v3451_v60 = vpop.f32.mrf.mxu0 }
 0x174   :  { %v2244_v19 = vadd.f32 %v3450_v55, %v4644_v38  ;;  %v3515_v63 = vpop.f32.mrf.mxu1 }
 0x175   :  { %v3452_v9 = vpop.f32.mrf.mxu0 }
 0x176   :  { %v4692_v0 = vadd.f32 %v3514_v58, %v2244_v19  ;;  %v3453_v2 = vadd.f32 %v3452_v9, %v3451_v60  ;;  %v3516_v25 = vpop.f32.mrf.mxu1 }
 0x177   :  { %v3517_v4 = vadd.f32 %v3516_v25, %v3515_v63  ;;  %v3454_v5 = vpop.f32.mrf.mxu0 }
 0x178   :  { %v2249_v27 = vadd.f32 %v3453_v2, %v4647_v47  ;;  %v3518_v7 = vpop.f32.mrf.mxu1 }
 0x179   :  { %v3455_v17 = vpop.f32.mrf.mxu0 }
 0x17a   :  { %v4695_v10 = vadd.f32 %v3517_v4, %v2249_v27  ;;  %v3456_v11 = vadd.f32 %v3455_v17, %v3454_v5  ;;  %v3519_v36 = vpop.f32.mrf.mxu1 }
 0x17b   :  { %v3520_v13 = vadd.f32 %v3519_v36, %v3518_v7  ;;  %v3457_v14 = vpop.f32.mrf.mxu0 }
 0x17c   :  { %v2252_v38 = vadd.f32 %v3456_v11, %v4650_v57  ;;  %v3521_v18 = vpop.f32.mrf.mxu1 }
 0x17d   :  { %v3458_v32 = vpop.f32.mrf.mxu0 }
 0x17e   :  { %v4698_v20 = vadd.f32 %v3520_v13, %v2252_v38  ;;  %v3459_v21 = vadd.f32 %v3458_v32, %v3457_v14  ;;  %v3522_v45 = vpop.f32.mrf.mxu1 }
 0x17f   :  { %v3523_v23 = vadd.f32 %v3522_v45, %v3521_v18  ;;  %v3460_v29 = vpop.f32.mrf.mxu0 }
 0x180   :  { %v2257_v47 = vadd.f32 %v3459_v21, %v4653_v3  ;;  %v3524_v26 = vpop.f32.mrf.mxu1 }
 0x181   :  { %v3461_v41 = vpop.f32.mrf.mxu0 }
 0x182   :  { %v4701_v28 = vadd.f32 %v3523_v23, %v2257_v47  ;;  %v3462_v30 = vadd.f32 %v3461_v41, %v3460_v29  ;;  %v3525_v53 = vpop.f32.mrf.mxu1 }
 0x183   :  { %v3526_v33 = vadd.f32 %v3525_v53, %v3524_v26  ;;  %v3463_v37 = vpop.f32.mrf.mxu0 }
 0x184   :  { %v2260_v57 = vadd.f32 %v3462_v30, %v4656_v12  ;;  %v3527_v35 = vpop.f32.mrf.mxu1 }
 0x185   :  { %v3464_v56 = vpop.f32.mrf.mxu0 }
 0x186   :  { %v4704_v39 = vadd.f32 %v3526_v33, %v2260_v57  ;;  %v3465_v40 = vadd.f32 %v3464_v56, %v3463_v37  ;;  %v3528_v62 = vpop.f32.mrf.mxu1 }
 0x187   :  { %v3529_v43 = vadd.f32 %v3528_v62, %v3527_v35  ;;  %v3466_v51 = vpop.f32.mrf.mxu0 }
 0x188   :  { %v2265_v3 = vadd.f32 %v3465_v40, %v4659_v22  ;;  %v3530_v46 = vpop.f32.mrf.mxu1 }
 0x189   :  { %v3467_v1 = vpop.f32.mrf.mxu0 }
 0x18a   :  { %v4707_v48 = vadd.f32 %v3529_v43, %v2265_v3  ;;  %v3468_v49 = vadd.f32 %v3467_v1, %v3466_v51  ;;  %v3531_v8 = vpop.f32.mrf.mxu1 }
 0x18b   :  { %v3532_v52 = vadd.f32 %v3531_v8, %v3530_v46  ;;  %v3469_v59 = vpop.f32.mrf.mxu0 }
 0x18c   :  { %v2268_v12 = vadd.f32 %v3468_v49, %v4662_v31  ;;  %v3533_v55 = vpop.f32.mrf.mxu1 }
 0x18d   :  { %v3470_v16 = vpop.f32.mrf.mxu0 }
 0x18e   :  { %v4710_v58 = vadd.f32 %v3532_v52, %v2268_v12  ;;  %v3471_v60 = vadd.f32 %v3470_v16, %v3469_v59  ;;  %v3534_v19 = vpop.f32.mrf.mxu1 }
 0x18f   :  { %v3535_v63 = vadd.f32 %v3534_v19, %v3533_v55  ;;  %v3472_v9 = vpop.f32.mrf.mxu0 }
 0x190   :  { %v2273_v22 = vadd.f32 %v3471_v60, %v4665_v42  ;;  %v3536_v2 = vpop.f32.mrf.mxu1 }
 0x191   :  { %v3473_v25 = vpop.f32.mrf.mxu0 }
 0x192   :  { %v4713_v4 = vadd.f32 %v3535_v63, %v2273_v22  ;;  %v3474_v5 = vadd.f32 %v3473_v25, %v3472_v9  ;;  %v3537_v27 = vpop.f32.mrf.mxu1 }
 0x193   :  { %v3538_v7 = vadd.f32 %v3537_v27, %v3536_v2  ;;  %v3475_v17 = vpop.f32.mrf.mxu0 }
 0x194   :  { %v2276_v31 = vadd.f32 %v3474_v5, %v4668_v50  ;;  %v3539_v11 = vpop.f32.mrf.mxu1 }
 0x195   :  { %v3476_v36 = vpop.f32.mrf.mxu0 }
 0x196   :  { %v4716_v13 = vadd.f32 %v3538_v7, %v2276_v31  ;;  %v3477_v14 = vadd.f32 %v3476_v36, %v3475_v17  ;;  %v3540_v38 = vpop.f32.mrf.mxu1 }
 0x197   :  { %v3541_v18 = vadd.f32 %v3540_v38, %v3539_v11  ;;  %v3478_v32 = vpop.f32.mrf.mxu0 }
 0x198   :  { %v2281_v42 = vadd.f32 %v3477_v14, %v4671_v61  ;;  %v3542_v21 = vpop.f32.mrf.mxu1 }
 0x199   :  { %v3479_v45 = vpop.f32.mrf.mxu0 }
 0x19a   :  { %v4719_v23 = vadd.f32 %v3541_v18, %v2281_v42  ;;  %v3480_v29 = vadd.f32 %v3479_v45, %v3478_v32  ;;  %v3543_v47 = vpop.f32.mrf.mxu1 }
 0x19b   :  { %v3544_v26 = vadd.f32 %v3543_v47, %v3542_v21  ;;  %v3481_v41 = vpop.f32.mrf.mxu0 }
 0x19c   :  { %v2284_v50 = vadd.f32 %v3480_v29, %v4674_v6  ;;  %v3545_v30 = vpop.f32.mrf.mxu1 }
 0x19d   :  { %v3482_v53 = vpop.f32.mrf.mxu0 }
 0x19e   :  { %v4722_v33 = vadd.f32 %v3544_v26, %v2284_v50  ;;  %v3483_v37 = vadd.f32 %v3482_v53, %v3481_v41  ;;  %v3546_v57 = vpop.f32.mrf.mxu1 }
 0x19f   :  { %v4724_v35 = vpop.f32.mrf.mxu0  ;;  %v3547_v56 = vadd.f32 %v3546_v57, %v3545_v30 }
 0x1a0   :  { %v2289_v61 = vadd.f32 %v3483_v37, %v4677_v15  ;;  %v4727_v40 = vpop.f32.mrf.mxu1 }
 0x1a1   :  { %v4729_v62 = vpop.f32.mrf.mxu0 }
 0x1a2   :  { %v4731_v43 = vadd.f32 %v3547_v56, %v2289_v61  ;;  %v4733_v51 = vpop.f32.mrf.mxu1 }
 0x1a3   :  { %v3567_v6 = vpop.f32.mrf.mxu0 }
 0x1a4   :  { %v3631_v3 = vpop.f32.mrf.mxu1 }
 0x1a5   :  { %v3568_v46 = vpop.f32.mrf.mxu0 }
 0x1a6   :  { %v3632_v1 = vpop.f32.mrf.mxu1  ;;  %v3569_v19 = vadd.f32 %v3568_v46, %v3567_v6 }
 0x1a7   :  { %v3570_v49 = vpop.f32.mrf.mxu0  ;;  %v3633_v14 = vadd.f32 %v3632_v1, %v3631_v3 }
 0x1a8   :  { %v3634_v8 = vpop.f32.mrf.mxu1  ;;  %v2427_v7 = vadd.f32 %v3569_v19, %v4683_v34 }
 0x1a9   :  { %v3571_v52 = vpop.f32.mrf.mxu0 }
 0x1aa   :  { %v3635_v59 = vpop.f32.mrf.mxu1  ;;  %v3572_v15 = vadd.f32 %v3571_v52, %v3570_v49 }
 0x1ab   :  { %v3573_v12 = vpop.f32.mrf.mxu0  ;;  %v3636_v17 = vadd.f32 %v3635_v59, %v3634_v8 }
 0x1ac   :  { %v3637_v55 = vpop.f32.mrf.mxu1  ;;  %v2430_v2 = vadd.f32 %v3572_v15, %v4686_v44  ;;  %v4741_v44 = vadd.f32 %v3633_v14, %v2427_v7 }
 0x1ad   :  { %v3574_v16 = vpop.f32.mrf.mxu0 }
 0x1ae   :  { %v3638_v60 = vpop.f32.mrf.mxu1  ;;  %v3575_v63 = vadd.f32 %v3574_v16, %v3573_v12  ;;  %v4738_v38 = vadd.f32 %v3636_v17, %v2430_v2  ;;  %v2607_v57 = vmul.f32 %v4741_v44, %v4741_v44 }
 0x1af   :  { %v3576_v9 = vpop.f32.mrf.mxu0  ;;  %v3639_v18 = vadd.f32 %v3638_v60, %v3637_v55 }
 0x1b0   :  { %v3640_v22 = vpop.f32.mrf.mxu1  ;;  %v2435_v31 = vadd.f32 %v3575_v63, %v4689_v54  ;;  %v2608_v41 = vmul.f32 %v4738_v38, %v4738_v38 }
 0x1b1   :  { %v3577_v25 = vpop.f32.mrf.mxu0 }
 0x1b2   :  { %v3578_v5 = vadd.f32 %v3577_v25, %v3576_v9  ;;  %v3641_v27 = vpop.f32.mrf.mxu1  ;;  %v4743_v29 = vadd.f32 %v3639_v18, %v2435_v31  ;;  %v2623_v49 = vadd.f32 %v2608_v41, %v2607_v57 }
 0x1b3   :  { %v3579_v11 = vpop.f32.mrf.mxu0  ;;  %v3642_v47 = vadd.f32 %v3641_v27, %v3640_v22 }
 0x1b4   :  { %v3643_v36 = vpop.f32.mrf.mxu1  ;;  %v2438_v32 = vadd.f32 %v3578_v5, %v4692_v0  ;;  %v2609_v61 = vmul.f32 %v4743_v29, %v4743_v29 }
 0x1b5   :  { %v3580_v42 = vpop.f32.mrf.mxu0 }
 0x1b6   :  { %v3581_v21 = vadd.f32 %v3580_v42, %v3579_v11  ;;  %v3644_v45 = vpop.f32.mrf.mxu1  ;;  %v4748_v50 = vadd.f32 %v3642_v47, %v2438_v32  ;;  %v2624_v16 = vadd.f32 %v2623_v49, %v2609_v61 }
 0x1b7   :  { %v3582_v34 = vpop.f32.mrf.mxu0  ;;  %v3645_v30 = vadd.f32 %v3644_v45, %v3643_v36 }
 0x1b8   :  { %v2443_v26 = vadd.f32 %v3581_v21, %v4695_v10  ;;  %v3646_v54 = vpop.f32.mrf.mxu1  ;;  %v2586_v10 = vadd.f32 %v4738_v38, %v4741_v44  ;;  %v2610_v8 = vmul.f32 %v4748_v50, %v4748_v50 }
 0x1b9   :  { %v3583_v53 = vpop.f32.mrf.mxu0 }
 0x1ba   :  { %v3584_v0 = vadd.f32 %v3583_v53, %v3582_v34  ;;  %v3647_v37 = vpop.f32.mrf.mxu1  ;;  %v4754_v56 = vadd.f32 %v3645_v30, %v2443_v26  ;;  %v2587_v59 = vadd.f32 %v2586_v10, %v4743_v29  ;;  %v2625_v2 = vadd.f32 %v2624_v16, %v2610_v8 }
 0x1bb   :  { %v3585_v6 = vpop.f32.mrf.mxu0  ;;  %v3648_v46 = vadd.f32 %v3647_v37, %v3646_v54 }
 0x1bc   :  { %v2446_v3 = vadd.f32 %v3584_v0, %v4698_v20  ;;  %v3649_v1 = vpop.f32.mrf.mxu1  ;;  %v2611_v60 = vmul.f32 %v4754_v56, %v4754_v56  ;;  %v2588_v20 = vadd.f32 %v2587_v59, %v4748_v50 }
 0x1bd   :  { %v3586_v52 = vpop.f32.mrf.mxu0 }
 0x1be   :  { %v4762_v12 = vadd.f32 %v3648_v46, %v2446_v3  ;;  %v3587_v55 = vadd.f32 %v3586_v52, %v3585_v6  ;;  %v3650_v15 = vpop.f32.mrf.mxu1  ;;  %v2589_v27 = vadd.f32 %v2588_v20, %v4754_v56  ;;  %v2626_v11 = vadd.f32 %v2625_v2, %v2611_v60 }
 0x1bf   :  { %v3588_v19 = vpop.f32.mrf.mxu0  ;;  %v3651_v9 = vadd.f32 %v3650_v15, %v3649_v1 }
 0x1c0   :  { %v2451_v63 = vadd.f32 %v3587_v55, %v4701_v28  ;;  %v3652_v22 = vpop.f32.mrf.mxu1  ;;  %v2612_v25 = vmul.f32 %v4762_v12, %v4762_v12  ;;  %v2590_v14 = vadd.f32 %v2589_v27, %v4762_v12 }
 0x1c1   :  { %v3589_v5 = vpop.f32.mrf.mxu0 }
 0x1c2   :  { %v4771_v7 = vadd.f32 %v3651_v9, %v2451_v63  ;;  %v3590_v17 = vadd.f32 %v3589_v5, %v3588_v19  ;;  %v3653_v31 = vpop.f32.mrf.mxu1  ;;  %v2627_v21 = vadd.f32 %v2626_v11, %v2612_v25 }
 0x1c3   :  { %v3591_v36 = vpop.f32.mrf.mxu0  ;;  %v3654_v32 = vadd.f32 %v3653_v31, %v3652_v22 }
 0x1c4   :  { %v2613_v28 = vmul.f32 %v4771_v7, %v4771_v7  ;;  %v2454_v18 = vadd.f32 %v3590_v17, %v4704_v39  ;;  %v3655_v42 = vpop.f32.mrf.mxu1  ;;  %v2591_v47 = vadd.f32 %v2590_v14, %v4771_v7 }
 0x1c5   :  { %v3592_v45 = vpop.f32.mrf.mxu0 }
 0x1c6   :  { %v4778_v34 = vadd.f32 %v3654_v32, %v2454_v18  ;;  %v3593_v26 = vadd.f32 %v3592_v45, %v3591_v36  ;;  %v3656_v54 = vpop.f32.mrf.mxu1  ;;  %v2628_v41 = vadd.f32 %v2627_v21, %v2613_v28 }
 0x1c7   :  { %v3594_v30 = vpop.f32.mrf.mxu0  ;;  %v3657_v39 = vadd.f32 %v3656_v54, %v3655_v42 }
 0x1c8   :  { %v2592_v53 = vadd.f32 %v2591_v47, %v4778_v34  ;;  %v2614_v0 = vmul.f32 %v4778_v34, %v4778_v34  ;;  %v2459_v37 = vadd.f32 %v3593_v26, %v4707_v48  ;;  %v3658_v57 = vpop.f32.mrf.mxu1 }
 0x1c9   :  { %v3595_v61 = vpop.f32.mrf.mxu0 }
 0x1ca   :  { %v2629_v6 = vadd.f32 %v2628_v41, %v2614_v0  ;;  %v4784_v10 = vadd.f32 %v3657_v39, %v2459_v37  ;;  %v3596_v3 = vadd.f32 %v3595_v61, %v3594_v30  ;;  %v3659_v46 = vpop.f32.mrf.mxu1 }
 0x1cb   :  { %v3597_v1 = vpop.f32.mrf.mxu0  ;;  %v3660_v59 = vadd.f32 %v3659_v46, %v3658_v57 }
 0x1cc   :  { %v2593_v49 = vadd.f32 %v2592_v53, %v4784_v10  ;;  %v2615_v8 = vmul.f32 %v4784_v10, %v4784_v10  ;;  %v2462_v52 = vadd.f32 %v3596_v3, %v4710_v58  ;;  %v3661_v55 = vpop.f32.mrf.mxu1 }
 0x1cd   :  { %v3598_v15 = vpop.f32.mrf.mxu0 }
 0x1ce   :  { %v2630_v48 = vadd.f32 %v2629_v6, %v2615_v8  ;;  %v4790_v16 = vadd.f32 %v3660_v59, %v2462_v52  ;;  %v3599_v60 = vadd.f32 %v3598_v15, %v3597_v1  ;;  %v3662_v19 = vpop.f32.mrf.mxu1 }
 0x1cf   :  { %v3600_v20 = vpop.f32.mrf.mxu0  ;;  %v3663_v2 = vadd.f32 %v3662_v19, %v3661_v55 }
 0x1d0   :  { %v2594_v63 = vadd.f32 %v2593_v49, %v4790_v16  ;;  %v2616_v9 = vmul.f32 %v4790_v16, %v4790_v16  ;;  %v2467_v22 = vadd.f32 %v3599_v60, %v4713_v4  ;;  %v3664_v25 = vpop.f32.mrf.mxu1 }
 0x1d1   :  { %v3601_v5 = vpop.f32.mrf.mxu0 }
 0x1d2   :  { %v2631_v58 = vadd.f32 %v2630_v48, %v2616_v9  ;;  %v4796_v27 = vadd.f32 %v3663_v2, %v2467_v22  ;;  %v3602_v17 = vadd.f32 %v3601_v5, %v3600_v20  ;;  %v3665_v31 = vpop.f32.mrf.mxu1  ;;  %v3550_v48 = vadd.f32 %v4733_v51, %v4727_v40 }
 0x1d3   :  { %v3603_v11 = vpop.f32.mrf.mxu0  ;;  %v3666_v18 = vadd.f32 %v3665_v31, %v3664_v25 }
 0x1d4   :  { %v2595_v36 = vadd.f32 %v2594_v63, %v4796_v27  ;;  %v2617_v14 = vmul.f32 %v4796_v27, %v4796_v27  ;;  %v2470_v28 = vadd.f32 %v3602_v17, %v4716_v13  ;;  %v3667_v32 = vpop.f32.mrf.mxu1  ;;  %v3486_v13 = vadd.f32 %v4729_v62, %v4724_v35 }
 0x1d5   :  { %v3604_v42 = vpop.f32.mrf.mxu0 }
 0x1d6   :  { %v2632_v4 = vadd.f32 %v2631_v58, %v2617_v14  ;;  %v4802_v21 = vadd.f32 %v3666_v18, %v2470_v28  ;;  %v3605_v45 = vadd.f32 %v3604_v42, %v3603_v11  ;;  %v3668_v47 = vpop.f32.mrf.mxu1  ;;  %v2292_v59 = vadd.f32 %v3486_v13, %v4680_v24 }
 0x1d7   :  { %v3606_v26 = vpop.f32.mrf.mxu0  ;;  %v3669_v53 = vadd.f32 %v3668_v47, %v3667_v32 }
 0x1d8   :  { %v2596_v54 = vadd.f32 %v2595_v36, %v4802_v21  ;;  %v2618_v41 = vmul.f32 %v4802_v21, %v4802_v21  ;;  %v2475_v30 = vadd.f32 %v3605_v45, %v4719_v23  ;;  %v3670_v0 = vpop.f32.mrf.mxu1  ;;  %v2389_v24 = vadd.f32 %v3550_v48, %v2292_v59  ;;  %v2653_v59 = vld [vmem:[%s4888_s3] sm:$0x1] }
 0x1d9   :  { %v3607_v37 = vpop.f32.mrf.mxu0 }
 0x1da   :  { %v2633_v39 = vadd.f32 %v2632_v4, %v2618_v41  ;;  %v4810_v57 = vadd.f32 %v3669_v53, %v2475_v30  ;;  %v3608_v61 = vadd.f32 %v3607_v37, %v3606_v26  ;;  %v3671_v6 = vpop.f32.mrf.mxu1 }
 0x1db   :  { %v3609_v3 = vpop.f32.mrf.mxu0  ;;  %v3672_v23 = vadd.f32 %v3671_v6, %v3670_v0 }
 0x1dc   :  { %v2597_v46 = vadd.f32 %v2596_v54, %v4810_v57  ;;  %v2619_v1 = vmul.f32 %v4810_v57, %v4810_v57  ;;  %v2478_v49 = vadd.f32 %v3608_v61, %v4722_v33  ;;  %v3673_v8 = vpop.f32.mrf.mxu1 }
 0x1dd   :  { %v3610_v52 = vpop.f32.mrf.mxu0 }
 0x1de   :  { %v2634_v55 = vadd.f32 %v2633_v39, %v2619_v1  ;;  %v4817_v35 = vadd.f32 %v3672_v23, %v2478_v49  ;;  %v3611_v62 = vadd.f32 %v3610_v52, %v3609_v3  ;;  %v3674_v15 = vpop.f32.mrf.mxu1  ;;  %v2649_v49 = vld [vmem:[%s4887_s2] sm:$0x1] }
 0x1df   :  { %v3612_v60 = vpop.f32.mrf.mxu0  ;;  %v3675_v63 = vadd.f32 %v3674_v15, %v3673_v8 }
 0x1e0   :  { %v2598_v19 = vadd.f32 %v2597_v46, %v4817_v35  ;;  %v2620_v20 = vmul.f32 %v4817_v35, %v4817_v35  ;;  %v2483_v33 = vadd.f32 %v3611_v62, %v4731_v43  ;;  %v3676_v9 = vpop.f32.mrf.mxu1  ;;  %v2657_v46 = vlaneseq }
 0x1e1   :  { %v3613_v22 = vpop.f32.mrf.mxu0 }
 0x1e2   :  { %v2635_v2 = vadd.f32 %v2634_v55, %v2620_v20  ;;  %v2580_v25 = vadd.f32 %v3675_v63, %v2483_v33  ;;  %v3614_v5 = vadd.f32 %v3613_v22, %v3612_v60  ;;  %v3677_v58 = vpop.f32.mrf.mxu1  ;;  %v2658_v1 = vshrl.u32 %v2657_v46, 7 }
 0x1e3   :  { %v3678_v40 = vadd.f32 %v3677_v58, %v3676_v9 }
 0x1e4   :  { %v2599_v17 = vadd.f32 %v2598_v19, %v2580_v25  ;;  %v2621_v31 = vmul.f32 %v2580_v25, %v2580_v25  ;;  %v2486_v11 = vadd.f32 %v3614_v5, %v2389_v24  ;;  %v2659_v23 = vsub.s32 0, %v2658_v1 }
 0x1e6   :  { %v2636_v51 = vadd.f32 %v2635_v2, %v2621_v31  ;;  %v2583_v36 = vadd.f32 %v3678_v40, %v2486_v11 }
 0x1e8   :  { %v2600_v14 = vadd.f32 %v2599_v17, %v2583_v36  ;;  %v2622_v28 = vmul.f32 %v2583_v36, %v2583_v36 }
 0x1ea   :  { %v2601_v18 = vrot.slane %v2600_v14, 4  ;;  %v2637_v32 = vadd.f32 %v2636_v51, %v2622_v28 }
 0x1ec   :  { %v2602_v42 = vadd.f32 %v2601_v18, %v2600_v14  ;;  %v2638_v43 = vrot.slane %v2637_v32, 4 }
 0x1ee   :  { %v2603_v4 = vrot.slane %v2602_v42, 2  ;;  %v2639_v45 = vadd.f32 %v2638_v43, %v2637_v32 }
 0x1f0   :  { %v2604_v47 = vadd.f32 %v2603_v4, %v2602_v42  ;;  %v2640_v26 = vrot.slane %v2639_v45, 2 }
 0x1f2   :  { %v2605_v54 = vrot.slane %v2604_v47, 1  ;;  %v2641_v41 = vadd.f32 %v2640_v26, %v2639_v45 }
 0x1f4   :  { %v2606_v30 = vadd.f32 %v2605_v54, %v2604_v47  ;;  %v2642_v53 = vrot.slane %v2641_v41, 1 }
 0x1f6   :  { %v2643_v0 = vadd.f32 %v2642_v53, %v2641_v41  ;;  %v2644_v37 = vmul.f32 0.0078125, %v2606_v30 }
 0x1f8   :  { %v2645_v13 = vmul.f32 0.0078125, %v2643_v0  ;;  %v2646_v39 = vmul.f32 %v2644_v37, %v2644_v37 }
 0x1fa   :  { %v2647_v61 = vsub.f32 %v2645_v13, %v2646_v39 }
 0x1fc   :  { %v2648_v6 = vmax.f32 %v2647_v61, 0.0 }
 0x1fe   :  { %v2650_v3 = vadd.f32 1e-05, %v2648_v6 }
 0x200   :  { %3807 = vrsqrt.f32 %v2650_v3 }
 0x20d   :  { %v3808_v8 = vpop.eup %3807 }
 0x20e   :  { %v2652_v52 = vmul.f32 %v3808_v8, %v2649_v49 }
 0x210   :  { %v2654_v55 = vmul.f32 %v2652_v52, %v2644_v37  ;;  %v2660_v62 = vrot.slane %v2652_v52, %v2659_v23 }
 0x212   :  { %v2655_v15 = vsub.f32 %v2653_v59, %v2654_v55  ;;  %v2662_v48 = vmul.f32 %v2660_v62, %v4741_v44  ;;  %v2663_v60 = vmul.f32 %v2660_v62, %v4738_v38  ;;  %v2668_v19 = vmul.f32 %v2660_v62, %v4771_v7 }
 0x213   :  { %v2669_v20 = vmul.f32 %v2660_v62, %v4778_v34  ;;  %v2670_v33 = vmul.f32 %v2660_v62, %v4784_v10  ;;  %v2671_v63 = vmul.f32 %v2660_v62, %v4790_v16  ;;  %v2672_v9 = vmul.f32 %v2660_v62, %v4796_v27 }
 0x214   :  { %v2673_v22 = vmul.f32 %v2660_v62, %v4802_v21  ;;  %v2674_v24 = vmul.f32 %v2660_v62, %v4810_v57  ;;  %v2675_v2 = vmul.f32 %v2660_v62, %v4817_v35  ;;  %v2676_v5 = vmul.f32 %v2660_v62, %v2580_v25 }
 0x215   :  { %v2664_v44 = vmul.f32 %v2660_v62, %v4743_v29  ;;  %v2665_v38 = vmul.f32 %v2660_v62, %v4748_v50  ;;  %v2677_v7 = vmul.f32 %v2660_v62, %v2583_v36  ;;  %v2682_v58 = vrot.slane %v2655_v15, %v2659_v23 }
 0x216   :  { %v2666_v34 = vmul.f32 %v2660_v62, %v4754_v56  ;;  %v2667_v10 = vmul.f32 %v2660_v62, %v4762_v12 }
 0x217   :  { %v2684_v16 = vadd.f32 %v2682_v58, %v2662_v48  ;;  %v2685_v17 = vadd.f32 %v2682_v58, %v2663_v60  ;;  %v2686_v27 = vadd.f32 %v2682_v58, %v2664_v44  ;;  %v2687_v31 = vadd.f32 %v2682_v58, %v2665_v38 }
 0x218   :  { %v2688_v21 = vadd.f32 %v2682_v58, %v2666_v34  ;;  %v2689_v11 = vadd.f32 %v2682_v58, %v2667_v10  ;;  %v2690_v57 = vadd.f32 %v2682_v58, %v2668_v19  ;;  %v2691_v40 = vadd.f32 %v2682_v58, %v2669_v20 }
 0x219   :  { %v2692_v35 = vadd.f32 %v2682_v58, %v2670_v33  ;;  %v2693_v25 = vadd.f32 %v2682_v58, %v2671_v63  ;;  %v2694_v51 = vadd.f32 %v2682_v58, %v2672_v9  ;;  %v2695_v29 = vadd.f32 %v2682_v58, %v2673_v22 }
 0x21a   :  { %v2696_v14 = vadd.f32 %v2682_v58, %v2674_v24  ;;  %v2697_v50 = vadd.f32 %v2682_v58, %v2675_v2  ;;  %v2698_v36 = vadd.f32 %v2682_v58, %v2676_v5  ;;  %v2699_v28 = vadd.f32 %v2682_v58, %v2677_v7 }
 0x21b   :  { %vm2700_vm0 = vcmp.gt.f32.partialorder %v2684_v16, 0.0  ;;  %vm2701_vm1 = vcmp.gt.f32.partialorder %v2685_v17, 0.0  ;;  %vm2702_vm2 = vcmp.gt.f32.partialorder %v2686_v27, 0.0  ;;  %vm2703_vm3 = vcmp.gt.f32.partialorder %v2687_v31, 0.0 }
 0x21c   :  { %vm2704_vm4 = vcmp.gt.f32.partialorder %v2688_v21, 0.0  ;;  %vm2705_vm5 = vcmp.gt.f32.partialorder %v2689_v11, 0.0  ;;  %vm2706_vm6 = vcmp.gt.f32.partialorder %v2690_v57, 0.0  ;;  %vm2707_vm7 = vcmp.gt.f32.partialorder %v2691_v40, 0.0 }
 0x21d   :  { %vm2708_vm8 = vcmp.gt.f32.partialorder %v2692_v35, 0.0  ;;  %vm2709_vm9 = vcmp.gt.f32.partialorder %v2693_v25, 0.0  ;;  %vm2710_vm10 = vcmp.gt.f32.partialorder %v2694_v51, 0.0  ;;  %vm2711_vm11 = vcmp.gt.f32.partialorder %v2695_v29, 0.0 }
 0x21e   :  { %vm2712_vm12 = vcmp.gt.f32.partialorder %v2696_v14, 0.0  ;;  %vm2713_vm13 = vcmp.gt.f32.partialorder %v2697_v50, 0.0  ;;  %vm2714_vm14 = vcmp.gt.f32.partialorder %v2698_v36, 0.0  ;;  %vm2715_vm15 = vcmp.gt.f32.partialorder %v2699_v28, 0.0 }
 0x21f   :  { %v2716_v56 = vmul.f32 0.2, %v2684_v16  ;;  %v2717_v12 = vmul.f32 0.2, %v2685_v17  ;;  %v2718_v18 = vmul.f32 0.2, %v2686_v27 }
 0x220   :  { %v2719_v32 = vmul.f32 0.2, %v2687_v31  ;;  %v2720_v42 = vmul.f32 0.2, %v2688_v21  ;;  %v2721_v43 = vmul.f32 0.2, %v2689_v11 }
 0x221   :  { %v2722_v4 = vmul.f32 0.2, %v2690_v57  ;;  %v2723_v45 = vmul.f32 0.2, %v2691_v40  ;;  %v2724_v47 = vmul.f32 0.2, %v2692_v35  ;;  %v2732_v26 = vsel %vm2700_vm0, %v2684_v16, %v2716_v56 }
 0x222   :  { %v2725_v54 = vmul.f32 0.2, %v2693_v25  ;;  %v2726_v41 = vmul.f32 0.2, %v2694_v51  ;;  %v2727_v30 = vmul.f32 0.2, %v2695_v29  ;;  %v2733_v53 = vsel %vm2701_vm1, %v2685_v17, %v2717_v12 }
 0x223   :  { %v2728_v0 = vmul.f32 0.2, %v2696_v14  ;;  %v2729_v37 = vmul.f32 0.2, %v2697_v50  ;;  %v2730_v13 = vmul.f32 0.2, %v2698_v36  ;;  %v2734_v39 = vsel %vm2702_vm2, %v2686_v27, %v2718_v18 }
 0x224   :  { %v2731_v61 = vmul.f32 0.2, %v2699_v28  ;;  %v2735_v6 = vsel %vm2703_vm3, %v2687_v31, %v2719_v32  ;;  %v2736_v3 = vsel %vm2704_vm4, %v2688_v21, %v2720_v42  ;;  %v2737_v46 = vsel %vm2705_vm5, %v2689_v11, %v2721_v43 }
 0x225   :  { %v2738_v1 = vsel %vm2706_vm6, %v2690_v57, %v2722_v4  ;;  %v2739_v49 = vsel %vm2707_vm7, %v2691_v40, %v2723_v45  ;;  %v2740_v23 = vsel %vm2708_vm8, %v2692_v35, %v2724_v47  ;;  %v2741_v8 = vsel %vm2709_vm9, %v2693_v25, %v2725_v54 }
 0x226   :  { %v2742_v52 = vsel %vm2710_vm10, %v2694_v51, %v2726_v41  ;;  %v2743_v59 = vsel %vm2711_vm11, %v2695_v29, %v2727_v30  ;;  %v2744_v55 = vsel %vm2712_vm12, %v2696_v14, %v2728_v0  ;;  %v2745_v62 = vsel %vm2713_vm13, %v2697_v50, %v2729_v37 }
 0x227   :  { %v2746_v15 = vsel %vm2714_vm14, %v2698_v36, %v2730_v13  ;;  %v2747_v48 = vsel %vm2715_vm15, %v2699_v28, %v2731_v61  ;;  %v3123_v60 = vpack.c.bf16 %v2733_v53, %v2732_v26  ;;  %v3128_v19 = vpack.c.bf16 %v2735_v6, %v2734_v39 }
 0x228   :  { %v3133_v20 = vpack.c.bf16 %v2737_v46, %v2736_v3  ;;  %v3138_v33 = vpack.c.bf16 %v2739_v49, %v2738_v1  ;;  %v3143_v63 = vpack.c.bf16 %v2741_v8, %v2740_v23  ;;  %v3148_v9 = vpack.c.bf16 %v2743_v59, %v2742_v52 }
 0x229   :  { %3124 = vst [vmem:[%s4889_s4] sm:$0xff] %v3123_v60   ;;  %3160 = vst [vmem:[%s4889_s4 + $0x8] sm:$0xff] %v3128_v19   ;;  %v3153_v22 = vpack.c.bf16 %v2745_v62, %v2744_v55  ;;  %v3158_v24 = vpack.c.bf16 %v2747_v48, %v2746_v15 }
 0x22a   :  { %3161 = vst [vmem:[%s4889_s4 + $0x10] sm:$0xff] %v3133_v20   ;;  %3162 = vst [vmem:[%s4889_s4 + $0x18] sm:$0xff] %v3138_v33  }
 0x22b   :  { %3163 = vst [vmem:[%s4889_s4 + $0x20] sm:$0xff] %v3143_v63   ;;  %3164 = vst [vmem:[%s4889_s4 + $0x28] sm:$0xff] %v3148_v9  }
 0x22c   :  { %3165 = vst [vmem:[%s4889_s4 + $0x30] sm:$0xff] %v3153_v22   ;;  %3166 = vst [vmem:[%s4889_s4 + $0x38] sm:$0xff] %v3158_v24  }

// kernel: discriminator_forward.5
= control target key start
LH: loop header
LB: loop body
LE: loop exit
PB: predicated region body
PF: predicated region fallthrough
CT: control target
= control target key end

     0   :  { %v12655_v0 = vmov 0   ;;  %s12650_s1 = inlined_call_operand.vmem [shape: bf16[2048,128], index: 1, kind: input, shape index: {}]   ;;  %s12651_s0 = inlined_call_operand.vmem [shape: bf16[512,2048], index: 0, kind: input, shape index: {}]   ;;  %s12652_s2 = inlined_call_operand.vmem [shape: f32[1,128], index: 2, kind: input, shape index: {}]   ;;  %s12653_s3 = inlined_call_operand.vmem [shape: f32[1,128], index: 3, kind: input, shape index: {}]   ;;  %s12654_s4 = inlined_call_operand.vmem [shape: bf16[512,128], index: 4, kind: output, shape index: {}]  }
   0x1   :  { %4114 = vmatprep.subr.bf16.mxu0 %v12655_v0  ;;  %4403 = vmatprep.subr.bf16.mxu1 %v12655_v0  ;;  %v8256_v1 = vld [vmem:[%s12650_s1 + $0x38] sm:$0xff]   ;;  %v8258_v3 = vld [vmem:[%s12650_s1 + $0x30] sm:$0xff]   ;;  %v8260_v5 = vld [vmem:[%s12650_s1 + $0x28] sm:$0xff]  }
   0x2   :  { %v8257_v2 = vld [vmem:[%s12650_s1 + $0xb8] sm:$0xff]   ;;  %4115 = vmatpush1.bf16.msra.mxu0 %v8256_v1  ;;  %v8259_v4 = vld [vmem:[%s12650_s1 + $0xb0] sm:$0xff]   ;;  %v8261_v6 = vld [vmem:[%s12650_s1 + $0xa8] sm:$0xff]  }
   0x3   :  { %4404 = vmatpush1.bf16.msra.mxu1 %v8257_v2  ;;  %4116 = vmatprep.subr.bf16.mxu0 %v12655_v0  ;;  %v8262_v7 = vld [vmem:[%s12650_s1 + $0x20] sm:$0xff]   ;;  %v8264_v9 = vld [vmem:[%s12650_s1 + $0x18] sm:$0xff]   ;;  %v8266_v11 = vld [vmem:[%s12650_s1 + $0x10] sm:$0xff]  }
   0x4   :  { %4405 = vmatprep.subr.bf16.mxu1 %v12655_v0  ;;  %v8263_v8 = vld [vmem:[%s12650_s1 + $0xa0] sm:$0xff]   ;;  %v8265_v10 = vld [vmem:[%s12650_s1 + $0x98] sm:$0xff]   ;;  %v8267_v12 = vld [vmem:[%s12650_s1 + $0x90] sm:$0xff]  }
   0x5   :  { %v8268_v13 = vld [vmem:[%s12650_s1 + $0x8] sm:$0xff]   ;;  %v8270_v15 = vld [vmem:[%s12650_s1] sm:$0xff]   ;;  %v8272_v17 = vld [vmem:[%s12650_s1 + $0x78] sm:$0xff]  }
   0x6   :  { %4117 = vmatpush1.bf16.msra.mxu0 %v8258_v3  ;;  %v8269_v14 = vld [vmem:[%s12650_s1 + $0x88] sm:$0xff]   ;;  %v8271_v16 = vld [vmem:[%s12650_s1 + $0x80] sm:$0xff]   ;;  %v8273_v18 = vld [vmem:[%s12650_s1 + $0xf8] sm:$0xff]  }
   0x7   :  { %4406 = vmatpush1.bf16.msra.mxu1 %v8259_v4  ;;  %4118 = vmatprep.subr.bf16.mxu0 %v12655_v0  ;;  %v8487_v19 = vld [vmem:[%s12651_s0] sm:$0xff]  ;;  %v8497_v21 = vld [vmem:[%s12651_s0 + $0x8] sm:$0xff]  ;;  %v8274_v24 = vld [vmem:[%s12650_s1 + $0x70] sm:$0xff]  }
   0x8   :  { %4407 = vmatprep.subr.bf16.mxu1 %v12655_v0  ;;  %v8492_v20 = vld [vmem:[%s12651_s0 + $0x40] sm:$0xff]  ;;  %v8504_v23 = vld [vmem:[%s12651_s0 + $0x48] sm:$0xff]  ;;  %v8275_v26 = vld [vmem:[%s12650_s1 + $0xf0] sm:$0xff]  }
   0x9   :  { %v7297_v22 = vcombine.high %v8487_v19, %v8492_v20  ;;  %v7299_v25 = vcombine.high %v8497_v21, %v8504_v23  ;;  %v8276_v27 = vld [vmem:[%s12650_s1 + $0x68] sm:$0xff]   ;;  %v8278_v29 = vld [vmem:[%s12650_s1 + $0x60] sm:$0xff]   ;;  %v8280_v31 = vld [vmem:[%s12650_s1 + $0x58] sm:$0xff]   ;;  %v7296_v42 = vcombine.low %v8487_v19, %v8492_v20  ;;  %v7298_v44 = vcombine.low %v8497_v21, %v8504_v23 }
   0xa   :  { %4119 = vmatpush1.bf16.msra.mxu0 %v8260_v5  ;;  %v8277_v28 = vld [vmem:[%s12650_s1 + $0xe8] sm:$0xff]   ;;  %v8279_v30 = vld [vmem:[%s12650_s1 + $0xe0] sm:$0xff]   ;;  %v8281_v32 = vld [vmem:[%s12650_s1 + $0xd8] sm:$0xff]  }
   0xb   :  { %4408 = vmatpush1.bf16.msra.mxu1 %v8261_v6  ;;  %4120 = vmatprep.subr.bf16.mxu0 %v12655_v0  ;;  %v8282_v33 = vld [vmem:[%s12650_s1 + $0x50] sm:$0xff]   ;;  %v8284_v35 = vld [vmem:[%s12650_s1 + $0x48] sm:$0xff]   ;;  %v8286_v37 = vld [vmem:[%s12650_s1 + $0x40] sm:$0xff]  }
   0xc   :  { %4409 = vmatprep.subr.bf16.mxu1 %v12655_v0  ;;  %4146 = vmatprep.mubr.bf16.mxu0 %v7297_v22  ;;  %v8283_v34 = vld [vmem:[%s12650_s1 + $0xd0] sm:$0xff]   ;;  %v8285_v36 = vld [vmem:[%s12650_s1 + $0xc8] sm:$0xff]   ;;  %v8287_v38 = vld [vmem:[%s12650_s1 + $0xc0] sm:$0xff]  }
   0xd   :  { %4435 = vmatprep.mubr.bf16.mxu1 %v7299_v25  ;;  %v34_v39 = vld [vmem:[%s12651_s0 + $0x80] sm:$0xff]  ;;  %v35_v41 = vld [vmem:[%s12651_s0 + $0x88] sm:$0xff]  ;;  %v8288_v45 = vld [vmem:[%s12650_s1 + $0x138] sm:$0xff]  }
   0xe   :  { %4121 = vmatpush1.bf16.msra.mxu0 %v8262_v7  ;;  %v42_v40 = vld [vmem:[%s12651_s0 + $0xc0] sm:$0xff]  ;;  %v43_v43 = vld [vmem:[%s12651_s0 + $0xc8] sm:$0xff]  ;;  %v8289_v46 = vld [vmem:[%s12650_s1 + $0x1b8] sm:$0xff]  }
   0xf   :  { %4410 = vmatpush1.bf16.msra.mxu1 %v8263_v8  ;;  %4122 = vmatprep.subr.bf16.mxu0 %v12655_v0  ;;  %v7313_v47 = vcombine.high %v34_v39, %v42_v40  ;;  %v7315_v48 = vcombine.high %v35_v41, %v43_v43  ;;  %v50_v49 = vld [vmem:[%s12651_s0 + $0x100] sm:$0xff]  ;;  %v8290_v51 = vld [vmem:[%s12650_s1 + $0x130] sm:$0xff]   ;;  %v51_v53 = vld [vmem:[%s12651_s0 + $0x108] sm:$0xff]  ;;  %v7312_v55 = vcombine.low %v34_v39, %v42_v40 }
  0x10   :  { %4411 = vmatprep.subr.bf16.mxu1 %v12655_v0  ;;  %v58_v50 = vld [vmem:[%s12651_s0 + $0x140] sm:$0xff]  ;;  %v8291_v52 = vld [vmem:[%s12650_s1 + $0x1b0] sm:$0xff]   ;;  %v59_v54 = vld [vmem:[%s12651_s0 + $0x148] sm:$0xff]  ;;  %v7314_v56 = vcombine.low %v35_v41, %v43_v43 }
  0x11   :  { %v7329_v57 = vcombine.high %v50_v49, %v58_v50  ;;  %v7331_v58 = vcombine.high %v51_v53, %v59_v54  ;;  %v8292_v59 = vld [vmem:[%s12650_s1 + $0x128] sm:$0xff]   ;;  %v66_v61 = vld [vmem:[%s12651_s0 + $0x180] sm:$0xff]  ;;  %v7328_v4 = vcombine.low %v50_v49, %v58_v50  ;;  %v8296_v5 = vld [vmem:[%s12650_s1 + $0x118] sm:$0xff]   ;;  %v7330_v6 = vcombine.low %v51_v53, %v59_v54 }
  0x12   :  { %4123 = vmatpush1.bf16.msra.mxu0 %v8264_v9  ;;  %v8293_v60 = vld [vmem:[%s12650_s1 + $0x1a8] sm:$0xff]   ;;  %v74_v62 = vld [vmem:[%s12651_s0 + $0x1c0] sm:$0xff]  ;;  %v8297_v8 = vld [vmem:[%s12650_s1 + $0x198] sm:$0xff]  }
  0x13   :  { %4412 = vmatpush1.bf16.msra.mxu1 %v8265_v10  ;;  %4124 = vmatprep.subr.bf16.mxu0 %v12655_v0  ;;  %v67_v63 = vld [vmem:[%s12651_s0 + $0x188] sm:$0xff]  ;;  %v8294_v2 = vld [vmem:[%s12650_s1 + $0x120] sm:$0xff]   ;;  %v7345_v7 = vcombine.high %v66_v61, %v74_v62  ;;  %v8307_v39 = vld [vmem:[%s12650_s1 + $0x1f0] sm:$0xff]  }
  0x14   :  { %4413 = vmatprep.subr.bf16.mxu1 %v12655_v0  ;;  %v75_v1 = vld [vmem:[%s12651_s0 + $0x1c8] sm:$0xff]  ;;  %v8295_v3 = vld [vmem:[%s12650_s1 + $0x1a0] sm:$0xff]  }
  0x15   :  { %v7347_v9 = vcombine.high %v67_v63, %v75_v1  ;;  %v82_v10 = vld [vmem:[%s12651_s0 + $0x200] sm:$0xff]  ;;  %v8301_v20 = vld [vmem:[%s12650_s1 + $0x188] sm:$0xff]  }
  0x16   :  { %4125 = vmatpush1.bf16.msra.mxu0 %v8266_v11  ;;  %v90_v11 = vld [vmem:[%s12651_s0 + $0x240] sm:$0xff]  ;;  %v107_v25 = vld [vmem:[%s12651_s0 + $0x2c8] sm:$0xff] }
  0x17   :  { %4414 = vmatpush1.bf16.msra.mxu1 %v8267_v12  ;;  %4126 = vmatprep.subr.bf16.mxu0 %v12655_v0  ;;  %v83_v12 = vld [vmem:[%s12651_s0 + $0x208] sm:$0xff]  ;;  %v7361_v19 = vcombine.high %v82_v10, %v90_v11  ;;  %v98_v22 = vld [vmem:[%s12651_s0 + $0x280] sm:$0xff] }
  0x18   :  { %4415 = vmatprep.subr.bf16.mxu1 %v12655_v0  ;;  %v106_v23 = vld [vmem:[%s12651_s0 + $0x2c0] sm:$0xff]  ;;  %v8308_v41 = vld [vmem:[%s12650_s1 + $0x168] sm:$0xff]  }
  0x19   :  { %v7376_v40 = vcombine.low %v98_v22, %v106_v23  ;;  %v139_v49 = vld [vmem:[%s12651_s0 + $0x3c8] sm:$0xff]  ;;  %v146_v54 = vld [vmem:[%s12651_s0 + $0x400] sm:$0xff] }
  0x1a   :  { %4127 = vmatpush1.bf16.msra.mxu0 %v8268_v13  ;;  %v91_v13 = vld [vmem:[%s12651_s0 + $0x248] sm:$0xff] }
  0x1b   :  { %4416 = vmatpush1.bf16.msra.mxu1 %v8269_v14  ;;  %4128 = vmatprep.subr.bf16.mxu0 %v12655_v0  ;;  %v8298_v14 = vld [vmem:[%s12650_s1 + $0x110] sm:$0xff]   ;;  %v7363_v21 = vcombine.high %v83_v12, %v91_v13 }
  0x1c   :  { %4417 = vmatprep.subr.bf16.mxu1 %v12655_v0 }
  0x1e   :  { %4129 = vmatpush1.bf16.msra.mxu0 %v8270_v15  ;;  %v8299_v15 = vld [vmem:[%s12650_s1 + $0x190] sm:$0xff]  }
  0x1f   :  { %4418 = vmatpush1.bf16.msra.mxu1 %v8271_v16  ;;  %4130 = vmatprep.subr.bf16.mxu0 %v12655_v0  ;;  %v7344_v16 = vcombine.low %v66_v61, %v74_v62 }
  0x20   :  { %4419 = vmatprep.subr.bf16.mxu1 %v12655_v0 }
  0x22   :  { %4131 = vmatpush2.bf16.msra.mxu0 %v8272_v17  ;;  %v8300_v17 = vld [vmem:[%s12650_s1 + $0x108] sm:$0xff]  }
  0x23   :  { %4420 = vmatpush2.bf16.msra.mxu1 %v8273_v18  ;;  %4132 = vmatprep.subr.bf16.mxu0 %v12655_v0  ;;  %v7346_v18 = vcombine.low %v67_v63, %v75_v1  ;;  %v162_v1 = vld [vmem:[%s12651_s0 + $0x480] sm:$0xff] }
  0x24   :  { %4421 = vmatprep.subr.bf16.mxu1 %v12655_v0 }
  0x26   :  { %4133 = vmatpush2.bf16.msra.mxu0 %v8274_v24  ;;  %v99_v24 = vld [vmem:[%s12651_s0 + $0x288] sm:$0xff] }
  0x27   :  { %4422 = vmatpush2.bf16.msra.mxu1 %v8275_v26  ;;  %4134 = vmatprep.subr.bf16.mxu0 %v12655_v0  ;;  %v8302_v26 = vld [vmem:[%s12650_s1 + $0x100] sm:$0xff]  }
  0x28   :  { %4423 = vmatprep.subr.bf16.mxu1 %v12655_v0 }
  0x2a   :  { %4135 = vmatpush2.bf16.msra.mxu0 %v8276_v27  ;;  %v8303_v27 = vld [vmem:[%s12650_s1 + $0x180] sm:$0xff]  }
  0x2b   :  { %4424 = vmatpush2.bf16.msra.mxu1 %v8277_v28  ;;  %4136 = vmatprep.subr.bf16.mxu0 %v12655_v0  ;;  %v7360_v28 = vcombine.low %v82_v10, %v90_v11  ;;  %v186_v10 = vld [vmem:[%s12651_s0 + $0x540] sm:$0xff]  ;;  %v179_v11 = vld [vmem:[%s12651_s0 + $0x508] sm:$0xff] }
  0x2c   :  { %4425 = vmatprep.subr.bf16.mxu1 %v12655_v0 }
  0x2e   :  { %4137 = vmatpush2.bf16.msra.mxu0 %v8278_v29  ;;  %v8304_v29 = vld [vmem:[%s12650_s1 + $0x178] sm:$0xff]  }
  0x2f   :  { %4426 = vmatpush2.bf16.msra.mxu1 %v8279_v30  ;;  %4138 = vmatprep.subr.bf16.mxu0 %v12655_v0  ;;  %v7362_v30 = vcombine.low %v83_v12, %v91_v13  ;;  %v187_v12 = vld [vmem:[%s12651_s0 + $0x548] sm:$0xff]  ;;  %v8312_v13 = vld [vmem:[%s12650_s1 + $0x158] sm:$0xff]  }
  0x30   :  { %4427 = vmatprep.subr.bf16.mxu1 %v12655_v0 }
  0x32   :  { %4139 = vmatpush2.bf16.msra.mxu0 %v8280_v31  ;;  %v7377_v31 = vcombine.high %v98_v22, %v106_v23  ;;  %v203_v22 = vld [vmem:[%s12651_s0 + $0x5c8] sm:$0xff] }
  0x33   :  { %4428 = vmatpush2.bf16.msra.mxu1 %v8281_v32  ;;  %4140 = vmatprep.subr.bf16.mxu0 %v12655_v0  ;;  %v8305_v32 = vld [vmem:[%s12650_s1 + $0x1f8] sm:$0xff]  }
  0x34   :  { %4429 = vmatprep.subr.bf16.mxu1 %v12655_v0 }
  0x36   :  { %4141 = vmatpush2.bf16.msra.mxu0 %v8282_v33  ;;  %v7379_v33 = vcombine.high %v99_v24, %v107_v25 }
  0x37   :  { %4430 = vmatpush2.bf16.msra.mxu1 %v8283_v34  ;;  %4142 = vmatprep.subr.bf16.mxu0 %v12655_v0  ;;  %v114_v34 = vld [vmem:[%s12651_s0 + $0x300] sm:$0xff] }
  0x38   :  { %4431 = vmatprep.subr.bf16.mxu1 %v12655_v0 }
  0x3a   :  { %4143 = vmatpush2.bf16.msra.mxu0 %v8284_v35  ;;  %v122_v35 = vld [vmem:[%s12651_s0 + $0x340] sm:$0xff] }
  0x3b   :  { %4432 = vmatpush2.bf16.msra.mxu1 %v8285_v36  ;;  %4144 = vmatprep.subr.bf16.mxu0 %v12655_v0  ;;  %v115_v36 = vld [vmem:[%s12651_s0 + $0x308] sm:$0xff]  ;;  %v7393_v43 = vcombine.high %v114_v34, %v122_v35  ;;  %v7392_v50 = vcombine.low %v114_v34, %v122_v35 }
  0x3c   :  { %4433 = vmatprep.subr.bf16.mxu1 %v12655_v0 }
  0x3e   :  { %4145 = vmatpush2.bf16.msra.mxu0 %v8286_v37  ;;  %v123_v37 = vld [vmem:[%s12651_s0 + $0x348] sm:$0xff] }
  0x3f   :  { %4434 = vmatpush2.bf16.msra.mxu1 %v8287_v38  ;;  %4692 = vmatprep.subr.bf16.mxu0 %v12655_v0  ;;  %v8306_v38 = vld [vmem:[%s12650_s1 + $0x170] sm:$0xff]  }
  0x40   :  { %4981 = vmatprep.subr.bf16.mxu1 %v12655_v0 }
  0x41   :  { %4147 = vmatmul.mubr.bf16.vlgmr.msra.gmra.mxu0 %v7296_v42  ;;  %v7378_v42 = vcombine.low %v99_v24, %v107_v25  ;;  %v7458_v24 = vcombine.low %v179_v11, %v187_v12 }
  0x42   :  { %4436 = vmatmul.mubr.bf16.vlgmr.msra.gmra.mxu1 %v7298_v44  ;;  %4693 = vmatpush1.bf16.msra.mxu0 %v8288_v45  ;;  %v8309_v44 = vld [vmem:[%s12650_s1 + $0x1e8] sm:$0xff]   ;;  %v7395_v45 = vcombine.high %v115_v36, %v123_v37 }
  0x43   :  { %4982 = vmatpush1.bf16.msra.mxu1 %v8289_v46  ;;  %4154 = vmatprep.mubr.bf16.mxu0 %v7313_v47  ;;  %v130_v46 = vld [vmem:[%s12651_s0 + $0x380] sm:$0xff] }
  0x44   :  { %4443 = vmatprep.mubr.bf16.mxu1 %v7315_v48  ;;  %4694 = vmatprep.subr.bf16.mxu0 %v12655_v0  ;;  %v138_v47 = vld [vmem:[%s12651_s0 + $0x3c0] sm:$0xff]  ;;  %v131_v48 = vld [vmem:[%s12651_s0 + $0x388] sm:$0xff] }
  0x45   :  { %4983 = vmatprep.subr.bf16.mxu1 %v12655_v0  ;;  %v7411_v53 = vcombine.high %v131_v48, %v139_v49  ;;  %v7410_v61 = vcombine.low %v131_v48, %v139_v49  ;;  %v243_v48 = vld [vmem:[%s12651_s0 + $0x708] sm:$0xff] }
  0x46   :  { %4695 = vmatpush1.bf16.msra.mxu0 %v8290_v51  ;;  %v7394_v51 = vcombine.low %v115_v36, %v123_v37  ;;  %v226_v37 = vld [vmem:[%s12651_s0 + $0x680] sm:$0xff]  ;;  %v251_v49 = vld [vmem:[%s12651_s0 + $0x748] sm:$0xff] }
  0x47   :  { %4984 = vmatpush1.bf16.msra.mxu1 %v8291_v52  ;;  %4696 = vmatprep.subr.bf16.mxu0 %v12655_v0  ;;  %v7409_v52 = vcombine.high %v130_v46, %v138_v47 }
  0x48   :  { %4985 = vmatprep.subr.bf16.mxu1 %v12655_v0 }
  0x49   :  { %4155 = vmatmul.mubr.bf16.gmra.mxu0 %v7312_v55  ;;  %v8310_v55 = vld [vmem:[%s12650_s1 + $0x160] sm:$0xff]  }
  0x4a   :  { %4444 = vmatmul.mubr.bf16.gmra.mxu1 %v7314_v56  ;;  %4162 = vmatprep.mubr.bf16.mxu0 %v7329_v57  ;;  %v8311_v56 = vld [vmem:[%s12650_s1 + $0x1e0] sm:$0xff]  }
  0x4b   :  { %4451 = vmatprep.mubr.bf16.mxu1 %v7331_v58  ;;  %4697 = vmatpush1.bf16.msra.mxu0 %v8292_v59  ;;  %v154_v57 = vld [vmem:[%s12651_s0 + $0x440] sm:$0xff]  ;;  %v147_v58 = vld [vmem:[%s12651_s0 + $0x408] sm:$0xff] }
  0x4c   :  { %4986 = vmatpush1.bf16.msra.mxu1 %v8293_v60  ;;  %4698 = vmatprep.subr.bf16.mxu0 %v12655_v0  ;;  %v155_v59 = vld [vmem:[%s12651_s0 + $0x448] sm:$0xff]  ;;  %v7408_v60 = vcombine.low %v130_v46, %v138_v47  ;;  %v7425_v62 = vcombine.high %v146_v54, %v154_v57  ;;  %v250_v46 = vld [vmem:[%s12651_s0 + $0x740] sm:$0xff] }
  0x4d   :  { %4987 = vmatprep.subr.bf16.mxu1 %v12655_v0  ;;  %v7427_v63 = vcombine.high %v147_v58, %v155_v59  ;;  %v8316_v47 = vld [vmem:[%s12650_s1 + $0x148] sm:$0xff]  }
  0x4f   :  { %4699 = vmatpush1.bf16.msra.mxu0 %v8294_v2  ;;  %v170_v2 = vld [vmem:[%s12651_s0 + $0x4c0] sm:$0xff] }
  0x50   :  { %4988 = vmatpush1.bf16.msra.mxu1 %v8295_v3  ;;  %4700 = vmatprep.subr.bf16.mxu0 %v12655_v0  ;;  %v163_v3 = vld [vmem:[%s12651_s0 + $0x488] sm:$0xff] }
  0x51   :  { %4163 = vmatmul.mubr.bf16.gmra.mxu0 %v7328_v4  ;;  %4989 = vmatprep.subr.bf16.mxu1 %v12655_v0  ;;  %v171_v4 = vld [vmem:[%s12651_s0 + $0x4c8] sm:$0xff] }
  0x52   :  { %4452 = vmatmul.mubr.bf16.gmra.mxu1 %v7330_v6  ;;  %4170 = vmatprep.mubr.bf16.mxu0 %v7345_v7  ;;  %v7426_v6 = vcombine.low %v147_v58, %v155_v59  ;;  %v7441_v7 = vcombine.high %v162_v1, %v170_v2  ;;  %v267_v58 = vld [vmem:[%s12651_s0 + $0x7c8] sm:$0xff] }
  0x53   :  { %4459 = vmatprep.mubr.bf16.mxu1 %v7347_v9  ;;  %4701 = vmatpush1.bf16.msra.mxu0 %v8296_v5  ;;  %v7424_v5 = vcombine.low %v146_v54, %v154_v57  ;;  %v178_v9 = vld [vmem:[%s12651_s0 + $0x500] sm:$0xff]  ;;  %v7523_v54 = vcombine.high %v243_v48, %v251_v49  ;;  %v259_v57 = vld [vmem:[%s12651_s0 + $0x788] sm:$0xff] }
  0x54   :  { %4990 = vmatpush1.bf16.msra.mxu1 %v8297_v8  ;;  %4702 = vmatprep.subr.bf16.mxu0 %v12655_v0  ;;  %v7443_v8 = vcombine.high %v163_v3, %v171_v4  ;;  %v7456_v23 = vcombine.low %v178_v9, %v186_v10 }
  0x55   :  { %4991 = vmatprep.subr.bf16.mxu1 %v12655_v0 }
  0x57   :  { %4703 = vmatpush1.bf16.msra.mxu0 %v8298_v14  ;;  %v8313_v14 = vld [vmem:[%s12650_s1 + $0x1d8] sm:$0xff]  }
  0x58   :  { %4992 = vmatpush1.bf16.msra.mxu1 %v8299_v15  ;;  %4704 = vmatprep.subr.bf16.mxu0 %v12655_v0  ;;  %v7440_v15 = vcombine.low %v162_v1, %v170_v2  ;;  %v282_v1 = vld [vmem:[%s12651_s0 + $0x840] sm:$0xff] }
  0x59   :  { %4171 = vmatmul.mubr.bf16.gmra.mxu0 %v7344_v16  ;;  %4993 = vmatprep.subr.bf16.mxu1 %v12655_v0  ;;  %v7442_v16 = vcombine.low %v163_v3, %v171_v4  ;;  %v8318_v2 = vld [vmem:[%s12650_s1 + $0x140] sm:$0xff]   ;;  %v275_v3 = vld [vmem:[%s12651_s0 + $0x808] sm:$0xff] }
  0x5a   :  { %4460 = vmatmul.mubr.bf16.gmra.mxu1 %v7346_v18  ;;  %4178 = vmatprep.mubr.bf16.mxu0 %v7361_v19  ;;  %v7459_v18 = vcombine.high %v179_v11, %v187_v12  ;;  %v194_v19 = vld [vmem:[%s12651_s0 + $0x580] sm:$0xff]  ;;  %v283_v4 = vld [vmem:[%s12651_s0 + $0x848] sm:$0xff] }
  0x5b   :  { %4467 = vmatprep.mubr.bf16.mxu1 %v7363_v21  ;;  %4705 = vmatpush1.bf16.msra.mxu0 %v8300_v17  ;;  %v7457_v17 = vcombine.high %v178_v9, %v186_v10  ;;  %v195_v21 = vld [vmem:[%s12651_s0 + $0x588] sm:$0xff]  ;;  %v7555_v9 = vcombine.high %v275_v3, %v283_v4  ;;  %v290_v10 = vld [vmem:[%s12651_s0 + $0x880] sm:$0xff] }
  0x5c   :  { %4994 = vmatpush1.bf16.msra.mxu1 %v8301_v20  ;;  %4706 = vmatprep.subr.bf16.mxu0 %v12655_v0  ;;  %v202_v20 = vld [vmem:[%s12651_s0 + $0x5c0] sm:$0xff]  ;;  %v7474_v34 = vcombine.low %v195_v21, %v203_v22  ;;  %v291_v12 = vld [vmem:[%s12651_s0 + $0x888] sm:$0xff] }
  0x5d   :  { %4995 = vmatprep.subr.bf16.mxu1 %v12655_v0  ;;  %v7473_v25 = vcombine.high %v194_v19, %v202_v20  ;;  %v298_v11 = vld [vmem:[%s12651_s0 + $0x8c0] sm:$0xff] }
  0x5f   :  { %4707 = vmatpush1.bf16.msra.mxu0 %v8302_v26  ;;  %v7475_v26 = vcombine.high %v195_v21, %v203_v22  ;;  %v315_v21 = vld [vmem:[%s12651_s0 + $0x948] sm:$0xff]  ;;  %v7568_v22 = vcombine.low %v290_v10, %v298_v11 }
  0x60   :  { %4996 = vmatpush1.bf16.msra.mxu1 %v8303_v27  ;;  %4708 = vmatprep.subr.bf16.mxu0 %v12655_v0  ;;  %v210_v27 = vld [vmem:[%s12651_s0 + $0x600] sm:$0xff] }
  0x61   :  { %4179 = vmatmul.mubr.bf16.gmra.mxu0 %v7360_v28  ;;  %4997 = vmatprep.subr.bf16.mxu1 %v12655_v0  ;;  %v218_v28 = vld [vmem:[%s12651_s0 + $0x640] sm:$0xff] }
  0x62   :  { %4468 = vmatmul.mubr.bf16.gmra.mxu1 %v7362_v30  ;;  %4186 = vmatprep.mubr.bf16.mxu0 %v7377_v31  ;;  %v211_v30 = vld [vmem:[%s12651_s0 + $0x608] sm:$0xff]  ;;  %v7489_v35 = vcombine.high %v210_v27, %v218_v28 }
  0x63   :  { %4475 = vmatprep.mubr.bf16.mxu1 %v7379_v33  ;;  %4709 = vmatpush2.bf16.msra.mxu0 %v8304_v29  ;;  %v8314_v29 = vld [vmem:[%s12650_s1 + $0x150] sm:$0xff]   ;;  %v219_v31 = vld [vmem:[%s12651_s0 + $0x648] sm:$0xff]  ;;  %v7472_v33 = vcombine.low %v194_v19, %v202_v20  ;;  %v314_v19 = vld [vmem:[%s12651_s0 + $0x940] sm:$0xff] }
  0x64   :  { %4998 = vmatpush2.bf16.msra.mxu1 %v8305_v32  ;;  %4710 = vmatprep.subr.bf16.mxu0 %v12655_v0  ;;  %v8315_v32 = vld [vmem:[%s12650_s1 + $0x1d0] sm:$0xff]   ;;  %v7491_v36 = vcombine.high %v211_v30, %v219_v31  ;;  %v307_v20 = vld [vmem:[%s12651_s0 + $0x908] sm:$0xff] }
  0x65   :  { %4999 = vmatprep.subr.bf16.mxu1 %v12655_v0 }
  0x67   :  { %4711 = vmatpush2.bf16.msra.mxu0 %v8306_v38  ;;  %v234_v38 = vld [vmem:[%s12651_s0 + $0x6c0] sm:$0xff] }
  0x68   :  { %5000 = vmatpush2.bf16.msra.mxu1 %v8307_v39  ;;  %4712 = vmatprep.subr.bf16.mxu0 %v12655_v0  ;;  %v227_v39 = vld [vmem:[%s12651_s0 + $0x688] sm:$0xff] }
  0x69   :  { %4187 = vmatmul.mubr.bf16.gmra.mxu0 %v7376_v40  ;;  %5001 = vmatprep.subr.bf16.mxu1 %v12655_v0  ;;  %v235_v40 = vld [vmem:[%s12651_s0 + $0x6c8] sm:$0xff] }
  0x6a   :  { %4476 = vmatmul.mubr.bf16.gmra.mxu1 %v7378_v42  ;;  %4194 = vmatprep.mubr.bf16.mxu0 %v7393_v43  ;;  %v7490_v42 = vcombine.low %v211_v30, %v219_v31  ;;  %v7505_v43 = vcombine.high %v226_v37, %v234_v38  ;;  %v7586_v31 = vcombine.low %v307_v20, %v315_v21 }
  0x6b   :  { %4483 = vmatprep.mubr.bf16.mxu1 %v7395_v45  ;;  %4713 = vmatpush2.bf16.msra.mxu0 %v8308_v41  ;;  %v7488_v41 = vcombine.low %v210_v27, %v218_v28  ;;  %v242_v45 = vld [vmem:[%s12651_s0 + $0x700] sm:$0xff]  ;;  %v323_v28 = vld [vmem:[%s12651_s0 + $0x988] sm:$0xff] }
  0x6c   :  { %5002 = vmatpush2.bf16.msra.mxu1 %v8309_v44  ;;  %4714 = vmatprep.subr.bf16.mxu0 %v12655_v0  ;;  %v7507_v44 = vcombine.high %v227_v39, %v235_v40  ;;  %v7520_v59 = vcombine.low %v242_v45, %v250_v46  ;;  %v330_v27 = vld [vmem:[%s12651_s0 + $0x9c0] sm:$0xff] }
  0x6d   :  { %5003 = vmatprep.subr.bf16.mxu1 %v12655_v0 }
  0x6f   :  { %4715 = vmatpush2.bf16.msra.mxu0 %v8310_v55  ;;  %v258_v55 = vld [vmem:[%s12651_s0 + $0x780] sm:$0xff] }
  0x70   :  { %5004 = vmatpush2.bf16.msra.mxu1 %v8311_v56  ;;  %4716 = vmatprep.subr.bf16.mxu0 %v12655_v0  ;;  %v266_v56 = vld [vmem:[%s12651_s0 + $0x7c0] sm:$0xff] }
  0x71   :  { %4195 = vmatmul.mubr.bf16.gmra.mxu0 %v7392_v50  ;;  %5005 = vmatprep.subr.bf16.mxu1 %v12655_v0  ;;  %v8317_v50 = vld [vmem:[%s12650_s1 + $0x1c8] sm:$0xff]  }
  0x72   :  { %4484 = vmatmul.mubr.bf16.gmra.mxu1 %v7394_v51  ;;  %4202 = vmatprep.mubr.bf16.mxu0 %v7409_v52  ;;  %v7504_v51 = vcombine.low %v226_v37, %v234_v38  ;;  %v7506_v52 = vcombine.low %v227_v39, %v235_v40  ;;  %v347_v37 = vld [vmem:[%s12651_s0 + $0xa48] sm:$0xff] }
  0x73   :  { %4491 = vmatprep.mubr.bf16.mxu1 %v7411_v53  ;;  %4717 = vmatpush2.bf16.msra.mxu0 %v8312_v13  ;;  %v7521_v53 = vcombine.high %v242_v45, %v250_v46  ;;  %v299_v13 = vld [vmem:[%s12651_s0 + $0x8c8] sm:$0xff] }
  0x74   :  { %5006 = vmatpush2.bf16.msra.mxu1 %v8313_v14  ;;  %4718 = vmatprep.subr.bf16.mxu0 %v12655_v0  ;;  %v363_v45 = vld [vmem:[%s12651_s0 + $0xac8] sm:$0xff] }
  0x75   :  { %5007 = vmatprep.subr.bf16.mxu1 %v12655_v0 }
  0x77   :  { %4719 = vmatpush2.bf16.msra.mxu0 %v8314_v29  ;;  %v331_v29 = vld [vmem:[%s12651_s0 + $0x9c8] sm:$0xff] }
  0x78   :  { %5008 = vmatpush2.bf16.msra.mxu1 %v8315_v32  ;;  %4720 = vmatprep.subr.bf16.mxu0 %v12655_v0  ;;  %v7602_v39 = vcombine.low %v323_v28, %v331_v29 }
  0x79   :  { %4203 = vmatmul.mubr.bf16.gmra.mxu0 %v7408_v60  ;;  %5009 = vmatprep.subr.bf16.mxu1 %v12655_v0  ;;  %v7522_v60 = vcombine.low %v243_v48, %v251_v49 }
  0x7a   :  { %4492 = vmatmul.mubr.bf16.gmra.mxu1 %v7410_v61  ;;  %4210 = vmatprep.mubr.bf16.mxu0 %v7425_v62  ;;  %v7537_v61 = vcombine.high %v258_v55, %v266_v56  ;;  %v7539_v62 = vcombine.high %v259_v57, %v267_v58 }
  0x7b   :  { %4499 = vmatprep.mubr.bf16.mxu1 %v7427_v63  ;;  %4721 = vmatpush2.bf16.msra.mxu0 %v8316_v47  ;;  %v274_v63 = vld [vmem:[%s12651_s0 + $0x800] sm:$0xff] }
  0x7c   :  { %5010 = vmatpush2.bf16.msra.mxu1 %v8317_v50  ;;  %4722 = vmatprep.subr.bf16.mxu0 %v12655_v0  ;;  %v7552_v14 = vcombine.low %v274_v63, %v282_v1  ;;  %v370_v50 = vld [vmem:[%s12651_s0 + $0xb00] sm:$0xff] }
  0x7d   :  { %5011 = vmatprep.subr.bf16.mxu1 %v12655_v0 }
  0x7f   :  { %4723 = vmatpush2.bf16.msra.mxu0 %v8318_v2 }
  0x80   :  { %5270 = vmatprep.subr.bf16.mxu0 %v12655_v0 }
  0x81   :  { %4211 = vmatmul.mubr.bf16.gmra.mxu0 %v7424_v5  ;;  %v8319_v5 = vld [vmem:[%s12650_s1 + $0x1c0] sm:$0xff]  }
  0x82   :  { %4500 = vmatmul.mubr.bf16.gmra.mxu1 %v7426_v6  ;;  %4218 = vmatprep.mubr.bf16.mxu0 %v7441_v7  ;;  %v7536_v6 = vcombine.low %v258_v55, %v266_v56  ;;  %v7538_v7 = vcombine.low %v259_v57, %v267_v58  ;;  %v386_v58 = vld [vmem:[%s12651_s0 + $0xb80] sm:$0xff] }
  0x83   :  { %4507 = vmatprep.mubr.bf16.mxu1 %v7443_v8  ;;  %v7553_v8 = vcombine.high %v274_v63, %v282_v1  ;;  %5012 = vmatpush2.bf16.msra.mxu1 %v8319_v5  ;;  %v403_v5 = vld [vmem:[%s12651_s0 + $0xc08] sm:$0xff] }
  0x84   :  { %5559 = vmatprep.subr.bf16.mxu1 %v12655_v0 }
  0x89   :  { %4219 = vmatmul.mubr.bf16.gmra.mxu0 %v7440_v15  ;;  %v7554_v15 = vcombine.low %v275_v3, %v283_v4  ;;  %v402_v3 = vld [vmem:[%s12651_s0 + $0xc00] sm:$0xff] }
  0x8a   :  { %4508 = vmatmul.mubr.bf16.gmra.mxu1 %v7442_v16  ;;  %4226 = vmatprep.mubr.bf16.mxu0 %v7457_v17  ;;  %v7569_v16 = vcombine.high %v290_v10, %v298_v11  ;;  %v7571_v17 = vcombine.high %v291_v12, %v299_v13  ;;  %v410_v4 = vld [vmem:[%s12651_s0 + $0xc40] sm:$0xff] }
  0x8b   :  { %4515 = vmatprep.mubr.bf16.mxu1 %v7459_v18  ;;  %v306_v18 = vld [vmem:[%s12651_s0 + $0x900] sm:$0xff] }
  0x8c   :  { %v7584_v30 = vcombine.low %v306_v18, %v314_v19  ;;  %v418_v11 = vld [vmem:[%s12651_s0 + $0xc80] sm:$0xff] }
  0x91   :  { %4227 = vmatmul.mubr.bf16.gmra.mxu0 %v7456_v23  ;;  %v7570_v23 = vcombine.low %v291_v12, %v299_v13  ;;  %v426_v12 = vld [vmem:[%s12651_s0 + $0xcc0] sm:$0xff]  ;;  %v419_v13 = vld [vmem:[%s12651_s0 + $0xc88] sm:$0xff] }
  0x92   :  { %4516 = vmatmul.mubr.bf16.gmra.mxu1 %v7458_v24  ;;  %4234 = vmatprep.mubr.bf16.mxu0 %v7473_v25  ;;  %v7585_v24 = vcombine.high %v306_v18, %v314_v19  ;;  %v7587_v25 = vcombine.high %v307_v20, %v315_v21 }
  0x93   :  { %4523 = vmatprep.mubr.bf16.mxu1 %v7475_v26  ;;  %v322_v26 = vld [vmem:[%s12651_s0 + $0x980] sm:$0xff] }
  0x94   :  { %v7601_v32 = vcombine.high %v322_v26, %v330_v27  ;;  %v7600_v38 = vcombine.low %v322_v26, %v330_v27  ;;  %v435_v26 = vld [vmem:[%s12651_s0 + $0xd08] sm:$0xff] }
  0x95   :  { %v443_v27 = vld [vmem:[%s12651_s0 + $0xd48] sm:$0xff] }
  0x99   :  { %4235 = vmatmul.mubr.bf16.gmra.mxu0 %v7472_v33  ;;  %v7603_v33 = vcombine.high %v323_v28, %v331_v29  ;;  %v7696_v29 = vcombine.low %v418_v11, %v426_v12 }
  0x9a   :  { %4524 = vmatmul.mubr.bf16.gmra.mxu1 %v7474_v34  ;;  %4242 = vmatprep.mubr.bf16.mxu0 %v7489_v35  ;;  %v338_v34 = vld [vmem:[%s12651_s0 + $0xa00] sm:$0xff] }
  0x9b   :  { %4531 = vmatprep.mubr.bf16.mxu1 %v7491_v36  ;;  %v346_v35 = vld [vmem:[%s12651_s0 + $0xa40] sm:$0xff]  ;;  %v339_v36 = vld [vmem:[%s12651_s0 + $0xa08] sm:$0xff] }
  0x9c   :  { %v7617_v40 = vcombine.high %v338_v34, %v346_v35  ;;  %v7616_v46 = vcombine.low %v338_v34, %v346_v35  ;;  %v7618_v47 = vcombine.low %v339_v36, %v347_v37  ;;  %v7715_v35 = vcombine.high %v435_v26, %v443_v27 }
  0xa1   :  { %4243 = vmatmul.mubr.bf16.gmra.mxu0 %v7488_v41  ;;  %v7619_v41 = vcombine.high %v339_v36, %v347_v37 }
  0xa2   :  { %4532 = vmatmul.mubr.bf16.gmra.mxu1 %v7490_v42  ;;  %4250 = vmatprep.mubr.bf16.mxu0 %v7505_v43  ;;  %v354_v42 = vld [vmem:[%s12651_s0 + $0xa80] sm:$0xff] }
  0xa3   :  { %4539 = vmatprep.mubr.bf16.mxu1 %v7507_v44  ;;  %v362_v43 = vld [vmem:[%s12651_s0 + $0xac0] sm:$0xff]  ;;  %v355_v44 = vld [vmem:[%s12651_s0 + $0xa88] sm:$0xff] }
  0xa4   :  { %v7633_v48 = vcombine.high %v354_v42, %v362_v43  ;;  %v7635_v49 = vcombine.high %v355_v44, %v363_v45  ;;  %v7634_v55 = vcombine.low %v355_v44, %v363_v45  ;;  %v451_v44 = vld [vmem:[%s12651_s0 + $0xd88] sm:$0xff] }
  0xa5   :  { %v459_v45 = vld [vmem:[%s12651_s0 + $0xdc8] sm:$0xff] }
  0xa9   :  { %4251 = vmatmul.mubr.bf16.gmra.mxu0 %v7504_v51  ;;  %v378_v51 = vld [vmem:[%s12651_s0 + $0xb40] sm:$0xff] }
  0xaa   :  { %4540 = vmatmul.mubr.bf16.gmra.mxu1 %v7506_v52  ;;  %4258 = vmatprep.mubr.bf16.mxu0 %v7521_v53  ;;  %v371_v52 = vld [vmem:[%s12651_s0 + $0xb08] sm:$0xff]  ;;  %v7649_v56 = vcombine.high %v370_v50, %v378_v51 }
  0xab   :  { %4547 = vmatprep.mubr.bf16.mxu1 %v7523_v54  ;;  %v379_v53 = vld [vmem:[%s12651_s0 + $0xb48] sm:$0xff]  ;;  %v7632_v54 = vcombine.low %v354_v42, %v362_v43  ;;  %v458_v42 = vld [vmem:[%s12651_s0 + $0xdc0] sm:$0xff] }
  0xac   :  { %v7651_v57 = vcombine.high %v371_v52, %v379_v53  ;;  %v7650_v63 = vcombine.low %v371_v52, %v379_v53  ;;  %v7731_v53 = vcombine.high %v451_v44, %v459_v45 }
  0xb1   :  { %4259 = vmatmul.mubr.bf16.gmra.mxu0 %v7520_v59  ;;  %v394_v59 = vld [vmem:[%s12651_s0 + $0xbc0] sm:$0xff] }
  0xb2   :  { %4548 = vmatmul.mubr.bf16.gmra.mxu1 %v7522_v60  ;;  %4266 = vmatprep.mubr.bf16.mxu0 %v7537_v61  ;;  %v387_v60 = vld [vmem:[%s12651_s0 + $0xb88] sm:$0xff]  ;;  %v7665_v1 = vcombine.high %v386_v58, %v394_v59 }
  0xb3   :  { %4555 = vmatprep.mubr.bf16.mxu1 %v7539_v62  ;;  %v395_v61 = vld [vmem:[%s12651_s0 + $0xbc8] sm:$0xff]  ;;  %v7648_v62 = vcombine.low %v370_v50, %v378_v51 }
  0xb4   :  { %v7667_v2 = vcombine.high %v387_v60, %v395_v61 }
  0xb9   :  { %4267 = vmatmul.mubr.bf16.gmra.mxu0 %v7536_v6  ;;  %v411_v6 = vld [vmem:[%s12651_s0 + $0xc48] sm:$0xff] }
  0xba   :  { %4556 = vmatmul.mubr.bf16.gmra.mxu1 %v7538_v7  ;;  %4274 = vmatprep.mubr.bf16.mxu0 %v7553_v8  ;;  %v7664_v7 = vcombine.low %v386_v58, %v394_v59  ;;  %v7666_v8 = vcombine.low %v387_v60, %v395_v61  ;;  %v7683_v10 = vcombine.high %v403_v5, %v411_v6  ;;  %v466_v59 = vld [vmem:[%s12651_s0 + $0xe00] sm:$0xff] }
  0xbb   :  { %4563 = vmatprep.mubr.bf16.mxu1 %v7555_v9  ;;  %v7681_v9 = vcombine.high %v402_v3, %v410_v4  ;;  %v474_v60 = vld [vmem:[%s12651_s0 + $0xe40] sm:$0xff] }
  0xc1   :  { %4275 = vmatmul.mubr.bf16.gmra.mxu0 %v7552_v14  ;;  %v427_v14 = vld [vmem:[%s12651_s0 + $0xcc8] sm:$0xff] }
  0xc2   :  { %4564 = vmatmul.mubr.bf16.gmra.mxu1 %v7554_v15  ;;  %4282 = vmatprep.mubr.bf16.mxu0 %v7569_v16  ;;  %v7680_v15 = vcombine.low %v402_v3, %v410_v4  ;;  %v7682_v16 = vcombine.low %v403_v5, %v411_v6  ;;  %v7699_v18 = vcombine.high %v419_v13, %v427_v14 }
  0xc3   :  { %4571 = vmatprep.mubr.bf16.mxu1 %v7571_v17  ;;  %v7697_v17 = vcombine.high %v418_v11, %v426_v12  ;;  %v7730_v4 = vcombine.low %v451_v44, %v459_v45  ;;  %v7745_v5 = vcombine.high %v466_v59, %v474_v60 }
  0xc9   :  { %4283 = vmatmul.mubr.bf16.gmra.mxu0 %v7568_v22 }
  0xca   :  { %4572 = vmatmul.mubr.bf16.gmra.mxu1 %v7570_v23  ;;  %4290 = vmatprep.mubr.bf16.mxu0 %v7585_v24  ;;  %v434_v23 = vld [vmem:[%s12651_s0 + $0xd00] sm:$0xff] }
  0xcb   :  { %4579 = vmatprep.mubr.bf16.mxu1 %v7587_v25  ;;  %v442_v24 = vld [vmem:[%s12651_s0 + $0xd40] sm:$0xff] }
  0xd1   :  { %4291 = vmatmul.mubr.bf16.gmra.mxu0 %v7584_v30 }
  0xd2   :  { %4580 = vmatmul.mubr.bf16.gmra.mxu1 %v7586_v31  ;;  %4298 = vmatprep.mubr.bf16.mxu0 %v7601_v32  ;;  %v7698_v31 = vcombine.low %v419_v13, %v427_v14  ;;  %v7713_v32 = vcombine.high %v434_v23, %v442_v24  ;;  %v482_v14 = vld [vmem:[%s12651_s0 + $0xe80] sm:$0xff] }
  0xd3   :  { %4587 = vmatprep.mubr.bf16.mxu1 %v7603_v33 }
  0xd9   :  { %4299 = vmatmul.mubr.bf16.gmra.mxu0 %v7600_v38 }
  0xda   :  { %4588 = vmatmul.mubr.bf16.gmra.mxu1 %v7602_v39  ;;  %4306 = vmatprep.mubr.bf16.mxu0 %v7617_v40 }
  0xdb   :  { %4595 = vmatprep.mubr.bf16.mxu1 %v7619_v41  ;;  %v450_v41 = vld [vmem:[%s12651_s0 + $0xd80] sm:$0xff] }
  0xdc   :  { %v7729_v50 = vcombine.high %v450_v41, %v458_v42 }
  0xe1   :  { %4307 = vmatmul.mubr.bf16.gmra.mxu0 %v7616_v46 }
  0xe2   :  { %4596 = vmatmul.mubr.bf16.gmra.mxu1 %v7618_v47  ;;  %4314 = vmatprep.mubr.bf16.mxu0 %v7633_v48  ;;  %v7712_v47 = vcombine.low %v434_v23, %v442_v24 }
  0xe3   :  { %4603 = vmatprep.mubr.bf16.mxu1 %v7635_v49  ;;  %v7714_v49 = vcombine.low %v435_v26, %v443_v27 }
  0xe9   :  { %4315 = vmatmul.mubr.bf16.gmra.mxu0 %v7632_v54 }
  0xea   :  { %4604 = vmatmul.mubr.bf16.gmra.mxu1 %v7634_v55  ;;  %4322 = vmatprep.mubr.bf16.mxu0 %v7649_v56 }
  0xeb   :  { %4611 = vmatprep.mubr.bf16.mxu1 %v7651_v57 }
  0xf1   :  { %4323 = vmatmul.mubr.bf16.gmra.mxu0 %v7648_v62  ;;  %v467_v62 = vld [vmem:[%s12651_s0 + $0xe08] sm:$0xff] }
  0xf2   :  { %4612 = vmatmul.mubr.bf16.gmra.mxu1 %v7650_v63  ;;  %4330 = vmatprep.mubr.bf16.mxu0 %v7665_v1  ;;  %v475_v63 = vld [vmem:[%s12651_s0 + $0xe48] sm:$0xff] }
  0xf3   :  { %4619 = vmatprep.mubr.bf16.mxu1 %v7667_v2  ;;  %v7728_v2 = vcombine.low %v450_v41, %v458_v42  ;;  %v7746_v23 = vcombine.low %v467_v62, %v475_v63 }
  0xf9   :  { %4331 = vmatmul.mubr.bf16.gmra.mxu0 %v7664_v7 }
  0xfa   :  { %4620 = vmatmul.mubr.bf16.gmra.mxu1 %v7666_v8  ;;  %4338 = vmatprep.mubr.bf16.mxu0 %v7681_v9  ;;  %v7747_v8 = vcombine.high %v467_v62, %v475_v63 }
  0xfb   :  { %4627 = vmatprep.mubr.bf16.mxu1 %v7683_v10 }
 0x101   :  { %v4148_v19 = vpop.f32.mrf.mxu0  ;;  %4339 = vmatmul.mubr.bf16.gmra.mxu0 %v7680_v15  ;;  %v490_v15 = vld [vmem:[%s12651_s0 + $0xec0] sm:$0xff] }
 0x102   :  { %v4437_v20 = vpop.f32.mrf.mxu1  ;;  %4628 = vmatmul.mubr.bf16.gmra.mxu1 %v7682_v16  ;;  %4346 = vmatprep.mubr.bf16.mxu0 %v7697_v17  ;;  %v483_v17 = vld [vmem:[%s12651_s0 + $0xe88] sm:$0xff]  ;;  %v7761_v24 = vcombine.high %v482_v14, %v490_v15  ;;  %v7760_v41 = vcombine.low %v482_v14, %v490_v15  ;;  %v21_v15 = vld [vmem:[%s12651_s0 + $0x18] sm:$0xff] }
 0x103   :  { %v8998_v21 = vadd.f32 %v4437_v20, %v4148_v19  ;;  %v4150_v22 = vpop.f32.mrf.mxu0  ;;  %4635 = vmatprep.mubr.bf16.mxu1 %v7699_v18  ;;  %v491_v18 = vld [vmem:[%s12651_s0 + $0xec8] sm:$0xff]  ;;  %v7744_v20 = vcombine.low %v466_v59, %v474_v60 }
 0x104   :  { %v4439_v25 = vpop.f32.mrf.mxu1  ;;  %v7763_v27 = vcombine.high %v483_v17, %v491_v18  ;;  %v523_v59 = vld [vmem:[%s12651_s0 + $0xfc8] sm:$0xff] }
 0x105   :  { %v4151_v28 = vpop.f32.mrf.mxu0 }
 0x106   :  { %v4440_v30 = vpop.f32.mrf.mxu1 }
 0x107   :  { %v9012_v33 = vadd.f32 %v4440_v30, %v4151_v28  ;;  %v4153_v34 = vpop.f32.mrf.mxu0 }
 0x108   :  { %v4442_v36 = vpop.f32.mrf.mxu1  ;;  %v498_v34 = vld [vmem:[%s12651_s0 + $0xf00] sm:$0xff] }
 0x109   :  { %v4156_v37 = vpop.f32.mrf.mxu0  ;;  %4347 = vmatmul.mubr.bf16.gmra.mxu0 %v7696_v29 }
 0x10a   :  { %v4445_v38 = vpop.f32.mrf.mxu1  ;;  %4636 = vmatmul.mubr.bf16.gmra.mxu1 %v7698_v31  ;;  %4354 = vmatprep.mubr.bf16.mxu0 %v7713_v32 }
 0x10b   :  { %v9014_v39 = vadd.f32 %v4445_v38, %v4156_v37  ;;  %v4158_v40 = vpop.f32.mrf.mxu0  ;;  %4643 = vmatprep.mubr.bf16.mxu1 %v7715_v35  ;;  %v506_v35 = vld [vmem:[%s12651_s0 + $0xf40] sm:$0xff]  ;;  %v499_v37 = vld [vmem:[%s12651_s0 + $0xf08] sm:$0xff] }
 0x10c   :  { %v4447_v43 = vpop.f32.mrf.mxu1  ;;  %v507_v38 = vld [vmem:[%s12651_s0 + $0xf48] sm:$0xff]  ;;  %v7777_v44 = vcombine.high %v498_v34, %v506_v35 }
 0x10d   :  { %v4159_v46 = vpop.f32.mrf.mxu0  ;;  %v7762_v43 = vcombine.low %v483_v17, %v491_v18  ;;  %v7778_v63 = vcombine.low %v499_v37, %v507_v38 }
 0x10e   :  { %v4448_v48 = vpop.f32.mrf.mxu1 }
 0x10f   :  { %v9028_v51 = vadd.f32 %v4448_v48, %v4159_v46  ;;  %v4161_v52 = vpop.f32.mrf.mxu0 }
 0x110   :  { %v4450_v54 = vpop.f32.mrf.mxu1 }
 0x111   :  { %v4164_v55 = vpop.f32.mrf.mxu0  ;;  %4355 = vmatmul.mubr.bf16.gmra.mxu0 %v7712_v47  ;;  %v7779_v47 = vcombine.high %v499_v37, %v507_v38  ;;  %v514_v54 = vld [vmem:[%s12651_s0 + $0xf80] sm:$0xff] }
 0x112   :  { %v4453_v56 = vpop.f32.mrf.mxu1  ;;  %4644 = vmatmul.mubr.bf16.gmra.mxu1 %v7714_v49  ;;  %4362 = vmatprep.mubr.bf16.mxu0 %v7729_v50 }
 0x113   :  { %v9030_v57 = vadd.f32 %v4453_v56, %v4164_v55  ;;  %v4166_v58 = vpop.f32.mrf.mxu0  ;;  %4651 = vmatprep.mubr.bf16.mxu1 %v7731_v53  ;;  %v522_v55 = vld [vmem:[%s12651_s0 + $0xfc0] sm:$0xff] }
 0x114   :  { %v4455_v61 = vpop.f32.mrf.mxu1  ;;  %v515_v58 = vld [vmem:[%s12651_s0 + $0xf88] sm:$0xff]  ;;  %v7792_v18 = vcombine.low %v514_v54, %v522_v55 }
 0x115   :  { %v4167_v1 = vpop.f32.mrf.mxu0  ;;  %v7776_v61 = vcombine.low %v498_v34, %v506_v35  ;;  %v36_v35 = vld [vmem:[%s12651_s0 + $0x90] sm:$0xff] }
 0x116   :  { %v4456_v3 = vpop.f32.mrf.mxu1 }
 0x117   :  { %v9044_v6 = vadd.f32 %v4456_v3, %v4167_v1  ;;  %v4169_v7 = vpop.f32.mrf.mxu0  ;;  %v7793_v1 = vcombine.high %v514_v54, %v522_v55 }
 0x118   :  { %v4458_v9 = vpop.f32.mrf.mxu1 }
 0x119   :  { %v4172_v10 = vpop.f32.mrf.mxu0  ;;  %4363 = vmatmul.mubr.bf16.gmra.mxu0 %v7728_v2 }
 0x11a   :  { %v4461_v11 = vpop.f32.mrf.mxu1  ;;  %4652 = vmatmul.mubr.bf16.gmra.mxu1 %v7730_v4  ;;  %4370 = vmatprep.mubr.bf16.mxu0 %v7745_v5  ;;  %v7795_v4 = vcombine.high %v515_v58, %v523_v59 }
 0x11b   :  { %v9046_v12 = vadd.f32 %v4461_v11, %v4172_v10  ;;  %v4174_v13 = vpop.f32.mrf.mxu0  ;;  %4659 = vmatprep.mubr.bf16.mxu1 %v7747_v8  ;;  %v20_v11 = vld [vmem:[%s12651_s0 + $0x10] sm:$0xff] }
 0x11c   :  { %v4463_v16 = vpop.f32.mrf.mxu1  ;;  %v28_v13 = vld [vmem:[%s12651_s0 + $0x50] sm:$0xff] }
 0x11d   :  { %v4175_v19 = vpop.f32.mrf.mxu0  ;;  %v29_v16 = vld [vmem:[%s12651_s0 + $0x58] sm:$0xff]  ;;  %v7300_v38 = vcombine.low %v20_v11, %v28_v13 }
 0x11e   :  { %v4464_v22 = vpop.f32.mrf.mxu1 }
 0x11f   :  { %v9060_v25 = vadd.f32 %v4464_v22, %v4175_v19  ;;  %v4177_v26 = vpop.f32.mrf.mxu0  ;;  %v7301_v22 = vcombine.high %v20_v11, %v28_v13 }
 0x120   :  { %v4466_v28 = vpop.f32.mrf.mxu1  ;;  %v7303_v26 = vcombine.high %v21_v15, %v29_v16 }
 0x121   :  { %v4180_v29 = vpop.f32.mrf.mxu0  ;;  %4371 = vmatmul.mubr.bf16.gmra.mxu0 %v7744_v20  ;;  %v7794_v20 = vcombine.low %v515_v58, %v523_v59 }
 0x122   :  { %v4469_v30 = vpop.f32.mrf.mxu1  ;;  %4660 = vmatmul.mubr.bf16.gmra.mxu1 %v7746_v23  ;;  %4378 = vmatprep.mubr.bf16.mxu0 %v7761_v24 }
 0x123   :  { %v9062_v31 = vadd.f32 %v4469_v30, %v4180_v29  ;;  %v4182_v32 = vpop.f32.mrf.mxu0  ;;  %4667 = vmatprep.mubr.bf16.mxu1 %v7763_v27 }
 0x124   :  { %v4471_v36 = vpop.f32.mrf.mxu1 }
 0x125   :  { %v4183_v40 = vpop.f32.mrf.mxu0  ;;  %v44_v36 = vld [vmem:[%s12651_s0 + $0xd0] sm:$0xff] }
 0x126   :  { %v4472_v42 = vpop.f32.mrf.mxu1 }
 0x127   :  { %v9076_v45 = vadd.f32 %v4472_v42, %v4183_v40  ;;  %v4185_v46 = vpop.f32.mrf.mxu0  ;;  %v37_v40 = vld [vmem:[%s12651_s0 + $0x98] sm:$0xff] }
 0x128   :  { %v4474_v48 = vpop.f32.mrf.mxu1 }
 0x129   :  { %v4188_v49 = vpop.f32.mrf.mxu0  ;;  %4379 = vmatmul.mubr.bf16.gmra.mxu0 %v7760_v41  ;;  %v45_v41 = vld [vmem:[%s12651_s0 + $0xd8] sm:$0xff] }
 0x12a   :  { %v4477_v50 = vpop.f32.mrf.mxu1  ;;  %4668 = vmatmul.mubr.bf16.gmra.mxu1 %v7762_v43  ;;  %4386 = vmatprep.mubr.bf16.mxu0 %v7777_v44  ;;  %v7302_v43 = vcombine.low %v21_v15, %v29_v16  ;;  %v8320_v44 = vld [vmem:[%s12650_s1 + $0x238] sm:$0xff]   ;;  %v8324_v15 = vld [vmem:[%s12650_s1 + $0x228] sm:$0xff]  }
 0x12b   :  { %v9078_v52 = vadd.f32 %v4477_v50, %v4188_v49  ;;  %v4190_v53 = vpop.f32.mrf.mxu0  ;;  %4675 = vmatprep.mubr.bf16.mxu1 %v7779_v47  ;;  %v8321_v48 = vld [vmem:[%s12650_s1 + $0x2b8] sm:$0xff]   ;;  %v7317_v49 = vcombine.high %v36_v35, %v44_v36 }
 0x12c   :  { %v4479_v56 = vpop.f32.mrf.mxu1  ;;  %v7319_v53 = vcombine.high %v37_v40, %v45_v41 }
 0x12d   :  { %v4191_v60 = vpop.f32.mrf.mxu0  ;;  %v8322_v56 = vld [vmem:[%s12650_s1 + $0x230] sm:$0xff]  }
 0x12e   :  { %v4480_v62 = vpop.f32.mrf.mxu1 }
 0x12f   :  { %v9092_v2 = vadd.f32 %v4480_v62, %v4191_v60  ;;  %v4193_v3 = vpop.f32.mrf.mxu0  ;;  %v52_v60 = vld [vmem:[%s12651_s0 + $0x110] sm:$0xff] }
 0x130   :  { %v4482_v5 = vpop.f32.mrf.mxu1  ;;  %v8323_v62 = vld [vmem:[%s12650_s1 + $0x2b0] sm:$0xff]   ;;  %v61_v3 = vld [vmem:[%s12651_s0 + $0x158] sm:$0xff] }
 0x131   :  { %v4196_v7 = vpop.f32.mrf.mxu0  ;;  %4387 = vmatmul.mubr.bf16.gmra.mxu0 %v7776_v61  ;;  %v60_v61 = vld [vmem:[%s12651_s0 + $0x150] sm:$0xff]  ;;  %v7316_v5 = vcombine.low %v36_v35, %v44_v36 }
 0x132   :  { %v4485_v8 = vpop.f32.mrf.mxu1  ;;  %4676 = vmatmul.mubr.bf16.gmra.mxu1 %v7778_v63  ;;  %4394 = vmatprep.mubr.bf16.mxu0 %v7793_v1  ;;  %v53_v1 = vld [vmem:[%s12651_s0 + $0x118] sm:$0xff]  ;;  %v7332_v36 = vcombine.low %v52_v60, %v60_v61 }
 0x133   :  { %v9094_v9 = vadd.f32 %v4485_v8, %v4196_v7  ;;  %v4198_v10 = vpop.f32.mrf.mxu0  ;;  %4683 = vmatprep.mubr.bf16.mxu1 %v7795_v4  ;;  %v7318_v8 = vcombine.low %v37_v40, %v45_v41 }
 0x134   :  { %v4487_v14 = vpop.f32.mrf.mxu1  ;;  %v7333_v10 = vcombine.high %v52_v60, %v60_v61  ;;  %v85_v61 = vld [vmem:[%s12651_s0 + $0x218] sm:$0xff] }
 0x135   :  { %v4199_v17 = vpop.f32.mrf.mxu0  ;;  %v7335_v14 = vcombine.high %v53_v1, %v61_v3 }
 0x136   :  { %v4488_v19 = vpop.f32.mrf.mxu1 }
 0x137   :  { %v9108_v23 = vadd.f32 %v4488_v19, %v4199_v17  ;;  %v4201_v24 = vpop.f32.mrf.mxu0  ;;  %v8325_v17 = vld [vmem:[%s12650_s1 + $0x2a8] sm:$0xff]  }
 0x138   :  { %v4490_v27 = vpop.f32.mrf.mxu1  ;;  %v68_v24 = vld [vmem:[%s12651_s0 + $0x190] sm:$0xff] }
 0x139   :  { %v4204_v28 = vpop.f32.mrf.mxu0  ;;  %4395 = vmatmul.mubr.bf16.gmra.mxu0 %v7792_v18  ;;  %v8326_v27 = vld [vmem:[%s12650_s1 + $0x220] sm:$0xff]  }
 0x13a   :  { %v4493_v29 = vpop.f32.mrf.mxu1  ;;  %4684 = vmatmul.mubr.bf16.gmra.mxu1 %v7794_v20  ;;  %4724 = vmatprep.mubr.bf16.mxu0 %v7301_v22 }
 0x13b   :  { %v9110_v30 = vadd.f32 %v4493_v29, %v4204_v28  ;;  %v4206_v32 = vpop.f32.mrf.mxu0  ;;  %5013 = vmatprep.mubr.bf16.mxu1 %v7303_v26  ;;  %v76_v26 = vld [vmem:[%s12651_s0 + $0x1d0] sm:$0xff]  ;;  %v69_v29 = vld [vmem:[%s12651_s0 + $0x198] sm:$0xff] }
 0x13c   :  { %v4495_v34 = vpop.f32.mrf.mxu1  ;;  %v77_v32 = vld [vmem:[%s12651_s0 + $0x1d8] sm:$0xff]  ;;  %v7349_v40 = vcombine.high %v68_v24, %v76_v26 }
 0x13d   :  { %v4207_v37 = vpop.f32.mrf.mxu0  ;;  %v8327_v34 = vld [vmem:[%s12650_s1 + $0x2a0] sm:$0xff]  }
 0x13e   :  { %v4496_v42 = vpop.f32.mrf.mxu1 }
 0x13f   :  { %v9127_v46 = vadd.f32 %v4496_v42, %v4207_v37  ;;  %v4209_v47 = vpop.f32.mrf.mxu0 }
 0x140   :  { %v4498_v50 = vpop.f32.mrf.mxu1 }
 0x141   :  { %v4212_v54 = vpop.f32.mrf.mxu0  ;;  %4725 = vmatmul.mubr.bf16.vlgmr.msra.gmra.mxu0 %v7300_v38  ;;  %v7334_v38 = vcombine.low %v53_v1, %v61_v3  ;;  %v7348_v3 = vcombine.low %v68_v24, %v76_v26  ;;  %v100_v24 = vld [vmem:[%s12651_s0 + $0x290] sm:$0xff] }
 0x142   :  { %v4501_v55 = vpop.f32.mrf.mxu1  ;;  %5014 = vmatmul.mubr.bf16.vlgmr.msra.gmra.mxu1 %v7302_v43  ;;  %5271 = vmatpush1.bf16.msra.mxu0 %v8320_v44  ;;  %v7351_v43 = vcombine.high %v69_v29, %v77_v32  ;;  %v8328_v44 = vld [vmem:[%s12650_s1 + $0x218] sm:$0xff]   ;;  %v108_v26 = vld [vmem:[%s12651_s0 + $0x2d0] sm:$0xff] }
 0x143   :  { %v9135_v58 = vadd.f32 %v4501_v55, %v4212_v54  ;;  %v4214_v59 = vpop.f32.mrf.mxu0  ;;  %5560 = vmatpush1.bf16.msra.mxu1 %v8321_v48  ;;  %4732 = vmatprep.mubr.bf16.mxu0 %v7317_v49  ;;  %v8329_v48 = vld [vmem:[%s12650_s1 + $0x298] sm:$0xff]   ;;  %v84_v55 = vld [vmem:[%s12651_s0 + $0x210] sm:$0xff] }
 0x144   :  { %v4503_v63 = vpop.f32.mrf.mxu1  ;;  %5021 = vmatprep.mubr.bf16.mxu1 %v7319_v53  ;;  %5272 = vmatprep.subr.bf16.mxu0 %v12655_v0  ;;  %v8330_v59 = vld [vmem:[%s12650_s1 + $0x210] sm:$0xff]  }
 0x145   :  { %v4215_v4 = vpop.f32.mrf.mxu0  ;;  %5561 = vmatprep.subr.bf16.mxu1 %v12655_v0  ;;  %v8331_v63 = vld [vmem:[%s12650_s1 + $0x290] sm:$0xff]  }
 0x146   :  { %v4504_v7 = vpop.f32.mrf.mxu1  ;;  %5273 = vmatpush1.bf16.msra.mxu0 %v8322_v56  ;;  %v92_v56 = vld [vmem:[%s12651_s0 + $0x250] sm:$0xff] }
 0x147   :  { %v9154_v11 = vadd.f32 %v4504_v7, %v4215_v4  ;;  %v4217_v13 = vpop.f32.mrf.mxu0  ;;  %5562 = vmatpush1.bf16.msra.mxu1 %v8323_v62  ;;  %5274 = vmatprep.subr.bf16.mxu0 %v12655_v0  ;;  %v93_v62 = vld [vmem:[%s12651_s0 + $0x258] sm:$0xff]  ;;  %v7365_v7 = vcombine.high %v84_v55, %v92_v56 }
 0x148   :  { %v4506_v16 = vpop.f32.mrf.mxu1  ;;  %5563 = vmatprep.subr.bf16.mxu1 %v12655_v0  ;;  %v7367_v13 = vcombine.high %v85_v61, %v93_v62 }
 0x149   :  { %v4220_v18 = vpop.f32.mrf.mxu0  ;;  %4733 = vmatmul.mubr.bf16.gmra.mxu0 %v7316_v5  ;;  %v7350_v5 = vcombine.low %v69_v29, %v77_v32  ;;  %v8333_v16 = vld [vmem:[%s12650_s1 + $0x288] sm:$0xff]   ;;  %v101_v29 = vld [vmem:[%s12651_s0 + $0x298] sm:$0xff] }
 0x14a   :  { %v4509_v19 = vpop.f32.mrf.mxu1  ;;  %5022 = vmatmul.mubr.bf16.gmra.mxu1 %v7318_v8  ;;  %4740 = vmatprep.mubr.bf16.mxu0 %v7333_v10  ;;  %v109_v32 = vld [vmem:[%s12651_s0 + $0x2d8] sm:$0xff] }
 0x14b   :  { %v9164_v20 = vadd.f32 %v4509_v19, %v4220_v18  ;;  %v4222_v22 = vpop.f32.mrf.mxu0  ;;  %5029 = vmatprep.mubr.bf16.mxu1 %v7335_v14  ;;  %5275 = vmatpush1.bf16.msra.mxu0 %v8324_v15  ;;  %v8332_v14 = vld [vmem:[%s12650_s1 + $0x208] sm:$0xff]  }
 0x14c   :  { %v4511_v28 = vpop.f32.mrf.mxu1  ;;  %5564 = vmatpush1.bf16.msra.mxu1 %v8325_v17  ;;  %5276 = vmatprep.subr.bf16.mxu0 %v12655_v0 }
 0x14d   :  { %v4223_v35 = vpop.f32.mrf.mxu0  ;;  %5565 = vmatprep.subr.bf16.mxu1 %v12655_v0 }
 0x14e   :  { %v4512_v37 = vpop.f32.mrf.mxu1 }
 0x14f   :  { %v9186_v41 = vadd.f32 %v4512_v37, %v4223_v35  ;;  %v4225_v42 = vpop.f32.mrf.mxu0  ;;  %5277 = vmatpush1.bf16.msra.mxu0 %v8326_v27  ;;  %v8334_v27 = vld [vmem:[%s12650_s1 + $0x200] sm:$0xff]  }
 0x150   :  { %v4514_v47 = vpop.f32.mrf.mxu1  ;;  %5566 = vmatpush1.bf16.msra.mxu1 %v8327_v34  ;;  %5278 = vmatprep.subr.bf16.mxu0 %v12655_v0  ;;  %v8335_v34 = vld [vmem:[%s12650_s1 + $0x280] sm:$0xff]  }
 0x151   :  { %v4228_v49 = vpop.f32.mrf.mxu0  ;;  %4741 = vmatmul.mubr.bf16.gmra.mxu0 %v7332_v36  ;;  %5567 = vmatprep.subr.bf16.mxu1 %v12655_v0  ;;  %v7364_v36 = vcombine.low %v84_v55, %v92_v56  ;;  %v8336_v47 = vld [vmem:[%s12650_s1 + $0x278] sm:$0xff]  }
 0x152   :  { %v4517_v50 = vpop.f32.mrf.mxu1  ;;  %5030 = vmatmul.mubr.bf16.gmra.mxu1 %v7334_v38  ;;  %4748 = vmatprep.mubr.bf16.mxu0 %v7349_v40  ;;  %v7366_v38 = vcombine.low %v85_v61, %v93_v62  ;;  %v7381_v40 = vcombine.high %v100_v24, %v108_v26  ;;  %v8338_v61 = vld [vmem:[%s12650_s1 + $0x270] sm:$0xff]  }
 0x153   :  { %v9196_v53 = vadd.f32 %v4517_v50, %v4228_v49  ;;  %v4230_v54 = vpop.f32.mrf.mxu0  ;;  %5037 = vmatprep.mubr.bf16.mxu1 %v7351_v43  ;;  %5279 = vmatpush1.bf16.msra.mxu0 %v8328_v44  ;;  %v7383_v44 = vcombine.high %v101_v29, %v109_v32  ;;  %v8337_v49 = vld [vmem:[%s12650_s1 + $0x2f8] sm:$0xff]  }
 0x154   :  { %v4519_v60 = vpop.f32.mrf.mxu1  ;;  %5568 = vmatpush1.bf16.msra.mxu1 %v8329_v48  ;;  %5280 = vmatprep.subr.bf16.mxu0 %v12655_v0 }
 0x155   :  { %v4231_v1 = vpop.f32.mrf.mxu0  ;;  %5569 = vmatprep.subr.bf16.mxu1 %v12655_v0  ;;  %v124_v60 = vld [vmem:[%s12651_s0 + $0x350] sm:$0xff] }
 0x156   :  { %v4520_v4 = vpop.f32.mrf.mxu1 }
 0x157   :  { %v9218_v8 = vadd.f32 %v4520_v4, %v4231_v1  ;;  %v4233_v10 = vpop.f32.mrf.mxu0  ;;  %5281 = vmatpush1.bf16.msra.mxu0 %v8330_v59  ;;  %v116_v59 = vld [vmem:[%s12651_s0 + $0x310] sm:$0xff]  ;;  %v125_v1 = vld [vmem:[%s12651_s0 + $0x358] sm:$0xff] }
 0x158   :  { %v4522_v15 = vpop.f32.mrf.mxu1  ;;  %5570 = vmatpush1.bf16.msra.mxu1 %v8331_v63  ;;  %5282 = vmatprep.subr.bf16.mxu0 %v12655_v0  ;;  %v117_v63 = vld [vmem:[%s12651_s0 + $0x318] sm:$0xff]  ;;  %v7382_v10 = vcombine.low %v101_v29, %v109_v32  ;;  %v132_v29 = vld [vmem:[%s12651_s0 + $0x390] sm:$0xff] }
 0x159   :  { %v4236_v17 = vpop.f32.mrf.mxu0  ;;  %4749 = vmatmul.mubr.bf16.gmra.mxu0 %v7348_v3  ;;  %5571 = vmatprep.subr.bf16.mxu1 %v12655_v0  ;;  %v8339_v3 = vld [vmem:[%s12650_s1 + $0x2f0] sm:$0xff]  }
 0x15a   :  { %v4525_v18 = vpop.f32.mrf.mxu1  ;;  %5038 = vmatmul.mubr.bf16.gmra.mxu1 %v7350_v5  ;;  %4756 = vmatprep.mubr.bf16.mxu0 %v7365_v7  ;;  %v7380_v5 = vcombine.low %v100_v24, %v108_v26  ;;  %v140_v32 = vld [vmem:[%s12651_s0 + $0x3d0] sm:$0xff] }
 0x15b   :  { %v9228_v19 = vadd.f32 %v4525_v18, %v4236_v17  ;;  %v4238_v22 = vpop.f32.mrf.mxu0  ;;  %5045 = vmatprep.mubr.bf16.mxu1 %v7367_v13  ;;  %5283 = vmatpush1.bf16.msra.mxu0 %v8332_v14  ;;  %v7397_v13 = vcombine.high %v116_v59, %v124_v60  ;;  %v8340_v17 = vld [vmem:[%s12650_s1 + $0x268] sm:$0xff]  }
 0x15c   :  { %v4527_v28 = vpop.f32.mrf.mxu1  ;;  %5572 = vmatpush1.bf16.msra.mxu1 %v8333_v16  ;;  %5284 = vmatprep.subr.bf16.mxu0 %v12655_v0  ;;  %v7399_v16 = vcombine.high %v117_v63, %v125_v1  ;;  %v8341_v22 = vld [vmem:[%s12650_s1 + $0x2e8] sm:$0xff]  }
 0x15d   :  { %v4239_v35 = vpop.f32.mrf.mxu0  ;;  %5573 = vmatprep.subr.bf16.mxu1 %v12655_v0 }
 0x15e   :  { %v4528_v37 = vpop.f32.mrf.mxu1 }
 0x15f   :  { %v9250_v42 = vadd.f32 %v4528_v37, %v4239_v35  ;;  %v4241_v43 = vpop.f32.mrf.mxu0  ;;  %5285 = vmatpush1.bf16.msra.mxu0 %v8334_v27  ;;  %v133_v35 = vld [vmem:[%s12651_s0 + $0x398] sm:$0xff] }
 0x160   :  { %v4530_v48 = vpop.f32.mrf.mxu1  ;;  %5574 = vmatpush1.bf16.msra.mxu1 %v8335_v34  ;;  %5286 = vmatprep.subr.bf16.mxu0 %v12655_v0  ;;  %v7398_v43 = vcombine.low %v117_v63, %v125_v1  ;;  %v8342_v63 = vld [vmem:[%s12650_s1 + $0x260] sm:$0xff]  }
 0x161   :  { %v4244_v50 = vpop.f32.mrf.mxu0  ;;  %4757 = vmatmul.mubr.bf16.gmra.mxu0 %v7364_v36  ;;  %5575 = vmatprep.subr.bf16.mxu1 %v12655_v0  ;;  %v141_v36 = vld [vmem:[%s12651_s0 + $0x3d8] sm:$0xff] }
 0x162   :  { %v4533_v54 = vpop.f32.mrf.mxu1  ;;  %5046 = vmatmul.mubr.bf16.gmra.mxu1 %v7366_v38  ;;  %4764 = vmatprep.mubr.bf16.mxu0 %v7381_v40  ;;  %v7396_v38 = vcombine.low %v116_v59, %v124_v60  ;;  %v148_v59 = vld [vmem:[%s12651_s0 + $0x410] sm:$0xff] }
 0x163   :  { %v9260_v55 = vadd.f32 %v4533_v54, %v4244_v50  ;;  %v4246_v56 = vpop.f32.mrf.mxu0  ;;  %5053 = vmatprep.mubr.bf16.mxu1 %v7383_v44  ;;  %5287 = vmatpush2.bf16.msra.mxu0 %v8336_v47  ;;  %v7413_v44 = vcombine.high %v132_v29, %v140_v32  ;;  %v156_v60 = vld [vmem:[%s12651_s0 + $0x450] sm:$0xff] }
 0x164   :  { %v4535_v62 = vpop.f32.mrf.mxu1  ;;  %5576 = vmatpush2.bf16.msra.mxu1 %v8337_v49  ;;  %5288 = vmatprep.subr.bf16.mxu0 %v12655_v0  ;;  %v7415_v49 = vcombine.high %v133_v35, %v141_v36 }
 0x165   :  { %v4247_v4 = vpop.f32.mrf.mxu0  ;;  %5577 = vmatprep.subr.bf16.mxu1 %v12655_v0 }
 0x166   :  { %v4536_v7 = vpop.f32.mrf.mxu1 }
 0x167   :  { %v9282_v14 = vadd.f32 %v4536_v7, %v4247_v4  ;;  %v4249_v15 = vpop.f32.mrf.mxu0  ;;  %5289 = vmatpush2.bf16.msra.mxu0 %v8338_v61  ;;  %v157_v4 = vld [vmem:[%s12651_s0 + $0x458] sm:$0xff] }
 0x168   :  { %v4538_v18 = vpop.f32.mrf.mxu1  ;;  %5578 = vmatpush2.bf16.msra.mxu1 %v8339_v3  ;;  %5290 = vmatprep.subr.bf16.mxu0 %v12655_v0  ;;  %v149_v3 = vld [vmem:[%s12651_s0 + $0x418] sm:$0xff]  ;;  %v7414_v15 = vcombine.low %v133_v35, %v141_v36  ;;  %v172_v35 = vld [vmem:[%s12651_s0 + $0x4d0] sm:$0xff] }
 0x169   :  { %v4252_v24 = vpop.f32.mrf.mxu0  ;;  %4765 = vmatmul.mubr.bf16.gmra.mxu0 %v7380_v5  ;;  %5579 = vmatprep.subr.bf16.mxu1 %v12655_v0  ;;  %v8343_v5 = vld [vmem:[%s12650_s1 + $0x2e0] sm:$0xff]  }
 0x16a   :  { %v4541_v26 = vpop.f32.mrf.mxu1  ;;  %5054 = vmatmul.mubr.bf16.gmra.mxu1 %v7382_v10  ;;  %4772 = vmatprep.mubr.bf16.mxu0 %v7397_v13  ;;  %v7412_v10 = vcombine.low %v132_v29, %v140_v32 }
 0x16b   :  { %v9292_v27 = vadd.f32 %v4541_v26, %v4252_v24  ;;  %v4254_v28 = vpop.f32.mrf.mxu0  ;;  %5061 = vmatprep.mubr.bf16.mxu1 %v7399_v16  ;;  %5291 = vmatpush2.bf16.msra.mxu0 %v8340_v17  ;;  %v7429_v16 = vcombine.high %v148_v59, %v156_v60 }
 0x16c   :  { %v4543_v34 = vpop.f32.mrf.mxu1  ;;  %5580 = vmatpush2.bf16.msra.mxu1 %v8341_v22  ;;  %5292 = vmatprep.subr.bf16.mxu0 %v12655_v0  ;;  %v7431_v22 = vcombine.high %v149_v3, %v157_v4 }
 0x16d   :  { %v4255_v37 = vpop.f32.mrf.mxu0  ;;  %5581 = vmatprep.subr.bf16.mxu1 %v12655_v0  ;;  %v164_v34 = vld [vmem:[%s12651_s0 + $0x490] sm:$0xff] }
 0x16e   :  { %v4544_v40 = vpop.f32.mrf.mxu1 }
 0x16f   :  { %v9308_v47 = vadd.f32 %v4544_v40, %v4255_v37  ;;  %v4257_v48 = vpop.f32.mrf.mxu0  ;;  %5293 = vmatpush2.bf16.msra.mxu0 %v8342_v63  ;;  %v165_v37 = vld [vmem:[%s12651_s0 + $0x498] sm:$0xff] }
 0x170   :  { %v4546_v50 = vpop.f32.mrf.mxu1  ;;  %5582 = vmatpush2.bf16.msra.mxu1 %v8343_v5  ;;  %5294 = vmatprep.subr.bf16.mxu0 %v12655_v0  ;;  %v7430_v48 = vcombine.low %v149_v3, %v157_v4  ;;  %v181_v3 = vld [vmem:[%s12651_s0 + $0x518] sm:$0xff] }
 0x171   :  { %v4260_v54 = vpop.f32.mrf.mxu0  ;;  %4773 = vmatmul.mubr.bf16.gmra.mxu0 %v7396_v38  ;;  %5583 = vmatprep.subr.bf16.mxu1 %v12655_v0  ;;  %v173_v38 = vld [vmem:[%s12651_s0 + $0x4d8] sm:$0xff] }
 0x172   :  { %v4549_v56 = vpop.f32.mrf.mxu1  ;;  %5062 = vmatmul.mubr.bf16.gmra.mxu1 %v7398_v43  ;;  %4780 = vmatprep.mubr.bf16.mxu0 %v7413_v44  ;;  %v7428_v43 = vcombine.low %v148_v59, %v156_v60  ;;  %v180_v59 = vld [vmem:[%s12651_s0 + $0x510] sm:$0xff] }
 0x173   :  { %v9310_v61 = vadd.f32 %v4549_v56, %v4260_v54  ;;  %v4262_v62 = vpop.f32.mrf.mxu0  ;;  %5069 = vmatprep.mubr.bf16.mxu1 %v7415_v49  ;;  %v7445_v49 = vcombine.high %v164_v34, %v172_v35  ;;  %v7447_v56 = vcombine.high %v165_v37, %v173_v38  ;;  %v188_v60 = vld [vmem:[%s12651_s0 + $0x550] sm:$0xff] }
 0x174   :  { %v4551_v1 = vpop.f32.mrf.mxu1 }
 0x175   :  { %v4263_v7 = vpop.f32.mrf.mxu0 }
 0x176   :  { %v4552_v13 = vpop.f32.mrf.mxu1 }
 0x177   :  { %v9331_v17 = vadd.f32 %v4552_v13, %v4263_v7  ;;  %v4265_v18 = vpop.f32.mrf.mxu0  ;;  %v8344_v13 = vld [vmem:[%s12650_s1 + $0x258] sm:$0xff]  }
 0x178   :  { %v4554_v24 = vpop.f32.mrf.mxu1  ;;  %v7444_v18 = vcombine.low %v164_v34, %v172_v35  ;;  %5295 = vmatpush2.bf16.msra.mxu0 %v8344_v13 }
 0x179   :  { %v4268_v26 = vpop.f32.mrf.mxu0  ;;  %4781 = vmatmul.mubr.bf16.gmra.mxu0 %v7412_v10  ;;  %v189_v10 = vld [vmem:[%s12651_s0 + $0x558] sm:$0xff]  ;;  %v7446_v24 = vcombine.low %v165_v37, %v173_v38  ;;  %5296 = vmatprep.subr.bf16.mxu0 %v12655_v0  ;;  %v196_v37 = vld [vmem:[%s12651_s0 + $0x590] sm:$0xff] }
 0x17a   :  { %v4557_v28 = vpop.f32.mrf.mxu1  ;;  %5070 = vmatmul.mubr.bf16.gmra.mxu1 %v7414_v15  ;;  %4788 = vmatprep.mubr.bf16.mxu0 %v7429_v16  ;;  %v8345_v15 = vld [vmem:[%s12650_s1 + $0x2d8] sm:$0xff]   ;;  %v204_v38 = vld [vmem:[%s12651_s0 + $0x5d0] sm:$0xff] }
 0x17b   :  { %v9334_v29 = vadd.f32 %v4557_v28, %v4268_v26  ;;  %v4270_v32 = vpop.f32.mrf.mxu0  ;;  %5077 = vmatprep.mubr.bf16.mxu1 %v7431_v22  ;;  %v7461_v26 = vcombine.high %v180_v59, %v188_v60  ;;  %5584 = vmatpush2.bf16.msra.mxu1 %v8345_v15 }
 0x17c   :  { %v4559_v36 = vpop.f32.mrf.mxu1  ;;  %5585 = vmatprep.subr.bf16.mxu1 %v12655_v0 }
 0x17d   :  { %v4271_v40 = vpop.f32.mrf.mxu0  ;;  %v7463_v36 = vcombine.high %v181_v3, %v189_v10 }
 0x17e   :  { %v4560_v44 = vpop.f32.mrf.mxu1 }
 0x17f   :  { %v9348_v50 = vadd.f32 %v4560_v44, %v4271_v40  ;;  %v4273_v54 = vpop.f32.mrf.mxu0 }
 0x180   :  { %v4562_v62 = vpop.f32.mrf.mxu1  ;;  %v205_v54 = vld [vmem:[%s12651_s0 + $0x5d8] sm:$0xff] }
 0x181   :  { %v4276_v63 = vpop.f32.mrf.mxu0  ;;  %4789 = vmatmul.mubr.bf16.gmra.mxu0 %v7428_v43  ;;  %v7460_v62 = vcombine.low %v180_v59, %v188_v60  ;;  %v212_v59 = vld [vmem:[%s12651_s0 + $0x610] sm:$0xff] }
 0x182   :  { %v4565_v1 = vpop.f32.mrf.mxu1  ;;  %5078 = vmatmul.mubr.bf16.gmra.mxu1 %v7430_v48  ;;  %4796 = vmatprep.mubr.bf16.mxu0 %v7445_v49  ;;  %v197_v49 = vld [vmem:[%s12651_s0 + $0x598] sm:$0xff]  ;;  %v220_v60 = vld [vmem:[%s12651_s0 + $0x650] sm:$0xff] }
 0x183   :  { %v9350_v5 = vadd.f32 %v4565_v1, %v4276_v63  ;;  %v4278_v7 = vpop.f32.mrf.mxu0  ;;  %5085 = vmatprep.mubr.bf16.mxu1 %v7447_v56  ;;  %v7462_v1 = vcombine.low %v181_v3, %v189_v10  ;;  %v7479_v15 = vcombine.high %v197_v49, %v205_v54  ;;  %v213_v3 = vld [vmem:[%s12651_s0 + $0x618] sm:$0xff] }
 0x184   :  { %v4567_v4 = vpop.f32.mrf.mxu1  ;;  %v7477_v7 = vcombine.high %v196_v37, %v204_v38 }
 0x185   :  { %v4279_v16 = vpop.f32.mrf.mxu0 }
 0x186   :  { %v4568_v22 = vpop.f32.mrf.mxu1 }
 0x187   :  { %v9370_v28 = vadd.f32 %v4568_v22, %v4279_v16  ;;  %v4281_v32 = vpop.f32.mrf.mxu0 }
 0x188   :  { %v4570_v40 = vpop.f32.mrf.mxu1  ;;  %v221_v32 = vld [vmem:[%s12651_s0 + $0x658] sm:$0xff] }
 0x189   :  { %v4284_v43 = vpop.f32.mrf.mxu0  ;;  %4797 = vmatmul.mubr.bf16.gmra.mxu0 %v7444_v18  ;;  %v8347_v40 = vld [vmem:[%s12650_s1 + $0x2d0] sm:$0xff]  }
 0x18a   :  { %v4573_v44 = vpop.f32.mrf.mxu1  ;;  %5086 = vmatmul.mubr.bf16.gmra.mxu1 %v7446_v24  ;;  %4804 = vmatprep.mubr.bf16.mxu0 %v7461_v26 }
 0x18b   :  { %v9374_v34 = vadd.f32 %v4573_v44, %v4284_v43  ;;  %v4286_v35 = vpop.f32.mrf.mxu0  ;;  %5093 = vmatprep.mubr.bf16.mxu1 %v7463_v36  ;;  %v8346_v36 = vld [vmem:[%s12650_s1 + $0x250] sm:$0xff]   ;;  %v7476_v44 = vcombine.low %v196_v37, %v204_v38  ;;  %5586 = vmatpush2.bf16.msra.mxu1 %v8347_v40  ;;  %v7494_v40 = vcombine.low %v213_v3, %v221_v32 }
 0x18c   :  { %v4575_v48 = vpop.f32.mrf.mxu1  ;;  %5297 = vmatpush2.bf16.msra.mxu0 %v8346_v36  ;;  %5587 = vmatprep.subr.bf16.mxu1 %v12655_v0 }
 0x18d   :  { %v4287_v56 = vpop.f32.mrf.mxu0  ;;  %v7478_v48 = vcombine.low %v197_v49, %v205_v54  ;;  %5298 = vmatprep.subr.bf16.mxu0 %v12655_v0  ;;  %v228_v49 = vld [vmem:[%s12651_s0 + $0x690] sm:$0xff] }
 0x18e   :  { %v4576_v63 = vpop.f32.mrf.mxu1  ;;  %v236_v54 = vld [vmem:[%s12651_s0 + $0x6d0] sm:$0xff] }
 0x18f   :  { %v9388_v4 = vadd.f32 %v4576_v63, %v4287_v56  ;;  %v4289_v13 = vpop.f32.mrf.mxu0  ;;  %v7493_v56 = vcombine.high %v212_v59, %v220_v60 }
 0x190   :  { %v4578_v16 = vpop.f32.mrf.mxu1 }
 0x191   :  { %v4292_v18 = vpop.f32.mrf.mxu0  ;;  %4805 = vmatmul.mubr.bf16.gmra.mxu0 %v7460_v62 }
 0x192   :  { %v4581_v22 = vpop.f32.mrf.mxu1  ;;  %5094 = vmatmul.mubr.bf16.gmra.mxu1 %v7462_v1  ;;  %4812 = vmatprep.mubr.bf16.mxu0 %v7477_v7  ;;  %v7495_v1 = vcombine.high %v213_v3, %v221_v32  ;;  %v245_v3 = vld [vmem:[%s12651_s0 + $0x718] sm:$0xff] }
 0x193   :  { %v9390_v24 = vadd.f32 %v4581_v22, %v4292_v18  ;;  %v4294_v26 = vpop.f32.mrf.mxu0  ;;  %5101 = vmatprep.mubr.bf16.mxu1 %v7479_v15  ;;  %v229_v18 = vld [vmem:[%s12651_s0 + $0x698] sm:$0xff] }
 0x194   :  { %v4583_v10 = vpop.f32.mrf.mxu1  ;;  %v237_v22 = vld [vmem:[%s12651_s0 + $0x6d8] sm:$0xff] }
 0x195   :  { %v4295_v43 = vpop.f32.mrf.mxu0  ;;  %v7492_v10 = vcombine.low %v212_v59, %v220_v60  ;;  %v244_v59 = vld [vmem:[%s12651_s0 + $0x710] sm:$0xff] }
 0x196   :  { %v4584_v35 = vpop.f32.mrf.mxu1  ;;  %v252_v60 = vld [vmem:[%s12651_s0 + $0x750] sm:$0xff] }
 0x197   :  { %v9410_v62 = vadd.f32 %v4584_v35, %v4295_v43  ;;  %v4297_v63 = vpop.f32.mrf.mxu0  ;;  %v7509_v43 = vcombine.high %v228_v49, %v236_v54 }
 0x198   :  { %v4586_v7 = vpop.f32.mrf.mxu1 }
 0x199   :  { %v4300_v13 = vpop.f32.mrf.mxu0  ;;  %4813 = vmatmul.mubr.bf16.gmra.mxu0 %v7476_v44 }
 0x19a   :  { %v4589_v15 = vpop.f32.mrf.mxu1  ;;  %5102 = vmatmul.mubr.bf16.gmra.mxu1 %v7478_v48  ;;  %4820 = vmatprep.mubr.bf16.mxu0 %v7493_v56  ;;  %v7511_v48 = vcombine.high %v229_v18, %v237_v22 }
 0x19b   :  { %v9414_v37 = vadd.f32 %v4589_v15, %v4300_v13  ;;  %v4302_v38 = vpop.f32.mrf.mxu0  ;;  %5109 = vmatprep.mubr.bf16.mxu1 %v7495_v1  ;;  %v253_v15 = vld [vmem:[%s12651_s0 + $0x758] sm:$0xff] }
 0x19c   :  { %v4591_v16 = vpop.f32.mrf.mxu1  ;;  %v8348_v38 = vld [vmem:[%s12650_s1 + $0x248] sm:$0xff]  }
 0x19d   :  { %v4303_v26 = vpop.f32.mrf.mxu0  ;;  %v8349_v16 = vld [vmem:[%s12650_s1 + $0x2c8] sm:$0xff]   ;;  %5299 = vmatpush2.bf16.msra.mxu0 %v8348_v38  ;;  %v261_v38 = vld [vmem:[%s12651_s0 + $0x798] sm:$0xff] }
 0x19e   :  { %v4592_v36 = vpop.f32.mrf.mxu1  ;;  %5588 = vmatpush2.bf16.msra.mxu1 %v8349_v16  ;;  %5300 = vmatprep.subr.bf16.mxu0 %v12655_v0  ;;  %v269_v16 = vld [vmem:[%s12651_s0 + $0x7d8] sm:$0xff] }
 0x19f   :  { %v9428_v44 = vadd.f32 %v4592_v36, %v4303_v26  ;;  %v4305_v35 = vpop.f32.mrf.mxu0  ;;  %5589 = vmatprep.subr.bf16.mxu1 %v12655_v0 }
 0x1a0   :  { %v4594_v56 = vpop.f32.mrf.mxu1 }
 0x1a1   :  { %v4308_v63 = vpop.f32.mrf.mxu0  ;;  %4821 = vmatmul.mubr.bf16.gmra.mxu0 %v7492_v10  ;;  %v7508_v10 = vcombine.low %v228_v49, %v236_v54  ;;  %v7527_v56 = vcombine.high %v245_v3, %v253_v15 }
 0x1a2   :  { %v4597_v1 = vpop.f32.mrf.mxu1  ;;  %5110 = vmatmul.mubr.bf16.gmra.mxu1 %v7494_v40  ;;  %4828 = vmatprep.mubr.bf16.mxu0 %v7509_v43  ;;  %v7510_v40 = vcombine.low %v229_v18, %v237_v22  ;;  %v7525_v43 = vcombine.high %v244_v59, %v252_v60  ;;  %v260_v18 = vld [vmem:[%s12651_s0 + $0x790] sm:$0xff] }
 0x1a3   :  { %v9430_v7 = vadd.f32 %v4597_v1, %v4308_v63  ;;  %v4310_v13 = vpop.f32.mrf.mxu0  ;;  %5117 = vmatprep.mubr.bf16.mxu1 %v7511_v48  ;;  %v268_v22 = vld [vmem:[%s12651_s0 + $0x7d0] sm:$0xff] }
 0x1a4   :  { %v4599_v32 = vpop.f32.mrf.mxu1 }
 0x1a5   :  { %v4311_v26 = vpop.f32.mrf.mxu0 }
 0x1a6   :  { %v4600_v36 = vpop.f32.mrf.mxu1 }
 0x1a7   :  { %v9450_v35 = vadd.f32 %v4600_v36, %v4311_v26  ;;  %v4313_v48 = vpop.f32.mrf.mxu0 }
 0x1a8   :  { %v4602_v63 = vpop.f32.mrf.mxu1 }
 0x1a9   :  { %v4316_v1 = vpop.f32.mrf.mxu0  ;;  %4829 = vmatmul.mubr.bf16.gmra.mxu0 %v7508_v10  ;;  %v7524_v10 = vcombine.low %v244_v59, %v252_v60  ;;  %v7543_v63 = vcombine.high %v261_v38, %v269_v16  ;;  %v276_v59 = vld [vmem:[%s12651_s0 + $0x810] sm:$0xff] }
 0x1aa   :  { %v4605_v13 = vpop.f32.mrf.mxu1  ;;  %5118 = vmatmul.mubr.bf16.gmra.mxu1 %v7510_v40  ;;  %4836 = vmatprep.mubr.bf16.mxu0 %v7525_v43  ;;  %v7526_v40 = vcombine.low %v245_v3, %v253_v15  ;;  %v7541_v43 = vcombine.high %v260_v18, %v268_v22  ;;  %v284_v60 = vld [vmem:[%s12651_s0 + $0x850] sm:$0xff]  ;;  %v277_v3 = vld [vmem:[%s12651_s0 + $0x818] sm:$0xff] }
 0x1ab   :  { %v9454_v49 = vadd.f32 %v4605_v13, %v4316_v1  ;;  %v4318_v54 = vpop.f32.mrf.mxu0  ;;  %5125 = vmatprep.mubr.bf16.mxu1 %v7527_v56 }
 0x1ac   :  { %v4607_v32 = vpop.f32.mrf.mxu1 }
 0x1ad   :  { %12712 = vst [vmem:[#allocation2_spill] sm:$0xff] %v9454_v49  ;;  %v4319_v26 = vpop.f32.mrf.mxu0 }
 0x1ae   :  { %v4608_v36 = vpop.f32.mrf.mxu1 }
 0x1af   :  { %v9468_v48 = vadd.f32 %v4608_v36, %v4319_v26  ;;  %v4321_v56 = vpop.f32.mrf.mxu0  ;;  %v285_v26 = vld [vmem:[%s12651_s0 + $0x858] sm:$0xff] }
 0x1b0   :  { %v4610_v1 = vpop.f32.mrf.mxu1  ;;  %v7542_v56 = vcombine.low %v261_v38, %v269_v16  ;;  %v292_v38 = vld [vmem:[%s12651_s0 + $0x890] sm:$0xff] }
 0x1b1   :  { %12713 = vst [vmem:[#allocation3_spill] sm:$0xff] %v9468_v48  ;;  %v4324_v13 = vpop.f32.mrf.mxu0  ;;  %4837 = vmatmul.mubr.bf16.gmra.mxu0 %v7524_v10  ;;  %v8351_v10 = vld [vmem:[%s12650_s1 + $0x2c0] sm:$0xff]   ;;  %v300_v16 = vld [vmem:[%s12651_s0 + $0x8d0] sm:$0xff] }
 0x1b2   :  { %v4613_v54 = vpop.f32.mrf.mxu1  ;;  %5126 = vmatmul.mubr.bf16.gmra.mxu1 %v7526_v40  ;;  %4844 = vmatprep.mubr.bf16.mxu0 %v7541_v43  ;;  %v7540_v40 = vcombine.low %v260_v18, %v268_v22 }
 0x1b3   :  { %v9470_v32 = vadd.f32 %v4613_v54, %v4324_v13  ;;  %v4326_v0 = vpop.f32.mrf.mxu0  ;;  %5133 = vmatprep.mubr.bf16.mxu1 %v7543_v63  ;;  %v7557_v63 = vcombine.high %v276_v59, %v284_v60  ;;  %5590 = vmatpush2.bf16.msra.mxu1 %v8351_v10  ;;  %v7559_v54 = vcombine.high %v277_v3, %v285_v26 }
 0x1b4   :  { %v4615_v15 = vpop.f32.mrf.mxu1  ;;  %v8350_v0 = vld [vmem:[%s12650_s1 + $0x240] sm:$0xff]   ;;  %v7556_v10 = vcombine.low %v276_v59, %v284_v60  ;;  %v308_v59 = vld [vmem:[%s12651_s0 + $0x910] sm:$0xff] }
 0x1b5   :  { %12714 = vst [vmem:[#allocation4_spill] sm:$0xff] %v9470_v32  ;;  %v4327_v36 = vpop.f32.mrf.mxu0  ;;  %5301 = vmatpush2.bf16.msra.mxu0 %v8350_v0  ;;  %v12716_v15 = vmov 0   ;;  %v316_v60 = vld [vmem:[%s12651_s0 + $0x950] sm:$0xff] }
 0x1b6   :  { %v4616_v43 = vpop.f32.mrf.mxu1  ;;  %5848 = vmatprep.subr.bf16.mxu0 %v12716_v15  ;;  %6137 = vmatprep.subr.bf16.mxu1 %v12716_v15 }
 0x1b7   :  { %v9490_v1 = vadd.f32 %v4616_v43, %v4327_v36  ;;  %v4329_v13 = vpop.f32.mrf.mxu0  ;;  %v7573_v43 = vcombine.high %v292_v38, %v300_v16 }
 0x1b8   :  { %v4618_v32 = vpop.f32.mrf.mxu1 }
 0x1b9   :  { %12715 = vst [vmem:[#allocation5_spill] sm:$0xff] %v9490_v1  ;;  %v4332_v48 = vpop.f32.mrf.mxu0  ;;  %4845 = vmatmul.mubr.bf16.gmra.mxu0 %v7540_v40  ;;  %v293_v32 = vld [vmem:[%s12651_s0 + $0x898] sm:$0xff]  ;;  %v7558_v40 = vcombine.low %v277_v3, %v285_v26 }
 0x1ba   :  { %v4621_v49 = vpop.f32.mrf.mxu1  ;;  %5134 = vmatmul.mubr.bf16.gmra.mxu1 %v7542_v56  ;;  %4852 = vmatprep.mubr.bf16.mxu0 %v7557_v63  ;;  %v309_v26 = vld [vmem:[%s12651_s0 + $0x918] sm:$0xff] }
 0x1bb   :  { %v9494_v18 = vadd.f32 %v4621_v49, %v4332_v48  ;;  %v4334_v22 = vpop.f32.mrf.mxu0  ;;  %5141 = vmatprep.mubr.bf16.mxu1 %v7559_v54  ;;  %v301_v49 = vld [vmem:[%s12651_s0 + $0x8d8] sm:$0xff] }
 0x1bc   :  { %v4623_v0 = vpop.f32.mrf.mxu1  ;;  %v7575_v13 = vcombine.high %v293_v32, %v301_v49 }
 0x1bd   :  { %12717 = vst [vmem:[#allocation6_spill] sm:$0xff] %v9494_v18  ;;  %v4335_v48 = vpop.f32.mrf.mxu0 }
 0x1be   :  { %v4624_v36 = vpop.f32.mrf.mxu1 }
 0x1bf   :  { %v9508_v56 = vadd.f32 %v4624_v36, %v4335_v48  ;;  %v4337_v63 = vpop.f32.mrf.mxu0  ;;  %v317_v48 = vld [vmem:[%s12651_s0 + $0x958] sm:$0xff] }
 0x1c0   :  { %v4626_v54 = vpop.f32.mrf.mxu1 }
 0x1c1   :  { %12718 = vst [vmem:[#allocation7_spill] sm:$0xff] %v9508_v56  ;;  %v4340_v22 = vpop.f32.mrf.mxu0  ;;  %4853 = vmatmul.mubr.bf16.gmra.mxu0 %v7556_v10  ;;  %v7591_v54 = vcombine.high %v309_v26, %v317_v48 }
 0x1c2   :  { %v4629_v0 = vpop.f32.mrf.mxu1  ;;  %5142 = vmatmul.mubr.bf16.gmra.mxu1 %v7558_v40  ;;  %4860 = vmatprep.mubr.bf16.mxu0 %v7573_v43  ;;  %v7574_v40 = vcombine.low %v293_v32, %v301_v49  ;;  %v7589_v43 = vcombine.high %v308_v59, %v316_v60  ;;  %v325_v49 = vld [vmem:[%s12651_s0 + $0x998] sm:$0xff] }
 0x1c3   :  { %v9510_v18 = vadd.f32 %v4629_v0, %v4340_v22  ;;  %v4342_v1 = vpop.f32.mrf.mxu0  ;;  %5149 = vmatprep.mubr.bf16.mxu1 %v7575_v13 }
 0x1c4   :  { %v4631_v3 = vpop.f32.mrf.mxu1  ;;  %v7572_v1 = vcombine.low %v292_v38, %v300_v16  ;;  %v324_v38 = vld [vmem:[%s12651_s0 + $0x990] sm:$0xff] }
 0x1c5   :  { %12719 = vst [vmem:[#allocation8_spill] sm:$0xff] %v9510_v18  ;;  %v4343_v10 = vpop.f32.mrf.mxu0  ;;  %v332_v16 = vld [vmem:[%s12651_s0 + $0x9d0] sm:$0xff] }
 0x1c6   :  { %v4632_v36 = vpop.f32.mrf.mxu1 }
 0x1c7   :  { %v9524_v63 = vadd.f32 %v4632_v36, %v4343_v10  ;;  %v4345_v13 = vpop.f32.mrf.mxu0  ;;  %v333_v10 = vld [vmem:[%s12651_s0 + $0x9d8] sm:$0xff] }
 0x1c8   :  { %v4634_v22 = vpop.f32.mrf.mxu1 }
 0x1c9   :  { %12720 = vst [vmem:[#allocation9_spill] sm:$0xff] %v9524_v63  ;;  %v4348_v0 = vpop.f32.mrf.mxu0  ;;  %4861 = vmatmul.mubr.bf16.gmra.mxu0 %v7572_v1  ;;  %v7607_v22 = vcombine.high %v325_v49, %v333_v10 }
 0x1ca   :  { %v4637_v3 = vpop.f32.mrf.mxu1  ;;  %5150 = vmatmul.mubr.bf16.gmra.mxu1 %v7574_v40  ;;  %4868 = vmatprep.mubr.bf16.mxu0 %v7589_v43  ;;  %v7590_v40 = vcombine.low %v309_v26, %v317_v48  ;;  %v7605_v43 = vcombine.high %v324_v38, %v332_v16  ;;  %v341_v48 = vld [vmem:[%s12651_s0 + $0xa18] sm:$0xff] }
 0x1cb   :  { %v9526_v18 = vadd.f32 %v4637_v3, %v4348_v0  ;;  %v4350_v56 = vpop.f32.mrf.mxu0  ;;  %5157 = vmatprep.mubr.bf16.mxu1 %v7591_v54 }
 0x1cc   :  { %v4639_v32 = vpop.f32.mrf.mxu1  ;;  %v7588_v56 = vcombine.low %v308_v59, %v316_v60  ;;  %v340_v59 = vld [vmem:[%s12651_s0 + $0xa10] sm:$0xff] }
 0x1cd   :  { %12721 = vst [vmem:[#allocation10_spill] sm:$0xff] %v9526_v18  ;;  %v4351_v1 = vpop.f32.mrf.mxu0  ;;  %v348_v60 = vld [vmem:[%s12651_s0 + $0xa50] sm:$0xff] }
 0x1ce   :  { %v4640_v36 = vpop.f32.mrf.mxu1 }
 0x1cf   :  { %v9540_v13 = vadd.f32 %v4640_v36, %v4351_v1  ;;  %v4353_v54 = vpop.f32.mrf.mxu0  ;;  %v349_v1 = vld [vmem:[%s12651_s0 + $0xa58] sm:$0xff] }
 0x1d0   :  { %v4642_v0 = vpop.f32.mrf.mxu1 }
 0x1d1   :  { %12722 = vst [vmem:[#allocation11_spill] sm:$0xff] %v9540_v13  ;;  %v4356_v3 = vpop.f32.mrf.mxu0  ;;  %4869 = vmatmul.mubr.bf16.gmra.mxu0 %v7588_v56  ;;  %v7623_v0 = vcombine.high %v341_v48, %v349_v1 }
 0x1d2   :  { %v4645_v32 = vpop.f32.mrf.mxu1  ;;  %5158 = vmatmul.mubr.bf16.gmra.mxu1 %v7590_v40  ;;  %4876 = vmatprep.mubr.bf16.mxu0 %v7605_v43  ;;  %v7606_v40 = vcombine.low %v325_v49, %v333_v10  ;;  %v7621_v43 = vcombine.high %v340_v59, %v348_v60  ;;  %v357_v10 = vld [vmem:[%s12651_s0 + $0xa98] sm:$0xff] }
 0x1d3   :  { %v9542_v18 = vadd.f32 %v4645_v32, %v4356_v3  ;;  %v4358_v63 = vpop.f32.mrf.mxu0  ;;  %5165 = vmatprep.mubr.bf16.mxu1 %v7607_v22 }
 0x1d4   :  { %v4647_v26 = vpop.f32.mrf.mxu1  ;;  %v7604_v63 = vcombine.low %v324_v38, %v332_v16  ;;  %v356_v38 = vld [vmem:[%s12651_s0 + $0xa90] sm:$0xff] }
 0x1d5   :  { %12723 = vst [vmem:[#allocation12_spill] sm:$0xff] %v9542_v18  ;;  %v4359_v56 = vpop.f32.mrf.mxu0  ;;  %v364_v16 = vld [vmem:[%s12651_s0 + $0xad0] sm:$0xff] }
 0x1d6   :  { %v4648_v36 = vpop.f32.mrf.mxu1 }
 0x1d7   :  { %v9556_v54 = vadd.f32 %v4648_v36, %v4359_v56  ;;  %v4361_v22 = vpop.f32.mrf.mxu0  ;;  %v365_v56 = vld [vmem:[%s12651_s0 + $0xad8] sm:$0xff] }
 0x1d8   :  { %v4650_v3 = vpop.f32.mrf.mxu1 }
 0x1d9   :  { %12724 = vst [vmem:[#allocation13_spill] sm:$0xff] %v9556_v54  ;;  %v4364_v32 = vpop.f32.mrf.mxu0  ;;  %4877 = vmatmul.mubr.bf16.gmra.mxu0 %v7604_v63  ;;  %v7639_v3 = vcombine.high %v357_v10, %v365_v56 }
 0x1da   :  { %v4653_v26 = vpop.f32.mrf.mxu1  ;;  %5166 = vmatmul.mubr.bf16.gmra.mxu1 %v7606_v40  ;;  %4884 = vmatprep.mubr.bf16.mxu0 %v7621_v43  ;;  %v7622_v40 = vcombine.low %v341_v48, %v349_v1  ;;  %v7637_v43 = vcombine.high %v356_v38, %v364_v16  ;;  %v373_v1 = vld [vmem:[%s12651_s0 + $0xb18] sm:$0xff] }
 0x1db   :  { %v9558_v18 = vadd.f32 %v4653_v26, %v4364_v32  ;;  %v4366_v13 = vpop.f32.mrf.mxu0  ;;  %5173 = vmatprep.mubr.bf16.mxu1 %v7623_v0 }
 0x1dc   :  { %v4655_v49 = vpop.f32.mrf.mxu1  ;;  %v7620_v13 = vcombine.low %v340_v59, %v348_v60  ;;  %v372_v59 = vld [vmem:[%s12651_s0 + $0xb10] sm:$0xff] }
 0x1dd   :  { %12725 = vst [vmem:[#allocation14_spill] sm:$0xff] %v9558_v18  ;;  %v4367_v63 = vpop.f32.mrf.mxu0  ;;  %v380_v60 = vld [vmem:[%s12651_s0 + $0xb50] sm:$0xff] }
 0x1de   :  { %v4656_v36 = vpop.f32.mrf.mxu1 }
 0x1df   :  { %v9572_v22 = vadd.f32 %v4656_v36, %v4367_v63  ;;  %v4369_v0 = vpop.f32.mrf.mxu0  ;;  %v381_v63 = vld [vmem:[%s12651_s0 + $0xb58] sm:$0xff] }
 0x1e0   :  { %v4658_v32 = vpop.f32.mrf.mxu1 }
 0x1e1   :  { %12726 = vst [vmem:[#allocation15_spill] sm:$0xff] %v9572_v22  ;;  %v4372_v26 = vpop.f32.mrf.mxu0  ;;  %4885 = vmatmul.mubr.bf16.gmra.mxu0 %v7620_v13  ;;  %v7655_v32 = vcombine.high %v373_v1, %v381_v63 }
 0x1e2   :  { %v4661_v49 = vpop.f32.mrf.mxu1  ;;  %5174 = vmatmul.mubr.bf16.gmra.mxu1 %v7622_v40  ;;  %4892 = vmatprep.mubr.bf16.mxu0 %v7637_v43  ;;  %v7638_v40 = vcombine.low %v357_v10, %v365_v56  ;;  %v7653_v43 = vcombine.high %v372_v59, %v380_v60  ;;  %v389_v56 = vld [vmem:[%s12651_s0 + $0xb98] sm:$0xff] }
 0x1e3   :  { %v9574_v18 = vadd.f32 %v4661_v49, %v4372_v26  ;;  %v4374_v54 = vpop.f32.mrf.mxu0  ;;  %5181 = vmatprep.mubr.bf16.mxu1 %v7639_v3 }
 0x1e4   :  { %v4663_v48 = vpop.f32.mrf.mxu1  ;;  %v7636_v54 = vcombine.low %v356_v38, %v364_v16  ;;  %v388_v38 = vld [vmem:[%s12651_s0 + $0xb90] sm:$0xff] }
 0x1e5   :  { %12727 = vst [vmem:[#allocation16_spill] sm:$0xff] %v9574_v18  ;;  %v4375_v13 = vpop.f32.mrf.mxu0  ;;  %v396_v16 = vld [vmem:[%s12651_s0 + $0xbd0] sm:$0xff] }
 0x1e6   :  { %v4664_v36 = vpop.f32.mrf.mxu1 }
 0x1e7   :  { %v9588_v0 = vadd.f32 %v4664_v36, %v4375_v13  ;;  %v4377_v3 = vpop.f32.mrf.mxu0  ;;  %v397_v13 = vld [vmem:[%s12651_s0 + $0xbd8] sm:$0xff] }
 0x1e8   :  { %v4666_v26 = vpop.f32.mrf.mxu1 }
 0x1e9   :  { %12728 = vst [vmem:[#allocation17_spill] sm:$0xff] %v9588_v0  ;;  %v4380_v49 = vpop.f32.mrf.mxu0  ;;  %4893 = vmatmul.mubr.bf16.gmra.mxu0 %v7636_v54  ;;  %v7671_v26 = vcombine.high %v389_v56, %v397_v13 }
 0x1ea   :  { %v4669_v48 = vpop.f32.mrf.mxu1  ;;  %5182 = vmatmul.mubr.bf16.gmra.mxu1 %v7638_v40  ;;  %4900 = vmatprep.mubr.bf16.mxu0 %v7653_v43  ;;  %v7654_v40 = vcombine.low %v373_v1, %v381_v63  ;;  %v7669_v43 = vcombine.high %v388_v38, %v396_v16  ;;  %v405_v63 = vld [vmem:[%s12651_s0 + $0xc18] sm:$0xff] }
 0x1eb   :  { %v9590_v18 = vadd.f32 %v4669_v48, %v4380_v49  ;;  %v4382_v22 = vpop.f32.mrf.mxu0  ;;  %5189 = vmatprep.mubr.bf16.mxu1 %v7655_v32 }
 0x1ec   :  { %v4671_v10 = vpop.f32.mrf.mxu1  ;;  %v7652_v22 = vcombine.low %v372_v59, %v380_v60  ;;  %v404_v59 = vld [vmem:[%s12651_s0 + $0xc10] sm:$0xff] }
 0x1ed   :  { %12729 = vst [vmem:[#allocation18_spill] sm:$0xff] %v9590_v18  ;;  %v4383_v54 = vpop.f32.mrf.mxu0  ;;  %v412_v60 = vld [vmem:[%s12651_s0 + $0xc50] sm:$0xff] }
 0x1ee   :  { %v4672_v36 = vpop.f32.mrf.mxu1 }
 0x1ef   :  { %v9604_v3 = vadd.f32 %v4672_v36, %v4383_v54  ;;  %v4385_v32 = vpop.f32.mrf.mxu0  ;;  %v413_v54 = vld [vmem:[%s12651_s0 + $0xc58] sm:$0xff] }
 0x1f0   :  { %v4674_v49 = vpop.f32.mrf.mxu1 }
 0x1f1   :  { %12730 = vst [vmem:[#allocation19_spill] sm:$0xff] %v9604_v3  ;;  %v4388_v48 = vpop.f32.mrf.mxu0  ;;  %4901 = vmatmul.mubr.bf16.gmra.mxu0 %v7652_v22  ;;  %v7687_v49 = vcombine.high %v405_v63, %v413_v54 }
 0x1f2   :  { %v4677_v10 = vpop.f32.mrf.mxu1  ;;  %5190 = vmatmul.mubr.bf16.gmra.mxu1 %v7654_v40  ;;  %4908 = vmatprep.mubr.bf16.mxu0 %v7669_v43  ;;  %v7670_v40 = vcombine.low %v389_v56, %v397_v13  ;;  %v7685_v43 = vcombine.high %v404_v59, %v412_v60  ;;  %v421_v13 = vld [vmem:[%s12651_s0 + $0xc98] sm:$0xff] }
 0x1f3   :  { %v9606_v18 = vadd.f32 %v4677_v10, %v4388_v48  ;;  %v4390_v0 = vpop.f32.mrf.mxu0  ;;  %5197 = vmatprep.mubr.bf16.mxu1 %v7671_v26 }
 0x1f4   :  { %v4679_v1 = vpop.f32.mrf.mxu1  ;;  %v7668_v0 = vcombine.low %v388_v38, %v396_v16  ;;  %v420_v38 = vld [vmem:[%s12651_s0 + $0xc90] sm:$0xff] }
 0x1f5   :  { %12731 = vst [vmem:[#allocation20_spill] sm:$0xff] %v9606_v18  ;;  %v4391_v22 = vpop.f32.mrf.mxu0  ;;  %v428_v16 = vld [vmem:[%s12651_s0 + $0xcd0] sm:$0xff] }
 0x1f6   :  { %v4680_v36 = vpop.f32.mrf.mxu1 }
 0x1f7   :  { %v9620_v32 = vadd.f32 %v4680_v36, %v4391_v22  ;;  %v4393_v26 = vpop.f32.mrf.mxu0  ;;  %v429_v22 = vld [vmem:[%s12651_s0 + $0xcd8] sm:$0xff] }
 0x1f8   :  { %v4682_v48 = vpop.f32.mrf.mxu1 }
 0x1f9   :  { %12732 = vst [vmem:[#allocation21_spill] sm:$0xff] %v9620_v32  ;;  %v4396_v10 = vpop.f32.mrf.mxu0  ;;  %4909 = vmatmul.mubr.bf16.gmra.mxu0 %v7668_v0  ;;  %v7703_v48 = vcombine.high %v421_v13, %v429_v22 }
 0x1fa   :  { %v4685_v1 = vpop.f32.mrf.mxu1  ;;  %5198 = vmatmul.mubr.bf16.gmra.mxu1 %v7670_v40  ;;  %4916 = vmatprep.mubr.bf16.mxu0 %v7685_v43  ;;  %v7686_v40 = vcombine.low %v405_v63, %v413_v54  ;;  %v7701_v43 = vcombine.high %v420_v38, %v428_v16 }
 0x1fb   :  { %v9622_v18 = vadd.f32 %v4685_v1, %v4396_v10  ;;  %v4398_v3 = vpop.f32.mrf.mxu0  ;;  %5205 = vmatprep.mubr.bf16.mxu1 %v7687_v49 }
 0x1fc   :  { %v4687_v56 = vpop.f32.mrf.mxu1  ;;  %v7684_v3 = vcombine.low %v404_v59, %v412_v60  ;;  %v436_v59 = vld [vmem:[%s12651_s0 + $0xd10] sm:$0xff] }
 0x1fd   :  { %12733 = vst [vmem:[#allocation22_spill] sm:$0xff] %v9622_v18  ;;  %v4399_v0 = vpop.f32.mrf.mxu0  ;;  %v444_v60 = vld [vmem:[%s12651_s0 + $0xd50] sm:$0xff] }
 0x1fe   :  { %v4688_v36 = vpop.f32.mrf.mxu1 }
 0x1ff   :  { %v9636_v26 = vadd.f32 %v4688_v36, %v4399_v0  ;;  %v4401_v49 = vpop.f32.mrf.mxu0 }
 0x200   :  { %v4690_v10 = vpop.f32.mrf.mxu1  ;;  %v7717_v49 = vcombine.high %v436_v59, %v444_v60 }
 0x201   :  { %12734 = vst [vmem:[#allocation23_spill] sm:$0xff] %v9636_v26  ;;  %v4726_v1 = vpop.f32.mrf.mxu0  ;;  %4917 = vmatmul.mubr.bf16.gmra.mxu0 %v7684_v3  ;;  %v7700_v3 = vcombine.low %v420_v38, %v428_v16  ;;  %v460_v38 = vld [vmem:[%s12651_s0 + $0xdd0] sm:$0xff] }
 0x202   :  { %v4727_v56 = vadd.f32 %v4726_v1, %v8998_v21  ;;  %v5015_v18 = vpop.f32.mrf.mxu1  ;;  %5206 = vmatmul.mubr.bf16.gmra.mxu1 %v7686_v40  ;;  %4924 = vmatprep.mubr.bf16.mxu0 %v7701_v43  ;;  %v437_v21 = vld [vmem:[%s12651_s0 + $0xd18] sm:$0xff]  ;;  %v7702_v43 = vcombine.low %v421_v13, %v429_v22 }
 0x203   :  { %v4728_v32 = vpop.f32.mrf.mxu0  ;;  %5213 = vmatprep.mubr.bf16.mxu1 %v7703_v48  ;;  %v461_v22 = vld [vmem:[%s12651_s0 + $0xdd8] sm:$0xff] }
 0x204   :  { %v9645_v63 = vadd.f32 %v5015_v18, %v4727_v56  ;;  %v5017_v54 = vpop.f32.mrf.mxu1  ;;  %v445_v32 = vld [vmem:[%s12651_s0 + $0xd58] sm:$0xff] }
 0x205   :  { %v4729_v0 = vpop.f32.mrf.mxu0  ;;  %v7719_v10 = vcombine.high %v437_v21, %v445_v32 }
 0x206   :  { %12735 = vst [vmem:[#allocation24_spill] sm:$0xff] %v9645_v63  ;;  %v4730_v36 = vadd.f32 %v4729_v0, %v9012_v33  ;;  %v5018_v40 = vpop.f32.mrf.mxu1  ;;  %v452_v33 = vld [vmem:[%s12651_s0 + $0xd90] sm:$0xff]  ;;  %v7716_v0 = vcombine.low %v436_v59, %v444_v60 }
 0x207   :  { %v4731_v48 = vpop.f32.mrf.mxu0  ;;  %v476_v59 = vld [vmem:[%s12651_s0 + $0xe50] sm:$0xff] }
 0x208   :  { %v9654_v18 = vadd.f32 %v5018_v40, %v4730_v36  ;;  %v5020_v1 = vpop.f32.mrf.mxu1  ;;  %v7718_v40 = vcombine.low %v437_v21, %v445_v32  ;;  %v477_v32 = vld [vmem:[%s12651_s0 + $0xe58] sm:$0xff] }
 0x209   :  { %v4734_v56 = vpop.f32.mrf.mxu0  ;;  %4925 = vmatmul.mubr.bf16.gmra.mxu0 %v7700_v3 }
 0x20a   :  { %v4735_v54 = vadd.f32 %v4734_v56, %v9014_v39  ;;  %v5023_v63 = vpop.f32.mrf.mxu1  ;;  %5214 = vmatmul.mubr.bf16.gmra.mxu1 %v7702_v43  ;;  %4932 = vmatprep.mubr.bf16.mxu0 %v7717_v49  ;;  %v453_v39 = vld [vmem:[%s12651_s0 + $0xd98] sm:$0xff]  ;;  %v7733_v43 = vcombine.high %v452_v33, %v460_v38 }
 0x20b   :  { %v4736_v26 = vpop.f32.mrf.mxu0  ;;  %5221 = vmatprep.mubr.bf16.mxu1 %v7719_v10  ;;  %v7735_v48 = vcombine.high %v453_v39, %v461_v22 }
 0x20c   :  { %v9663_v16 = vadd.f32 %v5023_v63, %v4735_v54  ;;  %v5025_v13 = vpop.f32.mrf.mxu1 }
 0x20d   :  { %v4737_v26 = vpop.f32.mrf.mxu0 }
 0x20e   :  { %v4738_v3 = vadd.f32 %v4737_v26, %v9028_v51  ;;  %v5026_v36 = vpop.f32.mrf.mxu1  ;;  %v468_v51 = vld [vmem:[%s12651_s0 + $0xe10] sm:$0xff] }
 0x20f   :  { %v4739_v49 = vpop.f32.mrf.mxu0 }
 0x210   :  { %v9672_v63 = vadd.f32 %v5026_v36, %v4738_v3  ;;  %v5028_v10 = vpop.f32.mrf.mxu1 }
 0x211   :  { %v4742_v1 = vpop.f32.mrf.mxu0  ;;  %4933 = vmatmul.mubr.bf16.gmra.mxu0 %v7716_v0  ;;  %v7732_v0 = vcombine.low %v452_v33, %v460_v38  ;;  %v492_v33 = vld [vmem:[%s12651_s0 + $0xed0] sm:$0xff] }
 0x212   :  { %v4743_v56 = vadd.f32 %v4742_v1, %v9030_v57  ;;  %v5031_v54 = vpop.f32.mrf.mxu1  ;;  %5222 = vmatmul.mubr.bf16.gmra.mxu1 %v7718_v40  ;;  %4940 = vmatprep.mubr.bf16.mxu0 %v7733_v43  ;;  %v469_v57 = vld [vmem:[%s12651_s0 + $0xe18] sm:$0xff]  ;;  %v7734_v40 = vcombine.low %v453_v39, %v461_v22  ;;  %v7749_v43 = vcombine.high %v468_v51, %v476_v59 }
 0x213   :  { %v4744_v13 = vpop.f32.mrf.mxu0  ;;  %5229 = vmatprep.mubr.bf16.mxu1 %v7735_v48  ;;  %v7751_v48 = vcombine.high %v469_v57, %v477_v32  ;;  %v493_v22 = vld [vmem:[%s12651_s0 + $0xed8] sm:$0xff] }
 0x214   :  { %v9681_v60 = vadd.f32 %v5031_v54, %v4743_v56  ;;  %v5033_v21 = vpop.f32.mrf.mxu1 }
 0x215   :  { %v4745_v26 = vpop.f32.mrf.mxu0 }
 0x216   :  { %v4746_v3 = vadd.f32 %v4745_v26, %v9044_v6  ;;  %v5034_v36 = vpop.f32.mrf.mxu1  ;;  %v484_v6 = vld [vmem:[%s12651_s0 + $0xe90] sm:$0xff] }
 0x217   :  { %v4747_v49 = vpop.f32.mrf.mxu0 }
 0x218   :  { %v9690_v10 = vadd.f32 %v5034_v36, %v4746_v3  ;;  %v5036_v1 = vpop.f32.mrf.mxu1 }
 0x219   :  { %v4750_v56 = vpop.f32.mrf.mxu0  ;;  %4941 = vmatmul.mubr.bf16.gmra.mxu0 %v7732_v0  ;;  %v7748_v0 = vcombine.low %v468_v51, %v476_v59  ;;  %v508_v51 = vld [vmem:[%s12651_s0 + $0xf50] sm:$0xff] }
 0x21a   :  { %v4751_v54 = vadd.f32 %v4750_v56, %v9046_v12  ;;  %v5039_v13 = vpop.f32.mrf.mxu1  ;;  %5230 = vmatmul.mubr.bf16.gmra.mxu1 %v7734_v40  ;;  %4948 = vmatprep.mubr.bf16.mxu0 %v7749_v43  ;;  %v485_v12 = vld [vmem:[%s12651_s0 + $0xe98] sm:$0xff]  ;;  %v7750_v40 = vcombine.low %v469_v57, %v477_v32  ;;  %v7765_v43 = vcombine.high %v484_v6, %v492_v33 }
 0x21b   :  { %v4752_v21 = vpop.f32.mrf.mxu0  ;;  %5237 = vmatprep.mubr.bf16.mxu1 %v7751_v48  ;;  %v7767_v48 = vcombine.high %v485_v12, %v493_v22  ;;  %v509_v32 = vld [vmem:[%s12651_s0 + $0xf58] sm:$0xff] }
 0x21c   :  { %v9699_v38 = vadd.f32 %v5039_v13, %v4751_v54  ;;  %v5041_v39 = vpop.f32.mrf.mxu1 }
 0x21d   :  { %v4753_v26 = vpop.f32.mrf.mxu0 }
 0x21e   :  { %v4754_v3 = vadd.f32 %v4753_v26, %v9060_v25  ;;  %v5042_v36 = vpop.f32.mrf.mxu1  ;;  %v500_v25 = vld [vmem:[%s12651_s0 + $0xf10] sm:$0xff] }
 0x21f   :  { %v4755_v49 = vpop.f32.mrf.mxu0 }
 0x220   :  { %v9708_v1 = vadd.f32 %v5042_v36, %v4754_v3  ;;  %v5044_v56 = vpop.f32.mrf.mxu1 }
 0x221   :  { %v4758_v54 = vpop.f32.mrf.mxu0  ;;  %4949 = vmatmul.mubr.bf16.gmra.mxu0 %v7748_v0  ;;  %v7764_v0 = vcombine.low %v484_v6, %v492_v33  ;;  %v524_v6 = vld [vmem:[%s12651_s0 + $0xfd0] sm:$0xff] }
 0x222   :  { %v4759_v13 = vadd.f32 %v4758_v54, %v9062_v31  ;;  %v5047_v21 = vpop.f32.mrf.mxu1  ;;  %5238 = vmatmul.mubr.bf16.gmra.mxu1 %v7750_v40  ;;  %4956 = vmatprep.mubr.bf16.mxu0 %v7765_v43  ;;  %v501_v31 = vld [vmem:[%s12651_s0 + $0xf18] sm:$0xff]  ;;  %v7766_v40 = vcombine.low %v485_v12, %v493_v22  ;;  %v7781_v43 = vcombine.high %v500_v25, %v508_v51 }
 0x223   :  { %v4760_v39 = vpop.f32.mrf.mxu0  ;;  %5245 = vmatprep.mubr.bf16.mxu1 %v7767_v48  ;;  %v7783_v48 = vcombine.high %v501_v31, %v509_v32  ;;  %v525_v22 = vld [vmem:[%s12651_s0 + $0xfd8] sm:$0xff] }
 0x224   :  { %v9717_v59 = vadd.f32 %v5047_v21, %v4759_v13  ;;  %v5049_v57 = vpop.f32.mrf.mxu1 }
 0x225   :  { %v4761_v26 = vpop.f32.mrf.mxu0 }
 0x226   :  { %v4762_v3 = vadd.f32 %v4761_v26, %v9076_v45  ;;  %v5050_v36 = vpop.f32.mrf.mxu1  ;;  %v516_v45 = vld [vmem:[%s12651_s0 + $0xf90] sm:$0xff] }
 0x227   :  { %v4763_v49 = vpop.f32.mrf.mxu0 }
 0x228   :  { %v9726_v56 = vadd.f32 %v5050_v36, %v4762_v3  ;;  %v5052_v54 = vpop.f32.mrf.mxu1 }
 0x229   :  { %v4766_v13 = vpop.f32.mrf.mxu0  ;;  %4957 = vmatmul.mubr.bf16.gmra.mxu0 %v7764_v0  ;;  %v7780_v0 = vcombine.low %v500_v25, %v508_v51  ;;  %v30_v25 = vld [vmem:[%s12651_s0 + $0x60] sm:$0xff] }
 0x22a   :  { %v4767_v21 = vadd.f32 %v4766_v13, %v9078_v52  ;;  %v5055_v39 = vpop.f32.mrf.mxu1  ;;  %5246 = vmatmul.mubr.bf16.gmra.mxu1 %v7766_v40  ;;  %4964 = vmatprep.mubr.bf16.mxu0 %v7781_v43  ;;  %v517_v52 = vld [vmem:[%s12651_s0 + $0xf98] sm:$0xff]  ;;  %v7782_v40 = vcombine.low %v501_v31, %v509_v32  ;;  %v7797_v43 = vcombine.high %v516_v45, %v524_v6  ;;  %v31_v32 = vld [vmem:[%s12651_s0 + $0x68] sm:$0xff] }
 0x22b   :  { %v4768_v57 = vpop.f32.mrf.mxu0  ;;  %5253 = vmatprep.mubr.bf16.mxu1 %v7783_v48  ;;  %v7799_v48 = vcombine.high %v517_v52, %v525_v22 }
 0x22c   :  { %v9735_v33 = vadd.f32 %v5055_v39, %v4767_v21  ;;  %v5057_v12 = vpop.f32.mrf.mxu1 }
 0x22d   :  { %v4769_v26 = vpop.f32.mrf.mxu0 }
 0x22e   :  { %v4770_v3 = vadd.f32 %v4769_v26, %v9092_v2  ;;  %v5058_v36 = vpop.f32.mrf.mxu1  ;;  %v22_v2 = vld [vmem:[%s12651_s0 + $0x20] sm:$0xff] }
 0x22f   :  { %v4771_v49 = vpop.f32.mrf.mxu0 }
 0x230   :  { %v9744_v54 = vadd.f32 %v5058_v36, %v4770_v3  ;;  %v5060_v13 = vpop.f32.mrf.mxu1 }
 0x231   :  { %v4774_v21 = vpop.f32.mrf.mxu0  ;;  %4965 = vmatmul.mubr.bf16.gmra.mxu0 %v7780_v0  ;;  %v7796_v0 = vcombine.low %v516_v45, %v524_v6  ;;  %v38_v6 = vld [vmem:[%s12651_s0 + $0xa0] sm:$0xff] }
 0x232   :  { %v4775_v39 = vadd.f32 %v4774_v21, %v9094_v9  ;;  %v5063_v57 = vpop.f32.mrf.mxu1  ;;  %5254 = vmatmul.mubr.bf16.gmra.mxu1 %v7782_v40  ;;  %4972 = vmatprep.mubr.bf16.mxu0 %v7797_v43  ;;  %v23_v9 = vld [vmem:[%s12651_s0 + $0x28] sm:$0xff]  ;;  %v7798_v40 = vcombine.low %v517_v52, %v525_v22  ;;  %v7305_v43 = vcombine.high %v22_v2, %v30_v25  ;;  %v46_v52 = vld [vmem:[%s12651_s0 + $0xe0] sm:$0xff] }
 0x233   :  { %v4776_v12 = vpop.f32.mrf.mxu0  ;;  %5261 = vmatprep.mubr.bf16.mxu1 %v7799_v48  ;;  %v7307_v48 = vcombine.high %v23_v9, %v31_v32 }
 0x234   :  { %v9753_v51 = vadd.f32 %v5063_v57, %v4775_v39  ;;  %v5065_v31 = vpop.f32.mrf.mxu1 }
 0x235   :  { %v4777_v26 = vpop.f32.mrf.mxu0 }
 0x236   :  { %v4778_v3 = vadd.f32 %v4777_v26, %v9108_v23  ;;  %v5066_v36 = vpop.f32.mrf.mxu1  ;;  %v7304_v26 = vcombine.low %v22_v2, %v30_v25  ;;  %v8353_v2 = vld [vmem:[%s12650_s1 + $0x3b8] sm:$0xff]   ;;  %v7321_v25 = vcombine.high %v38_v6, %v46_v52 }
 0x237   :  { %v4779_v49 = vpop.f32.mrf.mxu0 }
 0x238   :  { %v9762_v13 = vadd.f32 %v5066_v36, %v4778_v3  ;;  %v5068_v21 = vpop.f32.mrf.mxu1 }
 0x239   :  { %v4782_v39 = vpop.f32.mrf.mxu0  ;;  %4973 = vmatmul.mubr.bf16.gmra.mxu0 %v7796_v0  ;;  %v47_v0 = vld [vmem:[%s12651_s0 + $0xe8] sm:$0xff] }
 0x23a   :  { %v4783_v57 = vadd.f32 %v4782_v39, %v9110_v30  ;;  %v5071_v12 = vpop.f32.mrf.mxu1  ;;  %5262 = vmatmul.mubr.bf16.gmra.mxu1 %v7798_v40  ;;  %5302 = vmatprep.mubr.bf16.mxu0 %v7305_v43  ;;  %v39_v30 = vld [vmem:[%s12651_s0 + $0xa8] sm:$0xff]  ;;  %v7306_v40 = vcombine.low %v23_v9, %v31_v32  ;;  %v8352_v43 = vld [vmem:[%s12650_s1 + $0x338] sm:$0xff]   ;;  %v8354_v9 = vld [vmem:[%s12650_s1 + $0x330] sm:$0xff]  }
 0x23b   :  { %v4784_v31 = vpop.f32.mrf.mxu0  ;;  %5591 = vmatprep.mubr.bf16.mxu1 %v7307_v48  ;;  %v7323_v39 = vcombine.high %v39_v30, %v47_v0 }
 0x23c   :  { %v9765_v45 = vadd.f32 %v5071_v12, %v4783_v57  ;;  %v5073_v23 = vpop.f32.mrf.mxu1  ;;  %v54_v31 = vld [vmem:[%s12651_s0 + $0x120] sm:$0xff] }
 0x23d   :  { %v4785_v22 = vpop.f32.mrf.mxu0  ;;  %v62_v23 = vld [vmem:[%s12651_s0 + $0x160] sm:$0xff] }
 0x23e   :  { %v4786_v3 = vadd.f32 %v4785_v22, %v9127_v46  ;;  %v5074_v36 = vpop.f32.mrf.mxu1 }
 0x23f   :  { %v4787_v49 = vpop.f32.mrf.mxu0 }
 0x240   :  { %v9786_v48 = vadd.f32 %v5074_v36, %v4786_v3  ;;  %v5076_v21 = vpop.f32.mrf.mxu1  ;;  %v55_v3 = vld [vmem:[%s12651_s0 + $0x128] sm:$0xff] }
 0x241   :  { %v4790_v57 = vpop.f32.mrf.mxu0  ;;  %5303 = vmatmul.mubr.bf16.vlgmr.msra.gmra.mxu0 %v7304_v26  ;;  %v63_v36 = vld [vmem:[%s12651_s0 + $0x168] sm:$0xff]  ;;  %v7337_v21 = vcombine.high %v54_v31, %v62_v23 }
 0x242   :  { %v4791_v46 = vadd.f32 %v4790_v57, %v9135_v58  ;;  %v5079_v12 = vpop.f32.mrf.mxu1  ;;  %5592 = vmatmul.mubr.bf16.vlgmr.msra.gmra.mxu1 %v7306_v40  ;;  %5849 = vmatpush1.bf16.msra.mxu0 %v8352_v43  ;;  %v8355_v58 = vld [vmem:[%s12650_s1 + $0x3b0] sm:$0xff]   ;;  %v7320_v43 = vcombine.low %v38_v6, %v46_v52  ;;  %v7339_v57 = vcombine.high %v55_v3, %v63_v36 }
 0x243   :  { %v4792_v32 = vpop.f32.mrf.mxu0  ;;  %6138 = vmatpush1.bf16.msra.mxu1 %v8353_v2  ;;  %5310 = vmatprep.mubr.bf16.mxu0 %v7321_v25  ;;  %v7322_v25 = vcombine.low %v39_v30, %v47_v0 }
 0x244   :  { %v9801_v22 = vadd.f32 %v5079_v12, %v4791_v46  ;;  %v5081_v26 = vpop.f32.mrf.mxu1  ;;  %5599 = vmatprep.mubr.bf16.mxu1 %v7323_v39  ;;  %5850 = vmatprep.subr.bf16.mxu0 %v12716_v15  ;;  %v8356_v46 = vld [vmem:[%s12650_s1 + $0x328] sm:$0xff]   ;;  %v9826_v32 = vld [vmem:[%s12651_s0 + $0x1a0] sm:$0xff] }
 0x245   :  { %v4793_v40 = vpop.f32.mrf.mxu0  ;;  %6139 = vmatprep.subr.bf16.mxu1 %v12716_v15 }
 0x246   :  { %v4794_v49 = vadd.f32 %v4793_v40, %v9154_v11  ;;  %v5082_v2 = vpop.f32.mrf.mxu1  ;;  %5851 = vmatpush1.bf16.msra.mxu0 %v8354_v9  ;;  %v8357_v11 = vld [vmem:[%s12650_s1 + $0x3a8] sm:$0xff]  }
 0x247   :  { %v4795_v39 = vpop.f32.mrf.mxu0  ;;  %6140 = vmatpush1.bf16.msra.mxu1 %v8355_v58  ;;  %5852 = vmatprep.subr.bf16.mxu0 %v12716_v15  ;;  %v9831_v58 = vld [vmem:[%s12651_s0 + $0x1e0] sm:$0xff] }
 0x248   :  { %v9816_v12 = vadd.f32 %v5082_v2, %v4794_v49  ;;  %v5084_v6 = vpop.f32.mrf.mxu1  ;;  %6141 = vmatprep.subr.bf16.mxu1 %v12716_v15  ;;  %v79_v49 = vld [vmem:[%s12651_s0 + $0x1e8] sm:$0xff]  ;;  %v8359_v2 = vld [vmem:[%s12650_s1 + $0x3a0] sm:$0xff]  }
 0x249   :  { %v4798_v52 = vpop.f32.mrf.mxu0  ;;  %5311 = vmatmul.mubr.bf16.gmra.mxu0 %v7320_v43  ;;  %v71_v43 = vld [vmem:[%s12651_s0 + $0x1a8] sm:$0xff]  ;;  %v7353_v6 = vcombine.high %v9826_v32, %v9831_v58 }
 0x24a   :  { %v4799_v30 = vadd.f32 %v4798_v52, %v9164_v20  ;;  %v5087_v0 = vpop.f32.mrf.mxu1  ;;  %5600 = vmatmul.mubr.bf16.gmra.mxu1 %v7322_v25  ;;  %5318 = vmatprep.mubr.bf16.mxu0 %v7337_v21  ;;  %v8358_v20 = vld [vmem:[%s12650_s1 + $0x320] sm:$0xff]   ;;  %v7336_v21 = vcombine.low %v54_v31, %v62_v23 }
 0x24b   :  { %v4800_v9 = vpop.f32.mrf.mxu0  ;;  %5607 = vmatprep.mubr.bf16.mxu1 %v7339_v57  ;;  %5853 = vmatpush1.bf16.msra.mxu0 %v8356_v46  ;;  %v7338_v46 = vcombine.low %v55_v3, %v63_v36 }
 0x24c   :  { %v9836_v26 = vadd.f32 %v5087_v0, %v4799_v30  ;;  %v5089_v40 = vpop.f32.mrf.mxu1  ;;  %6142 = vmatpush1.bf16.msra.mxu1 %v8357_v11  ;;  %5854 = vmatprep.subr.bf16.mxu0 %v12716_v15  ;;  %v7355_v30 = vcombine.high %v71_v43, %v79_v49  ;;  %v8360_v11 = vld [vmem:[%s12650_s1 + $0x318] sm:$0xff]  }
 0x24d   :  { %v4801_v25 = vpop.f32.mrf.mxu0  ;;  %6143 = vmatprep.subr.bf16.mxu1 %v12716_v15  ;;  %v9871_v40 = vld [vmem:[%s12651_s0 + $0x260] sm:$0xff] }
 0x24e   :  { %v4802_v39 = vadd.f32 %v4801_v25, %v9186_v41  ;;  %v5090_v57 = vpop.f32.mrf.mxu1  ;;  %v8361_v41 = vld [vmem:[%s12650_s1 + $0x398] sm:$0xff]  }
 0x24f   :  { %v4803_v52 = vpop.f32.mrf.mxu0  ;;  %5855 = vmatpush1.bf16.msra.mxu0 %v8358_v20  ;;  %v9866_v20 = vld [vmem:[%s12651_s0 + $0x220] sm:$0xff] }
 0x250   :  { %v9855_v0 = vadd.f32 %v5090_v57, %v4802_v39  ;;  %v5092_v9 = vpop.f32.mrf.mxu1  ;;  %6144 = vmatpush1.bf16.msra.mxu1 %v8359_v2  ;;  %5856 = vmatprep.subr.bf16.mxu0 %v12716_v15  ;;  %v95_v39 = vld [vmem:[%s12651_s0 + $0x268] sm:$0xff]  ;;  %v8363_v57 = vld [vmem:[%s12650_s1 + $0x390] sm:$0xff]  }
 0x251   :  { %v4806_v31 = vpop.f32.mrf.mxu0  ;;  %5319 = vmatmul.mubr.bf16.gmra.mxu0 %v7336_v21  ;;  %6145 = vmatprep.subr.bf16.mxu1 %v12716_v15  ;;  %v87_v21 = vld [vmem:[%s12651_s0 + $0x228] sm:$0xff]  ;;  %v7369_v9 = vcombine.high %v9866_v20, %v9871_v40 }
 0x252   :  { %v4807_v23 = vadd.f32 %v4806_v31, %v9196_v53  ;;  %v5095_v3 = vpop.f32.mrf.mxu1  ;;  %5608 = vmatmul.mubr.bf16.gmra.mxu1 %v7338_v46  ;;  %5326 = vmatprep.mubr.bf16.mxu0 %v7353_v6  ;;  %v8362_v53 = vld [vmem:[%s12650_s1 + $0x310] sm:$0xff]   ;;  %v7352_v6 = vcombine.low %v9826_v32, %v9831_v58  ;;  %v7371_v31 = vcombine.high %v87_v21, %v95_v39 }
 0x253   :  { %v4808_v36 = vpop.f32.mrf.mxu0  ;;  %5615 = vmatprep.mubr.bf16.mxu1 %v7355_v30  ;;  %5857 = vmatpush1.bf16.msra.mxu0 %v8360_v11  ;;  %v7354_v11 = vcombine.low %v71_v43, %v79_v49 }
 0x254   :  { %v9876_v2 = vadd.f32 %v5095_v3, %v4807_v23  ;;  %v5097_v25 = vpop.f32.mrf.mxu1  ;;  %6146 = vmatpush1.bf16.msra.mxu1 %v8361_v41  ;;  %5858 = vmatprep.subr.bf16.mxu0 %v12716_v15  ;;  %v8364_v23 = vld [vmem:[%s12650_s1 + $0x308] sm:$0xff]  }
 0x255   :  { %v4809_v46 = vpop.f32.mrf.mxu0  ;;  %6147 = vmatprep.subr.bf16.mxu1 %v12716_v15  ;;  %v9913_v25 = vld [vmem:[%s12651_s0 + $0x2e0] sm:$0xff] }
 0x256   :  { %v4810_v52 = vadd.f32 %v4809_v46, %v9218_v8  ;;  %v5098_v30 = vpop.f32.mrf.mxu1  ;;  %v8365_v8 = vld [vmem:[%s12650_s1 + $0x388] sm:$0xff]  }
 0x257   :  { %v4811_v41 = vpop.f32.mrf.mxu0  ;;  %5859 = vmatpush1.bf16.msra.mxu0 %v8362_v53  ;;  %v9908_v53 = vld [vmem:[%s12651_s0 + $0x2a0] sm:$0xff] }
 0x258   :  { %v9897_v3 = vadd.f32 %v5098_v30, %v4810_v52  ;;  %v5100_v36 = vpop.f32.mrf.mxu1  ;;  %6148 = vmatpush1.bf16.msra.mxu1 %v8363_v57  ;;  %5860 = vmatprep.subr.bf16.mxu0 %v12716_v15  ;;  %v111_v52 = vld [vmem:[%s12651_s0 + $0x2e8] sm:$0xff]  ;;  %v8367_v30 = vld [vmem:[%s12650_s1 + $0x380] sm:$0xff]  }
 0x259   :  { %v4814_v32 = vpop.f32.mrf.mxu0  ;;  %5327 = vmatmul.mubr.bf16.gmra.mxu0 %v7352_v6  ;;  %6149 = vmatprep.subr.bf16.mxu1 %v12716_v15  ;;  %v103_v6 = vld [vmem:[%s12651_s0 + $0x2a8] sm:$0xff]  ;;  %v7385_v36 = vcombine.high %v9908_v53, %v9913_v25 }
 0x25a   :  { %v4815_v58 = vadd.f32 %v4814_v32, %v9228_v19  ;;  %v5103_v43 = vpop.f32.mrf.mxu1  ;;  %5616 = vmatmul.mubr.bf16.gmra.mxu1 %v7354_v11  ;;  %5334 = vmatprep.mubr.bf16.mxu0 %v7369_v9  ;;  %v8366_v19 = vld [vmem:[%s12650_s1 + $0x300] sm:$0xff]   ;;  %v7368_v9 = vcombine.low %v9866_v20, %v9871_v40  ;;  %v7387_v32 = vcombine.high %v103_v6, %v111_v52 }
 0x25b   :  { %v4816_v49 = vpop.f32.mrf.mxu0  ;;  %5623 = vmatprep.mubr.bf16.mxu1 %v7371_v31  ;;  %5861 = vmatpush1.bf16.msra.mxu0 %v8364_v23  ;;  %v7370_v23 = vcombine.low %v87_v21, %v95_v39 }
 0x25c   :  { %v9918_v57 = vadd.f32 %v5103_v43, %v4815_v58  ;;  %v5105_v46 = vpop.f32.mrf.mxu1  ;;  %6150 = vmatpush1.bf16.msra.mxu1 %v8365_v8  ;;  %5862 = vmatprep.subr.bf16.mxu0 %v12716_v15  ;;  %v8368_v58 = vld [vmem:[%s12650_s1 + $0x378] sm:$0xff]  }
 0x25d   :  { %v4817_v11 = vpop.f32.mrf.mxu0  ;;  %6151 = vmatprep.subr.bf16.mxu1 %v12716_v15  ;;  %v126_v46 = vld [vmem:[%s12651_s0 + $0x360] sm:$0xff] }
 0x25e   :  { %v4818_v41 = vadd.f32 %v4817_v11, %v9250_v42  ;;  %v5106_v31 = vpop.f32.mrf.mxu1  ;;  %v8369_v42 = vld [vmem:[%s12650_s1 + $0x3f8] sm:$0xff]  }
 0x25f   :  { %v4819_v8 = vpop.f32.mrf.mxu0  ;;  %5863 = vmatpush1.bf16.msra.mxu0 %v8366_v19  ;;  %v118_v19 = vld [vmem:[%s12651_s0 + $0x320] sm:$0xff] }
 0x260   :  { %v9939_v43 = vadd.f32 %v5106_v31, %v4818_v41  ;;  %v5108_v49 = vpop.f32.mrf.mxu1  ;;  %6152 = vmatpush1.bf16.msra.mxu1 %v8367_v30  ;;  %5864 = vmatprep.subr.bf16.mxu0 %v12716_v15  ;;  %v8370_v30 = vld [vmem:[%s12650_s1 + $0x370] sm:$0xff]   ;;  %v127_v41 = vld [vmem:[%s12651_s0 + $0x368] sm:$0xff] }
 0x261   :  { %v4822_v20 = vpop.f32.mrf.mxu0  ;;  %5335 = vmatmul.mubr.bf16.gmra.mxu0 %v7368_v9  ;;  %6153 = vmatprep.subr.bf16.mxu1 %v12716_v15  ;;  %v119_v9 = vld [vmem:[%s12651_s0 + $0x328] sm:$0xff]  ;;  %v8371_v31 = vld [vmem:[%s12650_s1 + $0x3f0] sm:$0xff]   ;;  %v7401_v49 = vcombine.high %v118_v19, %v126_v46 }
 0x262   :  { %v4823_v40 = vadd.f32 %v4822_v20, %v9260_v55  ;;  %v5111_v21 = vpop.f32.mrf.mxu1  ;;  %5624 = vmatmul.mubr.bf16.gmra.mxu1 %v7370_v23  ;;  %5342 = vmatprep.mubr.bf16.mxu0 %v7385_v36  ;;  %v7384_v36 = vcombine.low %v9908_v53, %v9913_v25 }
 0x263   :  { %v4824_v39 = vpop.f32.mrf.mxu0  ;;  %5631 = vmatprep.mubr.bf16.mxu1 %v7387_v32  ;;  %5865 = vmatpush2.bf16.msra.mxu0 %v8368_v58  ;;  %v7386_v58 = vcombine.low %v103_v6, %v111_v52 }
 0x264   :  { %v9956_v11 = vadd.f32 %v5111_v21, %v4823_v40  ;;  %v5113_v55 = vpop.f32.mrf.mxu1  ;;  %6154 = vmatpush2.bf16.msra.mxu1 %v8369_v42  ;;  %5866 = vmatprep.subr.bf16.mxu0 %v12716_v15  ;;  %v7403_v40 = vcombine.high %v119_v9, %v127_v41  ;;  %v8372_v42 = vld [vmem:[%s12650_s1 + $0x368] sm:$0xff]  }
 0x265   :  { %v4825_v23 = vpop.f32.mrf.mxu0  ;;  %6155 = vmatprep.subr.bf16.mxu1 %v12716_v15  ;;  %v142_v55 = vld [vmem:[%s12651_s0 + $0x3e0] sm:$0xff] }
 0x266   :  { %v4826_v8 = vadd.f32 %v4825_v23, %v9282_v14  ;;  %v5114_v32 = vpop.f32.mrf.mxu1  ;;  %v8373_v14 = vld [vmem:[%s12650_s1 + $0x3e8] sm:$0xff]  }
 0x267   :  { %v4827_v20 = vpop.f32.mrf.mxu0  ;;  %5867 = vmatpush2.bf16.msra.mxu0 %v8370_v30  ;;  %v134_v30 = vld [vmem:[%s12651_s0 + $0x3a0] sm:$0xff] }
 0x268   :  { %v9975_v21 = vadd.f32 %v5114_v32, %v4826_v8  ;;  %v5116_v39 = vpop.f32.mrf.mxu1  ;;  %6156 = vmatpush2.bf16.msra.mxu1 %v8371_v31  ;;  %5868 = vmatprep.subr.bf16.mxu0 %v12716_v15  ;;  %v7400_v32 = vcombine.low %v118_v19, %v126_v46  ;;  %v7402_v20 = vcombine.low %v119_v9, %v127_v41  ;;  %v158_v46 = vld [vmem:[%s12651_s0 + $0x460] sm:$0xff]  ;;  %v151_v9 = vld [vmem:[%s12651_s0 + $0x428] sm:$0xff] }
 0x269   :  { %v4830_v53 = vpop.f32.mrf.mxu0  ;;  %5343 = vmatmul.mubr.bf16.gmra.mxu0 %v7384_v36  ;;  %6157 = vmatprep.subr.bf16.mxu1 %v12716_v15  ;;  %v143_v36 = vld [vmem:[%s12651_s0 + $0x3e8] sm:$0xff] }
 0x26a   :  { %v4831_v25 = vadd.f32 %v4830_v53, %v9292_v27  ;;  %v5119_v6 = vpop.f32.mrf.mxu1  ;;  %5632 = vmatmul.mubr.bf16.gmra.mxu1 %v7386_v58  ;;  %5350 = vmatprep.mubr.bf16.mxu0 %v7401_v49  ;;  %v135_v27 = vld [vmem:[%s12651_s0 + $0x3a8] sm:$0xff] }
 0x26b   :  { %v4832_v52 = vpop.f32.mrf.mxu0  ;;  %5639 = vmatprep.mubr.bf16.mxu1 %v7403_v40  ;;  %5869 = vmatpush2.bf16.msra.mxu0 %v8372_v42  ;;  %v7417_v40 = vcombine.high %v134_v30, %v142_v55  ;;  %v7419_v39 = vcombine.high %v135_v27, %v143_v36 }
 0x26c   :  { %v9989_v31 = vadd.f32 %v5119_v6, %v4831_v25  ;;  %v5121_v23 = vpop.f32.mrf.mxu1  ;;  %6158 = vmatpush2.bf16.msra.mxu1 %v8373_v14  ;;  %5870 = vmatprep.subr.bf16.mxu0 %v12716_v15 }
 0x26d   :  { %v4833_v8 = vpop.f32.mrf.mxu0  ;;  %6159 = vmatprep.subr.bf16.mxu1 %v12716_v15  ;;  %v159_v23 = vld [vmem:[%s12651_s0 + $0x468] sm:$0xff] }
 0x26e   :  { %v4834_v58 = vadd.f32 %v4833_v8, %v9308_v47  ;;  %v5122_v49 = vpop.f32.mrf.mxu1  ;;  %v150_v47 = vld [vmem:[%s12651_s0 + $0x420] sm:$0xff] }
 0x26f   :  { %v4835_v42 = vpop.f32.mrf.mxu0  ;;  %v8374_v8 = vld [vmem:[%s12650_s1 + $0x360] sm:$0xff]  }
 0x270   :  { %v10000_v53 = vadd.f32 %v5122_v49, %v4834_v58  ;;  %v5124_v25 = vpop.f32.mrf.mxu1  ;;  %v7416_v49 = vcombine.low %v134_v30, %v142_v55  ;;  %v7418_v42 = vcombine.low %v135_v27, %v143_v36  ;;  %5871 = vmatpush2.bf16.msra.mxu0 %v8374_v8  ;;  %v166_v27 = vld [vmem:[%s12651_s0 + $0x4a0] sm:$0xff] }
 0x271   :  { %v4838_v6 = vpop.f32.mrf.mxu0  ;;  %5351 = vmatmul.mubr.bf16.gmra.mxu0 %v7400_v32  ;;  %v8375_v32 = vld [vmem:[%s12650_s1 + $0x3e0] sm:$0xff]   ;;  %5872 = vmatprep.subr.bf16.mxu0 %v12716_v15 }
 0x272   :  { %v4839_v14 = vadd.f32 %v4838_v6, %v9310_v61  ;;  %v5127_v52 = vpop.f32.mrf.mxu1  ;;  %5640 = vmatmul.mubr.bf16.gmra.mxu1 %v7402_v20  ;;  %5358 = vmatprep.mubr.bf16.mxu0 %v7417_v40  ;;  %v7435_v6 = vcombine.high %v151_v9, %v159_v23  ;;  %v174_v36 = vld [vmem:[%s12651_s0 + $0x4e0] sm:$0xff] }
 0x273   :  { %v4840_v19 = vpop.f32.mrf.mxu0  ;;  %5647 = vmatprep.mubr.bf16.mxu1 %v7419_v39  ;;  %v7433_v39 = vcombine.high %v150_v47, %v158_v46  ;;  %6160 = vmatpush2.bf16.msra.mxu1 %v8375_v32  ;;  %v175_v32 = vld [vmem:[%s12651_s0 + $0x4e8] sm:$0xff] }
 0x274   :  { %v10012_v41 = vadd.f32 %v5127_v52, %v4839_v14  ;;  %v5129_v61 = vpop.f32.mrf.mxu1  ;;  %6161 = vmatprep.subr.bf16.mxu1 %v12716_v15 }
 0x275   :  { %v4841_v58 = vpop.f32.mrf.mxu0 }
 0x276   :  { %v4842_v20 = vadd.f32 %v4841_v58, %v9331_v17  ;;  %v5130_v40 = vpop.f32.mrf.mxu1 }
 0x277   :  { %v4843_v25 = vpop.f32.mrf.mxu0 }
 0x278   :  { %v10026_v14 = vadd.f32 %v5130_v40, %v4842_v20  ;;  %v5132_v52 = vpop.f32.mrf.mxu1 }
 0x279   :  { %v4846_v19 = vpop.f32.mrf.mxu0  ;;  %5359 = vmatmul.mubr.bf16.gmra.mxu0 %v7416_v49  ;;  %v7432_v49 = vcombine.low %v150_v47, %v158_v46  ;;  %v190_v47 = vld [vmem:[%s12651_s0 + $0x560] sm:$0xff]  ;;  %v183_v46 = vld [vmem:[%s12651_s0 + $0x528] sm:$0xff] }
 0x27a   :  { %v4847_v30 = vadd.f32 %v4846_v19, %v9334_v29  ;;  %v5135_v55 = vpop.f32.mrf.mxu1  ;;  %5648 = vmatmul.mubr.bf16.gmra.mxu1 %v7418_v42  ;;  %5366 = vmatprep.mubr.bf16.mxu0 %v7433_v39  ;;  %v167_v29 = vld [vmem:[%s12651_s0 + $0x4a8] sm:$0xff]  ;;  %v7434_v42 = vcombine.low %v151_v9, %v159_v23  ;;  %v7449_v39 = vcombine.high %v166_v27, %v174_v36 }
 0x27b   :  { %v4848_v17 = vpop.f32.mrf.mxu0  ;;  %5655 = vmatprep.mubr.bf16.mxu1 %v7435_v6  ;;  %v7451_v6 = vcombine.high %v167_v29, %v175_v32  ;;  %v191_v23 = vld [vmem:[%s12651_s0 + $0x568] sm:$0xff] }
 0x27c   :  { %v10035_v61 = vadd.f32 %v5135_v55, %v4847_v30  ;;  %v5137_v8 = vpop.f32.mrf.mxu1 }
 0x27d   :  { %v4849_v58 = vpop.f32.mrf.mxu0 }
 0x27e   :  { %v4850_v20 = vadd.f32 %v4849_v58, %v9348_v50  ;;  %v5138_v40 = vpop.f32.mrf.mxu1  ;;  %v182_v50 = vld [vmem:[%s12651_s0 + $0x520] sm:$0xff]  ;;  %v8376_v58 = vld [vmem:[%s12650_s1 + $0x358] sm:$0xff]  }
 0x27f   :  { %v4851_v25 = vpop.f32.mrf.mxu0  ;;  %5873 = vmatpush2.bf16.msra.mxu0 %v8376_v58 }
 0x280   :  { %v10044_v52 = vadd.f32 %v5138_v40, %v4850_v20  ;;  %v5140_v19 = vpop.f32.mrf.mxu1  ;;  %v7448_v40 = vcombine.low %v166_v27, %v174_v36  ;;  %v7450_v25 = vcombine.low %v167_v29, %v175_v32  ;;  %5874 = vmatprep.subr.bf16.mxu0 %v12716_v15  ;;  %v198_v29 = vld [vmem:[%s12651_s0 + $0x5a0] sm:$0xff] }
 0x281   :  { %v4854_v30 = vpop.f32.mrf.mxu0  ;;  %5367 = vmatmul.mubr.bf16.gmra.mxu0 %v7432_v49  ;;  %v8377_v49 = vld [vmem:[%s12650_s1 + $0x3d8] sm:$0xff]   ;;  %v206_v32 = vld [vmem:[%s12651_s0 + $0x5e0] sm:$0xff] }
 0x282   :  { %v4855_v55 = vadd.f32 %v4854_v30, %v9350_v5  ;;  %v5143_v17 = vpop.f32.mrf.mxu1  ;;  %5656 = vmatmul.mubr.bf16.gmra.mxu1 %v7434_v42  ;;  %5374 = vmatprep.mubr.bf16.mxu0 %v7449_v39  ;;  %v7467_v30 = vcombine.high %v183_v46, %v191_v23 }
 0x283   :  { %v4856_v8 = vpop.f32.mrf.mxu0  ;;  %5663 = vmatprep.mubr.bf16.mxu1 %v7451_v6  ;;  %v7465_v6 = vcombine.high %v182_v50, %v190_v47  ;;  %6162 = vmatpush2.bf16.msra.mxu1 %v8377_v49  ;;  %v207_v49 = vld [vmem:[%s12651_s0 + $0x5e8] sm:$0xff] }
 0x284   :  { %v10056_v9 = vadd.f32 %v5143_v17, %v4855_v55  ;;  %v5145_v5 = vpop.f32.mrf.mxu1  ;;  %6163 = vmatprep.subr.bf16.mxu1 %v12716_v15 }
 0x285   :  { %v4857_v20 = vpop.f32.mrf.mxu0 }
 0x286   :  { %v4858_v42 = vadd.f32 %v4857_v20, %v9370_v28  ;;  %v5146_v39 = vpop.f32.mrf.mxu1 }
 0x287   :  { %v4859_v19 = vpop.f32.mrf.mxu0 }
 0x288   :  { %v10070_v55 = vadd.f32 %v5146_v39, %v4858_v42  ;;  %v5148_v17 = vpop.f32.mrf.mxu1 }
 0x289   :  { %v4862_v8 = vpop.f32.mrf.mxu0  ;;  %5375 = vmatmul.mubr.bf16.gmra.mxu0 %v7448_v40  ;;  %v7464_v40 = vcombine.low %v182_v50, %v190_v47  ;;  %v222_v50 = vld [vmem:[%s12651_s0 + $0x660] sm:$0xff]  ;;  %v215_v47 = vld [vmem:[%s12651_s0 + $0x628] sm:$0xff] }
 0x28a   :  { %v4863_v27 = vadd.f32 %v4862_v8, %v9374_v34  ;;  %v5151_v36 = vpop.f32.mrf.mxu1  ;;  %5664 = vmatmul.mubr.bf16.gmra.mxu1 %v7450_v25  ;;  %5382 = vmatprep.mubr.bf16.mxu0 %v7465_v6  ;;  %v199_v34 = vld [vmem:[%s12651_s0 + $0x5a8] sm:$0xff]  ;;  %v7466_v25 = vcombine.low %v183_v46, %v191_v23  ;;  %v7481_v6 = vcombine.high %v198_v29, %v206_v32 }
 0x28b   :  { %v4864_v28 = vpop.f32.mrf.mxu0  ;;  %5671 = vmatprep.mubr.bf16.mxu1 %v7467_v30  ;;  %v7483_v30 = vcombine.high %v199_v34, %v207_v49  ;;  %v223_v23 = vld [vmem:[%s12651_s0 + $0x668] sm:$0xff] }
 0x28c   :  { %v10079_v5 = vadd.f32 %v5151_v36, %v4863_v27  ;;  %v5153_v58 = vpop.f32.mrf.mxu1 }
 0x28d   :  { %v4865_v20 = vpop.f32.mrf.mxu0 }
 0x28e   :  { %v4866_v42 = vadd.f32 %v4865_v20, %v9388_v4  ;;  %v5154_v39 = vpop.f32.mrf.mxu1  ;;  %v214_v4 = vld [vmem:[%s12651_s0 + $0x620] sm:$0xff]  ;;  %v8378_v20 = vld [vmem:[%s12650_s1 + $0x350] sm:$0xff]  }
 0x28f   :  { %v4867_v19 = vpop.f32.mrf.mxu0  ;;  %5875 = vmatpush2.bf16.msra.mxu0 %v8378_v20 }
 0x290   :  { %v10088_v17 = vadd.f32 %v5154_v39, %v4866_v42  ;;  %v5156_v8 = vpop.f32.mrf.mxu1  ;;  %v7480_v39 = vcombine.low %v198_v29, %v206_v32  ;;  %v7482_v19 = vcombine.low %v199_v34, %v207_v49  ;;  %5876 = vmatprep.subr.bf16.mxu0 %v12716_v15  ;;  %v230_v34 = vld [vmem:[%s12651_s0 + $0x6a0] sm:$0xff] }
 0x291   :  { %v4870_v27 = vpop.f32.mrf.mxu0  ;;  %5383 = vmatmul.mubr.bf16.gmra.mxu0 %v7464_v40  ;;  %v8379_v40 = vld [vmem:[%s12650_s1 + $0x3d0] sm:$0xff]   ;;  %v238_v49 = vld [vmem:[%s12651_s0 + $0x6e0] sm:$0xff] }
 0x292   :  { %v4871_v36 = vadd.f32 %v4870_v27, %v9390_v24  ;;  %v5159_v28 = vpop.f32.mrf.mxu1  ;;  %5672 = vmatmul.mubr.bf16.gmra.mxu1 %v7466_v25  ;;  %5390 = vmatprep.mubr.bf16.mxu0 %v7481_v6  ;;  %v7499_v27 = vcombine.high %v215_v47, %v223_v23 }
 0x293   :  { %v4872_v58 = vpop.f32.mrf.mxu0  ;;  %5679 = vmatprep.mubr.bf16.mxu1 %v7483_v30  ;;  %v7497_v30 = vcombine.high %v214_v4, %v222_v50  ;;  %6164 = vmatpush2.bf16.msra.mxu1 %v8379_v40  ;;  %v239_v40 = vld [vmem:[%s12651_s0 + $0x6e8] sm:$0xff] }
 0x294   :  { %v10100_v46 = vadd.f32 %v5159_v28, %v4871_v36  ;;  %v5161_v24 = vpop.f32.mrf.mxu1  ;;  %6165 = vmatprep.subr.bf16.mxu1 %v12716_v15 }
 0x295   :  { %v4873_v42 = vpop.f32.mrf.mxu0 }
 0x296   :  { %v4874_v25 = vadd.f32 %v4873_v42, %v9410_v62  ;;  %v5162_v6 = vpop.f32.mrf.mxu1 }
 0x297   :  { %v4875_v8 = vpop.f32.mrf.mxu0 }
 0x298   :  { %v10114_v36 = vadd.f32 %v5162_v6, %v4874_v25  ;;  %v5164_v28 = vpop.f32.mrf.mxu1 }
 0x299   :  { %v4878_v58 = vpop.f32.mrf.mxu0  ;;  %5391 = vmatmul.mubr.bf16.gmra.mxu0 %v7480_v39  ;;  %v7496_v39 = vcombine.low %v214_v4, %v222_v50  ;;  %v254_v4 = vld [vmem:[%s12651_s0 + $0x760] sm:$0xff]  ;;  %v247_v50 = vld [vmem:[%s12651_s0 + $0x728] sm:$0xff] }
 0x29a   :  { %v4879_v29 = vadd.f32 %v4878_v58, %v9414_v37  ;;  %v5167_v32 = vpop.f32.mrf.mxu1  ;;  %5680 = vmatmul.mubr.bf16.gmra.mxu1 %v7482_v19  ;;  %5398 = vmatprep.mubr.bf16.mxu0 %v7497_v30  ;;  %v231_v37 = vld [vmem:[%s12651_s0 + $0x6a8] sm:$0xff]  ;;  %v7498_v19 = vcombine.low %v215_v47, %v223_v23  ;;  %v7513_v30 = vcombine.high %v230_v34, %v238_v49 }
 0x29b   :  { %v4880_v62 = vpop.f32.mrf.mxu0  ;;  %5687 = vmatprep.mubr.bf16.mxu1 %v7499_v27  ;;  %v7515_v27 = vcombine.high %v231_v37, %v239_v40  ;;  %v255_v23 = vld [vmem:[%s12651_s0 + $0x768] sm:$0xff] }
 0x29c   :  { %v10123_v24 = vadd.f32 %v5167_v32, %v4879_v29  ;;  %v5169_v20 = vpop.f32.mrf.mxu1 }
 0x29d   :  { %v4881_v42 = vpop.f32.mrf.mxu0 }
 0x29e   :  { %v4882_v25 = vadd.f32 %v4881_v42, %v9428_v44  ;;  %v5170_v6 = vpop.f32.mrf.mxu1  ;;  %v246_v44 = vld [vmem:[%s12651_s0 + $0x720] sm:$0xff]  ;;  %v8380_v42 = vld [vmem:[%s12650_s1 + $0x348] sm:$0xff]  }
 0x29f   :  { %v4883_v8 = vpop.f32.mrf.mxu0  ;;  %5877 = vmatpush2.bf16.msra.mxu0 %v8380_v42 }
 0x2a0   :  { %v10132_v28 = vadd.f32 %v5170_v6, %v4882_v25  ;;  %v5172_v58 = vpop.f32.mrf.mxu1  ;;  %v7512_v6 = vcombine.low %v230_v34, %v238_v49  ;;  %v7514_v8 = vcombine.low %v231_v37, %v239_v40  ;;  %5878 = vmatprep.subr.bf16.mxu0 %v12716_v15  ;;  %v262_v37 = vld [vmem:[%s12651_s0 + $0x7a0] sm:$0xff] }
 0x2a1   :  { %v4886_v29 = vpop.f32.mrf.mxu0  ;;  %5399 = vmatmul.mubr.bf16.gmra.mxu0 %v7496_v39  ;;  %v8381_v39 = vld [vmem:[%s12650_s1 + $0x3c8] sm:$0xff]  }
 0x2a2   :  { %v4887_v32 = vadd.f32 %v4886_v29, %v9430_v7  ;;  %v5175_v62 = vpop.f32.mrf.mxu1  ;;  %5688 = vmatmul.mubr.bf16.gmra.mxu1 %v7498_v19  ;;  %5406 = vmatprep.mubr.bf16.mxu0 %v7513_v30  ;;  %v7531_v29 = vcombine.high %v247_v50, %v255_v23 }
 0x2a3   :  { %v4888_v20 = vpop.f32.mrf.mxu0  ;;  %5695 = vmatprep.mubr.bf16.mxu1 %v7515_v27  ;;  %v7529_v27 = vcombine.high %v246_v44, %v254_v4  ;;  %6166 = vmatpush2.bf16.msra.mxu1 %v8381_v39  ;;  %v263_v39 = vld [vmem:[%s12651_s0 + $0x7a8] sm:$0xff] }
 0x2a4   :  { %v10144_v47 = vadd.f32 %v5175_v62, %v4887_v32  ;;  %v5177_v7 = vpop.f32.mrf.mxu1  ;;  %6167 = vmatprep.subr.bf16.mxu1 %v12716_v15  ;;  %v270_v15 = vld [vmem:[%s12651_s0 + $0x7e0] sm:$0xff] }
 0x2a5   :  { %v4889_v25 = vpop.f32.mrf.mxu0  ;;  %v12738_v7 = vld [vmem:[#allocation2_spill] sm:$0xff] }
 0x2a6   :  { %12736 = vst [vmem:[#allocation25_spill] sm:$0xff] %v10144_v47  ;;  %v4890_v19 = vadd.f32 %v4889_v25, %v9450_v35  ;;  %v5178_v30 = vpop.f32.mrf.mxu1  ;;  %v271_v25 = vld [vmem:[%s12651_s0 + $0x7e8] sm:$0xff] }
 0x2a7   :  { %v4891_v58 = vpop.f32.mrf.mxu0 }
 0x2a8   :  { %v10158_v32 = vadd.f32 %v5178_v30, %v4890_v19  ;;  %v5180_v62 = vpop.f32.mrf.mxu1  ;;  %v7528_v19 = vcombine.low %v246_v44, %v254_v4  ;;  %v12740_v30 = vld [vmem:[#allocation3_spill] sm:$0xff]  ;;  %v7530_v58 = vcombine.low %v247_v50, %v255_v23  ;;  %v278_v44 = vld [vmem:[%s12651_s0 + $0x820] sm:$0xff] }
 0x2a9   :  { %v4894_v20 = vpop.f32.mrf.mxu0  ;;  %5407 = vmatmul.mubr.bf16.gmra.mxu0 %v7512_v6  ;;  %v286_v4 = vld [vmem:[%s12651_s0 + $0x860] sm:$0xff]  ;;  %v279_v50 = vld [vmem:[%s12651_s0 + $0x828] sm:$0xff] }
 0x2aa   :  { %12737 = vst [vmem:[#allocation26_spill] sm:$0xff] %v10158_v32  ;;  %v4895_v34 = vadd.f32 %v4894_v20, %v12738_v7  ;;  %v5183_v49 = vpop.f32.mrf.mxu1  ;;  %5696 = vmatmul.mubr.bf16.gmra.mxu1 %v7514_v8  ;;  %5414 = vmatprep.mubr.bf16.mxu0 %v7529_v27  ;;  %v7547_v20 = vcombine.high %v263_v39, %v271_v25 }
 0x2ab   :  { %v4896_v35 = vpop.f32.mrf.mxu0  ;;  %5703 = vmatprep.mubr.bf16.mxu1 %v7531_v29  ;;  %v7545_v29 = vcombine.high %v262_v37, %v270_v15 }
 0x2ac   :  { %v10167_v40 = vadd.f32 %v5183_v49, %v4895_v34  ;;  %v5185_v42 = vpop.f32.mrf.mxu1  ;;  %v12742_v35 = vld [vmem:[#allocation4_spill] sm:$0xff] }
 0x2ad   :  { %v4897_v6 = vpop.f32.mrf.mxu0 }
 0x2ae   :  { %12739 = vst [vmem:[#allocation2_spill] sm:$0xff] %v10167_v40  ;;  %v4898_v8 = vadd.f32 %v4897_v6, %v12740_v30  ;;  %v5186_v27 = vpop.f32.mrf.mxu1  ;;  %v8383_v30 = vld [vmem:[%s12650_s1 + $0x3c0] sm:$0xff]  }
 0x2af   :  { %v4899_v62 = vpop.f32.mrf.mxu0  ;;  %6168 = vmatpush2.bf16.msra.mxu1 %v8383_v30  ;;  %v303_v30 = vld [vmem:[%s12651_s0 + $0x8e8] sm:$0xff] }
 0x2b0   :  { %v10176_v7 = vadd.f32 %v5186_v27, %v4898_v8  ;;  %v5188_v34 = vpop.f32.mrf.mxu1  ;;  %v7544_v27 = vcombine.low %v262_v37, %v270_v15  ;;  %v294_v15 = vld [vmem:[%s12651_s0 + $0x8a0] sm:$0xff] }
 0x2b1   :  { %v4902_v49 = vpop.f32.mrf.mxu0  ;;  %5415 = vmatmul.mubr.bf16.gmra.mxu0 %v7528_v19  ;;  %v8382_v19 = vld [vmem:[%s12650_s1 + $0x340] sm:$0xff]  }
 0x2b2   :  { %12741 = vst [vmem:[#allocation3_spill] sm:$0xff] %v10176_v7  ;;  %v4903_v42 = vadd.f32 %v4902_v49, %v12742_v35  ;;  %v5191_v40 = vpop.f32.mrf.mxu1  ;;  %5704 = vmatmul.mubr.bf16.gmra.mxu1 %v7530_v58  ;;  %5422 = vmatprep.mubr.bf16.mxu0 %v7545_v29  ;;  %v12744_v58 = vld [vmem:[#allocation5_spill] sm:$0xff] }
 0x2b3   :  { %v4904_v32 = vpop.f32.mrf.mxu0  ;;  %5711 = vmatprep.mubr.bf16.mxu1 %v7547_v20  ;;  %v7561_v20 = vcombine.high %v278_v44, %v286_v4  ;;  %5879 = vmatpush2.bf16.msra.mxu0 %v8382_v19 }
 0x2b4   :  { %v10188_v23 = vadd.f32 %v5191_v40, %v4903_v42  ;;  %v5193_v6 = vpop.f32.mrf.mxu1  ;;  %v287_v32 = vld [vmem:[%s12651_s0 + $0x868] sm:$0xff]  ;;  %v7546_v40 = vcombine.low %v263_v39, %v271_v25  ;;  %v302_v39 = vld [vmem:[%s12651_s0 + $0x8e0] sm:$0xff] }
 0x2b5   :  { %v4905_v8 = vpop.f32.mrf.mxu0  ;;  %v7563_v49 = vcombine.high %v279_v50, %v287_v32 }
 0x2b6   :  { %12743 = vst [vmem:[#allocation4_spill] sm:$0xff] %v10188_v23  ;;  %v4906_v29 = vadd.f32 %v4905_v8, %v12744_v58  ;;  %v5194_v62 = vpop.f32.mrf.mxu1  ;;  %v12745_v23 = vld [vmem:[#allocation6_spill] sm:$0xff]  ;;  %v12747_v58 = vld [vmem:[#allocation7_spill] sm:$0xff] }
 0x2b7   :  { %v4907_v34 = vpop.f32.mrf.mxu0 }
 0x2b8   :  { %v10200_v35 = vadd.f32 %v5194_v62, %v4906_v29  ;;  %v5196_v42 = vpop.f32.mrf.mxu1 }
 0x2b9   :  { %v4910_v6 = vpop.f32.mrf.mxu0  ;;  %5423 = vmatmul.mubr.bf16.gmra.mxu0 %v7544_v27  ;;  %v7560_v27 = vcombine.low %v278_v44, %v286_v4  ;;  %v310_v44 = vld [vmem:[%s12651_s0 + $0x920] sm:$0xff] }
 0x2ba   :  { %v4911_v7 = vadd.f32 %v4910_v6, %v12745_v23  ;;  %v5199_v47 = vpop.f32.mrf.mxu1  ;;  %5712 = vmatmul.mubr.bf16.gmra.mxu1 %v7546_v40  ;;  %5430 = vmatprep.mubr.bf16.mxu0 %v7561_v20  ;;  %v295_v23 = vld [vmem:[%s12651_s0 + $0x8a8] sm:$0xff]  ;;  %v7562_v40 = vcombine.low %v279_v50, %v287_v32  ;;  %v7577_v20 = vcombine.high %v294_v15, %v302_v39  ;;  %v12749_v6 = vld [vmem:[#allocation8_spill] sm:$0xff]  ;;  %v318_v4 = vld [vmem:[%s12651_s0 + $0x960] sm:$0xff] }
 0x2bb   :  { %v4912_v37 = vpop.f32.mrf.mxu0  ;;  %5719 = vmatprep.mubr.bf16.mxu1 %v7563_v49  ;;  %v7579_v49 = vcombine.high %v295_v23, %v303_v30 }
 0x2bc   :  { %v10209_v25 = vadd.f32 %v5199_v47, %v4911_v7  ;;  %v5201_v19 = vpop.f32.mrf.mxu1 }
 0x2bd   :  { %v4913_v8 = vpop.f32.mrf.mxu0 }
 0x2be   :  { %12746 = vst [vmem:[#allocation5_spill] sm:$0xff] %v10209_v25  ;;  %v4914_v29 = vadd.f32 %v4913_v8, %v12747_v58  ;;  %v5202_v62 = vpop.f32.mrf.mxu1  ;;  %v311_v8 = vld [vmem:[%s12651_s0 + $0x928] sm:$0xff]  ;;  %v7576_v58 = vcombine.low %v294_v15, %v302_v39  ;;  %v326_v15 = vld [vmem:[%s12651_s0 + $0x9a0] sm:$0xff] }
 0x2bf   :  { %v4915_v34 = vpop.f32.mrf.mxu0  ;;  %v334_v39 = vld [vmem:[%s12651_s0 + $0x9e0] sm:$0xff] }
 0x2c0   :  { %v10218_v47 = vadd.f32 %v5202_v62, %v4914_v29  ;;  %v5204_v7 = vpop.f32.mrf.mxu1  ;;  %v12751_v29 = vld [vmem:[#allocation9_spill] sm:$0xff]  ;;  %v7593_v34 = vcombine.high %v310_v44, %v318_v4 }
 0x2c1   :  { %v4918_v42 = vpop.f32.mrf.mxu0  ;;  %5431 = vmatmul.mubr.bf16.gmra.mxu0 %v7560_v27 }
 0x2c2   :  { %12748 = vst [vmem:[#allocation6_spill] sm:$0xff] %v10218_v47  ;;  %v4919_v37 = vadd.f32 %v4918_v42, %v12749_v6  ;;  %v5207_v19 = vpop.f32.mrf.mxu1  ;;  %5720 = vmatmul.mubr.bf16.gmra.mxu1 %v7562_v40  ;;  %5438 = vmatprep.mubr.bf16.mxu0 %v7577_v20  ;;  %v7578_v20 = vcombine.low %v295_v23, %v303_v30 }
 0x2c3   :  { %v4920_v25 = vpop.f32.mrf.mxu0  ;;  %5727 = vmatprep.mubr.bf16.mxu1 %v7579_v49 }
 0x2c4   :  { %v10227_v50 = vadd.f32 %v5207_v19, %v4919_v37  ;;  %v5209_v32 = vpop.f32.mrf.mxu1  ;;  %v319_v25 = vld [vmem:[%s12651_s0 + $0x968] sm:$0xff]  ;;  %v12753_v19 = vld [vmem:[#allocation10_spill] sm:$0xff] }
 0x2c5   :  { %v4921_v27 = vpop.f32.mrf.mxu0  ;;  %v7595_v7 = vcombine.high %v311_v8, %v319_v25 }
 0x2c6   :  { %12750 = vst [vmem:[#allocation7_spill] sm:$0xff] %v10227_v50  ;;  %v4922_v62 = vadd.f32 %v4921_v27, %v12751_v29  ;;  %v5210_v40 = vpop.f32.mrf.mxu1  ;;  %v327_v27 = vld [vmem:[%s12651_s0 + $0x9a8] sm:$0xff]  ;;  %v7592_v29 = vcombine.low %v310_v44, %v318_v4  ;;  %v342_v44 = vld [vmem:[%s12651_s0 + $0xa20] sm:$0xff] }
 0x2c7   :  { %v4923_v49 = vpop.f32.mrf.mxu0  ;;  %v350_v4 = vld [vmem:[%s12651_s0 + $0xa60] sm:$0xff] }
 0x2c8   :  { %v10236_v42 = vadd.f32 %v5210_v40, %v4922_v62  ;;  %v5212_v6 = vpop.f32.mrf.mxu1  ;;  %v12755_v62 = vld [vmem:[#allocation11_spill] sm:$0xff]  ;;  %v7609_v49 = vcombine.high %v326_v15, %v334_v39 }
 0x2c9   :  { %v4926_v37 = vpop.f32.mrf.mxu0  ;;  %5439 = vmatmul.mubr.bf16.gmra.mxu0 %v7576_v58 }
 0x2ca   :  { %12752 = vst [vmem:[#allocation8_spill] sm:$0xff] %v10236_v42  ;;  %v4927_v32 = vadd.f32 %v4926_v37, %v12753_v19  ;;  %v5215_v50 = vpop.f32.mrf.mxu1  ;;  %5728 = vmatmul.mubr.bf16.gmra.mxu1 %v7578_v20  ;;  %5446 = vmatprep.mubr.bf16.mxu0 %v7593_v34  ;;  %v7594_v34 = vcombine.low %v311_v8, %v319_v25 }
 0x2cb   :  { %v4928_v47 = vpop.f32.mrf.mxu0  ;;  %5735 = vmatprep.mubr.bf16.mxu1 %v7595_v7 }
 0x2cc   :  { %v10245_v23 = vadd.f32 %v5215_v50, %v4927_v32  ;;  %v5217_v30 = vpop.f32.mrf.mxu1  ;;  %v335_v47 = vld [vmem:[%s12651_s0 + $0x9e8] sm:$0xff]  ;;  %v12757_v32 = vld [vmem:[#allocation12_spill] sm:$0xff] }
 0x2cd   :  { %v4929_v58 = vpop.f32.mrf.mxu0  ;;  %v7611_v6 = vcombine.high %v327_v27, %v335_v47 }
 0x2ce   :  { %12754 = vst [vmem:[#allocation9_spill] sm:$0xff] %v10245_v23  ;;  %v4930_v40 = vadd.f32 %v4929_v58, %v12755_v62  ;;  %v5218_v20 = vpop.f32.mrf.mxu1  ;;  %v343_v58 = vld [vmem:[%s12651_s0 + $0xa28] sm:$0xff]  ;;  %v7608_v62 = vcombine.low %v326_v15, %v334_v39  ;;  %v358_v15 = vld [vmem:[%s12651_s0 + $0xaa0] sm:$0xff] }
 0x2cf   :  { %v4931_v7 = vpop.f32.mrf.mxu0  ;;  %v366_v39 = vld [vmem:[%s12651_s0 + $0xae0] sm:$0xff] }
 0x2d0   :  { %v10254_v50 = vadd.f32 %v5218_v20, %v4930_v40  ;;  %v5220_v37 = vpop.f32.mrf.mxu1  ;;  %v12759_v40 = vld [vmem:[#allocation13_spill] sm:$0xff]  ;;  %v7625_v7 = vcombine.high %v342_v44, %v350_v4 }
 0x2d1   :  { %v4934_v19 = vpop.f32.mrf.mxu0  ;;  %5447 = vmatmul.mubr.bf16.gmra.mxu0 %v7592_v29 }
 0x2d2   :  { %12756 = vst [vmem:[#allocation10_spill] sm:$0xff] %v10254_v50  ;;  %v4935_v30 = vadd.f32 %v4934_v19, %v12757_v32  ;;  %v5223_v23 = vpop.f32.mrf.mxu1  ;;  %5736 = vmatmul.mubr.bf16.gmra.mxu1 %v7594_v34  ;;  %5454 = vmatprep.mubr.bf16.mxu0 %v7609_v49  ;;  %v7610_v49 = vcombine.low %v327_v27, %v335_v47 }
 0x2d3   :  { %v4936_v42 = vpop.f32.mrf.mxu0  ;;  %5743 = vmatprep.mubr.bf16.mxu1 %v7611_v6 }
 0x2d4   :  { %v10263_v8 = vadd.f32 %v5223_v23, %v4935_v30  ;;  %v5225_v25 = vpop.f32.mrf.mxu1  ;;  %v351_v42 = vld [vmem:[%s12651_s0 + $0xa68] sm:$0xff]  ;;  %v12761_v30 = vld [vmem:[#allocation14_spill] sm:$0xff] }
 0x2d5   :  { %v4937_v29 = vpop.f32.mrf.mxu0  ;;  %v7627_v37 = vcombine.high %v343_v58, %v351_v42 }
 0x2d6   :  { %12758 = vst [vmem:[#allocation11_spill] sm:$0xff] %v10263_v8  ;;  %v4938_v20 = vadd.f32 %v4937_v29, %v12759_v40  ;;  %v5226_v34 = vpop.f32.mrf.mxu1  ;;  %v359_v29 = vld [vmem:[%s12651_s0 + $0xaa8] sm:$0xff]  ;;  %v7624_v40 = vcombine.low %v342_v44, %v350_v4  ;;  %v374_v44 = vld [vmem:[%s12651_s0 + $0xb20] sm:$0xff] }
 0x2d7   :  { %v4939_v6 = vpop.f32.mrf.mxu0  ;;  %v382_v4 = vld [vmem:[%s12651_s0 + $0xb60] sm:$0xff] }
 0x2d8   :  { %v10272_v23 = vadd.f32 %v5226_v34, %v4938_v20  ;;  %v5228_v19 = vpop.f32.mrf.mxu1  ;;  %v12763_v20 = vld [vmem:[#allocation15_spill] sm:$0xff]  ;;  %v7641_v6 = vcombine.high %v358_v15, %v366_v39 }
 0x2d9   :  { %v4942_v32 = vpop.f32.mrf.mxu0  ;;  %5455 = vmatmul.mubr.bf16.gmra.mxu0 %v7608_v62 }
 0x2da   :  { %12760 = vst [vmem:[#allocation12_spill] sm:$0xff] %v10272_v23  ;;  %v4943_v25 = vadd.f32 %v4942_v32, %v12761_v30  ;;  %v5231_v8 = vpop.f32.mrf.mxu1  ;;  %5744 = vmatmul.mubr.bf16.gmra.mxu1 %v7610_v49  ;;  %5462 = vmatprep.mubr.bf16.mxu0 %v7625_v7  ;;  %v7626_v7 = vcombine.low %v343_v58, %v351_v42 }
 0x2db   :  { %v4944_v50 = vpop.f32.mrf.mxu0  ;;  %5751 = vmatprep.mubr.bf16.mxu1 %v7627_v37 }
 0x2dc   :  { %v10281_v27 = vadd.f32 %v5231_v8, %v4943_v25  ;;  %v5233_v47 = vpop.f32.mrf.mxu1  ;;  %v367_v50 = vld [vmem:[%s12651_s0 + $0xae8] sm:$0xff]  ;;  %v12765_v25 = vld [vmem:[#allocation16_spill] sm:$0xff] }
 0x2dd   :  { %v4945_v62 = vpop.f32.mrf.mxu0  ;;  %v7643_v19 = vcombine.high %v359_v29, %v367_v50 }
 0x2de   :  { %12762 = vst [vmem:[#allocation13_spill] sm:$0xff] %v10281_v27  ;;  %v4946_v34 = vadd.f32 %v4945_v62, %v12763_v20  ;;  %v5234_v49 = vpop.f32.mrf.mxu1  ;;  %v375_v62 = vld [vmem:[%s12651_s0 + $0xb28] sm:$0xff]  ;;  %v7640_v20 = vcombine.low %v358_v15, %v366_v39  ;;  %v390_v15 = vld [vmem:[%s12651_s0 + $0xba0] sm:$0xff] }
 0x2df   :  { %v4947_v37 = vpop.f32.mrf.mxu0  ;;  %v398_v39 = vld [vmem:[%s12651_s0 + $0xbe0] sm:$0xff] }
 0x2e0   :  { %v10290_v8 = vadd.f32 %v5234_v49, %v4946_v34  ;;  %v5236_v32 = vpop.f32.mrf.mxu1  ;;  %v12767_v34 = vld [vmem:[#allocation17_spill] sm:$0xff]  ;;  %v7657_v37 = vcombine.high %v374_v44, %v382_v4 }
 0x2e1   :  { %v4950_v30 = vpop.f32.mrf.mxu0  ;;  %5463 = vmatmul.mubr.bf16.gmra.mxu0 %v7624_v40 }
 0x2e2   :  { %12764 = vst [vmem:[#allocation14_spill] sm:$0xff] %v10290_v8  ;;  %v4951_v47 = vadd.f32 %v4950_v30, %v12765_v25  ;;  %v5239_v27 = vpop.f32.mrf.mxu1  ;;  %5752 = vmatmul.mubr.bf16.gmra.mxu1 %v7626_v7  ;;  %5470 = vmatprep.mubr.bf16.mxu0 %v7641_v6  ;;  %v7642_v6 = vcombine.low %v359_v29, %v367_v50 }
 0x2e3   :  { %v4952_v23 = vpop.f32.mrf.mxu0  ;;  %5759 = vmatprep.mubr.bf16.mxu1 %v7643_v19 }
 0x2e4   :  { %v10299_v58 = vadd.f32 %v5239_v27, %v4951_v47  ;;  %v5241_v42 = vpop.f32.mrf.mxu1  ;;  %v383_v23 = vld [vmem:[%s12651_s0 + $0xb68] sm:$0xff]  ;;  %v12769_v47 = vld [vmem:[#allocation18_spill] sm:$0xff] }
 0x2e5   :  { %v4953_v40 = vpop.f32.mrf.mxu0  ;;  %v7659_v32 = vcombine.high %v375_v62, %v383_v23 }
 0x2e6   :  { %12766 = vst [vmem:[#allocation15_spill] sm:$0xff] %v10299_v58  ;;  %v4954_v49 = vadd.f32 %v4953_v40, %v12767_v34  ;;  %v5242_v7 = vpop.f32.mrf.mxu1  ;;  %v391_v40 = vld [vmem:[%s12651_s0 + $0xba8] sm:$0xff]  ;;  %v7656_v34 = vcombine.low %v374_v44, %v382_v4  ;;  %v406_v44 = vld [vmem:[%s12651_s0 + $0xc20] sm:$0xff] }
 0x2e7   :  { %v4955_v19 = vpop.f32.mrf.mxu0  ;;  %v414_v4 = vld [vmem:[%s12651_s0 + $0xc60] sm:$0xff] }
 0x2e8   :  { %v10308_v27 = vadd.f32 %v5242_v7, %v4954_v49  ;;  %v5244_v30 = vpop.f32.mrf.mxu1  ;;  %v12771_v49 = vld [vmem:[#allocation19_spill] sm:$0xff]  ;;  %v7673_v19 = vcombine.high %v390_v15, %v398_v39 }
 0x2e9   :  { %v4958_v25 = vpop.f32.mrf.mxu0  ;;  %5471 = vmatmul.mubr.bf16.gmra.mxu0 %v7640_v20 }
 0x2ea   :  { %12768 = vst [vmem:[#allocation16_spill] sm:$0xff] %v10308_v27  ;;  %v4959_v42 = vadd.f32 %v4958_v25, %v12769_v47  ;;  %v5247_v58 = vpop.f32.mrf.mxu1  ;;  %5760 = vmatmul.mubr.bf16.gmra.mxu1 %v7642_v6  ;;  %5478 = vmatprep.mubr.bf16.mxu0 %v7657_v37  ;;  %v7658_v37 = vcombine.low %v375_v62, %v383_v23 }
 0x2eb   :  { %v4960_v8 = vpop.f32.mrf.mxu0  ;;  %5767 = vmatprep.mubr.bf16.mxu1 %v7659_v32 }
 0x2ec   :  { %v10317_v29 = vadd.f32 %v5247_v58, %v4959_v42  ;;  %v5249_v50 = vpop.f32.mrf.mxu1  ;;  %v399_v8 = vld [vmem:[%s12651_s0 + $0xbe8] sm:$0xff]  ;;  %v12773_v42 = vld [vmem:[#allocation20_spill] sm:$0xff] }
 0x2ed   :  { %v4961_v20 = vpop.f32.mrf.mxu0  ;;  %v7675_v30 = vcombine.high %v391_v40, %v399_v8 }
 0x2ee   :  { %12770 = vst [vmem:[#allocation17_spill] sm:$0xff] %v10317_v29  ;;  %v4962_v7 = vadd.f32 %v4961_v20, %v12771_v49  ;;  %v5250_v6 = vpop.f32.mrf.mxu1  ;;  %v407_v20 = vld [vmem:[%s12651_s0 + $0xc28] sm:$0xff]  ;;  %v7672_v49 = vcombine.low %v390_v15, %v398_v39  ;;  %v422_v15 = vld [vmem:[%s12651_s0 + $0xca0] sm:$0xff] }
 0x2ef   :  { %v4963_v32 = vpop.f32.mrf.mxu0  ;;  %v430_v39 = vld [vmem:[%s12651_s0 + $0xce0] sm:$0xff] }
 0x2f0   :  { %v10326_v58 = vadd.f32 %v5250_v6, %v4962_v7  ;;  %v5252_v25 = vpop.f32.mrf.mxu1  ;;  %v12775_v7 = vld [vmem:[#allocation21_spill] sm:$0xff]  ;;  %v7689_v32 = vcombine.high %v406_v44, %v414_v4 }
 0x2f1   :  { %v4966_v47 = vpop.f32.mrf.mxu0  ;;  %5479 = vmatmul.mubr.bf16.gmra.mxu0 %v7656_v34 }
 0x2f2   :  { %12772 = vst [vmem:[#allocation18_spill] sm:$0xff] %v10326_v58  ;;  %v4967_v50 = vadd.f32 %v4966_v47, %v12773_v42  ;;  %v5255_v29 = vpop.f32.mrf.mxu1  ;;  %5768 = vmatmul.mubr.bf16.gmra.mxu1 %v7658_v37  ;;  %5486 = vmatprep.mubr.bf16.mxu0 %v7673_v19  ;;  %v7674_v19 = vcombine.low %v391_v40, %v399_v8 }
 0x2f3   :  { %v4968_v27 = vpop.f32.mrf.mxu0  ;;  %5775 = vmatprep.mubr.bf16.mxu1 %v7675_v30 }
 0x2f4   :  { %v10335_v62 = vadd.f32 %v5255_v29, %v4967_v50  ;;  %v5257_v23 = vpop.f32.mrf.mxu1  ;;  %v415_v27 = vld [vmem:[%s12651_s0 + $0xc68] sm:$0xff]  ;;  %v12777_v50 = vld [vmem:[#allocation22_spill] sm:$0xff] }
 0x2f5   :  { %v4969_v34 = vpop.f32.mrf.mxu0  ;;  %v7691_v25 = vcombine.high %v407_v20, %v415_v27 }
 0x2f6   :  { %12774 = vst [vmem:[#allocation19_spill] sm:$0xff] %v10335_v62  ;;  %v4970_v6 = vadd.f32 %v4969_v34, %v12775_v7  ;;  %v5258_v37 = vpop.f32.mrf.mxu1  ;;  %v423_v34 = vld [vmem:[%s12651_s0 + $0xca8] sm:$0xff]  ;;  %v7688_v7 = vcombine.low %v406_v44, %v414_v4  ;;  %v438_v44 = vld [vmem:[%s12651_s0 + $0xd20] sm:$0xff] }
 0x2f7   :  { %v4971_v30 = vpop.f32.mrf.mxu0  ;;  %v446_v4 = vld [vmem:[%s12651_s0 + $0xd60] sm:$0xff] }
 0x2f8   :  { %v10344_v29 = vadd.f32 %v5258_v37, %v4970_v6  ;;  %v5260_v47 = vpop.f32.mrf.mxu1  ;;  %v12779_v6 = vld [vmem:[#allocation23_spill] sm:$0xff]  ;;  %v7705_v30 = vcombine.high %v422_v15, %v430_v39 }
 0x2f9   :  { %v4974_v42 = vpop.f32.mrf.mxu0  ;;  %5487 = vmatmul.mubr.bf16.gmra.mxu0 %v7672_v49 }
 0x2fa   :  { %12776 = vst [vmem:[#allocation20_spill] sm:$0xff] %v10344_v29  ;;  %v4975_v23 = vadd.f32 %v4974_v42, %v12777_v50  ;;  %v5263_v62 = vpop.f32.mrf.mxu1  ;;  %5776 = vmatmul.mubr.bf16.gmra.mxu1 %v7674_v19  ;;  %5494 = vmatprep.mubr.bf16.mxu0 %v7689_v32  ;;  %v7690_v32 = vcombine.low %v407_v20, %v415_v27 }
 0x2fb   :  { %v4976_v58 = vpop.f32.mrf.mxu0  ;;  %5783 = vmatprep.mubr.bf16.mxu1 %v7691_v25 }
 0x2fc   :  { %v10353_v40 = vadd.f32 %v5263_v62, %v4975_v23  ;;  %v5265_v8 = vpop.f32.mrf.mxu1  ;;  %v431_v58 = vld [vmem:[%s12651_s0 + $0xce8] sm:$0xff]  ;;  %v12780_v23 = vld [vmem:[#allocation24_spill] sm:$0xff] }
 0x2fd   :  { %v4977_v49 = vpop.f32.mrf.mxu0  ;;  %v7707_v47 = vcombine.high %v423_v34, %v431_v58 }
 0x2fe   :  { %12778 = vst [vmem:[#allocation21_spill] sm:$0xff] %v10353_v40  ;;  %v4978_v37 = vadd.f32 %v4977_v49, %v12779_v6  ;;  %v5266_v19 = vpop.f32.mrf.mxu1  ;;  %v439_v49 = vld [vmem:[%s12651_s0 + $0xd28] sm:$0xff]  ;;  %v7704_v6 = vcombine.low %v422_v15, %v430_v39  ;;  %v462_v15 = vld [vmem:[%s12651_s0 + $0xde0] sm:$0xff] }
 0x2ff   :  { %v4979_v25 = vpop.f32.mrf.mxu0 }
 0x300   :  { %v10362_v62 = vadd.f32 %v5266_v19, %v4978_v37  ;;  %v5268_v42 = vpop.f32.mrf.mxu1 }
 0x301   :  { %v5304_v50 = vpop.f32.mrf.mxu0  ;;  %5495 = vmatmul.mubr.bf16.gmra.mxu0 %v7688_v7 }
 0x302   :  { %v5305_v8 = vadd.f32 %v5304_v50, %v12780_v23  ;;  %v5593_v40 = vpop.f32.mrf.mxu1  ;;  %5784 = vmatmul.mubr.bf16.gmra.mxu1 %v7690_v32  ;;  %5502 = vmatprep.mubr.bf16.mxu0 %v7705_v30  ;;  %v7706_v32 = vcombine.low %v423_v34, %v431_v58  ;;  %v7721_v30 = vcombine.high %v438_v44, %v446_v4  ;;  %v463_v58 = vld [vmem:[%s12651_s0 + $0xde8] sm:$0xff] }
 0x303   :  { %v5306_v29 = vpop.f32.mrf.mxu0  ;;  %5791 = vmatprep.mubr.bf16.mxu1 %v7707_v47 }
 0x304   :  { %v10371_v20 = vadd.f32 %v5593_v40, %v5305_v8  ;;  %v5595_v27 = vpop.f32.mrf.mxu1  ;;  %v447_v29 = vld [vmem:[%s12651_s0 + $0xd68] sm:$0xff] }
 0x305   :  { %v5307_v7 = vpop.f32.mrf.mxu0  ;;  %v7723_v47 = vcombine.high %v439_v49, %v447_v29 }
 0x306   :  { %v5308_v37 = vadd.f32 %v5307_v7, %v9654_v18  ;;  %v5596_v19 = vpop.f32.mrf.mxu1  ;;  %v454_v18 = vld [vmem:[%s12651_s0 + $0xda0] sm:$0xff] }
 0x307   :  { %v5309_v25 = vpop.f32.mrf.mxu0 }
 0x308   :  { %v10380_v40 = vadd.f32 %v5596_v19, %v5308_v37  ;;  %v5598_v42 = vpop.f32.mrf.mxu1 }
 0x309   :  { %v5312_v50 = vpop.f32.mrf.mxu0  ;;  %5503 = vmatmul.mubr.bf16.gmra.mxu0 %v7704_v6  ;;  %v7720_v6 = vcombine.low %v438_v44, %v446_v4  ;;  %v478_v44 = vld [vmem:[%s12651_s0 + $0xe60] sm:$0xff] }
 0x30a   :  { %v5313_v23 = vadd.f32 %v5312_v50, %v9663_v16  ;;  %v5601_v8 = vpop.f32.mrf.mxu1  ;;  %5792 = vmatmul.mubr.bf16.gmra.mxu1 %v7706_v32  ;;  %5510 = vmatprep.mubr.bf16.mxu0 %v7721_v30  ;;  %v455_v16 = vld [vmem:[%s12651_s0 + $0xda8] sm:$0xff]  ;;  %v7722_v32 = vcombine.low %v439_v49, %v447_v29  ;;  %v7737_v30 = vcombine.high %v454_v18, %v462_v15 }
 0x30b   :  { %v5314_v27 = vpop.f32.mrf.mxu0  ;;  %5799 = vmatprep.mubr.bf16.mxu1 %v7723_v47  ;;  %v7739_v47 = vcombine.high %v455_v16, %v463_v58  ;;  %v479_v29 = vld [vmem:[%s12651_s0 + $0xe68] sm:$0xff] }
 0x30c   :  { %v10389_v39 = vadd.f32 %v5601_v8, %v5313_v23  ;;  %v5603_v34 = vpop.f32.mrf.mxu1 }
 0x30d   :  { %v5315_v7 = vpop.f32.mrf.mxu0 }
 0x30e   :  { %v5316_v37 = vadd.f32 %v5315_v7, %v9672_v63  ;;  %v5604_v19 = vpop.f32.mrf.mxu1  ;;  %v470_v63 = vld [vmem:[%s12651_s0 + $0xe20] sm:$0xff] }
 0x30f   :  { %v5317_v25 = vpop.f32.mrf.mxu0 }
 0x310   :  { %v10398_v42 = vadd.f32 %v5604_v19, %v5316_v37  ;;  %v5606_v50 = vpop.f32.mrf.mxu1 }
 0x311   :  { %v5320_v23 = vpop.f32.mrf.mxu0  ;;  %5511 = vmatmul.mubr.bf16.gmra.mxu0 %v7720_v6  ;;  %v7736_v6 = vcombine.low %v454_v18, %v462_v15  ;;  %v494_v18 = vld [vmem:[%s12651_s0 + $0xee0] sm:$0xff] }
 0x312   :  { %v5321_v8 = vadd.f32 %v5320_v23, %v9681_v60  ;;  %v5609_v27 = vpop.f32.mrf.mxu1  ;;  %5800 = vmatmul.mubr.bf16.gmra.mxu1 %v7722_v32  ;;  %5518 = vmatprep.mubr.bf16.mxu0 %v7737_v30  ;;  %v471_v60 = vld [vmem:[%s12651_s0 + $0xe28] sm:$0xff]  ;;  %v7738_v32 = vcombine.low %v455_v16, %v463_v58  ;;  %v7753_v30 = vcombine.high %v470_v63, %v478_v44 }
 0x313   :  { %v5322_v34 = vpop.f32.mrf.mxu0  ;;  %5807 = vmatprep.mubr.bf16.mxu1 %v7739_v47  ;;  %v7755_v47 = vcombine.high %v471_v60, %v479_v29  ;;  %v495_v58 = vld [vmem:[%s12651_s0 + $0xee8] sm:$0xff] }
 0x314   :  { %v10407_v4 = vadd.f32 %v5609_v27, %v5321_v8  ;;  %v5611_v49 = vpop.f32.mrf.mxu1 }
 0x315   :  { %v5323_v7 = vpop.f32.mrf.mxu0 }
 0x316   :  { %v5324_v37 = vadd.f32 %v5323_v7, %v9690_v10  ;;  %v5612_v19 = vpop.f32.mrf.mxu1  ;;  %v486_v10 = vld [vmem:[%s12651_s0 + $0xea0] sm:$0xff] }
 0x317   :  { %v5325_v25 = vpop.f32.mrf.mxu0 }
 0x318   :  { %v10416_v50 = vadd.f32 %v5612_v19, %v5324_v37  ;;  %v5614_v23 = vpop.f32.mrf.mxu1 }
 0x319   :  { %v5328_v8 = vpop.f32.mrf.mxu0  ;;  %5519 = vmatmul.mubr.bf16.gmra.mxu0 %v7736_v6  ;;  %v7752_v6 = vcombine.low %v470_v63, %v478_v44  ;;  %v510_v63 = vld [vmem:[%s12651_s0 + $0xf60] sm:$0xff] }
 0x31a   :  { %v5329_v27 = vadd.f32 %v5328_v8, %v9699_v38  ;;  %v5617_v34 = vpop.f32.mrf.mxu1  ;;  %5808 = vmatmul.mubr.bf16.gmra.mxu1 %v7738_v32  ;;  %5526 = vmatprep.mubr.bf16.mxu0 %v7753_v30  ;;  %v487_v38 = vld [vmem:[%s12651_s0 + $0xea8] sm:$0xff]  ;;  %v7754_v32 = vcombine.low %v471_v60, %v479_v29  ;;  %v7769_v30 = vcombine.high %v486_v10, %v494_v18 }
 0x31b   :  { %v5330_v49 = vpop.f32.mrf.mxu0  ;;  %5815 = vmatprep.mubr.bf16.mxu1 %v7755_v47  ;;  %v7771_v47 = vcombine.high %v487_v38, %v495_v58  ;;  %v511_v29 = vld [vmem:[%s12651_s0 + $0xf68] sm:$0xff] }
 0x31c   :  { %v10425_v15 = vadd.f32 %v5617_v34, %v5329_v27  ;;  %v5619_v16 = vpop.f32.mrf.mxu1 }
 0x31d   :  { %v5331_v7 = vpop.f32.mrf.mxu0 }
 0x31e   :  { %v5332_v37 = vadd.f32 %v5331_v7, %v9708_v1  ;;  %v5620_v19 = vpop.f32.mrf.mxu1  ;;  %v502_v1 = vld [vmem:[%s12651_s0 + $0xf20] sm:$0xff] }
 0x31f   :  { %v5333_v25 = vpop.f32.mrf.mxu0 }
 0x320   :  { %v10434_v23 = vadd.f32 %v5620_v19, %v5332_v37  ;;  %v5622_v8 = vpop.f32.mrf.mxu1 }
 0x321   :  { %v5336_v27 = vpop.f32.mrf.mxu0  ;;  %5527 = vmatmul.mubr.bf16.gmra.mxu0 %v7752_v6  ;;  %v7768_v6 = vcombine.low %v486_v10, %v494_v18  ;;  %v526_v10 = vld [vmem:[%s12651_s0 + $0xfe0] sm:$0xff] }
 0x322   :  { %v5337_v34 = vadd.f32 %v5336_v27, %v9717_v59  ;;  %v5625_v49 = vpop.f32.mrf.mxu1  ;;  %5816 = vmatmul.mubr.bf16.gmra.mxu1 %v7754_v32  ;;  %5534 = vmatprep.mubr.bf16.mxu0 %v7769_v30  ;;  %v503_v59 = vld [vmem:[%s12651_s0 + $0xf28] sm:$0xff]  ;;  %v7770_v32 = vcombine.low %v487_v38, %v495_v58  ;;  %v7785_v30 = vcombine.high %v502_v1, %v510_v63 }
 0x323   :  { %v5338_v16 = vpop.f32.mrf.mxu0  ;;  %5823 = vmatprep.mubr.bf16.mxu1 %v7771_v47  ;;  %v7787_v47 = vcombine.high %v503_v59, %v511_v29  ;;  %v527_v58 = vld [vmem:[%s12651_s0 + $0xfe8] sm:$0xff] }
 0x324   :  { %v10443_v44 = vadd.f32 %v5625_v49, %v5337_v34  ;;  %v5627_v60 = vpop.f32.mrf.mxu1 }
 0x325   :  { %v5339_v7 = vpop.f32.mrf.mxu0 }
 0x326   :  { %v5340_v37 = vadd.f32 %v5339_v7, %v9726_v56  ;;  %v5628_v19 = vpop.f32.mrf.mxu1  ;;  %v518_v56 = vld [vmem:[%s12651_s0 + $0xfa0] sm:$0xff] }
 0x327   :  { %v5341_v25 = vpop.f32.mrf.mxu0 }
 0x328   :  { %v10452_v8 = vadd.f32 %v5628_v19, %v5340_v37  ;;  %v5630_v27 = vpop.f32.mrf.mxu1 }
 0x329   :  { %v5344_v34 = vpop.f32.mrf.mxu0  ;;  %5535 = vmatmul.mubr.bf16.gmra.mxu0 %v7768_v6  ;;  %v7784_v6 = vcombine.low %v502_v1, %v510_v63  ;;  %v32_v1 = vld [vmem:[%s12651_s0 + $0x70] sm:$0xff] }
 0x32a   :  { %v5345_v49 = vadd.f32 %v5344_v34, %v9735_v33  ;;  %v5633_v16 = vpop.f32.mrf.mxu1  ;;  %5824 = vmatmul.mubr.bf16.gmra.mxu1 %v7770_v32  ;;  %5542 = vmatprep.mubr.bf16.mxu0 %v7785_v30  ;;  %v519_v33 = vld [vmem:[%s12651_s0 + $0xfa8] sm:$0xff]  ;;  %v7786_v32 = vcombine.low %v503_v59, %v511_v29  ;;  %v7801_v30 = vcombine.high %v518_v56, %v526_v10  ;;  %v33_v29 = vld [vmem:[%s12651_s0 + $0x78] sm:$0xff] }
 0x32b   :  { %v5346_v60 = vpop.f32.mrf.mxu0  ;;  %5831 = vmatprep.mubr.bf16.mxu1 %v7787_v47  ;;  %v7803_v47 = vcombine.high %v519_v33, %v527_v58 }
 0x32c   :  { %v10461_v18 = vadd.f32 %v5633_v16, %v5345_v49  ;;  %v5635_v38 = vpop.f32.mrf.mxu1 }
 0x32d   :  { %v5347_v7 = vpop.f32.mrf.mxu0 }
 0x32e   :  { %v5348_v37 = vadd.f32 %v5347_v7, %v9744_v54  ;;  %v5636_v19 = vpop.f32.mrf.mxu1  ;;  %v24_v54 = vld [vmem:[%s12651_s0 + $0x30] sm:$0xff] }
 0x32f   :  { %v5349_v25 = vpop.f32.mrf.mxu0 }
 0x330   :  { %v10470_v27 = vadd.f32 %v5636_v19, %v5348_v37  ;;  %v5638_v34 = vpop.f32.mrf.mxu1 }
 0x331   :  { %v5352_v49 = vpop.f32.mrf.mxu0  ;;  %5543 = vmatmul.mubr.bf16.gmra.mxu0 %v7784_v6  ;;  %v7800_v6 = vcombine.low %v518_v56, %v526_v10  ;;  %v48_v56 = vld [vmem:[%s12651_s0 + $0xf0] sm:$0xff] }
 0x332   :  { %v5353_v16 = vadd.f32 %v5352_v49, %v9753_v51  ;;  %v5641_v60 = vpop.f32.mrf.mxu1  ;;  %5832 = vmatmul.mubr.bf16.gmra.mxu1 %v7786_v32  ;;  %5550 = vmatprep.mubr.bf16.mxu0 %v7801_v30  ;;  %v25_v51 = vld [vmem:[%s12651_s0 + $0x38] sm:$0xff]  ;;  %v7802_v32 = vcombine.low %v519_v33, %v527_v58  ;;  %v7309_v30 = vcombine.high %v24_v54, %v32_v1 }
 0x333   :  { %v5354_v38 = vpop.f32.mrf.mxu0  ;;  %5839 = vmatprep.mubr.bf16.mxu1 %v7803_v47  ;;  %v7311_v47 = vcombine.high %v25_v51, %v33_v29  ;;  %v49_v58 = vld [vmem:[%s12651_s0 + $0xf8] sm:$0xff] }
 0x334   :  { %v10479_v63 = vadd.f32 %v5641_v60, %v5353_v16  ;;  %v5643_v59 = vpop.f32.mrf.mxu1 }
 0x335   :  { %v5355_v7 = vpop.f32.mrf.mxu0 }
 0x336   :  { %v5356_v37 = vadd.f32 %v5355_v7, %v9762_v13  ;;  %v5644_v19 = vpop.f32.mrf.mxu1  ;;  %v40_v13 = vld [vmem:[%s12651_s0 + $0xb0] sm:$0xff] }
 0x337   :  { %v5357_v25 = vpop.f32.mrf.mxu0 }
 0x338   :  { %v10488_v34 = vadd.f32 %v5644_v19, %v5356_v37  ;;  %v5646_v49 = vpop.f32.mrf.mxu1 }
 0x339   :  { %v5360_v16 = vpop.f32.mrf.mxu0  ;;  %5551 = vmatmul.mubr.bf16.gmra.mxu0 %v7800_v6  ;;  %v7308_v6 = vcombine.low %v24_v54, %v32_v1  ;;  %v64_v54 = vld [vmem:[%s12651_s0 + $0x170] sm:$0xff] }
 0x33a   :  { %v5361_v60 = vadd.f32 %v5360_v16, %v9765_v45  ;;  %v5649_v38 = vpop.f32.mrf.mxu1  ;;  %5840 = vmatmul.mubr.bf16.gmra.mxu1 %v7802_v32  ;;  %5880 = vmatprep.mubr.bf16.mxu0 %v7309_v30  ;;  %v41_v45 = vld [vmem:[%s12651_s0 + $0xb8] sm:$0xff]  ;;  %v7310_v32 = vcombine.low %v25_v51, %v33_v29  ;;  %v7325_v30 = vcombine.high %v40_v13, %v48_v56 }
 0x33b   :  { %v5362_v59 = vpop.f32.mrf.mxu0  ;;  %6169 = vmatprep.mubr.bf16.mxu1 %v7311_v47  ;;  %v7327_v47 = vcombine.high %v41_v45, %v49_v58  ;;  %v65_v29 = vld [vmem:[%s12651_s0 + $0x178] sm:$0xff] }
 0x33c   :  { %v10497_v10 = vadd.f32 %v5649_v38, %v5361_v60  ;;  %v5651_v33 = vpop.f32.mrf.mxu1 }
 0x33d   :  { %v5363_v7 = vpop.f32.mrf.mxu0 }
 0x33e   :  { %v5364_v37 = vadd.f32 %v5363_v7, %v9786_v48  ;;  %v5652_v19 = vpop.f32.mrf.mxu1  ;;  %v56_v48 = vld [vmem:[%s12651_s0 + $0x130] sm:$0xff] }
 0x33f   :  { %v5365_v25 = vpop.f32.mrf.mxu0 }
 0x340   :  { %v10506_v49 = vadd.f32 %v5652_v19, %v5364_v37  ;;  %v5654_v16 = vpop.f32.mrf.mxu1 }
 0x341   :  { %v5368_v60 = vpop.f32.mrf.mxu0  ;;  %5881 = vmatmul.mubr.bf16.vlgmr.msra.gmra.mxu0 %v7308_v6  ;;  %v7324_v6 = vcombine.low %v40_v13, %v48_v56  ;;  %v80_v13 = vld [vmem:[%s12651_s0 + $0x1f0] sm:$0xff] }
 0x342   :  { %v5369_v38 = vadd.f32 %v5368_v60, %v9801_v22  ;;  %v5657_v59 = vpop.f32.mrf.mxu1  ;;  %6170 = vmatmul.mubr.bf16.vlgmr.msra.gmra.mxu1 %v7310_v32  ;;  %5888 = vmatprep.mubr.bf16.mxu0 %v7325_v30  ;;  %v57_v22 = vld [vmem:[%s12651_s0 + $0x138] sm:$0xff]  ;;  %v7326_v32 = vcombine.low %v41_v45, %v49_v58  ;;  %v7341_v30 = vcombine.high %v56_v48, %v64_v54 }
 0x343   :  { %v5370_v33 = vpop.f32.mrf.mxu0  ;;  %6177 = vmatprep.mubr.bf16.mxu1 %v7327_v47  ;;  %v7343_v47 = vcombine.high %v57_v22, %v65_v29  ;;  %v81_v58 = vld [vmem:[%s12651_s0 + $0x1f8] sm:$0xff] }
 0x344   :  { %v10515_v1 = vadd.f32 %v5657_v59, %v5369_v38  ;;  %v5659_v51 = vpop.f32.mrf.mxu1 }
 0x345   :  { %v5371_v7 = vpop.f32.mrf.mxu0 }
 0x346   :  { %v5372_v37 = vadd.f32 %v5371_v7, %v9816_v12  ;;  %v5660_v19 = vpop.f32.mrf.mxu1  ;;  %v72_v12 = vld [vmem:[%s12651_s0 + $0x1b0] sm:$0xff] }
 0x347   :  { %v5373_v25 = vpop.f32.mrf.mxu0 }
 0x348   :  { %v10524_v16 = vadd.f32 %v5660_v19, %v5372_v37  ;;  %v5662_v60 = vpop.f32.mrf.mxu1 }
 0x349   :  { %v5376_v38 = vpop.f32.mrf.mxu0  ;;  %5889 = vmatmul.mubr.bf16.gmra.mxu0 %v7324_v6  ;;  %v7340_v6 = vcombine.low %v56_v48, %v64_v54  ;;  %v96_v48 = vld [vmem:[%s12651_s0 + $0x270] sm:$0xff] }
 0x34a   :  { %v5377_v59 = vadd.f32 %v5376_v38, %v9836_v26  ;;  %v5665_v33 = vpop.f32.mrf.mxu1  ;;  %6178 = vmatmul.mubr.bf16.gmra.mxu1 %v7326_v32  ;;  %5896 = vmatprep.mubr.bf16.mxu0 %v7341_v30  ;;  %v73_v26 = vld [vmem:[%s12651_s0 + $0x1b8] sm:$0xff]  ;;  %v7342_v32 = vcombine.low %v57_v22, %v65_v29  ;;  %v7357_v30 = vcombine.high %v72_v12, %v80_v13 }
 0x34b   :  { %v5378_v51 = vpop.f32.mrf.mxu0  ;;  %6185 = vmatprep.mubr.bf16.mxu1 %v7343_v47  ;;  %v7359_v47 = vcombine.high %v73_v26, %v81_v58  ;;  %v97_v29 = vld [vmem:[%s12651_s0 + $0x278] sm:$0xff] }
 0x34c   :  { %v10533_v56 = vadd.f32 %v5665_v33, %v5377_v59  ;;  %v5667_v45 = vpop.f32.mrf.mxu1 }
 0x34d   :  { %v5379_v7 = vpop.f32.mrf.mxu0 }
 0x34e   :  { %v5380_v37 = vadd.f32 %v5379_v7, %v9855_v0  ;;  %v5668_v19 = vpop.f32.mrf.mxu1  ;;  %v88_v0 = vld [vmem:[%s12651_s0 + $0x230] sm:$0xff] }
 0x34f   :  { %v5381_v25 = vpop.f32.mrf.mxu0 }
 0x350   :  { %v10542_v60 = vadd.f32 %v5668_v19, %v5380_v37  ;;  %v5670_v38 = vpop.f32.mrf.mxu1 }
 0x351   :  { %v5384_v59 = vpop.f32.mrf.mxu0  ;;  %5897 = vmatmul.mubr.bf16.gmra.mxu0 %v7340_v6  ;;  %v7356_v6 = vcombine.low %v72_v12, %v80_v13  ;;  %v112_v12 = vld [vmem:[%s12651_s0 + $0x2f0] sm:$0xff] }
 0x352   :  { %v5385_v33 = vadd.f32 %v5384_v59, %v9876_v2  ;;  %v5673_v51 = vpop.f32.mrf.mxu1  ;;  %6186 = vmatmul.mubr.bf16.gmra.mxu1 %v7342_v32  ;;  %5904 = vmatprep.mubr.bf16.mxu0 %v7357_v30  ;;  %v89_v2 = vld [vmem:[%s12651_s0 + $0x238] sm:$0xff]  ;;  %v7358_v32 = vcombine.low %v73_v26, %v81_v58  ;;  %v7373_v30 = vcombine.high %v88_v0, %v96_v48 }
 0x353   :  { %v5386_v45 = vpop.f32.mrf.mxu0  ;;  %6193 = vmatprep.mubr.bf16.mxu1 %v7359_v47  ;;  %v7375_v47 = vcombine.high %v89_v2, %v97_v29  ;;  %v113_v58 = vld [vmem:[%s12651_s0 + $0x2f8] sm:$0xff] }
 0x354   :  { %v10551_v54 = vadd.f32 %v5673_v51, %v5385_v33  ;;  %v5675_v22 = vpop.f32.mrf.mxu1 }
 0x355   :  { %v5387_v7 = vpop.f32.mrf.mxu0 }
 0x356   :  { %v5388_v37 = vadd.f32 %v5387_v7, %v9897_v3  ;;  %v5676_v19 = vpop.f32.mrf.mxu1  ;;  %v104_v3 = vld [vmem:[%s12651_s0 + $0x2b0] sm:$0xff] }
 0x357   :  { %v5389_v25 = vpop.f32.mrf.mxu0 }
 0x358   :  { %v10560_v38 = vadd.f32 %v5676_v19, %v5388_v37  ;;  %v5678_v59 = vpop.f32.mrf.mxu1 }
 0x359   :  { %v5392_v33 = vpop.f32.mrf.mxu0  ;;  %5905 = vmatmul.mubr.bf16.gmra.mxu0 %v7356_v6  ;;  %v7372_v6 = vcombine.low %v88_v0, %v96_v48  ;;  %v128_v0 = vld [vmem:[%s12651_s0 + $0x370] sm:$0xff] }
 0x35a   :  { %v5393_v51 = vadd.f32 %v5392_v33, %v9918_v57  ;;  %v5681_v45 = vpop.f32.mrf.mxu1  ;;  %6194 = vmatmul.mubr.bf16.gmra.mxu1 %v7358_v32  ;;  %5912 = vmatprep.mubr.bf16.mxu0 %v7373_v30  ;;  %v105_v57 = vld [vmem:[%s12651_s0 + $0x2b8] sm:$0xff]  ;;  %v7374_v32 = vcombine.low %v89_v2, %v97_v29  ;;  %v7389_v30 = vcombine.high %v104_v3, %v112_v12 }
 0x35b   :  { %v5394_v22 = vpop.f32.mrf.mxu0  ;;  %6201 = vmatprep.mubr.bf16.mxu1 %v7375_v47  ;;  %v7391_v47 = vcombine.high %v105_v57, %v113_v58  ;;  %v129_v29 = vld [vmem:[%s12651_s0 + $0x378] sm:$0xff] }
 0x35c   :  { %v10569_v13 = vadd.f32 %v5681_v45, %v5393_v51  ;;  %v5683_v26 = vpop.f32.mrf.mxu1 }
 0x35d   :  { %v5395_v7 = vpop.f32.mrf.mxu0 }
 0x35e   :  { %v5396_v37 = vadd.f32 %v5395_v7, %v9939_v43  ;;  %v5684_v19 = vpop.f32.mrf.mxu1  ;;  %v120_v43 = vld [vmem:[%s12651_s0 + $0x330] sm:$0xff] }
 0x35f   :  { %v5397_v25 = vpop.f32.mrf.mxu0 }
 0x360   :  { %v10578_v59 = vadd.f32 %v5684_v19, %v5396_v37  ;;  %v5686_v33 = vpop.f32.mrf.mxu1 }
 0x361   :  { %v5400_v51 = vpop.f32.mrf.mxu0  ;;  %5913 = vmatmul.mubr.bf16.gmra.mxu0 %v7372_v6  ;;  %v7388_v6 = vcombine.low %v104_v3, %v112_v12  ;;  %v144_v3 = vld [vmem:[%s12651_s0 + $0x3f0] sm:$0xff] }
 0x362   :  { %v5401_v45 = vadd.f32 %v5400_v51, %v9956_v11  ;;  %v5689_v22 = vpop.f32.mrf.mxu1  ;;  %6202 = vmatmul.mubr.bf16.gmra.mxu1 %v7374_v32  ;;  %5920 = vmatprep.mubr.bf16.mxu0 %v7389_v30  ;;  %v121_v11 = vld [vmem:[%s12651_s0 + $0x338] sm:$0xff]  ;;  %v7390_v32 = vcombine.low %v105_v57, %v113_v58  ;;  %v7405_v30 = vcombine.high %v120_v43, %v128_v0 }
 0x363   :  { %v5402_v26 = vpop.f32.mrf.mxu0  ;;  %6209 = vmatprep.mubr.bf16.mxu1 %v7391_v47  ;;  %v7407_v47 = vcombine.high %v121_v11, %v129_v29  ;;  %v145_v58 = vld [vmem:[%s12651_s0 + $0x3f8] sm:$0xff] }
 0x364   :  { %v10587_v48 = vadd.f32 %v5689_v22, %v5401_v45  ;;  %v5691_v2 = vpop.f32.mrf.mxu1 }
 0x365   :  { %v5403_v7 = vpop.f32.mrf.mxu0 }
 0x366   :  { %v5404_v37 = vadd.f32 %v5403_v7, %v9975_v21  ;;  %v5692_v19 = vpop.f32.mrf.mxu1  ;;  %v136_v21 = vld [vmem:[%s12651_s0 + $0x3b0] sm:$0xff] }
 0x367   :  { %v5405_v25 = vpop.f32.mrf.mxu0 }
 0x368   :  { %v10596_v33 = vadd.f32 %v5692_v19, %v5404_v37  ;;  %v5694_v51 = vpop.f32.mrf.mxu1 }
 0x369   :  { %v5408_v45 = vpop.f32.mrf.mxu0  ;;  %5921 = vmatmul.mubr.bf16.gmra.mxu0 %v7388_v6  ;;  %v7404_v6 = vcombine.low %v120_v43, %v128_v0  ;;  %v160_v43 = vld [vmem:[%s12651_s0 + $0x470] sm:$0xff] }
 0x36a   :  { %v5409_v22 = vadd.f32 %v5408_v45, %v9989_v31  ;;  %v5697_v26 = vpop.f32.mrf.mxu1  ;;  %6210 = vmatmul.mubr.bf16.gmra.mxu1 %v7390_v32  ;;  %5928 = vmatprep.mubr.bf16.mxu0 %v7405_v30  ;;  %v137_v31 = vld [vmem:[%s12651_s0 + $0x3b8] sm:$0xff]  ;;  %v7406_v32 = vcombine.low %v121_v11, %v129_v29  ;;  %v7421_v30 = vcombine.high %v136_v21, %v144_v3 }
 0x36b   :  { %v5410_v2 = vpop.f32.mrf.mxu0  ;;  %6217 = vmatprep.mubr.bf16.mxu1 %v7407_v47  ;;  %v7423_v47 = vcombine.high %v137_v31, %v145_v58  ;;  %v161_v29 = vld [vmem:[%s12651_s0 + $0x478] sm:$0xff] }
 0x36c   :  { %v10605_v12 = vadd.f32 %v5697_v26, %v5409_v22  ;;  %v5699_v57 = vpop.f32.mrf.mxu1 }
 0x36d   :  { %v5411_v7 = vpop.f32.mrf.mxu0 }
 0x36e   :  { %v5412_v37 = vadd.f32 %v5411_v7, %v10000_v53  ;;  %v5700_v19 = vpop.f32.mrf.mxu1  ;;  %v152_v53 = vld [vmem:[%s12651_s0 + $0x430] sm:$0xff] }
 0x36f   :  { %v5413_v25 = vpop.f32.mrf.mxu0 }
 0x370   :  { %v10614_v51 = vadd.f32 %v5700_v19, %v5412_v37  ;;  %v5702_v45 = vpop.f32.mrf.mxu1 }
 0x371   :  { %v5416_v22 = vpop.f32.mrf.mxu0  ;;  %5929 = vmatmul.mubr.bf16.gmra.mxu0 %v7404_v6  ;;  %v7420_v6 = vcombine.low %v136_v21, %v144_v3  ;;  %v176_v21 = vld [vmem:[%s12651_s0 + $0x4f0] sm:$0xff] }
 0x372   :  { %v5417_v26 = vadd.f32 %v5416_v22, %v10012_v41  ;;  %v5705_v2 = vpop.f32.mrf.mxu1  ;;  %6218 = vmatmul.mubr.bf16.gmra.mxu1 %v7406_v32  ;;  %5936 = vmatprep.mubr.bf16.mxu0 %v7421_v30  ;;  %v153_v41 = vld [vmem:[%s12651_s0 + $0x438] sm:$0xff]  ;;  %v7422_v32 = vcombine.low %v137_v31, %v145_v58  ;;  %v7437_v30 = vcombine.high %v152_v53, %v160_v43 }
 0x373   :  { %v5418_v57 = vpop.f32.mrf.mxu0  ;;  %6225 = vmatprep.mubr.bf16.mxu1 %v7423_v47  ;;  %v7439_v47 = vcombine.high %v153_v41, %v161_v29  ;;  %v177_v58 = vld [vmem:[%s12651_s0 + $0x4f8] sm:$0xff] }
 0x374   :  { %v10623_v0 = vadd.f32 %v5705_v2, %v5417_v26  ;;  %v5707_v11 = vpop.f32.mrf.mxu1 }
 0x375   :  { %v5419_v7 = vpop.f32.mrf.mxu0 }
 0x376   :  { %v5420_v37 = vadd.f32 %v5419_v7, %v10026_v14  ;;  %v5708_v19 = vpop.f32.mrf.mxu1  ;;  %v168_v14 = vld [vmem:[%s12651_s0 + $0x4b0] sm:$0xff] }
 0x377   :  { %v5421_v25 = vpop.f32.mrf.mxu0 }
 0x378   :  { %v10632_v45 = vadd.f32 %v5708_v19, %v5420_v37  ;;  %v5710_v22 = vpop.f32.mrf.mxu1 }
 0x379   :  { %v5424_v26 = vpop.f32.mrf.mxu0  ;;  %5937 = vmatmul.mubr.bf16.gmra.mxu0 %v7420_v6  ;;  %v7436_v6 = vcombine.low %v152_v53, %v160_v43  ;;  %v192_v53 = vld [vmem:[%s12651_s0 + $0x570] sm:$0xff] }
 0x37a   :  { %v5425_v2 = vadd.f32 %v5424_v26, %v10035_v61  ;;  %v5713_v57 = vpop.f32.mrf.mxu1  ;;  %6226 = vmatmul.mubr.bf16.gmra.mxu1 %v7422_v32  ;;  %5944 = vmatprep.mubr.bf16.mxu0 %v7437_v30  ;;  %v169_v61 = vld [vmem:[%s12651_s0 + $0x4b8] sm:$0xff]  ;;  %v7438_v32 = vcombine.low %v153_v41, %v161_v29  ;;  %v7453_v30 = vcombine.high %v168_v14, %v176_v21 }
 0x37b   :  { %v5426_v11 = vpop.f32.mrf.mxu0  ;;  %6233 = vmatprep.mubr.bf16.mxu1 %v7439_v47  ;;  %v7455_v47 = vcombine.high %v169_v61, %v177_v58  ;;  %v193_v29 = vld [vmem:[%s12651_s0 + $0x578] sm:$0xff] }
 0x37c   :  { %v10641_v3 = vadd.f32 %v5713_v57, %v5425_v2  ;;  %v5715_v31 = vpop.f32.mrf.mxu1 }
 0x37d   :  { %v5427_v7 = vpop.f32.mrf.mxu0 }
 0x37e   :  { %v5428_v37 = vadd.f32 %v5427_v7, %v10044_v52  ;;  %v5716_v19 = vpop.f32.mrf.mxu1  ;;  %v184_v52 = vld [vmem:[%s12651_s0 + $0x530] sm:$0xff] }
 0x37f   :  { %v5429_v25 = vpop.f32.mrf.mxu0 }
 0x380   :  { %v10650_v22 = vadd.f32 %v5716_v19, %v5428_v37  ;;  %v5718_v26 = vpop.f32.mrf.mxu1 }
 0x381   :  { %v5432_v2 = vpop.f32.mrf.mxu0  ;;  %5945 = vmatmul.mubr.bf16.gmra.mxu0 %v7436_v6  ;;  %v7452_v6 = vcombine.low %v168_v14, %v176_v21  ;;  %v208_v14 = vld [vmem:[%s12651_s0 + $0x5f0] sm:$0xff] }
 0x382   :  { %v5433_v57 = vadd.f32 %v5432_v2, %v10056_v9  ;;  %v5721_v11 = vpop.f32.mrf.mxu1  ;;  %6234 = vmatmul.mubr.bf16.gmra.mxu1 %v7438_v32  ;;  %5952 = vmatprep.mubr.bf16.mxu0 %v7453_v30  ;;  %v185_v9 = vld [vmem:[%s12651_s0 + $0x538] sm:$0xff]  ;;  %v7454_v32 = vcombine.low %v169_v61, %v177_v58  ;;  %v7469_v30 = vcombine.high %v184_v52, %v192_v53 }
 0x383   :  { %v5434_v31 = vpop.f32.mrf.mxu0  ;;  %6241 = vmatprep.mubr.bf16.mxu1 %v7455_v47  ;;  %v7471_v47 = vcombine.high %v185_v9, %v193_v29  ;;  %v209_v58 = vld [vmem:[%s12651_s0 + $0x5f8] sm:$0xff] }
 0x384   :  { %v10659_v43 = vadd.f32 %v5721_v11, %v5433_v57  ;;  %v5723_v41 = vpop.f32.mrf.mxu1 }
 0x385   :  { %v5435_v7 = vpop.f32.mrf.mxu0 }
 0x386   :  { %v5436_v37 = vadd.f32 %v5435_v7, %v10070_v55  ;;  %v5724_v19 = vpop.f32.mrf.mxu1  ;;  %v200_v55 = vld [vmem:[%s12651_s0 + $0x5b0] sm:$0xff] }
 0x387   :  { %v5437_v25 = vpop.f32.mrf.mxu0 }
 0x388   :  { %v10668_v26 = vadd.f32 %v5724_v19, %v5436_v37  ;;  %v5726_v2 = vpop.f32.mrf.mxu1 }
 0x389   :  { %v5440_v57 = vpop.f32.mrf.mxu0  ;;  %5953 = vmatmul.mubr.bf16.gmra.mxu0 %v7452_v6  ;;  %v7468_v6 = vcombine.low %v184_v52, %v192_v53  ;;  %v224_v52 = vld [vmem:[%s12651_s0 + $0x670] sm:$0xff] }
 0x38a   :  { %v5441_v11 = vadd.f32 %v5440_v57, %v10079_v5  ;;  %v5729_v31 = vpop.f32.mrf.mxu1  ;;  %6242 = vmatmul.mubr.bf16.gmra.mxu1 %v7454_v32  ;;  %5960 = vmatprep.mubr.bf16.mxu0 %v7469_v30  ;;  %v201_v5 = vld [vmem:[%s12651_s0 + $0x5b8] sm:$0xff]  ;;  %v7470_v32 = vcombine.low %v185_v9, %v193_v29  ;;  %v7485_v30 = vcombine.high %v200_v55, %v208_v14 }
 0x38b   :  { %v5442_v41 = vpop.f32.mrf.mxu0  ;;  %6249 = vmatprep.mubr.bf16.mxu1 %v7471_v47  ;;  %v7487_v47 = vcombine.high %v201_v5, %v209_v58  ;;  %v225_v29 = vld [vmem:[%s12651_s0 + $0x678] sm:$0xff] }
 0x38c   :  { %v10677_v21 = vadd.f32 %v5729_v31, %v5441_v11  ;;  %v5731_v61 = vpop.f32.mrf.mxu1 }
 0x38d   :  { %v5443_v7 = vpop.f32.mrf.mxu0 }
 0x38e   :  { %v5444_v37 = vadd.f32 %v5443_v7, %v10088_v17  ;;  %v5732_v19 = vpop.f32.mrf.mxu1  ;;  %v216_v17 = vld [vmem:[%s12651_s0 + $0x630] sm:$0xff] }
 0x38f   :  { %v5445_v25 = vpop.f32.mrf.mxu0 }
 0x390   :  { %v10686_v2 = vadd.f32 %v5732_v19, %v5444_v37  ;;  %v5734_v57 = vpop.f32.mrf.mxu1 }
 0x391   :  { %v5448_v11 = vpop.f32.mrf.mxu0  ;;  %5961 = vmatmul.mubr.bf16.gmra.mxu0 %v7468_v6  ;;  %v7484_v6 = vcombine.low %v200_v55, %v208_v14  ;;  %v240_v55 = vld [vmem:[%s12651_s0 + $0x6f0] sm:$0xff] }
 0x392   :  { %v5449_v31 = vadd.f32 %v5448_v11, %v10100_v46  ;;  %v5737_v41 = vpop.f32.mrf.mxu1  ;;  %6250 = vmatmul.mubr.bf16.gmra.mxu1 %v7470_v32  ;;  %5968 = vmatprep.mubr.bf16.mxu0 %v7485_v30  ;;  %v217_v46 = vld [vmem:[%s12651_s0 + $0x638] sm:$0xff]  ;;  %v7486_v32 = vcombine.low %v201_v5, %v209_v58  ;;  %v7501_v30 = vcombine.high %v216_v17, %v224_v52 }
 0x393   :  { %v5450_v61 = vpop.f32.mrf.mxu0  ;;  %6257 = vmatprep.mubr.bf16.mxu1 %v7487_v47  ;;  %v7503_v47 = vcombine.high %v217_v46, %v225_v29  ;;  %v241_v58 = vld [vmem:[%s12651_s0 + $0x6f8] sm:$0xff] }
 0x394   :  { %v10695_v53 = vadd.f32 %v5737_v41, %v5449_v31  ;;  %v5739_v9 = vpop.f32.mrf.mxu1 }
 0x395   :  { %v5451_v7 = vpop.f32.mrf.mxu0 }
 0x396   :  { %v5452_v37 = vadd.f32 %v5451_v7, %v10114_v36  ;;  %v5740_v19 = vpop.f32.mrf.mxu1  ;;  %v232_v36 = vld [vmem:[%s12651_s0 + $0x6b0] sm:$0xff] }
 0x397   :  { %v5453_v25 = vpop.f32.mrf.mxu0 }
 0x398   :  { %v10704_v57 = vadd.f32 %v5740_v19, %v5452_v37  ;;  %v5742_v11 = vpop.f32.mrf.mxu1 }
 0x399   :  { %v5456_v31 = vpop.f32.mrf.mxu0  ;;  %5969 = vmatmul.mubr.bf16.gmra.mxu0 %v7484_v6  ;;  %v7500_v6 = vcombine.low %v216_v17, %v224_v52  ;;  %v256_v17 = vld [vmem:[%s12651_s0 + $0x770] sm:$0xff] }
 0x39a   :  { %v5457_v41 = vadd.f32 %v5456_v31, %v10123_v24  ;;  %v5745_v61 = vpop.f32.mrf.mxu1  ;;  %6258 = vmatmul.mubr.bf16.gmra.mxu1 %v7486_v32  ;;  %5976 = vmatprep.mubr.bf16.mxu0 %v7501_v30  ;;  %v233_v24 = vld [vmem:[%s12651_s0 + $0x6b8] sm:$0xff]  ;;  %v7502_v32 = vcombine.low %v217_v46, %v225_v29  ;;  %v7517_v30 = vcombine.high %v232_v36, %v240_v55 }
 0x39b   :  { %v5458_v9 = vpop.f32.mrf.mxu0  ;;  %6265 = vmatprep.mubr.bf16.mxu1 %v7503_v47  ;;  %v7519_v47 = vcombine.high %v233_v24, %v241_v58  ;;  %v249_v29 = vld [vmem:[%s12651_s0 + $0x738] sm:$0xff] }
 0x39c   :  { %v10713_v14 = vadd.f32 %v5745_v61, %v5457_v41  ;;  %v5747_v5 = vpop.f32.mrf.mxu1  ;;  %v12783_v61 = vld [vmem:[#allocation25_spill] sm:$0xff] }
 0x39d   :  { %v5459_v7 = vpop.f32.mrf.mxu0 }
 0x39e   :  { %12781 = vst [vmem:[#allocation22_spill] sm:$0xff] %v10713_v14  ;;  %v5460_v37 = vadd.f32 %v5459_v7, %v10132_v28  ;;  %v5748_v19 = vpop.f32.mrf.mxu1  ;;  %v248_v28 = vld [vmem:[%s12651_s0 + $0x730] sm:$0xff] }
 0x39f   :  { %v5461_v25 = vpop.f32.mrf.mxu0 }
 0x3a0   :  { %v10722_v11 = vadd.f32 %v5748_v19, %v5460_v37  ;;  %v5750_v31 = vpop.f32.mrf.mxu1  ;;  %v12785_v37 = vld [vmem:[#allocation26_spill] sm:$0xff]  ;;  %v7533_v25 = vcombine.high %v248_v28, %v256_v17 }
 0x3a1   :  { %v5464_v41 = vpop.f32.mrf.mxu0  ;;  %5977 = vmatmul.mubr.bf16.gmra.mxu0 %v7500_v6  ;;  %v7516_v6 = vcombine.low %v232_v36, %v240_v55  ;;  %v264_v36 = vld [vmem:[%s12651_s0 + $0x7b0] sm:$0xff] }
 0x3a2   :  { %12782 = vst [vmem:[#allocation23_spill] sm:$0xff] %v10722_v11  ;;  %v5465_v9 = vadd.f32 %v5464_v41, %v12783_v61  ;;  %v5753_v5 = vpop.f32.mrf.mxu1  ;;  %6266 = vmatmul.mubr.bf16.gmra.mxu1 %v7502_v32  ;;  %5984 = vmatprep.mubr.bf16.mxu0 %v7517_v30  ;;  %v7518_v30 = vcombine.low %v233_v24, %v241_v58  ;;  %v272_v55 = vld [vmem:[%s12651_s0 + $0x7f0] sm:$0xff] }
 0x3a3   :  { %v5466_v14 = vpop.f32.mrf.mxu0  ;;  %6273 = vmatprep.mubr.bf16.mxu1 %v7519_v47 }
 0x3a4   :  { %v10731_v52 = vadd.f32 %v5753_v5, %v5465_v9  ;;  %v5755_v46 = vpop.f32.mrf.mxu1  ;;  %v257_v14 = vld [vmem:[%s12651_s0 + $0x778] sm:$0xff]  ;;  %v12787_v5 = vld [vmem:[#allocation2_spill] sm:$0xff] }
 0x3a5   :  { %v5467_v7 = vpop.f32.mrf.mxu0  ;;  %v7535_v31 = vcombine.high %v249_v29, %v257_v14 }
 0x3a6   :  { %12784 = vst [vmem:[#allocation24_spill] sm:$0xff] %v10731_v52  ;;  %v5468_v19 = vadd.f32 %v5467_v7, %v12785_v37  ;;  %v5756_v32 = vpop.f32.mrf.mxu1  ;;  %v265_v7 = vld [vmem:[%s12651_s0 + $0x7b8] sm:$0xff]  ;;  %v7532_v37 = vcombine.low %v248_v28, %v256_v17  ;;  %v280_v28 = vld [vmem:[%s12651_s0 + $0x830] sm:$0xff] }
 0x3a7   :  { %v5469_v47 = vpop.f32.mrf.mxu0  ;;  %v288_v17 = vld [vmem:[%s12651_s0 + $0x870] sm:$0xff] }
 0x3a8   :  { %v10740_v41 = vadd.f32 %v5756_v32, %v5468_v19  ;;  %v5758_v61 = vpop.f32.mrf.mxu1  ;;  %v12789_v19 = vld [vmem:[#allocation3_spill] sm:$0xff]  ;;  %v7549_v47 = vcombine.high %v264_v36, %v272_v55 }
 0x3a9   :  { %v5472_v9 = vpop.f32.mrf.mxu0  ;;  %5985 = vmatmul.mubr.bf16.gmra.mxu0 %v7516_v6 }
 0x3aa   :  { %12786 = vst [vmem:[#allocation25_spill] sm:$0xff] %v10740_v41  ;;  %v5473_v46 = vadd.f32 %v5472_v9, %v12787_v5  ;;  %v5761_v52 = vpop.f32.mrf.mxu1  ;;  %6274 = vmatmul.mubr.bf16.gmra.mxu1 %v7518_v30  ;;  %5992 = vmatprep.mubr.bf16.mxu0 %v7533_v25  ;;  %v7534_v25 = vcombine.low %v249_v29, %v257_v14 }
 0x3ab   :  { %v5474_v11 = vpop.f32.mrf.mxu0  ;;  %6281 = vmatprep.mubr.bf16.mxu1 %v7535_v31 }
 0x3ac   :  { %v10749_v24 = vadd.f32 %v5761_v52, %v5473_v46  ;;  %v5763_v58 = vpop.f32.mrf.mxu1  ;;  %v273_v11 = vld [vmem:[%s12651_s0 + $0x7f8] sm:$0xff]  ;;  %v12790_v46 = vld [vmem:[#allocation4_spill] sm:$0xff] }
 0x3ad   :  { %v5475_v6 = vpop.f32.mrf.mxu0  ;;  %v7551_v61 = vcombine.high %v265_v7, %v273_v11 }
 0x3ae   :  { %12788 = vst [vmem:[#allocation26_spill] sm:$0xff] %v10749_v24  ;;  %v5476_v32 = vadd.f32 %v5475_v6, %v12789_v19  ;;  %v5764_v30 = vpop.f32.mrf.mxu1  ;;  %v281_v6 = vld [vmem:[%s12651_s0 + $0x838] sm:$0xff]  ;;  %v7548_v19 = vcombine.low %v264_v36, %v272_v55  ;;  %v304_v36 = vld [vmem:[%s12651_s0 + $0x8f0] sm:$0xff] }
 0x3af   :  { %v5477_v31 = vpop.f32.mrf.mxu0 }
 0x3b0   :  { %v10758_v52 = vadd.f32 %v5764_v30, %v5476_v32  ;;  %v5766_v9 = vpop.f32.mrf.mxu1 }
 0x3b1   :  { %v5480_v5 = vpop.f32.mrf.mxu0  ;;  %5993 = vmatmul.mubr.bf16.gmra.mxu0 %v7532_v37 }
 0x3b2   :  { %v5481_v58 = vadd.f32 %v5480_v5, %v12790_v46  ;;  %v5769_v24 = vpop.f32.mrf.mxu1  ;;  %6282 = vmatmul.mubr.bf16.gmra.mxu1 %v7534_v25  ;;  %6000 = vmatprep.mubr.bf16.mxu0 %v7549_v47  ;;  %v7550_v25 = vcombine.low %v265_v7, %v273_v11  ;;  %v7565_v47 = vcombine.high %v280_v28, %v288_v17  ;;  %v12793_v46 = vld [vmem:[#allocation5_spill] sm:$0xff] }
 0x3b3   :  { %v5482_v41 = vpop.f32.mrf.mxu0  ;;  %6289 = vmatprep.mubr.bf16.mxu1 %v7551_v61  ;;  %v297_v11 = vld [vmem:[%s12651_s0 + $0x8b8] sm:$0xff] }
 0x3b4   :  { %v10767_v29 = vadd.f32 %v5769_v24, %v5481_v58  ;;  %v5771_v14 = vpop.f32.mrf.mxu1  ;;  %v289_v41 = vld [vmem:[%s12651_s0 + $0x878] sm:$0xff] }
 0x3b5   :  { %v5483_v37 = vpop.f32.mrf.mxu0  ;;  %v7567_v61 = vcombine.high %v281_v6, %v289_v41 }
 0x3b6   :  { %12791 = vst [vmem:[#allocation2_spill] sm:$0xff] %v10767_v29  ;;  %v5484_v32 = vadd.f32 %v5483_v37, %v10200_v35  ;;  %v5772_v30 = vpop.f32.mrf.mxu1  ;;  %v296_v35 = vld [vmem:[%s12651_s0 + $0x8b0] sm:$0xff] }
 0x3b7   :  { %v5485_v31 = vpop.f32.mrf.mxu0 }
 0x3b8   :  { %v10776_v24 = vadd.f32 %v5772_v30, %v5484_v32  ;;  %v5774_v9 = vpop.f32.mrf.mxu1  ;;  %v12795_v32 = vld [vmem:[#allocation6_spill] sm:$0xff]  ;;  %v7581_v31 = vcombine.high %v296_v35, %v304_v36 }
 0x3b9   :  { %v5488_v5 = vpop.f32.mrf.mxu0  ;;  %6001 = vmatmul.mubr.bf16.gmra.mxu0 %v7548_v19  ;;  %v7564_v19 = vcombine.low %v280_v28, %v288_v17  ;;  %v312_v28 = vld [vmem:[%s12651_s0 + $0x930] sm:$0xff] }
 0x3ba   :  { %12792 = vst [vmem:[#allocation3_spill] sm:$0xff] %v10776_v24  ;;  %v5489_v58 = vadd.f32 %v5488_v5, %v12793_v46  ;;  %v5777_v14 = vpop.f32.mrf.mxu1  ;;  %6290 = vmatmul.mubr.bf16.gmra.mxu1 %v7550_v25  ;;  %6008 = vmatprep.mubr.bf16.mxu0 %v7565_v47  ;;  %v7566_v47 = vcombine.low %v281_v6, %v289_v41  ;;  %v320_v17 = vld [vmem:[%s12651_s0 + $0x970] sm:$0xff] }
 0x3bb   :  { %v5490_v29 = vpop.f32.mrf.mxu0  ;;  %6297 = vmatprep.mubr.bf16.mxu1 %v7567_v61 }
 0x3bc   :  { %v10785_v55 = vadd.f32 %v5777_v14, %v5489_v58  ;;  %v5779_v7 = vpop.f32.mrf.mxu1  ;;  %v305_v29 = vld [vmem:[%s12651_s0 + $0x8f8] sm:$0xff]  ;;  %v12797_v14 = vld [vmem:[#allocation7_spill] sm:$0xff] }
 0x3bd   :  { %v5491_v37 = vpop.f32.mrf.mxu0  ;;  %v7583_v9 = vcombine.high %v297_v11, %v305_v29 }
 0x3be   :  { %12794 = vst [vmem:[#allocation4_spill] sm:$0xff] %v10785_v55  ;;  %v5492_v30 = vadd.f32 %v5491_v37, %v12795_v32  ;;  %v5780_v25 = vpop.f32.mrf.mxu1  ;;  %v313_v37 = vld [vmem:[%s12651_s0 + $0x938] sm:$0xff]  ;;  %v7580_v32 = vcombine.low %v296_v35, %v304_v36  ;;  %v328_v35 = vld [vmem:[%s12651_s0 + $0x9b0] sm:$0xff] }
 0x3bf   :  { %v5493_v61 = vpop.f32.mrf.mxu0  ;;  %v336_v36 = vld [vmem:[%s12651_s0 + $0x9f0] sm:$0xff] }
 0x3c0   :  { %v10794_v5 = vadd.f32 %v5780_v25, %v5492_v30  ;;  %v5782_v46 = vpop.f32.mrf.mxu1  ;;  %v12799_v30 = vld [vmem:[#allocation8_spill] sm:$0xff]  ;;  %v7597_v61 = vcombine.high %v312_v28, %v320_v17 }
 0x3c1   :  { %v5496_v58 = vpop.f32.mrf.mxu0  ;;  %6009 = vmatmul.mubr.bf16.gmra.mxu0 %v7564_v19 }
 0x3c2   :  { %12796 = vst [vmem:[#allocation5_spill] sm:$0xff] %v10794_v5  ;;  %v5497_v7 = vadd.f32 %v5496_v58, %v12797_v14  ;;  %v5785_v55 = vpop.f32.mrf.mxu1  ;;  %6298 = vmatmul.mubr.bf16.gmra.mxu1 %v7566_v47  ;;  %6016 = vmatprep.mubr.bf16.mxu0 %v7581_v31  ;;  %v7582_v31 = vcombine.low %v297_v11, %v305_v29 }
 0x3c3   :  { %v5498_v24 = vpop.f32.mrf.mxu0  ;;  %6305 = vmatprep.mubr.bf16.mxu1 %v7583_v9 }
 0x3c4   :  { %v10803_v6 = vadd.f32 %v5785_v55, %v5497_v7  ;;  %v5787_v41 = vpop.f32.mrf.mxu1  ;;  %v321_v24 = vld [vmem:[%s12651_s0 + $0x978] sm:$0xff] }
 0x3c5   :  { %v5499_v19 = vpop.f32.mrf.mxu0  ;;  %v7599_v46 = vcombine.high %v313_v37, %v321_v24  ;;  %v12801_v7 = vld [vmem:[#allocation9_spill] sm:$0xff] }
 0x3c6   :  { %12798 = vst [vmem:[#allocation6_spill] sm:$0xff] %v10803_v6  ;;  %v5500_v25 = vadd.f32 %v5499_v19, %v12799_v30  ;;  %v5788_v47 = vpop.f32.mrf.mxu1  ;;  %v329_v19 = vld [vmem:[%s12651_s0 + $0x9b8] sm:$0xff]  ;;  %v7596_v30 = vcombine.low %v312_v28, %v320_v17  ;;  %v344_v28 = vld [vmem:[%s12651_s0 + $0xa30] sm:$0xff] }
 0x3c7   :  { %v5501_v9 = vpop.f32.mrf.mxu0  ;;  %v352_v17 = vld [vmem:[%s12651_s0 + $0xa70] sm:$0xff] }
 0x3c8   :  { %v10812_v55 = vadd.f32 %v5788_v47, %v5500_v25  ;;  %v5790_v58 = vpop.f32.mrf.mxu1  ;;  %v12803_v25 = vld [vmem:[#allocation10_spill] sm:$0xff]  ;;  %v7613_v9 = vcombine.high %v328_v35, %v336_v36 }
 0x3c9   :  { %v5504_v14 = vpop.f32.mrf.mxu0  ;;  %6017 = vmatmul.mubr.bf16.gmra.mxu0 %v7580_v32 }
 0x3ca   :  { %12800 = vst [vmem:[#allocation7_spill] sm:$0xff] %v10812_v55  ;;  %v5505_v41 = vadd.f32 %v5504_v14, %v12801_v7  ;;  %v5793_v6 = vpop.f32.mrf.mxu1  ;;  %6306 = vmatmul.mubr.bf16.gmra.mxu1 %v7582_v31  ;;  %6024 = vmatprep.mubr.bf16.mxu0 %v7597_v61  ;;  %v7598_v61 = vcombine.low %v313_v37, %v321_v24 }
 0x3cb   :  { %v5506_v5 = vpop.f32.mrf.mxu0  ;;  %6313 = vmatprep.mubr.bf16.mxu1 %v7599_v46 }
 0x3cc   :  { %v10821_v11 = vadd.f32 %v5793_v6, %v5505_v41  ;;  %v5795_v29 = vpop.f32.mrf.mxu1  ;;  %v337_v5 = vld [vmem:[%s12651_s0 + $0x9f8] sm:$0xff]  ;;  %v12805_v41 = vld [vmem:[#allocation11_spill] sm:$0xff] }
 0x3cd   :  { %v5507_v32 = vpop.f32.mrf.mxu0  ;;  %v7615_v58 = vcombine.high %v329_v19, %v337_v5 }
 0x3ce   :  { %12802 = vst [vmem:[#allocation8_spill] sm:$0xff] %v10821_v11  ;;  %v5508_v47 = vadd.f32 %v5507_v32, %v12803_v25  ;;  %v5796_v31 = vpop.f32.mrf.mxu1  ;;  %v345_v32 = vld [vmem:[%s12651_s0 + $0xa38] sm:$0xff]  ;;  %v7612_v25 = vcombine.low %v328_v35, %v336_v36  ;;  %v360_v35 = vld [vmem:[%s12651_s0 + $0xab0] sm:$0xff] }
 0x3cf   :  { %v5509_v46 = vpop.f32.mrf.mxu0  ;;  %v368_v36 = vld [vmem:[%s12651_s0 + $0xaf0] sm:$0xff] }
 0x3d0   :  { %v10830_v6 = vadd.f32 %v5796_v31, %v5508_v47  ;;  %v5798_v14 = vpop.f32.mrf.mxu1  ;;  %v12807_v47 = vld [vmem:[#allocation12_spill] sm:$0xff]  ;;  %v7629_v46 = vcombine.high %v344_v28, %v352_v17 }
 0x3d1   :  { %v5512_v7 = vpop.f32.mrf.mxu0  ;;  %6025 = vmatmul.mubr.bf16.gmra.mxu0 %v7596_v30 }
 0x3d2   :  { %12804 = vst [vmem:[#allocation9_spill] sm:$0xff] %v10830_v6  ;;  %v5513_v29 = vadd.f32 %v5512_v7, %v12805_v41  ;;  %v5801_v11 = vpop.f32.mrf.mxu1  ;;  %6314 = vmatmul.mubr.bf16.gmra.mxu1 %v7598_v61  ;;  %6032 = vmatprep.mubr.bf16.mxu0 %v7613_v9  ;;  %v7614_v9 = vcombine.low %v329_v19, %v337_v5 }
 0x3d3   :  { %v5514_v55 = vpop.f32.mrf.mxu0  ;;  %6321 = vmatprep.mubr.bf16.mxu1 %v7615_v58 }
 0x3d4   :  { %v10839_v37 = vadd.f32 %v5801_v11, %v5513_v29  ;;  %v5803_v24 = vpop.f32.mrf.mxu1  ;;  %v353_v55 = vld [vmem:[%s12651_s0 + $0xa78] sm:$0xff] }
 0x3d5   :  { %v5515_v30 = vpop.f32.mrf.mxu0  ;;  %v7631_v14 = vcombine.high %v345_v32, %v353_v55  ;;  %v12809_v29 = vld [vmem:[#allocation13_spill] sm:$0xff] }
 0x3d6   :  { %12806 = vst [vmem:[#allocation10_spill] sm:$0xff] %v10839_v37  ;;  %v5516_v31 = vadd.f32 %v5515_v30, %v12807_v47  ;;  %v5804_v61 = vpop.f32.mrf.mxu1  ;;  %v361_v30 = vld [vmem:[%s12651_s0 + $0xab8] sm:$0xff]  ;;  %v7628_v47 = vcombine.low %v344_v28, %v352_v17  ;;  %v376_v28 = vld [vmem:[%s12651_s0 + $0xb30] sm:$0xff] }
 0x3d7   :  { %v5517_v58 = vpop.f32.mrf.mxu0  ;;  %v384_v17 = vld [vmem:[%s12651_s0 + $0xb70] sm:$0xff] }
 0x3d8   :  { %v10848_v11 = vadd.f32 %v5804_v61, %v5516_v31  ;;  %v5806_v7 = vpop.f32.mrf.mxu1  ;;  %v12811_v31 = vld [vmem:[#allocation14_spill] sm:$0xff]  ;;  %v7645_v58 = vcombine.high %v360_v35, %v368_v36 }
 0x3d9   :  { %v5520_v41 = vpop.f32.mrf.mxu0  ;;  %6033 = vmatmul.mubr.bf16.gmra.mxu0 %v7612_v25 }
 0x3da   :  { %12808 = vst [vmem:[#allocation11_spill] sm:$0xff] %v10848_v11  ;;  %v5521_v24 = vadd.f32 %v5520_v41, %v12809_v29  ;;  %v5809_v37 = vpop.f32.mrf.mxu1  ;;  %6322 = vmatmul.mubr.bf16.gmra.mxu1 %v7614_v9  ;;  %6040 = vmatprep.mubr.bf16.mxu0 %v7629_v46  ;;  %v7630_v46 = vcombine.low %v345_v32, %v353_v55 }
 0x3db   :  { %v5522_v6 = vpop.f32.mrf.mxu0  ;;  %6329 = vmatprep.mubr.bf16.mxu1 %v7631_v14 }
 0x3dc   :  { %v10857_v19 = vadd.f32 %v5809_v37, %v5521_v24  ;;  %v5811_v5 = vpop.f32.mrf.mxu1  ;;  %v369_v6 = vld [vmem:[%s12651_s0 + $0xaf8] sm:$0xff]  ;;  %v12813_v24 = vld [vmem:[#allocation15_spill] sm:$0xff] }
 0x3dd   :  { %v5523_v25 = vpop.f32.mrf.mxu0  ;;  %v7647_v7 = vcombine.high %v361_v30, %v369_v6 }
 0x3de   :  { %12810 = vst [vmem:[#allocation12_spill] sm:$0xff] %v10857_v19  ;;  %v5524_v61 = vadd.f32 %v5523_v25, %v12811_v31  ;;  %v5812_v9 = vpop.f32.mrf.mxu1  ;;  %v377_v25 = vld [vmem:[%s12651_s0 + $0xb38] sm:$0xff]  ;;  %v7644_v31 = vcombine.low %v360_v35, %v368_v36  ;;  %v392_v35 = vld [vmem:[%s12651_s0 + $0xbb0] sm:$0xff] }
 0x3df   :  { %v5525_v14 = vpop.f32.mrf.mxu0  ;;  %v400_v36 = vld [vmem:[%s12651_s0 + $0xbf0] sm:$0xff] }
 0x3e0   :  { %v10866_v37 = vadd.f32 %v5812_v9, %v5524_v61  ;;  %v5814_v41 = vpop.f32.mrf.mxu1  ;;  %v12815_v61 = vld [vmem:[#allocation16_spill] sm:$0xff]  ;;  %v7661_v14 = vcombine.high %v376_v28, %v384_v17 }
 0x3e1   :  { %v5528_v29 = vpop.f32.mrf.mxu0  ;;  %6041 = vmatmul.mubr.bf16.gmra.mxu0 %v7628_v47 }
 0x3e2   :  { %12812 = vst [vmem:[#allocation13_spill] sm:$0xff] %v10866_v37  ;;  %v5529_v5 = vadd.f32 %v5528_v29, %v12813_v24  ;;  %v5817_v19 = vpop.f32.mrf.mxu1  ;;  %6330 = vmatmul.mubr.bf16.gmra.mxu1 %v7630_v46  ;;  %6048 = vmatprep.mubr.bf16.mxu0 %v7645_v58  ;;  %v7646_v58 = vcombine.low %v361_v30, %v369_v6 }
 0x3e3   :  { %v5530_v11 = vpop.f32.mrf.mxu0  ;;  %6337 = vmatprep.mubr.bf16.mxu1 %v7647_v7 }
 0x3e4   :  { %v10875_v32 = vadd.f32 %v5817_v19, %v5529_v5  ;;  %v5819_v55 = vpop.f32.mrf.mxu1  ;;  %v385_v11 = vld [vmem:[%s12651_s0 + $0xb78] sm:$0xff] }
 0x3e5   :  { %v5531_v47 = vpop.f32.mrf.mxu0  ;;  %v7663_v41 = vcombine.high %v377_v25, %v385_v11  ;;  %v12817_v5 = vld [vmem:[#allocation17_spill] sm:$0xff] }
 0x3e6   :  { %12814 = vst [vmem:[#allocation14_spill] sm:$0xff] %v10875_v32  ;;  %v5532_v9 = vadd.f32 %v5531_v47, %v12815_v61  ;;  %v5820_v46 = vpop.f32.mrf.mxu1  ;;  %v393_v47 = vld [vmem:[%s12651_s0 + $0xbb8] sm:$0xff]  ;;  %v7660_v61 = vcombine.low %v376_v28, %v384_v17  ;;  %v408_v28 = vld [vmem:[%s12651_s0 + $0xc30] sm:$0xff] }
 0x3e7   :  { %v5533_v7 = vpop.f32.mrf.mxu0  ;;  %v416_v17 = vld [vmem:[%s12651_s0 + $0xc70] sm:$0xff] }
 0x3e8   :  { %v10884_v19 = vadd.f32 %v5820_v46, %v5532_v9  ;;  %v5822_v29 = vpop.f32.mrf.mxu1  ;;  %v12819_v9 = vld [vmem:[#allocation18_spill] sm:$0xff]  ;;  %v7677_v7 = vcombine.high %v392_v35, %v400_v36 }
 0x3e9   :  { %v5536_v24 = vpop.f32.mrf.mxu0  ;;  %6049 = vmatmul.mubr.bf16.gmra.mxu0 %v7644_v31 }
 0x3ea   :  { %12816 = vst [vmem:[#allocation15_spill] sm:$0xff] %v10884_v19  ;;  %v5537_v55 = vadd.f32 %v5536_v24, %v12817_v5  ;;  %v5825_v32 = vpop.f32.mrf.mxu1  ;;  %6338 = vmatmul.mubr.bf16.gmra.mxu1 %v7646_v58  ;;  %6056 = vmatprep.mubr.bf16.mxu0 %v7661_v14  ;;  %v7662_v14 = vcombine.low %v377_v25, %v385_v11 }
 0x3eb   :  { %v5538_v37 = vpop.f32.mrf.mxu0  ;;  %6345 = vmatprep.mubr.bf16.mxu1 %v7663_v41 }
 0x3ec   :  { %v10893_v30 = vadd.f32 %v5825_v32, %v5537_v55  ;;  %v5827_v6 = vpop.f32.mrf.mxu1  ;;  %v401_v37 = vld [vmem:[%s12651_s0 + $0xbf8] sm:$0xff]  ;;  %v12821_v55 = vld [vmem:[#allocation19_spill] sm:$0xff] }
 0x3ed   :  { %v5539_v31 = vpop.f32.mrf.mxu0  ;;  %v7679_v29 = vcombine.high %v393_v47, %v401_v37 }
 0x3ee   :  { %12818 = vst [vmem:[#allocation16_spill] sm:$0xff] %v10893_v30  ;;  %v5540_v46 = vadd.f32 %v5539_v31, %v12819_v9  ;;  %v5828_v58 = vpop.f32.mrf.mxu1  ;;  %v409_v31 = vld [vmem:[%s12651_s0 + $0xc38] sm:$0xff]  ;;  %v7676_v9 = vcombine.low %v392_v35, %v400_v36  ;;  %v424_v35 = vld [vmem:[%s12651_s0 + $0xcb0] sm:$0xff] }
 0x3ef   :  { %v5541_v41 = vpop.f32.mrf.mxu0  ;;  %v432_v36 = vld [vmem:[%s12651_s0 + $0xcf0] sm:$0xff] }
 0x3f0   :  { %v10902_v32 = vadd.f32 %v5828_v58, %v5540_v46  ;;  %v5830_v24 = vpop.f32.mrf.mxu1  ;;  %v12823_v46 = vld [vmem:[#allocation20_spill] sm:$0xff]  ;;  %v7693_v41 = vcombine.high %v408_v28, %v416_v17 }
 0x3f1   :  { %v5544_v5 = vpop.f32.mrf.mxu0  ;;  %6057 = vmatmul.mubr.bf16.gmra.mxu0 %v7660_v61 }
 0x3f2   :  { %12820 = vst [vmem:[#allocation17_spill] sm:$0xff] %v10902_v32  ;;  %v5545_v6 = vadd.f32 %v5544_v5, %v12821_v55  ;;  %v5833_v30 = vpop.f32.mrf.mxu1  ;;  %6346 = vmatmul.mubr.bf16.gmra.mxu1 %v7662_v14  ;;  %6064 = vmatprep.mubr.bf16.mxu0 %v7677_v7  ;;  %v7678_v7 = vcombine.low %v393_v47, %v401_v37 }
 0x3f3   :  { %v5546_v19 = vpop.f32.mrf.mxu0  ;;  %6353 = vmatprep.mubr.bf16.mxu1 %v7679_v29 }
 0x3f4   :  { %v10911_v25 = vadd.f32 %v5833_v30, %v5545_v6  ;;  %v5835_v11 = vpop.f32.mrf.mxu1  ;;  %v417_v19 = vld [vmem:[%s12651_s0 + $0xc78] sm:$0xff] }
 0x3f5   :  { %v5547_v61 = vpop.f32.mrf.mxu0  ;;  %v7695_v24 = vcombine.high %v409_v31, %v417_v19  ;;  %v12824_v6 = vld [vmem:[#allocation21_spill] sm:$0xff] }
 0x3f6   :  { %12822 = vst [vmem:[#allocation18_spill] sm:$0xff] %v10911_v25  ;;  %v5548_v58 = vadd.f32 %v5547_v61, %v12823_v46  ;;  %v5836_v14 = vpop.f32.mrf.mxu1  ;;  %v425_v61 = vld [vmem:[%s12651_s0 + $0xcb8] sm:$0xff]  ;;  %v7692_v46 = vcombine.low %v408_v28, %v416_v17  ;;  %v448_v28 = vld [vmem:[%s12651_s0 + $0xd70] sm:$0xff] }
 0x3f7   :  { %v5549_v29 = vpop.f32.mrf.mxu0 }
 0x3f8   :  { %v10920_v30 = vadd.f32 %v5836_v14, %v5548_v58  ;;  %v5838_v5 = vpop.f32.mrf.mxu1 }
 0x3f9   :  { %v5552_v55 = vpop.f32.mrf.mxu0  ;;  %6065 = vmatmul.mubr.bf16.gmra.mxu0 %v7676_v9 }
 0x3fa   :  { %v5553_v11 = vadd.f32 %v5552_v55, %v12824_v6  ;;  %v5841_v25 = vpop.f32.mrf.mxu1  ;;  %6354 = vmatmul.mubr.bf16.gmra.mxu1 %v7678_v7  ;;  %6072 = vmatprep.mubr.bf16.mxu0 %v7693_v41  ;;  %v7694_v7 = vcombine.low %v409_v31, %v417_v19  ;;  %v7709_v41 = vcombine.high %v424_v35, %v432_v36  ;;  %v449_v19 = vld [vmem:[%s12651_s0 + $0xd78] sm:$0xff] }
 0x3fb   :  { %v5554_v32 = vpop.f32.mrf.mxu0  ;;  %6361 = vmatprep.mubr.bf16.mxu1 %v7695_v24 }
 0x3fc   :  { %v10929_v47 = vadd.f32 %v5841_v25, %v5553_v11  ;;  %v5843_v37 = vpop.f32.mrf.mxu1  ;;  %v433_v32 = vld [vmem:[%s12651_s0 + $0xcf8] sm:$0xff] }
 0x3fd   :  { %v5555_v9 = vpop.f32.mrf.mxu0  ;;  %v7711_v24 = vcombine.high %v425_v61, %v433_v32 }
 0x3fe   :  { %v5556_v58 = vadd.f32 %v5555_v9, %v10362_v62  ;;  %v5844_v14 = vpop.f32.mrf.mxu1  ;;  %v440_v62 = vld [vmem:[%s12651_s0 + $0xd30] sm:$0xff] }
 0x3ff   :  { %v5557_v29 = vpop.f32.mrf.mxu0 }
 0x400   :  { %v10938_v25 = vadd.f32 %v5844_v14, %v5556_v58  ;;  %v5846_v5 = vpop.f32.mrf.mxu1 }
 0x401   :  { %v5882_v55 = vpop.f32.mrf.mxu0  ;;  %6073 = vmatmul.mubr.bf16.gmra.mxu0 %v7692_v46  ;;  %v7708_v46 = vcombine.low %v424_v35, %v432_v36  ;;  %v464_v35 = vld [vmem:[%s12651_s0 + $0xdf0] sm:$0xff] }
 0x402   :  { %v5883_v6 = vadd.f32 %v5882_v55, %v10371_v20  ;;  %v6171_v11 = vpop.f32.mrf.mxu1  ;;  %6362 = vmatmul.mubr.bf16.gmra.mxu1 %v7694_v7  ;;  %6080 = vmatprep.mubr.bf16.mxu0 %v7709_v41  ;;  %v441_v20 = vld [vmem:[%s12651_s0 + $0xd38] sm:$0xff]  ;;  %v7710_v7 = vcombine.low %v425_v61, %v433_v32  ;;  %v7725_v41 = vcombine.high %v440_v62, %v448_v28 }
 0x403   :  { %v5884_v37 = vpop.f32.mrf.mxu0  ;;  %6369 = vmatprep.mubr.bf16.mxu1 %v7711_v24  ;;  %v7727_v24 = vcombine.high %v441_v20, %v449_v19  ;;  %v465_v32 = vld [vmem:[%s12651_s0 + $0xdf8] sm:$0xff] }
 0x404   :  { %v10947_v17 = vadd.f32 %v6171_v11, %v5883_v6  ;;  %v6173_v31 = vpop.f32.mrf.mxu1 }
 0x405   :  { %v5885_v9 = vpop.f32.mrf.mxu0 }
 0x406   :  { %v5886_v58 = vadd.f32 %v5885_v9, %v10380_v40  ;;  %v6174_v14 = vpop.f32.mrf.mxu1  ;;  %v456_v40 = vld [vmem:[%s12651_s0 + $0xdb0] sm:$0xff] }
 0x407   :  { %v5887_v29 = vpop.f32.mrf.mxu0 }
 0x408   :  { %v10956_v5 = vadd.f32 %v6174_v14, %v5886_v58  ;;  %v6176_v55 = vpop.f32.mrf.mxu1 }
 0x409   :  { %v5890_v6 = vpop.f32.mrf.mxu0  ;;  %6081 = vmatmul.mubr.bf16.gmra.mxu0 %v7708_v46  ;;  %v7724_v46 = vcombine.low %v440_v62, %v448_v28  ;;  %v480_v62 = vld [vmem:[%s12651_s0 + $0xe70] sm:$0xff] }
 0x40a   :  { %v5891_v11 = vadd.f32 %v5890_v6, %v10389_v39  ;;  %v6179_v37 = vpop.f32.mrf.mxu1  ;;  %6370 = vmatmul.mubr.bf16.gmra.mxu1 %v7710_v7  ;;  %6088 = vmatprep.mubr.bf16.mxu0 %v7725_v41  ;;  %v457_v39 = vld [vmem:[%s12651_s0 + $0xdb8] sm:$0xff]  ;;  %v7726_v7 = vcombine.low %v441_v20, %v449_v19  ;;  %v7741_v41 = vcombine.high %v456_v40, %v464_v35 }
 0x40b   :  { %v5892_v31 = vpop.f32.mrf.mxu0  ;;  %6377 = vmatprep.mubr.bf16.mxu1 %v7727_v24  ;;  %v7743_v24 = vcombine.high %v457_v39, %v465_v32  ;;  %v481_v19 = vld [vmem:[%s12651_s0 + $0xe78] sm:$0xff] }
 0x40c   :  { %v10965_v36 = vadd.f32 %v6179_v37, %v5891_v11  ;;  %v6181_v61 = vpop.f32.mrf.mxu1 }
 0x40d   :  { %v5893_v9 = vpop.f32.mrf.mxu0 }
 0x40e   :  { %v5894_v58 = vadd.f32 %v5893_v9, %v10398_v42  ;;  %v6182_v14 = vpop.f32.mrf.mxu1  ;;  %v472_v42 = vld [vmem:[%s12651_s0 + $0xe30] sm:$0xff] }
 0x40f   :  { %v5895_v29 = vpop.f32.mrf.mxu0 }
 0x410   :  { %v10974_v55 = vadd.f32 %v6182_v14, %v5894_v58  ;;  %v6184_v6 = vpop.f32.mrf.mxu1 }
 0x411   :  { %v5898_v11 = vpop.f32.mrf.mxu0  ;;  %6089 = vmatmul.mubr.bf16.gmra.mxu0 %v7724_v46  ;;  %v7740_v46 = vcombine.low %v456_v40, %v464_v35  ;;  %v496_v40 = vld [vmem:[%s12651_s0 + $0xef0] sm:$0xff] }
 0x412   :  { %v5899_v37 = vadd.f32 %v5898_v11, %v10407_v4  ;;  %v6187_v31 = vpop.f32.mrf.mxu1  ;;  %6378 = vmatmul.mubr.bf16.gmra.mxu1 %v7726_v7  ;;  %6096 = vmatprep.mubr.bf16.mxu0 %v7741_v41  ;;  %v473_v4 = vld [vmem:[%s12651_s0 + $0xe38] sm:$0xff]  ;;  %v7742_v7 = vcombine.low %v457_v39, %v465_v32  ;;  %v7757_v41 = vcombine.high %v472_v42, %v480_v62 }
 0x413   :  { %v5900_v61 = vpop.f32.mrf.mxu0  ;;  %6385 = vmatprep.mubr.bf16.mxu1 %v7743_v24  ;;  %v7759_v24 = vcombine.high %v473_v4, %v481_v19  ;;  %v497_v32 = vld [vmem:[%s12651_s0 + $0xef8] sm:$0xff] }
 0x414   :  { %v10983_v28 = vadd.f32 %v6187_v31, %v5899_v37  ;;  %v6189_v20 = vpop.f32.mrf.mxu1 }
 0x415   :  { %v5901_v9 = vpop.f32.mrf.mxu0 }
 0x416   :  { %v5902_v58 = vadd.f32 %v5901_v9, %v10416_v50  ;;  %v6190_v14 = vpop.f32.mrf.mxu1  ;;  %v488_v50 = vld [vmem:[%s12651_s0 + $0xeb0] sm:$0xff] }
 0x417   :  { %v5903_v29 = vpop.f32.mrf.mxu0 }
 0x418   :  { %v10992_v6 = vadd.f32 %v6190_v14, %v5902_v58  ;;  %v6192_v11 = vpop.f32.mrf.mxu1 }
 0x419   :  { %v5906_v37 = vpop.f32.mrf.mxu0  ;;  %6097 = vmatmul.mubr.bf16.gmra.mxu0 %v7740_v46  ;;  %v7756_v46 = vcombine.low %v472_v42, %v480_v62  ;;  %v512_v42 = vld [vmem:[%s12651_s0 + $0xf70] sm:$0xff] }
 0x41a   :  { %v5907_v31 = vadd.f32 %v5906_v37, %v10425_v15  ;;  %v6195_v61 = vpop.f32.mrf.mxu1  ;;  %6386 = vmatmul.mubr.bf16.gmra.mxu1 %v7742_v7  ;;  %6104 = vmatprep.mubr.bf16.mxu0 %v7757_v41  ;;  %v489_v15 = vld [vmem:[%s12651_s0 + $0xeb8] sm:$0xff]  ;;  %v7758_v7 = vcombine.low %v473_v4, %v481_v19  ;;  %v7773_v41 = vcombine.high %v488_v50, %v496_v40 }
 0x41b   :  { %v5908_v20 = vpop.f32.mrf.mxu0  ;;  %6393 = vmatprep.mubr.bf16.mxu1 %v7759_v24  ;;  %v7775_v24 = vcombine.high %v489_v15, %v497_v32  ;;  %v513_v19 = vld [vmem:[%s12651_s0 + $0xf78] sm:$0xff] }
 0x41c   :  { %v11001_v35 = vadd.f32 %v6195_v61, %v5907_v31  ;;  %v6197_v39 = vpop.f32.mrf.mxu1 }
 0x41d   :  { %v5909_v9 = vpop.f32.mrf.mxu0 }
 0x41e   :  { %v5910_v58 = vadd.f32 %v5909_v9, %v10434_v23  ;;  %v6198_v14 = vpop.f32.mrf.mxu1  ;;  %v504_v23 = vld [vmem:[%s12651_s0 + $0xf30] sm:$0xff] }
 0x41f   :  { %v5911_v29 = vpop.f32.mrf.mxu0 }
 0x420   :  { %v11010_v11 = vadd.f32 %v6198_v14, %v5910_v58  ;;  %v6200_v37 = vpop.f32.mrf.mxu1 }
 0x421   :  { %v5914_v31 = vpop.f32.mrf.mxu0  ;;  %6105 = vmatmul.mubr.bf16.gmra.mxu0 %v7756_v46  ;;  %v7772_v46 = vcombine.low %v488_v50, %v496_v40  ;;  %v528_v50 = vld [vmem:[%s12651_s0 + $0xff0] sm:$0xff] }
 0x422   :  { %v5915_v61 = vadd.f32 %v5914_v31, %v10443_v44  ;;  %v6203_v20 = vpop.f32.mrf.mxu1  ;;  %6394 = vmatmul.mubr.bf16.gmra.mxu1 %v7758_v7  ;;  %6112 = vmatprep.mubr.bf16.mxu0 %v7773_v41  ;;  %v505_v44 = vld [vmem:[%s12651_s0 + $0xf38] sm:$0xff]  ;;  %v7774_v7 = vcombine.low %v489_v15, %v497_v32  ;;  %v7789_v41 = vcombine.high %v504_v23, %v512_v42 }
 0x423   :  { %v5916_v39 = vpop.f32.mrf.mxu0  ;;  %6401 = vmatprep.mubr.bf16.mxu1 %v7775_v24  ;;  %v7791_v24 = vcombine.high %v505_v44, %v513_v19  ;;  %v529_v32 = vld [vmem:[%s12651_s0 + $0xff8] sm:$0xff] }
 0x424   :  { %v11019_v62 = vadd.f32 %v6203_v20, %v5915_v61  ;;  %v6205_v4 = vpop.f32.mrf.mxu1 }
 0x425   :  { %v5917_v9 = vpop.f32.mrf.mxu0 }
 0x426   :  { %v5918_v58 = vadd.f32 %v5917_v9, %v10452_v8  ;;  %v6206_v14 = vpop.f32.mrf.mxu1  ;;  %v520_v8 = vld [vmem:[%s12651_s0 + $0xfb0] sm:$0xff] }
 0x427   :  { %v5919_v29 = vpop.f32.mrf.mxu0 }
 0x428   :  { %v11028_v37 = vadd.f32 %v6206_v14, %v5918_v58  ;;  %v6208_v31 = vpop.f32.mrf.mxu1 }
 0x429   :  { %v5922_v61 = vpop.f32.mrf.mxu0  ;;  %6113 = vmatmul.mubr.bf16.gmra.mxu0 %v7772_v46  ;;  %v7788_v46 = vcombine.low %v504_v23, %v512_v42 }
 0x42a   :  { %v5923_v20 = vadd.f32 %v5922_v61, %v10461_v18  ;;  %v6211_v39 = vpop.f32.mrf.mxu1  ;;  %6402 = vmatmul.mubr.bf16.gmra.mxu1 %v7774_v7  ;;  %6120 = vmatprep.mubr.bf16.mxu0 %v7789_v41  ;;  %v521_v18 = vld [vmem:[%s12651_s0 + $0xfb8] sm:$0xff]  ;;  %v7790_v7 = vcombine.low %v505_v44, %v513_v19  ;;  %v7805_v41 = vcombine.high %v520_v8, %v528_v50 }
 0x42b   :  { %v5924_v4 = vpop.f32.mrf.mxu0  ;;  %6409 = vmatprep.mubr.bf16.mxu1 %v7791_v24  ;;  %v7807_v24 = vcombine.high %v521_v18, %v529_v32  ;;  %v7804_v44 = vcombine.low %v520_v8, %v528_v50 }
 0x42c   :  { %v11037_v40 = vadd.f32 %v6211_v39, %v5923_v20  ;;  %v6213_v15 = vpop.f32.mrf.mxu1 }
 0x42d   :  { %v5925_v9 = vpop.f32.mrf.mxu0 }
 0x42e   :  { %v5926_v58 = vadd.f32 %v5925_v9, %v10470_v27  ;;  %v6214_v14 = vpop.f32.mrf.mxu1 }
 0x42f   :  { %v5927_v29 = vpop.f32.mrf.mxu0 }
 0x430   :  { %v11046_v31 = vadd.f32 %v6214_v14, %v5926_v58  ;;  %v6216_v61 = vpop.f32.mrf.mxu1  ;;  %v7806_v58 = vcombine.low %v521_v18, %v529_v32 }
 0x431   :  { %v5930_v20 = vpop.f32.mrf.mxu0  ;;  %6121 = vmatmul.mubr.bf16.gmra.mxu0 %v7788_v46 }
 0x432   :  { %v5931_v39 = vadd.f32 %v5930_v20, %v10479_v63  ;;  %v6219_v4 = vpop.f32.mrf.mxu1  ;;  %6410 = vmatmul.mubr.bf16.gmra.mxu1 %v7790_v7  ;;  %6128 = vmatprep.mubr.bf16.mxu0 %v7805_v41 }
 0x433   :  { %v5932_v15 = vpop.f32.mrf.mxu0  ;;  %6417 = vmatprep.mubr.bf16.mxu1 %v7807_v24 }
 0x434   :  { %v11049_v23 = vadd.f32 %v6219_v4, %v5931_v39  ;;  %v6221_v27 = vpop.f32.mrf.mxu1 }
 0x435   :  { %v5933_v42 = vpop.f32.mrf.mxu0 }
 0x436   :  { %v5934_v19 = vadd.f32 %v5933_v42, %v10488_v34  ;;  %v6222_v9 = vpop.f32.mrf.mxu1 }
 0x437   :  { %v5935_v14 = vpop.f32.mrf.mxu0 }
 0x438   :  { %v11052_v29 = vadd.f32 %v6222_v9, %v5934_v19  ;;  %v6224_v46 = vpop.f32.mrf.mxu1 }
 0x439   :  { %v5938_v61 = vpop.f32.mrf.mxu0  ;;  %6129 = vmatmul.mubr.bf16.gmra.mxu0 %v7804_v44 }
 0x43a   :  { %v5939_v63 = vadd.f32 %v5938_v61, %v10497_v10  ;;  %v6227_v7 = vpop.f32.mrf.mxu1  ;;  %6418 = vmatmul.mubr.bf16.gmra.mxu1 %v7806_v58 }
 0x43b   :  { %v5940_v41 = vpop.f32.mrf.mxu0 }
 0x43c   :  { %v11055_v24 = vadd.f32 %v6227_v7, %v5939_v63  ;;  %v6229_v20 = vpop.f32.mrf.mxu1 }
 0x43d   :  { %v5941_v39 = vpop.f32.mrf.mxu0 }
 0x43e   :  { %v5942_v8 = vadd.f32 %v5941_v39, %v10506_v49  ;;  %v6230_v34 = vpop.f32.mrf.mxu1 }
 0x43f   :  { %v5943_v50 = vpop.f32.mrf.mxu0 }
 0x440   :  { %v11058_v18 = vadd.f32 %v6230_v34, %v5942_v8  ;;  %v6232_v32 = vpop.f32.mrf.mxu1 }
 0x441   :  { %v5946_v4 = vpop.f32.mrf.mxu0 }
 0x442   :  { %v5947_v15 = vadd.f32 %v5946_v4, %v10515_v1  ;;  %v6235_v27 = vpop.f32.mrf.mxu1 }
 0x443   :  { %v5948_v42 = vpop.f32.mrf.mxu0 }
 0x444   :  { %v11061_v10 = vadd.f32 %v6235_v27, %v5947_v15  ;;  %v6237_v44 = vpop.f32.mrf.mxu1 }
 0x445   :  { %v5949_v19 = vpop.f32.mrf.mxu0 }
 0x446   :  { %v5950_v9 = vadd.f32 %v5949_v19, %v10524_v16  ;;  %v6238_v58 = vpop.f32.mrf.mxu1 }
 0x447   :  { %v5951_v14 = vpop.f32.mrf.mxu0 }
 0x448   :  { %v11064_v46 = vadd.f32 %v6238_v58, %v5950_v9  ;;  %v6240_v49 = vpop.f32.mrf.mxu1 }
 0x449   :  { %v5954_v61 = vpop.f32.mrf.mxu0 }
 0x44a   :  { %v5955_v63 = vadd.f32 %v5954_v61, %v10533_v56  ;;  %v6243_v7 = vpop.f32.mrf.mxu1 }
 0x44b   :  { %v5956_v41 = vpop.f32.mrf.mxu0 }
 0x44c   :  { %v11067_v20 = vadd.f32 %v6243_v7, %v5955_v63  ;;  %v6245_v1 = vpop.f32.mrf.mxu1 }
 0x44d   :  { %v5957_v39 = vpop.f32.mrf.mxu0 }
 0x44e   :  { %v5958_v8 = vadd.f32 %v5957_v39, %v10542_v60  ;;  %v6246_v34 = vpop.f32.mrf.mxu1 }
 0x44f   :  { %v5959_v50 = vpop.f32.mrf.mxu0 }
 0x450   :  { %v11070_v32 = vadd.f32 %v6246_v34, %v5958_v8  ;;  %v6248_v16 = vpop.f32.mrf.mxu1 }
 0x451   :  { %v5962_v4 = vpop.f32.mrf.mxu0 }
 0x452   :  { %v5963_v15 = vadd.f32 %v5962_v4, %v10551_v54  ;;  %v6251_v27 = vpop.f32.mrf.mxu1 }
 0x453   :  { %v5964_v42 = vpop.f32.mrf.mxu0 }
 0x454   :  { %v11073_v44 = vadd.f32 %v6251_v27, %v5963_v15  ;;  %v6253_v56 = vpop.f32.mrf.mxu1 }
 0x455   :  { %v5965_v19 = vpop.f32.mrf.mxu0 }
 0x456   :  { %v5966_v9 = vadd.f32 %v5965_v19, %v10560_v38  ;;  %v6254_v58 = vpop.f32.mrf.mxu1 }
 0x457   :  { %v5967_v14 = vpop.f32.mrf.mxu0 }
 0x458   :  { %v11076_v49 = vadd.f32 %v6254_v58, %v5966_v9  ;;  %v6256_v60 = vpop.f32.mrf.mxu1 }
 0x459   :  { %v5970_v61 = vpop.f32.mrf.mxu0 }
 0x45a   :  { %v5971_v63 = vadd.f32 %v5970_v61, %v10569_v13  ;;  %v6259_v7 = vpop.f32.mrf.mxu1 }
 0x45b   :  { %v5972_v41 = vpop.f32.mrf.mxu0 }
 0x45c   :  { %v11079_v1 = vadd.f32 %v6259_v7, %v5971_v63  ;;  %v6261_v54 = vpop.f32.mrf.mxu1 }
 0x45d   :  { %v5973_v39 = vpop.f32.mrf.mxu0 }
 0x45e   :  { %v5974_v8 = vadd.f32 %v5973_v39, %v10578_v59  ;;  %v6262_v34 = vpop.f32.mrf.mxu1 }
 0x45f   :  { %v5975_v50 = vpop.f32.mrf.mxu0 }
 0x460   :  { %v11082_v16 = vadd.f32 %v6262_v34, %v5974_v8  ;;  %v6264_v38 = vpop.f32.mrf.mxu1 }
 0x461   :  { %v5978_v4 = vpop.f32.mrf.mxu0 }
 0x462   :  { %v5979_v15 = vadd.f32 %v5978_v4, %v10587_v48  ;;  %v6267_v27 = vpop.f32.mrf.mxu1 }
 0x463   :  { %v5980_v42 = vpop.f32.mrf.mxu0 }
 0x464   :  { %v11085_v56 = vadd.f32 %v6267_v27, %v5979_v15  ;;  %v6269_v13 = vpop.f32.mrf.mxu1 }
 0x465   :  { %v5981_v19 = vpop.f32.mrf.mxu0 }
 0x466   :  { %v5982_v9 = vadd.f32 %v5981_v19, %v10596_v33  ;;  %v6270_v58 = vpop.f32.mrf.mxu1 }
 0x467   :  { %v5983_v14 = vpop.f32.mrf.mxu0 }
 0x468   :  { %v11088_v60 = vadd.f32 %v6270_v58, %v5982_v9  ;;  %v6272_v59 = vpop.f32.mrf.mxu1 }
 0x469   :  { %v5986_v61 = vpop.f32.mrf.mxu0 }
 0x46a   :  { %v5987_v63 = vadd.f32 %v5986_v61, %v10605_v12  ;;  %v6275_v7 = vpop.f32.mrf.mxu1 }
 0x46b   :  { %v5988_v41 = vpop.f32.mrf.mxu0 }
 0x46c   :  { %v11091_v54 = vadd.f32 %v6275_v7, %v5987_v63  ;;  %v6277_v48 = vpop.f32.mrf.mxu1  ;;  %v6496_v63 = vmul.f32 %v10956_v5, %v10956_v5 }
 0x46d   :  { %v5989_v39 = vpop.f32.mrf.mxu0  ;;  %v6495_v48 = vmul.f32 %v10947_v17, %v10947_v17 }
 0x46e   :  { %12825 = vst [vmem:[#allocation19_spill] sm:$0xff] %v11091_v54  ;;  %v5990_v8 = vadd.f32 %v5989_v39, %v10614_v51  ;;  %v6278_v34 = vpop.f32.mrf.mxu1  ;;  %v6426_v39 = vadd.f32 %v10956_v5, %v10947_v17 }
 0x46f   :  { %v5991_v50 = vpop.f32.mrf.mxu0 }
 0x470   :  { %v11094_v38 = vadd.f32 %v6278_v34, %v5990_v8  ;;  %v6280_v33 = vpop.f32.mrf.mxu1 }
 0x471   :  { %v5994_v4 = vpop.f32.mrf.mxu0  ;;  %v6559_v33 = vadd.f32 %v6496_v63, %v6495_v48 }
 0x472   :  { %v5995_v15 = vadd.f32 %v5994_v4, %v10623_v0  ;;  %v6283_v27 = vpop.f32.mrf.mxu1  ;;  %v6427_v4 = vadd.f32 %v6426_v39, %v10965_v36 }
 0x473   :  { %v5996_v42 = vpop.f32.mrf.mxu0 }
 0x474   :  { %v11097_v13 = vadd.f32 %v6283_v27, %v5995_v15  ;;  %v6285_v12 = vpop.f32.mrf.mxu1 }
 0x475   :  { %v5997_v19 = vpop.f32.mrf.mxu0 }
 0x476   :  { %12826 = vst [vmem:[#allocation20_spill] sm:$0xff] %v11097_v13  ;;  %v5998_v9 = vadd.f32 %v5997_v19, %v10632_v45  ;;  %v6286_v58 = vpop.f32.mrf.mxu1  ;;  %v6497_v45 = vmul.f32 %v10965_v36, %v10965_v36  ;;  %v6428_v19 = vadd.f32 %v6427_v4, %v10974_v55 }
 0x477   :  { %v5999_v14 = vpop.f32.mrf.mxu0 }
 0x478   :  { %v11100_v59 = vadd.f32 %v6286_v58, %v5998_v9  ;;  %v6288_v51 = vpop.f32.mrf.mxu1  ;;  %v6560_v12 = vadd.f32 %v6559_v33, %v6497_v45  ;;  %v6499_v9 = vmul.f32 %v10983_v28, %v10983_v28  ;;  %v6429_v63 = vadd.f32 %v6428_v19, %v10983_v28 }
 0x479   :  { %v6002_v61 = vpop.f32.mrf.mxu0  ;;  %v6501_v45 = vmul.f32 %v11001_v35, %v11001_v35 }
 0x47a   :  { %v6003_v7 = vadd.f32 %v6002_v61, %v10641_v3  ;;  %v6291_v0 = vpop.f32.mrf.mxu1  ;;  %v6498_v3 = vmul.f32 %v10974_v55, %v10974_v55  ;;  %v6430_v39 = vadd.f32 %v6429_v63, %v10992_v6 }
 0x47b   :  { %v6004_v41 = vpop.f32.mrf.mxu0 }
 0x47c   :  { %v11111_v8 = vadd.f32 %v6291_v0, %v6003_v7  ;;  %v6293_v34 = vpop.f32.mrf.mxu1  ;;  %v6561_v61 = vadd.f32 %v6560_v12, %v6498_v3  ;;  %v6500_v7 = vmul.f32 %v10992_v6, %v10992_v6  ;;  %v6431_v3 = vadd.f32 %v6430_v39, %v11001_v35 }
 0x47d   :  { %v6005_v50 = vpop.f32.mrf.mxu0 }
 0x47e   :  { %12827 = vst [vmem:[#allocation21_spill] sm:$0xff] %v11111_v8  ;;  %v6006_v15 = vadd.f32 %v6005_v50, %v10650_v22  ;;  %v6294_v27 = vpop.f32.mrf.mxu1  ;;  %v6562_v48 = vadd.f32 %v6561_v61, %v6499_v9  ;;  %v6432_v19 = vadd.f32 %v6431_v3, %v11010_v11  ;;  %v6503_v9 = vmul.f32 %v11019_v62, %v11019_v62 }
 0x47f   :  { %v6007_v42 = vpop.f32.mrf.mxu0 }
 0x480   :  { %v11120_v58 = vadd.f32 %v6294_v27, %v6006_v15  ;;  %v6296_v14 = vpop.f32.mrf.mxu1  ;;  %v6563_v4 = vadd.f32 %v6562_v48, %v6500_v7  ;;  %v6502_v15 = vmul.f32 %v11010_v11, %v11010_v11  ;;  %v6433_v7 = vadd.f32 %v6432_v19, %v11019_v62 }
 0x481   :  { %v6010_v51 = vpop.f32.mrf.mxu0 }
 0x482   :  { %v6011_v22 = vadd.f32 %v6010_v51, %v10659_v43  ;;  %v6299_v0 = vpop.f32.mrf.mxu1  ;;  %v6564_v12 = vadd.f32 %v6563_v4, %v6501_v45  ;;  %v6434_v39 = vadd.f32 %v6433_v7, %v11028_v37  ;;  %v6505_v45 = vmul.f32 %v11037_v40, %v11037_v40 }
 0x483   :  { %v6012_v41 = vpop.f32.mrf.mxu0 }
 0x484   :  { %v11129_v34 = vadd.f32 %v6299_v0, %v6011_v22  ;;  %v6301_v50 = vpop.f32.mrf.mxu1  ;;  %v6565_v63 = vadd.f32 %v6564_v12, %v6502_v15  ;;  %v6504_v22 = vmul.f32 %v11028_v37, %v11028_v37  ;;  %v6435_v15 = vadd.f32 %v6434_v39, %v11037_v40 }
 0x485   :  { %v6013_v33 = vpop.f32.mrf.mxu0 }
 0x486   :  { %12828 = vst [vmem:[#allocation27_spill] sm:$0xff] %v11129_v34  ;;  %v6014_v43 = vadd.f32 %v6013_v33, %v10668_v26  ;;  %v6302_v27 = vpop.f32.mrf.mxu1  ;;  %v6566_v48 = vadd.f32 %v6565_v63, %v6503_v9  ;;  %v6436_v19 = vadd.f32 %v6435_v15, %v11046_v31  ;;  %v6507_v9 = vmul.f32 %v11049_v23, %v11049_v23 }
 0x487   :  { %v6015_v42 = vpop.f32.mrf.mxu0 }
 0x488   :  { %v11138_v14 = vadd.f32 %v6302_v27, %v6014_v43  ;;  %v6304_v51 = vpop.f32.mrf.mxu1  ;;  %v6567_v3 = vadd.f32 %v6566_v48, %v6504_v22  ;;  %v6506_v43 = vmul.f32 %v11046_v31, %v11046_v31  ;;  %v6437_v22 = vadd.f32 %v6436_v19, %v11049_v23 }
 0x489   :  { %v6018_v61 = vpop.f32.mrf.mxu0 }
 0x48a   :  { %v6019_v26 = vadd.f32 %v6018_v61, %v10677_v21  ;;  %v6307_v0 = vpop.f32.mrf.mxu1  ;;  %v6568_v12 = vadd.f32 %v6567_v3, %v6505_v45  ;;  %v6438_v39 = vadd.f32 %v6437_v22, %v11052_v29  ;;  %v6509_v45 = vmul.f32 %v11055_v24, %v11055_v24 }
 0x48b   :  { %v6020_v41 = vpop.f32.mrf.mxu0 }
 0x48c   :  { %v11147_v50 = vadd.f32 %v6307_v0, %v6019_v26  ;;  %v6309_v33 = vpop.f32.mrf.mxu1  ;;  %v6569_v7 = vadd.f32 %v6568_v12, %v6506_v43  ;;  %v6508_v26 = vmul.f32 %v11052_v29, %v11052_v29  ;;  %v6439_v43 = vadd.f32 %v6438_v39, %v11055_v24 }
 0x48d   :  { %v6021_v4 = vpop.f32.mrf.mxu0 }
 0x48e   :  { %12829 = vst [vmem:[#allocation28_spill] sm:$0xff] %v11147_v50  ;;  %v6022_v21 = vadd.f32 %v6021_v4, %v10686_v2  ;;  %v6310_v27 = vpop.f32.mrf.mxu1  ;;  %v6570_v48 = vadd.f32 %v6569_v7, %v6507_v9  ;;  %v6440_v19 = vadd.f32 %v6439_v43, %v11058_v18  ;;  %v6511_v9 = vmul.f32 %v11061_v10, %v11061_v10 }
 0x48f   :  { %v6023_v42 = vpop.f32.mrf.mxu0 }
 0x490   :  { %v11156_v51 = vadd.f32 %v6310_v27, %v6022_v21  ;;  %v6312_v61 = vpop.f32.mrf.mxu1  ;;  %v6571_v15 = vadd.f32 %v6570_v48, %v6508_v26  ;;  %v6510_v21 = vmul.f32 %v11058_v18, %v11058_v18  ;;  %v6441_v26 = vadd.f32 %v6440_v19, %v11061_v10 }
 0x491   :  { %v6026_v63 = vpop.f32.mrf.mxu0 }
 0x492   :  { %v6027_v2 = vadd.f32 %v6026_v63, %v10695_v53  ;;  %v6315_v0 = vpop.f32.mrf.mxu1  ;;  %v6572_v12 = vadd.f32 %v6571_v15, %v6509_v45  ;;  %v6442_v45 = vadd.f32 %v6441_v26, %v11064_v46 }
 0x493   :  { %v6028_v41 = vpop.f32.mrf.mxu0 }
 0x494   :  { %v11165_v33 = vadd.f32 %v6315_v0, %v6027_v2  ;;  %v6317_v4 = vpop.f32.mrf.mxu1  ;;  %v6573_v22 = vadd.f32 %v6572_v12, %v6510_v21  ;;  %v6512_v2 = vmul.f32 %v11064_v46, %v11064_v46  ;;  %v12831_v0 = vld [vmem:[#allocation22_spill] sm:$0xff] }
 0x495   :  { %v6029_v3 = vpop.f32.mrf.mxu0  ;;  %v6513_v4 = vmul.f32 %v11067_v20, %v11067_v20 }
 0x496   :  { %12830 = vst [vmem:[#allocation29_spill] sm:$0xff] %v11165_v33  ;;  %v6030_v53 = vadd.f32 %v6029_v3, %v10704_v57  ;;  %v6318_v27 = vpop.f32.mrf.mxu1  ;;  %v6574_v39 = vadd.f32 %v6573_v22, %v6511_v9  ;;  %v6515_v22 = vmul.f32 %v11073_v44, %v11073_v44 }
 0x497   :  { %v6031_v42 = vpop.f32.mrf.mxu0 }
 0x498   :  { %v11174_v61 = vadd.f32 %v6318_v27, %v6030_v53  ;;  %v6320_v63 = vpop.f32.mrf.mxu1  ;;  %v6575_v21 = vadd.f32 %v6574_v39, %v6512_v2  ;;  %v6443_v53 = vadd.f32 %v6442_v45, %v11067_v20  ;;  %v6514_v27 = vmul.f32 %v11070_v32, %v11070_v32  ;;  %v12833_v42 = vld [vmem:[#allocation23_spill] sm:$0xff]  ;;  %v12834_v39 = vld [vmem:[#allocation24_spill] sm:$0xff] }
 0x499   :  { %v6034_v7 = vpop.f32.mrf.mxu0 }
 0x49a   :  { %v6035_v57 = vadd.f32 %v6034_v7, %v12831_v0  ;;  %v6323_v41 = vpop.f32.mrf.mxu1  ;;  %v6576_v9 = vadd.f32 %v6575_v21, %v6513_v4  ;;  %v6444_v7 = vadd.f32 %v6443_v53, %v11070_v32  ;;  %v6517_v53 = vmul.f32 %v11079_v1, %v11079_v1 }
 0x49b   :  { %v6036_v48 = vpop.f32.mrf.mxu0 }
 0x49c   :  { %v11183_v3 = vadd.f32 %v6323_v41, %v6035_v57  ;;  %v6325_v15 = vpop.f32.mrf.mxu1  ;;  %v6577_v2 = vadd.f32 %v6576_v9, %v6514_v27  ;;  %v6445_v41 = vadd.f32 %v6444_v7, %v11073_v44  ;;  %v6516_v48 = vmul.f32 %v11076_v49, %v11076_v49  ;;  %v12836_v7 = vld [vmem:[#allocation25_spill] sm:$0xff] }
 0x49d   :  { %v6037_v43 = vpop.f32.mrf.mxu0  ;;  %v6518_v9 = vmul.f32 %v11082_v16, %v11082_v16 }
 0x49e   :  { %12832 = vst [vmem:[#allocation22_spill] sm:$0xff] %v11183_v3  ;;  %v6038_v12 = vadd.f32 %v6037_v43, %v12833_v42  ;;  %v6326_v19 = vpop.f32.mrf.mxu1  ;;  %v6578_v4 = vadd.f32 %v6577_v2, %v6515_v22  ;;  %v6446_v21 = vadd.f32 %v6445_v41, %v11076_v49  ;;  %v6519_v41 = vmul.f32 %v11085_v56, %v11085_v56 }
 0x49f   :  { %v6039_v63 = vpop.f32.mrf.mxu0 }
 0x4a0   :  { %v11192_v26 = vadd.f32 %v6326_v19, %v6038_v12  ;;  %v6328_v0 = vpop.f32.mrf.mxu1  ;;  %v6579_v27 = vadd.f32 %v6578_v4, %v6516_v48  ;;  %v6447_v63 = vadd.f32 %v6446_v21, %v11079_v1  ;;  %v6520_v21 = vmul.f32 %v11088_v60, %v11088_v60 }
 0x4a1   :  { %v6042_v57 = vpop.f32.mrf.mxu0 }
 0x4a2   :  { %v6043_v45 = vadd.f32 %v6042_v57, %v12834_v39  ;;  %v6331_v15 = vpop.f32.mrf.mxu1  ;;  %v6580_v22 = vadd.f32 %v6579_v27, %v6517_v53  ;;  %v6448_v2 = vadd.f32 %v6447_v63, %v11082_v16  ;;  %v6521_v63 = vmul.f32 %v11091_v54, %v11091_v54 }
 0x4a3   :  { %v6044_v43 = vpop.f32.mrf.mxu0 }
 0x4a4   :  { %v11201_v42 = vadd.f32 %v6331_v15, %v6043_v45  ;;  %v6333_v12 = vpop.f32.mrf.mxu1  ;;  %v6581_v48 = vadd.f32 %v6580_v22, %v6518_v9  ;;  %v6449_v4 = vadd.f32 %v6448_v2, %v11085_v56  ;;  %v6522_v2 = vmul.f32 %v11094_v38, %v11094_v38 }
 0x4a5   :  { %v6045_v19 = vpop.f32.mrf.mxu0  ;;  %v12837_v12 = vld [vmem:[#allocation26_spill] sm:$0xff] }
 0x4a6   :  { %12835 = vst [vmem:[#allocation23_spill] sm:$0xff] %v11201_v42  ;;  %v6046_v0 = vadd.f32 %v6045_v19, %v12836_v7  ;;  %v6334_v57 = vpop.f32.mrf.mxu1  ;;  %v6582_v53 = vadd.f32 %v6581_v48, %v6519_v41  ;;  %v6450_v27 = vadd.f32 %v6449_v4, %v11088_v60  ;;  %v6523_v4 = vmul.f32 %v11097_v13, %v11097_v13 }
 0x4a7   :  { %v6047_v39 = vpop.f32.mrf.mxu0 }
 0x4a8   :  { %v11210_v45 = vadd.f32 %v6334_v57, %v6046_v0  ;;  %v6336_v15 = vpop.f32.mrf.mxu1  ;;  %v6583_v9 = vadd.f32 %v6582_v53, %v6520_v21  ;;  %v6451_v22 = vadd.f32 %v6450_v27, %v11091_v54  ;;  %v6524_v27 = vmul.f32 %v11100_v59, %v11100_v59  ;;  %v12839_v54 = vld [vmem:[#allocation2_spill] sm:$0xff] }
 0x4a9   :  { %v6050_v43 = vpop.f32.mrf.mxu0 }
 0x4aa   :  { %v6051_v19 = vadd.f32 %v6050_v43, %v12837_v12  ;;  %v6339_v7 = vpop.f32.mrf.mxu1  ;;  %v6584_v41 = vadd.f32 %v6583_v9, %v6521_v63  ;;  %v6452_v48 = vadd.f32 %v6451_v22, %v11094_v38  ;;  %v6525_v22 = vmul.f32 %v11111_v8, %v11111_v8 }
 0x4ab   :  { %v6052_v39 = vpop.f32.mrf.mxu0 }
 0x4ac   :  { %v11219_v0 = vadd.f32 %v6339_v7, %v6051_v19  ;;  %v6341_v57 = vpop.f32.mrf.mxu1  ;;  %v6585_v21 = vadd.f32 %v6584_v41, %v6522_v2  ;;  %v6453_v53 = vadd.f32 %v6452_v48, %v11097_v13  ;;  %v6526_v48 = vmul.f32 %v11120_v58, %v11120_v58  ;;  %v12841_v13 = vld [vmem:[#allocation3_spill] sm:$0xff] }
 0x4ad   :  { %v6053_v15 = vpop.f32.mrf.mxu0 }
 0x4ae   :  { %12838 = vst [vmem:[#allocation24_spill] sm:$0xff] %v11219_v0  ;;  %v6054_v43 = vadd.f32 %v6053_v15, %v10758_v52  ;;  %v6342_v12 = vpop.f32.mrf.mxu1  ;;  %v6586_v63 = vadd.f32 %v6585_v21, %v6523_v4  ;;  %v6454_v9 = vadd.f32 %v6453_v53, %v11100_v59  ;;  %v6527_v53 = vmul.f32 %v11129_v34, %v11129_v34 }
 0x4af   :  { %v6055_v39 = vpop.f32.mrf.mxu0 }
 0x4b0   :  { %v11228_v19 = vadd.f32 %v6342_v12, %v6054_v43  ;;  %v6344_v7 = vpop.f32.mrf.mxu1  ;;  %v6587_v2 = vadd.f32 %v6586_v63, %v6524_v27  ;;  %v6455_v41 = vadd.f32 %v6454_v9, %v11111_v8  ;;  %v6528_v9 = vmul.f32 %v11138_v14, %v11138_v14  ;;  %v12842_v8 = vld [vmem:[#allocation4_spill] sm:$0xff] }
 0x4b1   :  { %v6058_v57 = vpop.f32.mrf.mxu0 }
 0x4b2   :  { %v6059_v52 = vadd.f32 %v6058_v57, %v12839_v54  ;;  %v6347_v15 = vpop.f32.mrf.mxu1  ;;  %v6588_v4 = vadd.f32 %v6587_v2, %v6525_v22  ;;  %v6456_v21 = vadd.f32 %v6455_v41, %v11120_v58  ;;  %v6529_v41 = vmul.f32 %v11147_v50, %v11147_v50 }
 0x4b3   :  { %v6060_v39 = vpop.f32.mrf.mxu0 }
 0x4b4   :  { %v11237_v43 = vadd.f32 %v6347_v15, %v6059_v52  ;;  %v6349_v12 = vpop.f32.mrf.mxu1  ;;  %v6589_v27 = vadd.f32 %v6588_v4, %v6526_v48  ;;  %v6457_v63 = vadd.f32 %v6456_v21, %v11129_v34  ;;  %v6530_v21 = vmul.f32 %v11156_v51, %v11156_v51  ;;  %v12844_v34 = vld [vmem:[#allocation5_spill] sm:$0xff] }
 0x4b5   :  { %v6061_v7 = vpop.f32.mrf.mxu0 }
 0x4b6   :  { %12840 = vst [vmem:[#allocation25_spill] sm:$0xff] %v11237_v43  ;;  %v6062_v54 = vadd.f32 %v6061_v7, %v12841_v13  ;;  %v6350_v57 = vpop.f32.mrf.mxu1  ;;  %v6590_v22 = vadd.f32 %v6589_v27, %v6527_v53  ;;  %v6458_v2 = vadd.f32 %v6457_v63, %v11138_v14  ;;  %v6531_v63 = vmul.f32 %v11165_v33, %v11165_v33 }
 0x4b7   :  { %v6063_v39 = vpop.f32.mrf.mxu0 }
 0x4b8   :  { %v11246_v52 = vadd.f32 %v6350_v57, %v6062_v54  ;;  %v6352_v15 = vpop.f32.mrf.mxu1  ;;  %v6591_v48 = vadd.f32 %v6590_v22, %v6528_v9  ;;  %v6459_v4 = vadd.f32 %v6458_v2, %v11147_v50  ;;  %v6532_v2 = vmul.f32 %v11174_v61, %v11174_v61  ;;  %v12845_v50 = vld [vmem:[#allocation6_spill] sm:$0xff] }
 0x4b9   :  { %v6066_v12 = vpop.f32.mrf.mxu0 }
 0x4ba   :  { %v6067_v13 = vadd.f32 %v6066_v12, %v12842_v8  ;;  %v6355_v7 = vpop.f32.mrf.mxu1  ;;  %v6592_v53 = vadd.f32 %v6591_v48, %v6529_v41  ;;  %v6460_v27 = vadd.f32 %v6459_v4, %v11156_v51  ;;  %v6533_v4 = vmul.f32 %v11183_v3, %v11183_v3 }
 0x4bb   :  { %v6068_v39 = vpop.f32.mrf.mxu0 }
 0x4bc   :  { %v11255_v54 = vadd.f32 %v6355_v7, %v6067_v13  ;;  %v6357_v57 = vpop.f32.mrf.mxu1  ;;  %v6593_v9 = vadd.f32 %v6592_v53, %v6530_v21  ;;  %v6461_v22 = vadd.f32 %v6460_v27, %v11165_v33  ;;  %v6534_v27 = vmul.f32 %v11192_v26, %v11192_v26  ;;  %v12847_v33 = vld [vmem:[#allocation7_spill] sm:$0xff] }
 0x4bd   :  { %v6069_v15 = vpop.f32.mrf.mxu0 }
 0x4be   :  { %12843 = vst [vmem:[#allocation26_spill] sm:$0xff] %v11255_v54  ;;  %v6070_v8 = vadd.f32 %v6069_v15, %v12844_v34  ;;  %v6358_v12 = vpop.f32.mrf.mxu1  ;;  %v6594_v41 = vadd.f32 %v6593_v9, %v6531_v63  ;;  %v6462_v48 = vadd.f32 %v6461_v22, %v11174_v61  ;;  %v6535_v22 = vmul.f32 %v11201_v42, %v11201_v42 }
 0x4bf   :  { %v6071_v39 = vpop.f32.mrf.mxu0 }
 0x4c0   :  { %v11264_v13 = vadd.f32 %v6358_v12, %v6070_v8  ;;  %v6360_v7 = vpop.f32.mrf.mxu1  ;;  %v6595_v21 = vadd.f32 %v6594_v41, %v6532_v2  ;;  %v6463_v53 = vadd.f32 %v6462_v48, %v11183_v3  ;;  %v6536_v48 = vmul.f32 %v11210_v45, %v11210_v45  ;;  %v12848_v3 = vld [vmem:[#allocation8_spill] sm:$0xff] }
 0x4c1   :  { %v6074_v57 = vpop.f32.mrf.mxu0 }
 0x4c2   :  { %v6075_v34 = vadd.f32 %v6074_v57, %v12845_v50  ;;  %v6363_v15 = vpop.f32.mrf.mxu1  ;;  %v6596_v63 = vadd.f32 %v6595_v21, %v6533_v4  ;;  %v6464_v9 = vadd.f32 %v6463_v53, %v11192_v26  ;;  %v6537_v53 = vmul.f32 %v11219_v0, %v11219_v0 }
 0x4c3   :  { %v6076_v39 = vpop.f32.mrf.mxu0 }
 0x4c4   :  { %v11273_v8 = vadd.f32 %v6363_v15, %v6075_v34  ;;  %v6365_v12 = vpop.f32.mrf.mxu1  ;;  %v6597_v2 = vadd.f32 %v6596_v63, %v6534_v27  ;;  %v6465_v41 = vadd.f32 %v6464_v9, %v11201_v42  ;;  %v6538_v9 = vmul.f32 %v11228_v19, %v11228_v19  ;;  %v12850_v42 = vld [vmem:[#allocation9_spill] sm:$0xff] }
 0x4c5   :  { %v6077_v7 = vpop.f32.mrf.mxu0 }
 0x4c6   :  { %12846 = vst [vmem:[#allocation2_spill] sm:$0xff] %v11273_v8  ;;  %v6078_v50 = vadd.f32 %v6077_v7, %v12847_v33  ;;  %v6366_v57 = vpop.f32.mrf.mxu1  ;;  %v6598_v4 = vadd.f32 %v6597_v2, %v6535_v22  ;;  %v6466_v21 = vadd.f32 %v6465_v41, %v11210_v45  ;;  %v6539_v41 = vmul.f32 %v11237_v43, %v11237_v43 }
 0x4c7   :  { %v6079_v39 = vpop.f32.mrf.mxu0 }
 0x4c8   :  { %v11282_v34 = vadd.f32 %v6366_v57, %v6078_v50  ;;  %v6368_v15 = vpop.f32.mrf.mxu1  ;;  %v6599_v27 = vadd.f32 %v6598_v4, %v6536_v48  ;;  %v6467_v63 = vadd.f32 %v6466_v21, %v11219_v0  ;;  %v6540_v21 = vmul.f32 %v11246_v52, %v11246_v52  ;;  %v12852_v0 = vld [vmem:[#allocation10_spill] sm:$0xff] }
 0x4c9   :  { %v6082_v12 = vpop.f32.mrf.mxu0 }
 0x4ca   :  { %v6083_v33 = vadd.f32 %v6082_v12, %v12848_v3  ;;  %v6371_v7 = vpop.f32.mrf.mxu1  ;;  %v6600_v22 = vadd.f32 %v6599_v27, %v6537_v53  ;;  %v6468_v2 = vadd.f32 %v6467_v63, %v11228_v19  ;;  %v6541_v63 = vmul.f32 %v11255_v54, %v11255_v54 }
 0x4cb   :  { %v6084_v39 = vpop.f32.mrf.mxu0 }
 0x4cc   :  { %v11291_v50 = vadd.f32 %v6371_v7, %v6083_v33  ;;  %v6373_v57 = vpop.f32.mrf.mxu1  ;;  %v6601_v48 = vadd.f32 %v6600_v22, %v6538_v9  ;;  %v6469_v4 = vadd.f32 %v6468_v2, %v11237_v43  ;;  %v6542_v2 = vmul.f32 %v11264_v13, %v11264_v13  ;;  %v12854_v43 = vld [vmem:[#allocation11_spill] sm:$0xff] }
 0x4cd   :  { %v6085_v15 = vpop.f32.mrf.mxu0 }
 0x4ce   :  { %12849 = vst [vmem:[#allocation3_spill] sm:$0xff] %v11291_v50  ;;  %v6086_v3 = vadd.f32 %v6085_v15, %v12850_v42  ;;  %v6374_v12 = vpop.f32.mrf.mxu1  ;;  %v6602_v53 = vadd.f32 %v6601_v48, %v6539_v41  ;;  %v6470_v27 = vadd.f32 %v6469_v4, %v11246_v52  ;;  %v6543_v4 = vmul.f32 %v11273_v8, %v11273_v8 }
 0x4cf   :  { %v6087_v39 = vpop.f32.mrf.mxu0 }
 0x4d0   :  { %v11300_v33 = vadd.f32 %v6374_v12, %v6086_v3  ;;  %v6376_v7 = vpop.f32.mrf.mxu1  ;;  %v6603_v9 = vadd.f32 %v6602_v53, %v6540_v21  ;;  %v6471_v22 = vadd.f32 %v6470_v27, %v11255_v54  ;;  %v6544_v27 = vmul.f32 %v11282_v34, %v11282_v34  ;;  %v12856_v54 = vld [vmem:[#allocation12_spill] sm:$0xff] }
 0x4d1   :  { %v6090_v57 = vpop.f32.mrf.mxu0 }
 0x4d2   :  { %12851 = vst [vmem:[#allocation4_spill] sm:$0xff] %v11300_v33  ;;  %v6091_v42 = vadd.f32 %v6090_v57, %v12852_v0  ;;  %v6379_v15 = vpop.f32.mrf.mxu1  ;;  %v6604_v41 = vadd.f32 %v6603_v9, %v6541_v63  ;;  %v6472_v48 = vadd.f32 %v6471_v22, %v11264_v13  ;;  %v6545_v22 = vmul.f32 %v11291_v50, %v11291_v50 }
 0x4d3   :  { %v6092_v39 = vpop.f32.mrf.mxu0 }
 0x4d4   :  { %v11309_v3 = vadd.f32 %v6379_v15, %v6091_v42  ;;  %v6381_v12 = vpop.f32.mrf.mxu1  ;;  %v6605_v21 = vadd.f32 %v6604_v41, %v6542_v2  ;;  %v6473_v53 = vadd.f32 %v6472_v48, %v11273_v8  ;;  %v6546_v48 = vmul.f32 %v11300_v33, %v11300_v33  ;;  %v12858_v8 = vld [vmem:[#allocation13_spill] sm:$0xff] }
 0x4d5   :  { %v6093_v7 = vpop.f32.mrf.mxu0 }
 0x4d6   :  { %12853 = vst [vmem:[#allocation5_spill] sm:$0xff] %v11309_v3  ;;  %v6094_v0 = vadd.f32 %v6093_v7, %v12854_v43  ;;  %v6382_v57 = vpop.f32.mrf.mxu1  ;;  %v6606_v63 = vadd.f32 %v6605_v21, %v6543_v4  ;;  %v6474_v9 = vadd.f32 %v6473_v53, %v11282_v34  ;;  %v6547_v53 = vmul.f32 %v11309_v3, %v11309_v3 }
 0x4d7   :  { %v6095_v39 = vpop.f32.mrf.mxu0 }
 0x4d8   :  { %v11318_v42 = vadd.f32 %v6382_v57, %v6094_v0  ;;  %v6384_v15 = vpop.f32.mrf.mxu1  ;;  %v6607_v2 = vadd.f32 %v6606_v63, %v6544_v27  ;;  %v6475_v41 = vadd.f32 %v6474_v9, %v11291_v50  ;;  %v12860_v50 = vld [vmem:[#allocation14_spill] sm:$0xff] }
 0x4d9   :  { %v6098_v12 = vpop.f32.mrf.mxu0 }
 0x4da   :  { %12855 = vst [vmem:[#allocation6_spill] sm:$0xff] %v11318_v42  ;;  %v6099_v43 = vadd.f32 %v6098_v12, %v12856_v54  ;;  %v6387_v7 = vpop.f32.mrf.mxu1  ;;  %v6608_v4 = vadd.f32 %v6607_v2, %v6545_v22  ;;  %v6476_v21 = vadd.f32 %v6475_v41, %v11300_v33  ;;  %v6548_v9 = vmul.f32 %v11318_v42, %v11318_v42 }
 0x4db   :  { %v6100_v39 = vpop.f32.mrf.mxu0 }
 0x4dc   :  { %v11327_v0 = vadd.f32 %v6387_v7, %v6099_v43  ;;  %v6389_v57 = vpop.f32.mrf.mxu1  ;;  %v6609_v27 = vadd.f32 %v6608_v4, %v6546_v48  ;;  %v6477_v63 = vadd.f32 %v6476_v21, %v11309_v3  ;;  %v12862_v3 = vld [vmem:[#allocation15_spill] sm:$0xff] }
 0x4dd   :  { %v6101_v15 = vpop.f32.mrf.mxu0 }
 0x4de   :  { %12857 = vst [vmem:[#allocation7_spill] sm:$0xff] %v11327_v0  ;;  %v6102_v54 = vadd.f32 %v6101_v15, %v12858_v8  ;;  %v6390_v12 = vpop.f32.mrf.mxu1  ;;  %v6610_v22 = vadd.f32 %v6609_v27, %v6547_v53  ;;  %v6478_v2 = vadd.f32 %v6477_v63, %v11318_v42  ;;  %v6549_v41 = vmul.f32 %v11327_v0, %v11327_v0 }
 0x4df   :  { %v6103_v39 = vpop.f32.mrf.mxu0 }
 0x4e0   :  { %v11336_v43 = vadd.f32 %v6390_v12, %v6102_v54  ;;  %v6392_v7 = vpop.f32.mrf.mxu1  ;;  %v6611_v48 = vadd.f32 %v6610_v22, %v6548_v9  ;;  %v6479_v4 = vadd.f32 %v6478_v2, %v11327_v0  ;;  %v12863_v0 = vld [vmem:[#allocation16_spill] sm:$0xff] }
 0x4e1   :  { %v6106_v57 = vpop.f32.mrf.mxu0 }
 0x4e2   :  { %12859 = vst [vmem:[#allocation8_spill] sm:$0xff] %v11336_v43  ;;  %v6107_v8 = vadd.f32 %v6106_v57, %v12860_v50  ;;  %v6395_v15 = vpop.f32.mrf.mxu1  ;;  %v6550_v21 = vmul.f32 %v11336_v43, %v11336_v43  ;;  %v6612_v53 = vadd.f32 %v6611_v48, %v6549_v41  ;;  %v6480_v27 = vadd.f32 %v6479_v4, %v11336_v43 }
 0x4e3   :  { %v6108_v39 = vpop.f32.mrf.mxu0 }
 0x4e4   :  { %v11345_v54 = vadd.f32 %v6395_v15, %v6107_v8  ;;  %v6397_v12 = vpop.f32.mrf.mxu1  ;;  %v6613_v9 = vadd.f32 %v6612_v53, %v6550_v21  ;;  %v12864_v53 = vld [vmem:[#allocation17_spill] sm:$0xff] }
 0x4e5   :  { %v6109_v7 = vpop.f32.mrf.mxu0 }
 0x4e6   :  { %12861 = vst [vmem:[#allocation9_spill] sm:$0xff] %v11345_v54  ;;  %v6110_v50 = vadd.f32 %v6109_v7, %v12862_v3  ;;  %v6398_v57 = vpop.f32.mrf.mxu1  ;;  %v6551_v63 = vmul.f32 %v11345_v54, %v11345_v54  ;;  %v6481_v22 = vadd.f32 %v6480_v27, %v11345_v54 }
 0x4e7   :  { %v6111_v39 = vpop.f32.mrf.mxu0 }
 0x4e8   :  { %v11354_v8 = vadd.f32 %v6398_v57, %v6110_v50  ;;  %v6400_v15 = vpop.f32.mrf.mxu1  ;;  %v6614_v41 = vadd.f32 %v6613_v9, %v6551_v63 }
 0x4e9   :  { %v6114_v12 = vpop.f32.mrf.mxu0 }
 0x4ea   :  { %v6552_v2 = vmul.f32 %v11354_v8, %v11354_v8  ;;  %v6115_v3 = vadd.f32 %v6114_v12, %v12863_v0  ;;  %v6403_v7 = vpop.f32.mrf.mxu1  ;;  %v6482_v48 = vadd.f32 %v6481_v22, %v11354_v8 }
 0x4eb   :  { %v6116_v39 = vpop.f32.mrf.mxu0 }
 0x4ec   :  { %v11361_v4 = vadd.f32 %v6403_v7, %v6115_v3  ;;  %v6405_v43 = vpop.f32.mrf.mxu1  ;;  %v6615_v57 = vadd.f32 %v6614_v41, %v6552_v2  ;;  %v12865_v2 = vld [vmem:[#allocation18_spill] sm:$0xff] }
 0x4ed   :  { %v6117_v50 = vpop.f32.mrf.mxu0 }
 0x4ee   :  { %v6483_v15 = vadd.f32 %v6482_v48, %v11361_v4  ;;  %v6553_v21 = vmul.f32 %v11361_v4, %v11361_v4  ;;  %v6118_v27 = vadd.f32 %v6117_v50, %v12864_v53  ;;  %v6406_v54 = vpop.f32.mrf.mxu1 }
 0x4ef   :  { %v6119_v42 = vpop.f32.mrf.mxu0 }
 0x4f0   :  { %v6616_v0 = vadd.f32 %v6615_v57, %v6553_v21  ;;  %v11367_v12 = vadd.f32 %v6406_v54, %v6118_v27  ;;  %v6408_v63 = vpop.f32.mrf.mxu1 }
 0x4f1   :  { %v6122_v9 = vpop.f32.mrf.mxu0 }
 0x4f2   :  { %v6484_v22 = vadd.f32 %v6483_v15, %v11367_v12  ;;  %v6554_v43 = vmul.f32 %v11367_v12, %v11367_v12  ;;  %v6123_v3 = vadd.f32 %v6122_v9, %v12865_v2  ;;  %v6411_v7 = vpop.f32.mrf.mxu1 }
 0x4f3   :  { %v6124_v39 = vpop.f32.mrf.mxu0 }
 0x4f4   :  { %v6617_v41 = vadd.f32 %v6616_v0, %v6554_v43  ;;  %v11373_v48 = vadd.f32 %v6411_v7, %v6123_v3  ;;  %v6413_v50 = vpop.f32.mrf.mxu1 }
 0x4f5   :  { %v6125_v53 = vpop.f32.mrf.mxu0 }
 0x4f6   :  { %12866 = vst [vmem:[#allocation10_spill] sm:$0xff] %v11373_v48  ;;  %v6485_v42 = vadd.f32 %v6484_v22, %v11373_v48  ;;  %v6555_v54 = vmul.f32 %v11373_v48, %v11373_v48  ;;  %v6126_v57 = vadd.f32 %v6125_v53, %v10920_v30  ;;  %v6414_v15 = vpop.f32.mrf.mxu1 }
 0x4f7   :  { %v6127_v21 = vpop.f32.mrf.mxu0 }
 0x4f8   :  { %v6618_v27 = vadd.f32 %v6617_v41, %v6555_v54  ;;  %v11379_v63 = vadd.f32 %v6414_v15, %v6126_v57  ;;  %v6416_v9 = vpop.f32.mrf.mxu1 }
 0x4f9   :  { %v6130_v2 = vpop.f32.mrf.mxu0 }
 0x4fa   :  { %12867 = vst [vmem:[#allocation11_spill] sm:$0xff] %v11379_v63  ;;  %v6486_v0 = vadd.f32 %v6485_v42, %v11379_v63  ;;  %v6556_v43 = vmul.f32 %v11379_v63, %v11379_v63  ;;  %v6131_v3 = vadd.f32 %v6130_v2, %v10929_v47  ;;  %v6419_v22 = vpop.f32.mrf.mxu1 }
 0x4fb   :  { %v6132_v7 = vpop.f32.mrf.mxu0 }
 0x4fc   :  { %v6619_v39 = vadd.f32 %v6618_v27, %v6556_v43  ;;  %v11385_v50 = vadd.f32 %v6419_v22, %v6131_v3  ;;  %v6421_v30 = vpop.f32.mrf.mxu1 }
 0x4fd   :  { %v6133_v53 = vpop.f32.mrf.mxu0 }
 0x4fe   :  { %12868 = vst [vmem:[#allocation12_spill] sm:$0xff] %v11385_v50  ;;  %v6487_v41 = vadd.f32 %v6486_v0, %v11385_v50  ;;  %v6557_v54 = vmul.f32 %v11385_v50, %v11385_v50  ;;  %v6134_v57 = vadd.f32 %v6133_v53, %v10938_v25  ;;  %v6422_v42 = vpop.f32.mrf.mxu1 }
 0x4ff   :  { %v6135_v15 = vpop.f32.mrf.mxu0 }
 0x500   :  { %v6620_v21 = vadd.f32 %v6619_v39, %v6557_v54  ;;  %v11391_v9 = vadd.f32 %v6422_v42, %v6134_v57  ;;  %v6424_v47 = vpop.f32.mrf.mxu1 }
 0x502   :  { %12869 = vst [vmem:[#allocation13_spill] sm:$0xff] %v11391_v9  ;;  %v6488_v2 = vadd.f32 %v6487_v41, %v11391_v9  ;;  %v6558_v27 = vmul.f32 %v11391_v9, %v11391_v9  ;;  %v6641_v9 = vlaneseq }
 0x504   :  { %v6489_v43 = vrot.slane %v6488_v2, 4  ;;  %v6621_v3 = vadd.f32 %v6620_v21, %v6558_v27  ;;  %v11396_v21 = vshrl.u32 %v6641_v9, 7 }
 0x506   :  { %v6490_v22 = vadd.f32 %v6489_v43, %v6488_v2  ;;  %v6622_v0 = vrot.slane %v6621_v3, 4  ;;  %v6633_v2 = vld [vmem:[%s12652_s2] sm:$0x1]  ;;  %v12680_v27 = vsub.s32 0, %v11396_v21 }
 0x507   :  { %v11405_v43 = vld [vmem:[%s12653_s3] sm:$0x1] }
 0x508   :  { %v6491_v7 = vrot.slane %v6490_v22, 2  ;;  %v6623_v30 = vadd.f32 %v6622_v0, %v6621_v3 }
 0x50a   :  { %v6492_v33 = vadd.f32 %v6491_v7, %v6490_v22  ;;  %v6624_v50 = vrot.slane %v6623_v30, 2 }
 0x50c   :  { %v6493_v25 = vrot.slane %v6492_v33, 1  ;;  %v6625_v53 = vadd.f32 %v6624_v50, %v6623_v30 }
 0x50e   :  { %v6494_v15 = vadd.f32 %v6493_v25, %v6492_v33  ;;  %v6626_v39 = vrot.slane %v6625_v53, 1  ;;  %v12870_v25 = vld [vmem:[#allocation19_spill] sm:$0xff] }
 0x510   :  { %v6627_v54 = vadd.f32 %v6626_v39, %v6625_v53  ;;  %v6628_v57 = vmul.f32 0.001953125, %v6494_v15  ;;  %v12871_v53 = vld [vmem:[#allocation20_spill] sm:$0xff]  ;;  %v12872_v15 = vld [vmem:[#allocation21_spill] sm:$0xff] }
 0x512   :  { %v6629_v42 = vmul.f32 0.001953125, %v6627_v54  ;;  %v6630_v47 = vmul.f32 %v6628_v57, %v6628_v57  ;;  %v12873_v54 = vld [vmem:[#allocation27_spill] sm:$0xff] }
 0x514   :  { %v6631_v41 = vsub.f32 %v6629_v42, %v6630_v47  ;;  %v12874_v42 = vld [vmem:[#allocation28_spill] sm:$0xff] }
 0x516   :  { %v6632_v63 = vmax.f32 %v6631_v41, 0.0  ;;  %v12875_v41 = vld [vmem:[#allocation29_spill] sm:$0xff] }
 0x518   :  { %v6634_v48 = vadd.f32 1e-05, %v6632_v63 }
 0x51a   :  { %8384 = vrsqrt.f32 %v6634_v48 }
 0x527   :  { %v8385_v50 = vpop.eup %8384 }
 0x528   :  { %v6636_v33 = vmul.f32 %v8385_v50, %v6633_v2  ;;  %v12876_v50 = vld [vmem:[#allocation22_spill] sm:$0xff] }
 0x52a   :  { %v11407_v3 = vmul.f32 %v6636_v33, %v6628_v57  ;;  %v11411_v48 = vrot.slane %v6636_v33, %v12680_v27  ;;  %v12892_v27 = vld [vmem:[#allocation11_spill] sm:$0xff] }
 0x52c   :  { %v6639_v63 = vsub.f32 %v11405_v43, %v11407_v3  ;;  %v11417_v9 = vmul.f32 %v11411_v48, %v10947_v17  ;;  %v11421_v22 = vmul.f32 %v11411_v48, %v10956_v5  ;;  %v11425_v0 = vmul.f32 %v11411_v48, %v10965_v36  ;;  %v12877_v43 = vld [vmem:[#allocation23_spill] sm:$0xff] }
 0x52d   :  { %v11429_v7 = vmul.f32 %v11411_v48, %v10974_v55  ;;  %v11433_v30 = vmul.f32 %v11411_v48, %v10983_v28  ;;  %v11437_v17 = vmul.f32 %v11411_v48, %v10992_v6  ;;  %v11441_v5 = vmul.f32 %v11411_v48, %v11001_v35 }
 0x52e   :  { %v11445_v36 = vmul.f32 %v11411_v48, %v11010_v11  ;;  %v11449_v55 = vmul.f32 %v11411_v48, %v11019_v62  ;;  %v11453_v28 = vmul.f32 %v11411_v48, %v11028_v37  ;;  %v11457_v6 = vmul.f32 %v11411_v48, %v11037_v40 }
 0x52f   :  { %v11461_v35 = vmul.f32 %v11411_v48, %v11046_v31  ;;  %v11465_v11 = vmul.f32 %v11411_v48, %v11049_v23  ;;  %v11469_v62 = vmul.f32 %v11411_v48, %v11052_v29  ;;  %v11473_v37 = vmul.f32 %v11411_v48, %v11055_v24 }
 0x530   :  { %v11477_v40 = vmul.f32 %v11411_v48, %v11058_v18  ;;  %v11481_v31 = vmul.f32 %v11411_v48, %v11061_v10  ;;  %v11485_v23 = vmul.f32 %v11411_v48, %v11064_v46  ;;  %v11489_v29 = vmul.f32 %v11411_v48, %v11067_v20 }
 0x531   :  { %v11493_v24 = vmul.f32 %v11411_v48, %v11070_v32  ;;  %v11497_v18 = vmul.f32 %v11411_v48, %v11073_v44  ;;  %v11501_v10 = vmul.f32 %v11411_v48, %v11076_v49  ;;  %v11505_v46 = vmul.f32 %v11411_v48, %v11079_v1 }
 0x532   :  { %v11509_v20 = vmul.f32 %v11411_v48, %v11082_v16  ;;  %v11513_v32 = vmul.f32 %v11411_v48, %v11085_v56  ;;  %v11517_v44 = vmul.f32 %v11411_v48, %v11088_v60  ;;  %v11521_v49 = vmul.f32 %v11411_v48, %v12870_v25  ;;  %v12878_v25 = vld [vmem:[#allocation24_spill] sm:$0xff] }
 0x533   :  { %v11525_v1 = vmul.f32 %v11411_v48, %v11094_v38  ;;  %v11529_v16 = vmul.f32 %v11411_v48, %v12871_v53  ;;  %v11533_v56 = vmul.f32 %v11411_v48, %v11100_v59  ;;  %v11537_v60 = vmul.f32 %v11411_v48, %v12872_v15  ;;  %v12879_v15 = vld [vmem:[#allocation25_spill] sm:$0xff] }
 0x534   :  { %v11541_v39 = vmul.f32 %v11411_v48, %v11120_v58  ;;  %v11545_v38 = vmul.f32 %v11411_v48, %v12873_v54  ;;  %v11549_v57 = vmul.f32 %v11411_v48, %v11138_v14  ;;  %v11553_v59 = vmul.f32 %v11411_v48, %v12874_v42  ;;  %v12880_v42 = vld [vmem:[#allocation26_spill] sm:$0xff] }
 0x535   :  { %v11557_v47 = vmul.f32 %v11411_v48, %v11156_v51  ;;  %v11561_v58 = vmul.f32 %v11411_v48, %v12875_v41  ;;  %v11565_v2 = vmul.f32 %v11411_v48, %v11174_v61  ;;  %v11569_v14 = vmul.f32 %v11411_v48, %v12876_v50  ;;  %v12882_v50 = vld [vmem:[#allocation2_spill] sm:$0xff] }
 0x536   :  { %v11573_v33 = vmul.f32 %v11411_v48, %v11192_v26  ;;  %v11577_v51 = vmul.f32 %v11411_v48, %v12877_v43  ;;  %v11581_v3 = vmul.f32 %v11411_v48, %v11210_v45  ;;  %v11585_v61 = vmul.f32 %v11411_v48, %v12878_v25  ;;  %v12885_v25 = vld [vmem:[#allocation3_spill] sm:$0xff] }
 0x537   :  { %v11589_v53 = vmul.f32 %v11411_v48, %v11228_v19  ;;  %v11593_v26 = vmul.f32 %v11411_v48, %v12879_v15  ;;  %v11597_v54 = vmul.f32 %v11411_v48, %v11246_v52  ;;  %v11601_v45 = vmul.f32 %v11411_v48, %v12880_v42 }
 0x538   :  { %v11605_v41 = vmul.f32 %v11411_v48, %v11264_v13  ;;  %v11609_v19 = vmul.f32 %v11411_v48, %v12882_v50  ;;  %v11613_v43 = vmul.f32 %v11411_v48, %v11282_v34  ;;  %v11617_v52 = vmul.f32 %v11411_v48, %v12885_v25  ;;  %v12890_v50 = vld [vmem:[#allocation10_spill] sm:$0xff] }
 0x539   :  { %v11621_v15 = vmul.f32 %v11411_v48, %v11354_v8  ;;  %v11625_v13 = vmul.f32 %v11411_v48, %v11361_v4  ;;  %v11629_v42 = vmul.f32 %v11411_v48, %v11367_v12  ;;  %v11633_v34 = vmul.f32 %v11411_v48, %v12890_v50  ;;  %v12898_v12 = vld [vmem:[#allocation13_spill] sm:$0xff] }
 0x53a   :  { %12881 = vst [vmem:[#allocation14_spill] sm:$0xff] %v11605_v41  ;;  %12883 = vst [vmem:[#allocation15_spill] sm:$0xff] %v11609_v19  ;;  %v11637_v25 = vmul.f32 %v11411_v48, %v12892_v27  ;;  %v12899_v50 = vsub.s32 0, %v11396_v21  ;;  %v12900_v27 = vld [vmem:[#allocation6_spill] sm:$0xff]  ;;  %v12901_v19 = vld [vmem:[#allocation7_spill] sm:$0xff] }
 0x53b   :  { %12884 = vst [vmem:[#allocation16_spill] sm:$0xff] %v11613_v43  ;;  %12886 = vst [vmem:[#allocation17_spill] sm:$0xff] %v11617_v52  ;;  %v12894_v52 = vld [vmem:[#allocation12_spill] sm:$0xff]  ;;  %v12903_v41 = vld [vmem:[#allocation9_spill] sm:$0xff] }
 0x53c   :  { %12887 = vst [vmem:[#allocation18_spill] sm:$0xff] %v11621_v15  ;;  %12888 = vst [vmem:[#allocation19_spill] sm:$0xff] %v11625_v13  ;;  %v11641_v8 = vmul.f32 %v11411_v48, %v12894_v52  ;;  %v12896_v15 = vld [vmem:[#allocation4_spill] sm:$0xff]  ;;  %v12897_v13 = vld [vmem:[#allocation5_spill] sm:$0xff]  ;;  %v6700_v52 = vmul.f32 %v11411_v48, %v12901_v19 }
 0x53d   :  { %12889 = vst [vmem:[#allocation20_spill] sm:$0xff] %v11629_v42  ;;  %12891 = vst [vmem:[#allocation21_spill] sm:$0xff] %v11633_v34  ;;  %v6697_v4 = vmul.f32 %v11411_v48, %v12896_v15  ;;  %v6698_v43 = vmul.f32 %v11411_v48, %v12897_v13  ;;  %v11649_v42 = vmul.f32 %v11411_v48, %v12898_v12 }
 0x53e   :  { %12893 = vst [vmem:[#allocation27_spill] sm:$0xff] %v11637_v25  ;;  %12895 = vst [vmem:[#allocation28_spill] sm:$0xff] %v11641_v8  ;;  %v11653_v34 = vrot.slane %v6639_v63, %v12899_v50  ;;  %v6699_v25 = vmul.f32 %v11411_v48, %v12900_v27  ;;  %v12902_v8 = vld [vmem:[#allocation8_spill] sm:$0xff]  ;;  %v6702_v13 = vmul.f32 %v11411_v48, %v12903_v41 }
 0x53f   :  { %v6701_v15 = vmul.f32 %v11411_v48, %v12902_v8 }
 0x540   :  { %v11665_v12 = vadd.f32 %v11653_v34, %v11417_v9  ;;  %v11669_v21 = vadd.f32 %v11653_v34, %v11421_v22  ;;  %v11673_v63 = vadd.f32 %v11653_v34, %v11425_v0  ;;  %v11677_v19 = vadd.f32 %v11653_v34, %v11429_v7 }
 0x541   :  { %v11681_v8 = vadd.f32 %v11653_v34, %v11433_v30  ;;  %v11685_v48 = vadd.f32 %v11653_v34, %v11437_v17  ;;  %v11689_v9 = vadd.f32 %v11653_v34, %v11441_v5  ;;  %v11693_v22 = vadd.f32 %v11653_v34, %v11445_v36  ;;  %v12906_v41 = vld [vmem:[#allocation15_spill] sm:$0xff] }
 0x542   :  { %v11697_v0 = vadd.f32 %v11653_v34, %v11449_v55  ;;  %v11701_v7 = vadd.f32 %v11653_v34, %v11453_v28  ;;  %v11705_v30 = vadd.f32 %v11653_v34, %v11457_v6  ;;  %v11709_v17 = vadd.f32 %v11653_v34, %v11461_v35  ;;  %v12908_v50 = vld [vmem:[#allocation16_spill] sm:$0xff]  ;;  %v12910_v27 = vld [vmem:[#allocation17_spill] sm:$0xff] }
 0x543   :  { %v11713_v5 = vadd.f32 %v11653_v34, %v11465_v11  ;;  %v11717_v36 = vadd.f32 %v11653_v34, %v11469_v62  ;;  %v11721_v55 = vadd.f32 %v11653_v34, %v11473_v37  ;;  %v11725_v28 = vadd.f32 %v11653_v34, %v11477_v40 }
 0x544   :  { %v11729_v6 = vadd.f32 %v11653_v34, %v11481_v31  ;;  %v11733_v35 = vadd.f32 %v11653_v34, %v11485_v23  ;;  %v11737_v11 = vadd.f32 %v11653_v34, %v11489_v29  ;;  %v11741_v62 = vadd.f32 %v11653_v34, %v11493_v24 }
 0x545   :  { %v11745_v37 = vadd.f32 %v11653_v34, %v11497_v18  ;;  %v11749_v40 = vadd.f32 %v11653_v34, %v11501_v10  ;;  %v11753_v31 = vadd.f32 %v11653_v34, %v11505_v46  ;;  %v11757_v23 = vadd.f32 %v11653_v34, %v11509_v20 }
 0x546   :  { %v11761_v29 = vadd.f32 %v11653_v34, %v11513_v32  ;;  %v11765_v24 = vadd.f32 %v11653_v34, %v11517_v44  ;;  %v11769_v18 = vadd.f32 %v11653_v34, %v11521_v49  ;;  %v11773_v10 = vadd.f32 %v11653_v34, %v11525_v1 }
 0x547   :  { %v11777_v46 = vadd.f32 %v11653_v34, %v11529_v16  ;;  %v11781_v20 = vadd.f32 %v11653_v34, %v11533_v56  ;;  %v11785_v32 = vadd.f32 %v11653_v34, %v11537_v60  ;;  %v11789_v44 = vadd.f32 %v11653_v34, %v11541_v39 }
 0x548   :  { %v11793_v49 = vadd.f32 %v11653_v34, %v11545_v38  ;;  %v11797_v1 = vadd.f32 %v11653_v34, %v11549_v57  ;;  %v11801_v16 = vadd.f32 %v11653_v34, %v11553_v59  ;;  %v11805_v56 = vadd.f32 %v11653_v34, %v11557_v47 }
 0x549   :  { %v11809_v60 = vadd.f32 %v11653_v34, %v11561_v58  ;;  %v11813_v39 = vadd.f32 %v11653_v34, %v11565_v2  ;;  %v11817_v38 = vadd.f32 %v11653_v34, %v11569_v14  ;;  %v11821_v57 = vadd.f32 %v11653_v34, %v11573_v33 }
 0x54a   :  { %v11825_v59 = vadd.f32 %v11653_v34, %v11577_v51  ;;  %v11829_v47 = vadd.f32 %v11653_v34, %v11581_v3  ;;  %v11833_v58 = vadd.f32 %v11653_v34, %v11585_v61  ;;  %v11837_v2 = vadd.f32 %v11653_v34, %v11589_v53  ;;  %v12905_v3 = vld [vmem:[#allocation14_spill] sm:$0xff] }
 0x54b   :  { %v11841_v14 = vadd.f32 %v11653_v34, %v11593_v26  ;;  %v11845_v33 = vadd.f32 %v11653_v34, %v11597_v54  ;;  %v11849_v51 = vadd.f32 %v11653_v34, %v11601_v45  ;;  %v11853_v61 = vadd.f32 %v11653_v34, %v12905_v3 }
 0x54c   :  { %v11857_v53 = vadd.f32 %v11653_v34, %v12906_v41  ;;  %v11861_v26 = vadd.f32 %v11653_v34, %v12908_v50  ;;  %v11865_v54 = vadd.f32 %v11653_v34, %v12910_v27  ;;  %v11871_v45 = vadd.f32 %v11653_v34, %v6698_v43  ;;  %v12918_v27 = vld [vmem:[#allocation18_spill] sm:$0xff] }
 0x54d   :  { %12904 = vst [vmem:[#allocation29_spill] sm:$0xff] %v11845_v33  ;;  %v11868_v33 = vadd.f32 %v11653_v34, %v6697_v4  ;;  %v11874_v3 = vadd.f32 %v11653_v34, %v6699_v25  ;;  %v11877_v41 = vadd.f32 %v11653_v34, %v6700_v52  ;;  %v11883_v50 = vadd.f32 %v11653_v34, %v6702_v13  ;;  %v12920_v4 = vld [vmem:[#allocation19_spill] sm:$0xff]  ;;  %v12924_v52 = vld [vmem:[#allocation21_spill] sm:$0xff] }
 0x54e   :  { %12907 = vst [vmem:[#allocation22_spill] sm:$0xff] %v11857_v53  ;;  %12909 = vst [vmem:[#allocation23_spill] sm:$0xff] %v11861_v26  ;;  %v11880_v53 = vadd.f32 %v11653_v34, %v6701_v15  ;;  %v11891_v43 = vadd.f32 %v11653_v34, %v12920_v4  ;;  %v12926_v15 = vld [vmem:[#allocation27_spill] sm:$0xff]  ;;  %v11911_v4 = vadd.f32 %v11653_v34, %v11649_v42  ;;  %vm6780_vm0 = vcmp.gt.f32.partialorder %v11665_v12, 0.0 }
 0x54f   :  { %12911 = vst [vmem:[#allocation24_spill] sm:$0xff] %v11865_v54  ;;  %12912 = vst [vmem:[#allocation25_spill] sm:$0xff] %v11868_v33  ;;  %v11887_v54 = vadd.f32 %v11653_v34, %v12918_v27  ;;  %v11903_v13 = vadd.f32 %v11653_v34, %v12926_v15  ;;  %vm6781_vm1 = vcmp.gt.f32.partialorder %v11669_v21, 0.0  ;;  %vm6782_vm2 = vcmp.gt.f32.partialorder %v11673_v63, 0.0 }
 0x550   :  { %12913 = vst [vmem:[#allocation26_spill] sm:$0xff] %v11871_v45  ;;  %12914 = vst [vmem:[#allocation2_spill] sm:$0xff] %v11874_v3  ;;  %v12922_v45 = vld [vmem:[#allocation20_spill] sm:$0xff]  ;;  %vm6783_vm3 = vcmp.gt.f32.partialorder %v11677_v19, 0.0  ;;  %vm6784_vm4 = vcmp.gt.f32.partialorder %v11681_v8, 0.0  ;;  %vm6785_vm5 = vcmp.gt.f32.partialorder %v11685_v48, 0.0 }
 0x551   :  { %12915 = vst [vmem:[#allocation3_spill] sm:$0xff] %v11877_v41  ;;  %12916 = vst [vmem:[#allocation10_spill] sm:$0xff] %v11880_v53  ;;  %v11895_v25 = vadd.f32 %v11653_v34, %v12922_v45  ;;  %v11899_v41 = vadd.f32 %v11653_v34, %v12924_v52  ;;  %vm6786_vm6 = vcmp.gt.f32.partialorder %v11689_v9, 0.0  ;;  %vm6787_vm7 = vcmp.gt.f32.partialorder %v11693_v22, 0.0 }
 0x552   :  { %12917 = vst [vmem:[#allocation11_spill] sm:$0xff] %v11883_v50  ;;  %12919 = vst [vmem:[#allocation12_spill] sm:$0xff] %v11887_v54  ;;  %v12928_v50 = vld [vmem:[#allocation28_spill] sm:$0xff]  ;;  %vm6788_vm8 = vcmp.gt.f32.partialorder %v11697_v0, 0.0  ;;  %vm6789_vm9 = vcmp.gt.f32.partialorder %v11701_v7, 0.0  ;;  %vm6790_vm10 = vcmp.gt.f32.partialorder %v11705_v30, 0.0 }
 0x553   :  { %12921 = vst [vmem:[#allocation4_spill] sm:$0xff] %v11891_v43  ;;  %12923 = vst [vmem:[#allocation5_spill] sm:$0xff] %v11895_v25  ;;  %v11907_v27 = vadd.f32 %v11653_v34, %v12928_v50  ;;  %v6844_v42 = vmul.f32 0.2, %v11665_v12  ;;  %v6845_v34 = vmul.f32 0.2, %v11669_v21 }
 0x554   :  { %12925 = vst [vmem:[#allocation13_spill] sm:$0xff] %v11899_v41  ;;  %12927 = vst [vmem:[#allocation6_spill] sm:$0xff] %v11903_v13  ;;  %v6846_v45 = vmul.f32 0.2, %v11673_v63  ;;  %v6847_v50 = vmul.f32 0.2, %v11677_v19 }
 0x555   :  { %12929 = vst [vmem:[#allocation7_spill] sm:$0xff] %v11907_v27  ;;  %12930 = vst [vmem:[#allocation8_spill] sm:$0xff] %v11911_v4  ;;  %v6848_v52 = vmul.f32 0.2, %v11681_v8  ;;  %v6849_v15 = vmul.f32 0.2, %v11685_v48  ;;  %v11937_v41 = vsel %vm6780_vm0, %v11665_v12, %v6844_v42  ;;  %v11948_v53 = vsel %vm6781_vm1, %v11669_v21, %v6845_v34 }
 0x556   :  { %vm6791_vm11 = vcmp.gt.f32.partialorder %v11709_v17, 0.0  ;;  %v6850_v4 = vmul.f32 0.2, %v11689_v9  ;;  %v6851_v27 = vmul.f32 0.2, %v11693_v22  ;;  %12931 = vst [vmem:[#allocation9_spill] sm:$0xff] %v11937_v41  ;;  %v11963_v41 = vsel %vm6782_vm2, %v11673_v63, %v6846_v45 }
 0x557   :  { %v6852_v13 = vmul.f32 0.2, %v11697_v0  ;;  %vm6792_vm12 = vcmp.gt.f32.partialorder %v11713_v5, 0.0  ;;  %v6853_v25 = vmul.f32 0.2, %v11701_v7  ;;  %12932 = vst [vmem:[#allocation14_spill] sm:$0xff] %v11948_v53  ;;  %v11978_v33 = vsel %vm6783_vm3, %v11677_v19, %v6847_v50 }
 0x558   :  { %v6854_v43 = vmul.f32 0.2, %v11705_v30  ;;  %v11943_v54 = vmul.f32 0.2, %v11709_v17  ;;  %vm6793_vm13 = vcmp.gt.f32.partialorder %v11717_v36, 0.0  ;;  %12933 = vst [vmem:[#allocation15_spill] sm:$0xff] %v11963_v41 }
 0x559   :  { %v11952_v3 = vmul.f32 0.2, %v11713_v5  ;;  %v11955_v12 = vmul.f32 0.2, %v11717_v36  ;;  %v11958_v42 = vmul.f32 0.2, %v11721_v55 }
 0x55a   :  { %vm6794_vm14 = vcmp.gt.f32.partialorder %v11721_v55, 0.0  ;;  %v11967_v21 = vmul.f32 0.2, %v11725_v28  ;;  %v11970_v34 = vmul.f32 0.2, %v11729_v6  ;;  %12935 = vst [vmem:[#allocation17_spill] sm:$0xff] %v11978_v33 }
 0x55b   :  { %v11973_v53 = vmul.f32 0.2, %v11733_v35  ;;  %vm6795_vm15 = vcmp.gt.f32.partialorder %v11725_v28, 0.0  ;;  %v11982_v63 = vmul.f32 0.2, %v11737_v11  ;;  %vm6796_vm0 = vcmp.gt.f32.partialorder %v11729_v6, 0.0 }
 0x55c   :  { %v11985_v45 = vmul.f32 0.2, %v11741_v62  ;;  %v11988_v41 = vmul.f32 0.2, %v11745_v37  ;;  %v11997_v19 = vmul.f32 0.2, %v11749_v40 }
 0x55d   :  { %12934 = vst [vmem:[#allocation16_spill] sm:$0xff] %v11973_v53  ;;  %v11993_v53 = vsel %vm6784_vm4, %v11681_v8, %v6848_v52  ;;  %v12000_v50 = vmul.f32 0.2, %v11753_v31  ;;  %v12003_v33 = vmul.f32 0.2, %v11757_v23  ;;  %vm6797_vm1 = vcmp.gt.f32.partialorder %v11733_v35, 0.0 }
 0x55e   :  { %12936 = vst [vmem:[#allocation18_spill] sm:$0xff] %v11988_v41  ;;  %12937 = vst [vmem:[#allocation19_spill] sm:$0xff] %v11993_v53  ;;  %v12008_v41 = vsel %vm6785_vm5, %v11685_v48, %v6849_v15  ;;  %v12012_v8 = vmul.f32 0.2, %v11761_v29  ;;  %v12015_v52 = vmul.f32 0.2, %v11765_v24 }
 0x55f   :  { %12938 = vst [vmem:[#allocation20_spill] sm:$0xff] %v12003_v33  ;;  %12939 = vst [vmem:[#allocation21_spill] sm:$0xff] %v12008_v41  ;;  %v12018_v53 = vmul.f32 0.2, %v11769_v18  ;;  %v12023_v33 = vsel %vm6786_vm6, %v11689_v9, %v6850_v4  ;;  %vm6798_vm2 = vcmp.gt.f32.partialorder %v11737_v11, 0.0  ;;  %vm6799_vm3 = vcmp.gt.f32.partialorder %v11741_v62, 0.0 }
 0x560   :  { %12941 = vst [vmem:[#allocation28_spill] sm:$0xff] %v12023_v33  ;;  %v12027_v48 = vmul.f32 0.2, %v11773_v10  ;;  %v12030_v15 = vmul.f32 0.2, %v11777_v46  ;;  %vm6802_vm6 = vcmp.gt.f32.partialorder %v11753_v31, 0.0 }
 0x561   :  { %12940 = vst [vmem:[#allocation27_spill] sm:$0xff] %v12018_v53  ;;  %v12033_v41 = vmul.f32 0.2, %v11781_v20  ;;  %v12038_v53 = vsel %vm6787_vm7, %v11693_v22, %v6851_v27  ;;  %v12044_v9 = vmul.f32 0.2, %v11785_v32  ;;  %v12055_v22 = vsel %vm6788_vm8, %v11697_v0, %v6852_v13 }
 0x562   :  { %12942 = vst [vmem:[#allocation30_spill] sm:$0xff] %v12038_v53  ;;  %v12047_v4 = vmul.f32 0.2, %v11789_v44  ;;  %v12050_v33 = vmul.f32 0.2, %v11793_v49  ;;  %12944 = vst [vmem:[#allocation32_spill] sm:$0xff] %v12055_v22  ;;  %v12073_v0 = vsel %vm6789_vm9, %v11701_v7, %v6853_v25  ;;  %v12091_v7 = vsel %vm6790_vm10, %v11705_v30, %v6854_v43 }
 0x563   :  { %v12062_v27 = vmul.f32 0.2, %v11797_v1  ;;  %v12065_v53 = vmul.f32 0.2, %v11801_v16  ;;  %12946 = vst [vmem:[#allocation34_spill] sm:$0xff] %v12073_v0  ;;  %vm6806_vm8 = vcmp.gt.f32.partialorder %v11769_v18, 0.0  ;;  %v12110_v30 = vsel %vm6791_vm11, %v11709_v17, %v11943_v54 }
 0x564   :  { %12943 = vst [vmem:[#allocation31_spill] sm:$0xff] %v12050_v33  ;;  %v12068_v33 = vmul.f32 0.2, %v11805_v56  ;;  %v12080_v13 = vmul.f32 0.2, %v11809_v60  ;;  %12948 = vst [vmem:[#allocation36_spill] sm:$0xff] %v12091_v7  ;;  %v12129_v17 = vsel %vm6792_vm12, %v11713_v5, %v11952_v3  ;;  %v12148_v5 = vsel %vm6793_vm13, %v11717_v36, %v11955_v12 }
 0x565   :  { %v12083_v22 = vmul.f32 0.2, %v11813_v39  ;;  %vm6810_vm9 = vcmp.gt.f32.partialorder %v11785_v32, 0.0  ;;  %v12098_v25 = vmul.f32 0.2, %v11821_v57  ;;  %12950 = vst [vmem:[#allocation38_spill] sm:$0xff] %v12110_v30  ;;  %v12167_v36 = vsel %vm6794_vm14, %v11721_v55, %v11958_v42 }
 0x566   :  { %12945 = vst [vmem:[#allocation33_spill] sm:$0xff] %v12068_v33  ;;  %v12086_v33 = vmul.f32 0.2, %v11817_v38  ;;  %v12101_v0 = vmul.f32 0.2, %v11825_v59  ;;  %vm6814_vm10 = vcmp.gt.f32.partialorder %v11801_v16, 0.0  ;;  %v12186_v55 = vsel %vm6795_vm15, %v11725_v28, %v11967_v21 }
 0x567   :  { %v12117_v43 = vmul.f32 0.2, %v11833_v58  ;;  %v12120_v7 = vmul.f32 0.2, %v11837_v2  ;;  %12953 = vst [vmem:[#allocation41_spill] sm:$0xff] %v12129_v17  ;;  %vm6818_vm11 = vcmp.gt.f32.partialorder %v11817_v38, 0.0  ;;  %v12199_v28 = vsel %vm6796_vm0, %v11729_v6, %v11970_v34 }
 0x568   :  { %12947 = vst [vmem:[#allocation35_spill] sm:$0xff] %v12086_v33  ;;  %v12104_v33 = vmul.f32 0.2, %v11829_v47  ;;  %v12954_v54 = vld [vmem:[#allocation29_spill] sm:$0xff]  ;;  %12958 = vst [vmem:[#allocation45_spill] sm:$0xff] %v12148_v5  ;;  %vm6822_vm12 = vcmp.gt.f32.partialorder %v11833_v58, 0.0 }
 0x569   :  { %12951 = vst [vmem:[#allocation39_spill] sm:$0xff] %v12120_v7  ;;  %v12136_v30 = vmul.f32 0.2, %v12954_v54  ;;  %v12139_v7 = vmul.f32 0.2, %v11849_v51  ;;  %v12959_v3 = vld [vmem:[#allocation22_spill] sm:$0xff] }
 0x56a   :  { %12949 = vst [vmem:[#allocation37_spill] sm:$0xff] %v12104_v33  ;;  %v12123_v33 = vmul.f32 0.2, %v11841_v14  ;;  %v12155_v17 = vmul.f32 0.2, %v12959_v3  ;;  %12964 = vst [vmem:[#allocation49_spill] sm:$0xff] %v12167_v36 }
 0x56b   :  { %12955 = vst [vmem:[#allocation42_spill] sm:$0xff] %v12136_v30  ;;  %12956 = vst [vmem:[#allocation43_spill] sm:$0xff] %v12139_v7  ;;  %v12158_v7 = vmul.f32 0.2, %v11861_v26  ;;  %vm6826_vm13 = vcmp.gt.f32.partialorder %v11849_v51, 0.0  ;;  %v12965_v12 = vld [vmem:[#allocation25_spill] sm:$0xff] }
 0x56c   :  { %12952 = vst [vmem:[#allocation40_spill] sm:$0xff] %v12123_v33  ;;  %v12142_v33 = vmul.f32 0.2, %v11853_v61  ;;  %12960 = vst [vmem:[#allocation46_spill] sm:$0xff] %v12155_v17  ;;  %v12174_v5 = vmul.f32 0.2, %v12965_v12 }
 0x56d   :  { %12961 = vst [vmem:[#allocation47_spill] sm:$0xff] %v12158_v7  ;;  %v12967_v7 = vld [vmem:[#allocation26_spill] sm:$0xff]  ;;  %12971 = vst [vmem:[#allocation53_spill] sm:$0xff] %v12186_v55  ;;  %v12972_v42 = vld [vmem:[#allocation3_spill] sm:$0xff]  ;;  %vm12986_vm7 = vcmp.gt.f32.partialorder %v11745_v37, 0.0 }
 0x56e   :  { %12957 = vst [vmem:[#allocation44_spill] sm:$0xff] %v12142_v33  ;;  %v12962_v33 = vld [vmem:[#allocation24_spill] sm:$0xff]  ;;  %12966 = vst [vmem:[#allocation50_spill] sm:$0xff] %v12174_v5  ;;  %v12177_v17 = vmul.f32 0.2, %v12967_v7  ;;  %v12974_v26 = vld [vmem:[#allocation11_spill] sm:$0xff] }
 0x56f   :  { %v12161_v30 = vmul.f32 0.2, %v12962_v33  ;;  %vm6830_vm14 = vcmp.gt.f32.partialorder %v12962_v33, 0.0  ;;  %v6898_v36 = vmul.f32 0.2, %v12972_v42  ;;  %12975 = vst [vmem:[#allocation54_spill] sm:$0xff] %v12199_v28 }
 0x570   :  { %12968 = vst [vmem:[#allocation51_spill] sm:$0xff] %v12177_v17  ;;  %v12973_v17 = vld [vmem:[#allocation10_spill] sm:$0xff]  ;;  %vm6834_vm15 = vcmp.gt.f32.partialorder %v12972_v42, 0.0  ;;  %v12976_v21 = vld [vmem:[#allocation12_spill] sm:$0xff]  ;;  %v12978_v12 = vld [vmem:[#allocation5_spill] sm:$0xff] }
 0x571   :  { %12963 = vst [vmem:[#allocation48_spill] sm:$0xff] %v12161_v30  ;;  %v12969_v30 = vld [vmem:[#allocation2_spill] sm:$0xff]  ;;  %v6899_v5 = vmul.f32 0.2, %v12973_v17  ;;  %v6901_v55 = vmul.f32 0.2, %v12976_v21 }
 0x572   :  { %v12180_v54 = vmul.f32 0.2, %v12969_v30  ;;  %v12977_v30 = vld [vmem:[#allocation4_spill] sm:$0xff]  ;;  %v6903_v33 = vmul.f32 0.2, %v12978_v12  ;;  %v12981_v34 = vld [vmem:[#allocation13_spill] sm:$0xff] }
 0x573   :  { %v6902_v7 = vmul.f32 0.2, %v12977_v30  ;;  %v12979_v3 = vld [vmem:[#allocation16_spill] sm:$0xff]  ;;  %vm6838_vm0 = vcmp.gt.f32.partialorder %v12977_v30, 0.0  ;;  %vm6840_vm4 = vcmp.gt.f32.partialorder %v12981_v34, 0.0  ;;  %v12982_v28 = vld [vmem:[#allocation6_spill] sm:$0xff] }
 0x574   :  { %12970 = vst [vmem:[#allocation52_spill] sm:$0xff] %v12180_v54  ;;  %v6900_v54 = vmul.f32 0.2, %v12974_v26  ;;  %v12212_v6 = vsel %vm6797_vm1, %v11733_v35, %v12979_v3  ;;  %v6904_v21 = vmul.f32 0.2, %v12981_v34  ;;  %v12983_v17 = vld [vmem:[#allocation7_spill] sm:$0xff]  ;;  %v12225_v35 = vsel %vm6798_vm2, %v11737_v11, %v11982_v63 }
 0x575   :  { %12980 = vst [vmem:[#allocation4_spill] sm:$0xff] %v12212_v6  ;;  %v6905_v26 = vmul.f32 0.2, %v12982_v28  ;;  %v6906_v42 = vmul.f32 0.2, %v12983_v17  ;;  %vm6842_vm1 = vcmp.gt.f32.partialorder %v12983_v17, 0.0  ;;  %v12234_v34 = vsel %vm6799_vm3, %v11741_v62, %v11985_v45 }
 0x576   :  { %v12984_v3 = vld [vmem:[#allocation8_spill] sm:$0xff]  ;;  %v12985_v28 = vld [vmem:[#allocation18_spill] sm:$0xff]  ;;  %vm12987_vm2 = vcmp.gt.f32.partialorder %v11749_v40, 0.0  ;;  %v12252_v63 = vsel %vm6802_vm6, %v11753_v31, %v12000_v50  ;;  %vm12989_vm3 = vcmp.gt.f32.partialorder %v11757_v23, 0.0  ;;  %v12992_v31 = vld [vmem:[#allocation27_spill] sm:$0xff]  ;;  %vm12993_vm6 = vcmp.gt.f32.partialorder %v11773_v10, 0.0 }
 0x577   :  { %vm6843_vm5 = vcmp.gt.f32.partialorder %v12984_v3, 0.0  ;;  %v6907_v6 = vmul.f32 0.2, %v12984_v3  ;;  %v12240_v12 = vsel %vm12986_vm7, %v11745_v37, %v12985_v28  ;;  %v12246_v11 = vsel %vm12987_vm2, %v11749_v40, %v11997_v19  ;;  %v12988_v62 = vld [vmem:[#allocation20_spill] sm:$0xff] }
 0x578   :  { %v12258_v45 = vsel %vm12989_vm3, %v11757_v23, %v12988_v62  ;;  %vm12990_vm7 = vcmp.gt.f32.partialorder %v11761_v29, 0.0  ;;  %vm12991_vm2 = vcmp.gt.f32.partialorder %v11765_v24, 0.0  ;;  %v12276_v19 = vsel %vm6806_vm8, %v11769_v18, %v12992_v31  ;;  %v13026_v28 = vld [vmem:[#allocation24_spill] sm:$0xff]  ;;  %v13028_v31 = vld [vmem:[#allocation25_spill] sm:$0xff] }
 0x579   :  { %v12264_v37 = vsel %vm12990_vm7, %v11761_v29, %v12012_v8  ;;  %v12270_v40 = vsel %vm12991_vm2, %v11765_v24, %v12015_v52  ;;  %v12282_v23 = vsel %vm12993_vm6, %v11773_v10, %v12027_v48  ;;  %vm12994_vm3 = vcmp.gt.f32.partialorder %v11777_v46, 0.0 }
 0x57a   :  { %v12288_v29 = vsel %vm12994_vm3, %v11777_v46, %v12030_v15  ;;  %vm12995_vm7 = vcmp.gt.f32.partialorder %v11781_v20, 0.0  ;;  %v12300_v18 = vsel %vm6810_vm9, %v11785_v32, %v12044_v9  ;;  %vm12996_vm8 = vcmp.gt.f32.partialorder %v11789_v44, 0.0  ;;  %v12997_v46 = vld [vmem:[#allocation31_spill] sm:$0xff]  ;;  %v13014_v15 = vld [vmem:[#allocation29_spill] sm:$0xff] }
 0x57b   :  { %v12294_v24 = vsel %vm12995_vm7, %v11781_v20, %v12033_v41  ;;  %v12306_v10 = vsel %vm12996_vm8, %v11789_v44, %v12047_v4  ;;  %vm12998_vm2 = vcmp.gt.f32.partialorder %v11793_v49, 0.0  ;;  %vm12999_vm6 = vcmp.gt.f32.partialorder %v11797_v1, 0.0  ;;  %v13000_v44 = vld [vmem:[#allocation33_spill] sm:$0xff] }
 0x57c   :  { %v12312_v50 = vsel %vm12998_vm2, %v11793_v49, %v12997_v46  ;;  %v12318_v20 = vsel %vm12999_vm6, %v11797_v1, %v12062_v27  ;;  %v12324_v32 = vsel %vm6814_vm10, %v11801_v16, %v12065_v53  ;;  %vm13001_vm9 = vcmp.gt.f32.partialorder %v11805_v56, 0.0  ;;  %v13004_v16 = vld [vmem:[#allocation35_spill] sm:$0xff]  ;;  %v13020_v27 = vld [vmem:[#allocation22_spill] sm:$0xff] }
 0x57d   :  { %v12330_v41 = vsel %vm13001_vm9, %v11805_v56, %v13000_v44  ;;  %vm13002_vm3 = vcmp.gt.f32.partialorder %v11809_v60, 0.0  ;;  %vm13003_vm7 = vcmp.gt.f32.partialorder %v11813_v39, 0.0  ;;  %v12348_v53 = vsel %vm6818_vm11, %v11817_v38, %v13004_v16  ;;  %v13030_v44 = vld [vmem:[#allocation51_spill] sm:$0xff]  ;;  %v13031_v16 = vld [vmem:[#allocation26_spill] sm:$0xff] }
 0x57e   :  { %v12336_v49 = vsel %vm13002_vm3, %v11809_v60, %v12080_v13  ;;  %v12342_v1 = vsel %vm13003_vm7, %v11813_v39, %v12083_v22  ;;  %vm13005_vm10 = vcmp.gt.f32.partialorder %v11821_v57, 0.0  ;;  %vm13006_vm8 = vcmp.gt.f32.partialorder %v11825_v59, 0.0  ;;  %v13007_v39 = vld [vmem:[#allocation37_spill] sm:$0xff]  ;;  %v13022_v13 = vld [vmem:[#allocation47_spill] sm:$0xff] }
 0x57f   :  { %v12354_v56 = vsel %vm13005_vm10, %v11821_v57, %v12098_v25  ;;  %v12360_v60 = vsel %vm13006_vm8, %v11825_v59, %v12101_v0  ;;  %vm13008_vm2 = vcmp.gt.f32.partialorder %v11829_v47, 0.0  ;;  %v12372_v38 = vsel %vm6822_vm12, %v11833_v58, %v12117_v43  ;;  %v13009_v57 = vld [vmem:[#allocation39_spill] sm:$0xff]  ;;  %v13011_v59 = vld [vmem:[#allocation40_spill] sm:$0xff] }
 0x580   :  { %v12366_v8 = vsel %vm13008_vm2, %v11829_v47, %v13007_v39  ;;  %vm13010_vm11 = vcmp.gt.f32.partialorder %v11837_v2, 0.0  ;;  %vm13012_vm6 = vcmp.gt.f32.partialorder %v11841_v14, 0.0  ;;  %v13013_v47 = vld [vmem:[#allocation42_spill] sm:$0xff]  ;;  %vm13015_vm9 = vcmp.gt.f32.partialorder %v13014_v15, 0.0  ;;  %v13016_v58 = vld [vmem:[#allocation43_spill] sm:$0xff] }
 0x581   :  { %v12378_v52 = vsel %vm13010_vm11, %v11837_v2, %v13009_v57  ;;  %v12384_v48 = vsel %vm13012_vm6, %v11841_v14, %v13011_v59  ;;  %v12390_v9 = vsel %vm13015_vm9, %v13014_v15, %v13013_v47  ;;  %v12396_v4 = vsel %vm6826_vm13, %v11849_v51, %v13016_v58  ;;  %v13017_v2 = vld [vmem:[#allocation44_spill] sm:$0xff]  ;;  %v13019_v14 = vld [vmem:[#allocation46_spill] sm:$0xff]  ;;  %v13023_v25 = vld [vmem:[#allocation23_spill] sm:$0xff] }
 0x582   :  { %vm13018_vm12 = vcmp.gt.f32.partialorder %v11853_v61, 0.0  ;;  %vm13021_vm3 = vcmp.gt.f32.partialorder %v13020_v27, 0.0  ;;  %vm13024_vm7 = vcmp.gt.f32.partialorder %v13023_v25, 0.0  ;;  %v13025_v51 = vld [vmem:[#allocation48_spill] sm:$0xff]  ;;  %vm13029_vm13 = vcmp.gt.f32.partialorder %v13028_v31, 0.0  ;;  %v13034_v59 = vld [vmem:[#allocation2_spill] sm:$0xff] }
 0x583   :  { %v12402_v22 = vsel %vm13018_vm12, %v11853_v61, %v13017_v2  ;;  %v12408_v0 = vsel %vm13021_vm3, %v13020_v27, %v13019_v14  ;;  %v12414_v43 = vsel %vm13024_vm7, %v13023_v25, %v13022_v13  ;;  %v12420_v62 = vsel %vm6830_vm14, %v13026_v28, %v13025_v51  ;;  %v13027_v61 = vld [vmem:[#allocation50_spill] sm:$0xff]  ;;  %v13033_v57 = vld [vmem:[#allocation52_spill] sm:$0xff]  ;;  %v13036_v15 = vld [vmem:[#allocation3_spill] sm:$0xff] }
 0x584   :  { %v12426_v46 = vsel %vm13029_vm13, %v13028_v31, %v13027_v61  ;;  %vm13032_vm10 = vcmp.gt.f32.partialorder %v13031_v16, 0.0  ;;  %vm13035_vm8 = vcmp.gt.f32.partialorder %v13034_v59, 0.0  ;;  %v12443_v58 = vsel %vm6834_vm15, %v13036_v15, %v6898_v36  ;;  %v13037_v2 = vld [vmem:[#allocation10_spill] sm:$0xff]  ;;  %v13039_v27 = vld [vmem:[#allocation11_spill] sm:$0xff]  ;;  %v13041_v25 = vld [vmem:[#allocation12_spill] sm:$0xff] }
 0x585   :  { %v12432_v39 = vsel %vm13032_vm10, %v13031_v16, %v13030_v44  ;;  %v12438_v47 = vsel %vm13035_vm8, %v13034_v59, %v13033_v57  ;;  %vm13038_vm14 = vcmp.gt.f32.partialorder %v13037_v2, 0.0  ;;  %vm13040_vm2 = vcmp.gt.f32.partialorder %v13039_v27, 0.0  ;;  %v13043_v28 = vld [vmem:[#allocation5_spill] sm:$0xff]  ;;  %v13046_v31 = vld [vmem:[#allocation6_spill] sm:$0xff]  ;;  %v13054_v15 = vld [vmem:[#allocation19_spill] sm:$0xff] }
 0x586   :  { %v12448_v14 = vsel %vm13038_vm14, %v13037_v2, %v6899_v5  ;;  %v12453_v13 = vsel %vm13040_vm2, %v13039_v27, %v6900_v54  ;;  %vm13042_vm11 = vcmp.gt.f32.partialorder %v13041_v25, 0.0  ;;  %v12463_v36 = vsel %vm6838_vm0, %v12977_v30, %v6902_v7  ;;  %v13045_v61 = vld [vmem:[#allocation13_spill] sm:$0xff]  ;;  %v13051_v44 = vld [vmem:[#allocation14_spill] sm:$0xff]  ;;  %v13056_v27 = vld [vmem:[#allocation28_spill] sm:$0xff] }
 0x587   :  { %v12458_v51 = vsel %vm13042_vm11, %v13041_v25, %v6901_v55  ;;  %vm13044_vm15 = vcmp.gt.f32.partialorder %v13043_v28, 0.0  ;;  %v12473_v54 = vsel %vm6840_vm4, %v13045_v61, %v6904_v21  ;;  %vm13047_vm6 = vcmp.gt.f32.partialorder %v13046_v31, 0.0  ;;  %v13050_v30 = vld [vmem:[#allocation9_spill] sm:$0xff]  ;;  %v13052_v21 = vld [vmem:[#allocation15_spill] sm:$0xff]  ;;  %v13057_v25 = vld [vmem:[#allocation30_spill] sm:$0xff] }
 0x588   :  { %v12468_v5 = vsel %vm13044_vm15, %v13043_v28, %v6903_v33  ;;  %v12478_v55 = vsel %vm13047_vm6, %v13046_v31, %v6905_v26  ;;  %v12483_v7 = vsel %vm6842_vm1, %v12983_v17, %v6906_v42  ;;  %v12488_v33 = vsel %vm6843_vm5, %v12984_v3, %v6907_v6  ;;  %v13053_v57 = vld [vmem:[#allocation17_spill] sm:$0xff]  ;;  %v13058_v61 = vld [vmem:[#allocation32_spill] sm:$0xff]  ;;  %v13059_v17 = vld [vmem:[#allocation34_spill] sm:$0xff] }
 0x589   :  { %13048 = vst [vmem:[#allocation16_spill] sm:$0xff] %v12478_v55  ;;  %13049 = vst [vmem:[#allocation7_spill] sm:$0xff] %v12483_v7  ;;  %v8067_v16 = vpack.c.bf16 %v13051_v44, %v13050_v30  ;;  %v8072_v59 = vpack.c.bf16 %v13053_v57, %v13052_v21  ;;  %v13055_v2 = vld [vmem:[#allocation21_spill] sm:$0xff]  ;;  %v8082_v28 = vpack.c.bf16 %v13057_v25, %v13056_v27  ;;  %v13060_v31 = vld [vmem:[#allocation36_spill] sm:$0xff] }
 0x58a   :  { %v8077_v26 = vpack.c.bf16 %v13055_v2, %v13054_v15  ;;  %v8087_v42 = vpack.c.bf16 %v13059_v17, %v13058_v61  ;;  %v13061_v7 = vld [vmem:[#allocation38_spill] sm:$0xff]  ;;  %v13062_v6 = vld [vmem:[#allocation41_spill] sm:$0xff]  ;;  %v13067_v2 = vld [vmem:[#allocation4_spill] sm:$0xff] }
 0x58b   :  { %v8092_v55 = vpack.c.bf16 %v13061_v7, %v13060_v31  ;;  %8068 = vst [vmem:[%s12654_s4] sm:$0xff] %v8067_v16   ;;  %8224 = vst [vmem:[%s12654_s4 + $0x8] sm:$0xff] %v8072_v59   ;;  %v13063_v3 = vld [vmem:[#allocation45_spill] sm:$0xff]  ;;  %v13066_v15 = vld [vmem:[#allocation54_spill] sm:$0xff]  ;;  %v8112_v7 = vpack.c.bf16 %v12234_v34, %v12225_v35  ;;  %v8117_v16 = vpack.c.bf16 %v12246_v11, %v12240_v12 }
 0x58c   :  { %v8097_v30 = vpack.c.bf16 %v13063_v3, %v13062_v6  ;;  %v13064_v44 = vld [vmem:[#allocation49_spill] sm:$0xff]  ;;  %v8107_v27 = vpack.c.bf16 %v13067_v2, %v13066_v15  ;;  %8225 = vst [vmem:[%s12654_s4 + $0x10] sm:$0xff] %v8077_v26   ;;  %8226 = vst [vmem:[%s12654_s4 + $0x18] sm:$0xff] %v8082_v28   ;;  %v8122_v34 = vpack.c.bf16 %v12258_v45, %v12252_v63 }
 0x58d   :  { %v13065_v21 = vld [vmem:[#allocation53_spill] sm:$0xff]  ;;  %8227 = vst [vmem:[%s12654_s4 + $0x20] sm:$0xff] %v8087_v42   ;;  %8228 = vst [vmem:[%s12654_s4 + $0x28] sm:$0xff] %v8092_v55   ;;  %v8127_v35 = vpack.c.bf16 %v12270_v40, %v12264_v37  ;;  %v8132_v59 = vpack.c.bf16 %v12282_v23, %v12276_v19  ;;  %v8137_v12 = vpack.c.bf16 %v12294_v24, %v12288_v29 }
 0x58e   :  { %v8102_v57 = vpack.c.bf16 %v13065_v21, %v13064_v44  ;;  %8229 = vst [vmem:[%s12654_s4 + $0x30] sm:$0xff] %v8097_v30   ;;  %8231 = vst [vmem:[%s12654_s4 + $0x40] sm:$0xff] %v8107_v27   ;;  %v8142_v11 = vpack.c.bf16 %v12306_v10, %v12300_v18  ;;  %v8147_v63 = vpack.c.bf16 %v12318_v20, %v12312_v50 }
 0x58f   :  { %8232 = vst [vmem:[%s12654_s4 + $0x48] sm:$0xff] %v8112_v7   ;;  %v8152_v45 = vpack.c.bf16 %v12330_v41, %v12324_v32  ;;  %8233 = vst [vmem:[%s12654_s4 + $0x50] sm:$0xff] %v8117_v16   ;;  %v8157_v37 = vpack.c.bf16 %v12342_v1, %v12336_v49  ;;  %v8162_v40 = vpack.c.bf16 %v12354_v56, %v12348_v53 }
 0x590   :  { %8230 = vst [vmem:[%s12654_s4 + $0x38] sm:$0xff] %v8102_v57   ;;  %8234 = vst [vmem:[%s12654_s4 + $0x58] sm:$0xff] %v8122_v34   ;;  %v8167_v19 = vpack.c.bf16 %v12366_v8, %v12360_v60  ;;  %v8172_v23 = vpack.c.bf16 %v12378_v52, %v12372_v38  ;;  %v8177_v29 = vpack.c.bf16 %v12390_v9, %v12384_v48  ;;  %v13068_v49 = vld [vmem:[#allocation16_spill] sm:$0xff]  ;;  %v13069_v53 = vld [vmem:[#allocation7_spill] sm:$0xff] }
 0x591   :  { %8235 = vst [vmem:[%s12654_s4 + $0x60] sm:$0xff] %v8127_v35   ;;  %8236 = vst [vmem:[%s12654_s4 + $0x68] sm:$0xff] %v8132_v59   ;;  %v8182_v24 = vpack.c.bf16 %v12402_v22, %v12396_v4  ;;  %v8187_v18 = vpack.c.bf16 %v12414_v43, %v12408_v0  ;;  %v8192_v10 = vpack.c.bf16 %v12426_v46, %v12420_v62 }
 0x592   :  { %8237 = vst [vmem:[%s12654_s4 + $0x70] sm:$0xff] %v8137_v12   ;;  %8238 = vst [vmem:[%s12654_s4 + $0x78] sm:$0xff] %v8142_v11   ;;  %v8197_v50 = vpack.c.bf16 %v12438_v47, %v12432_v39  ;;  %v8202_v20 = vpack.c.bf16 %v12448_v14, %v12443_v58  ;;  %v8207_v32 = vpack.c.bf16 %v12458_v51, %v12453_v13 }
 0x593   :  { %8239 = vst [vmem:[%s12654_s4 + $0x80] sm:$0xff] %v8147_v63   ;;  %8240 = vst [vmem:[%s12654_s4 + $0x88] sm:$0xff] %v8152_v45   ;;  %v8212_v41 = vpack.c.bf16 %v12468_v5, %v12463_v36  ;;  %v8217_v1 = vpack.c.bf16 %v13068_v49, %v12473_v54  ;;  %v8222_v56 = vpack.c.bf16 %v12488_v33, %v13069_v53 }
 0x594   :  { %8241 = vst [vmem:[%s12654_s4 + $0x90] sm:$0xff] %v8157_v37   ;;  %8242 = vst [vmem:[%s12654_s4 + $0x98] sm:$0xff] %v8162_v40  }
 0x595   :  { %8243 = vst [vmem:[%s12654_s4 + $0xa0] sm:$0xff] %v8167_v19   ;;  %8244 = vst [vmem:[%s12654_s4 + $0xa8] sm:$0xff] %v8172_v23  }
 0x596   :  { %8245 = vst [vmem:[%s12654_s4 + $0xb0] sm:$0xff] %v8177_v29   ;;  %8246 = vst [vmem:[%s12654_s4 + $0xb8] sm:$0xff] %v8182_v24  }
 0x597   :  { %8247 = vst [vmem:[%s12654_s4 + $0xc0] sm:$0xff] %v8187_v18   ;;  %8248 = vst [vmem:[%s12654_s4 + $0xc8] sm:$0xff] %v8192_v10  }
 0x598   :  { %8249 = vst [vmem:[%s12654_s4 + $0xd0] sm:$0xff] %v8197_v50   ;;  %8250 = vst [vmem:[%s12654_s4 + $0xd8] sm:$0xff] %v8202_v20  }
 0x599   :  { %8251 = vst [vmem:[%s12654_s4 + $0xe0] sm:$0xff] %v8207_v32   ;;  %8252 = vst [vmem:[%s12654_s4 + $0xe8] sm:$0xff] %v8212_v41  }
 0x59a   :  { %8253 = vst [vmem:[%s12654_s4 + $0xf0] sm:$0xff] %v8217_v1   ;;  %8254 = vst [vmem:[%s12654_s4 + $0xf8] sm:$0xff] %v8222_v56  }

// kernel: discriminator_forward.7
= control target key start
LH: loop header
LB: loop body
LE: loop exit
PB: predicated region body
PF: predicated region fallthrough
CT: control target
= control target key end

     0   :  { %vm1729_vm4 = vcmask 130112   ;;  %vm1740_vm5 = vcmask 1041409   ;;  %vm1743_vm6 = vcmask 123904   ;;  %vm1761_vm7 = vcmask 1024   ;;  %s2819_s1 = inlined_call_operand.vmem [shape: bf16[2048,128], index: 1, kind: input, shape index: {}]   ;;  %s2820_s0 = inlined_call_operand.vmem [shape: bf16[32,2048], index: 0, kind: input, shape index: {}]   ;;  %s2821_s2 = inlined_call_operand.vmem [shape: f32[1,128], index: 2, kind: input, shape index: {}]   ;;  %s2822_s3 = inlined_call_operand.vmem [shape: f32[1,128], index: 3, kind: input, shape index: {}]   ;;  %s2823_s4 = inlined_call_operand.vmem [shape: f32[16,128], index: 4, kind: input, shape index: {}]   ;;  %s2824_s5 = inlined_call_operand.<no memory space> [shape: f32[1,1], index: 5, kind: input, shape index: {}]   ;;  %s2825_s6 = inlined_call_operand.vmem [shape: f32[2,1], index: 6, kind: output, shape index: {}]  }
   0x1   :  { %v2152_v0 = vld [vmem:[%s2819_s1 + $0x78] sm:$0xff]   ;;  %v2156_v4 = vld [vmem:[%s2819_s1 + $0x70] sm:$0xff]   ;;  %v2160_v8 = vld [vmem:[%s2819_s1 + $0x68] sm:$0xff]  }
   0x2   :  { %v2153_v1 = vld [vmem:[%s2819_s1 + $0xf8] sm:$0xff]   ;;  %1928 = vmatprep.subr.bf16.mxu0 %v2152_v0  ;;  %v2157_v5 = vld [vmem:[%s2819_s1 + $0xf0] sm:$0xff]   ;;  %v2161_v9 = vld [vmem:[%s2819_s1 + $0xe8] sm:$0xff]  }
   0x3   :  { %v2154_v2 = vld [vmem:[%s2819_s1 + $0x38] sm:$0xff]   ;;  %1956 = vmatprep.subr.bf16.mxu1 %v2153_v1  ;;  %v2158_v6 = vld [vmem:[%s2819_s1 + $0x30] sm:$0xff]   ;;  %v2162_v10 = vld [vmem:[%s2819_s1 + $0x28] sm:$0xff]  }
   0x4   :  { %v2155_v3 = vld [vmem:[%s2819_s1 + $0xb8] sm:$0xff]   ;;  %1929 = vmatpush3.bf16.msra.mxu0 %v2154_v2  ;;  %v2159_v7 = vld [vmem:[%s2819_s1 + $0xb0] sm:$0xff]   ;;  %v2163_v11 = vld [vmem:[%s2819_s1 + $0xa8] sm:$0xff]  }
   0x5   :  { %1957 = vmatpush3.bf16.msra.mxu1 %v2155_v3  ;;  %1930 = vmatprep.subr.bf16.mxu0 %v2156_v4  ;;  %v2164_v12 = vld [vmem:[%s2819_s1 + $0x60] sm:$0xff]   ;;  %v2168_v16 = vld [vmem:[%s2819_s1 + $0x58] sm:$0xff]   ;;  %v2172_v20 = vld [vmem:[%s2819_s1 + $0x50] sm:$0xff]  }
   0x6   :  { %1958 = vmatprep.subr.bf16.mxu1 %v2157_v5  ;;  %v2165_v13 = vld [vmem:[%s2819_s1 + $0xe0] sm:$0xff]   ;;  %v2169_v17 = vld [vmem:[%s2819_s1 + $0xd8] sm:$0xff]   ;;  %v2173_v21 = vld [vmem:[%s2819_s1 + $0xd0] sm:$0xff]  }
   0x7   :  { %v2166_v14 = vld [vmem:[%s2819_s1 + $0x20] sm:$0xff]   ;;  %v2170_v18 = vld [vmem:[%s2819_s1 + $0x18] sm:$0xff]   ;;  %v2174_v22 = vld [vmem:[%s2819_s1 + $0x10] sm:$0xff]  }
   0x8   :  { %1931 = vmatpush3.bf16.msra.mxu0 %v2158_v6  ;;  %v2167_v15 = vld [vmem:[%s2819_s1 + $0xa0] sm:$0xff]   ;;  %v2171_v19 = vld [vmem:[%s2819_s1 + $0x98] sm:$0xff]   ;;  %v2175_v23 = vld [vmem:[%s2819_s1 + $0x90] sm:$0xff]  }
   0x9   :  { %1959 = vmatpush3.bf16.msra.mxu1 %v2159_v7  ;;  %1932 = vmatprep.subr.bf16.mxu0 %v2160_v8  ;;  %v2176_v24 = vld [vmem:[%s2819_s1 + $0x48] sm:$0xff]   ;;  %v2180_v28 = vld [vmem:[%s2819_s1 + $0x40] sm:$0xff]   ;;  %v2184_v40 = vld [vmem:[%s2819_s1 + $0x178] sm:$0xff]  }
   0xa   :  { %1960 = vmatprep.subr.bf16.mxu1 %v2161_v9  ;;  %v2177_v25 = vld [vmem:[%s2819_s1 + $0xc8] sm:$0xff]   ;;  %v2181_v29 = vld [vmem:[%s2819_s1 + $0xc0] sm:$0xff]   ;;  %v2185_v41 = vld [vmem:[%s2819_s1 + $0x1f8] sm:$0xff]  }
   0xb   :  { %v2178_v26 = vld [vmem:[%s2819_s1 + $0x8] sm:$0xff]   ;;  %v2182_v30 = vld [vmem:[%s2819_s1] sm:$0xff]   ;;  %v2186_v42 = vld [vmem:[%s2819_s1 + $0x138] sm:$0xff]  }
   0xc   :  { %1933 = vmatpush3.bf16.msra.mxu0 %v2162_v10  ;;  %v2179_v27 = vld [vmem:[%s2819_s1 + $0x88] sm:$0xff]   ;;  %v2183_v31 = vld [vmem:[%s2819_s1 + $0x80] sm:$0xff]   ;;  %v2187_v43 = vld [vmem:[%s2819_s1 + $0x1b8] sm:$0xff]  }
   0xd   :  { %1961 = vmatpush3.bf16.msra.mxu1 %v2163_v11  ;;  %1934 = vmatprep.subr.bf16.mxu0 %v2164_v12  ;;  %v26_v32 = vld [vmem:[%s2820_s0] sm:$0xff]  ;;  %v27_v34 = vld [vmem:[%s2820_s0 + $0x8] sm:$0xff]  ;;  %v2188_v44 = vld [vmem:[%s2819_s1 + $0x170] sm:$0xff]  }
   0xe   :  { %1962 = vmatprep.subr.bf16.mxu1 %v2165_v13  ;;  %v34_v33 = vld [vmem:[%s2820_s0 + $0x40] sm:$0xff]  ;;  %v35_v37 = vld [vmem:[%s2820_s0 + $0x48] sm:$0xff]  ;;  %v2189_v45 = vld [vmem:[%s2819_s1 + $0x1f0] sm:$0xff]  }
   0xf   :  { %v1767_v35 = vcombine.low %v26_v32, %v34_v33  ;;  %v1768_v36 = vcombine.high %v26_v32, %v34_v33  ;;  %v1769_v38 = vcombine.low %v27_v34, %v35_v37  ;;  %v1770_v39 = vcombine.high %v27_v34, %v35_v37  ;;  %v2190_v46 = vld [vmem:[%s2819_s1 + $0x130] sm:$0xff]   ;;  %v2192_v48 = vld [vmem:[%s2819_s1 + $0x168] sm:$0xff]   ;;  %v2196_v52 = vld [vmem:[%s2819_s1 + $0x160] sm:$0xff]  }
  0x10   :  { %1935 = vmatpush3.bf16.msra.mxu0 %v2166_v14  ;;  %v2191_v47 = vld [vmem:[%s2819_s1 + $0x1b0] sm:$0xff]   ;;  %v2193_v49 = vld [vmem:[%s2819_s1 + $0x1e8] sm:$0xff]   ;;  %v2197_v53 = vld [vmem:[%s2819_s1 + $0x1e0] sm:$0xff]  }
  0x11   :  { %1963 = vmatpush3.bf16.msra.mxu1 %v2167_v15  ;;  %1936 = vmatprep.subr.bf16.mxu0 %v2168_v16  ;;  %v2194_v50 = vld [vmem:[%s2819_s1 + $0x128] sm:$0xff]   ;;  %v2198_v54 = vld [vmem:[%s2819_s1 + $0x120] sm:$0xff]   ;;  %v2200_v56 = vld [vmem:[%s2819_s1 + $0x158] sm:$0xff]  }
  0x12   :  { %1964 = vmatprep.subr.bf16.mxu1 %v2169_v17  ;;  %1274 = vmatprep.mubr.bf16.mxu0 %v1768_v36  ;;  %v2195_v51 = vld [vmem:[%s2819_s1 + $0x1a8] sm:$0xff]   ;;  %v2199_v55 = vld [vmem:[%s2819_s1 + $0x1a0] sm:$0xff]   ;;  %v2201_v57 = vld [vmem:[%s2819_s1 + $0x1d8] sm:$0xff]  }
  0x13   :  { %1323 = vmatprep.mubr.bf16.mxu1 %v1770_v39  ;;  %v2202_v58 = vld [vmem:[%s2819_s1 + $0x118] sm:$0xff]   ;;  %v42_v60 = vld [vmem:[%s2820_s0 + $0x80] sm:$0xff]  ;;  %v43_v63 = vld [vmem:[%s2820_s0 + $0x88] sm:$0xff] }
  0x14   :  { %1937 = vmatpush3.bf16.msra.mxu0 %v2170_v18  ;;  %v2203_v59 = vld [vmem:[%s2819_s1 + $0x198] sm:$0xff]   ;;  %v50_v61 = vld [vmem:[%s2820_s0 + $0xc0] sm:$0xff]  ;;  %v51_v0 = vld [vmem:[%s2820_s0 + $0xc8] sm:$0xff] }
  0x15   :  { %1965 = vmatpush3.bf16.msra.mxu1 %v2171_v19  ;;  %1938 = vmatprep.subr.bf16.mxu0 %v2172_v20  ;;  %v1784_v62 = vcombine.high %v42_v60, %v50_v61  ;;  %v1783_v1 = vcombine.low %v42_v60, %v50_v61  ;;  %v1786_v2 = vcombine.high %v43_v63, %v51_v0  ;;  %v2204_v4 = vld [vmem:[%s2819_s1 + $0x150] sm:$0xff]   ;;  %v2208_v8 = vld [vmem:[%s2819_s1 + $0x148] sm:$0xff]   ;;  %v2212_v12 = vld [vmem:[%s2819_s1 + $0x140] sm:$0xff]  }
  0x16   :  { %1966 = vmatprep.subr.bf16.mxu1 %v2173_v21  ;;  %v1785_v3 = vcombine.low %v43_v63, %v51_v0  ;;  %v2205_v5 = vld [vmem:[%s2819_s1 + $0x1d0] sm:$0xff]   ;;  %v2209_v9 = vld [vmem:[%s2819_s1 + $0x1c8] sm:$0xff]   ;;  %v2213_v13 = vld [vmem:[%s2819_s1 + $0x1c0] sm:$0xff]  }
  0x17   :  { %v2206_v6 = vld [vmem:[%s2819_s1 + $0x110] sm:$0xff]   ;;  %v2210_v10 = vld [vmem:[%s2819_s1 + $0x108] sm:$0xff]   ;;  %v2214_v14 = vld [vmem:[%s2819_s1 + $0x100] sm:$0xff]  }
  0x18   :  { %1939 = vmatpush3.bf16.msra.mxu0 %v2174_v22  ;;  %v2207_v7 = vld [vmem:[%s2819_s1 + $0x190] sm:$0xff]   ;;  %v2211_v11 = vld [vmem:[%s2819_s1 + $0x188] sm:$0xff]   ;;  %v2215_v15 = vld [vmem:[%s2819_s1 + $0x180] sm:$0xff]  }
  0x19   :  { %1967 = vmatpush3.bf16.msra.mxu1 %v2175_v23  ;;  %1940 = vmatprep.subr.bf16.mxu0 %v2176_v24  ;;  %v28_v16 = vld [vmem:[%s2820_s0 + $0x10] sm:$0xff]  ;;  %v29_v18 = vld [vmem:[%s2820_s0 + $0x18] sm:$0xff]  ;;  %v2224_v36 = vld [vmem:[%s2819_s1 + $0x268] sm:$0xff]  }
  0x1a   :  { %1968 = vmatprep.subr.bf16.mxu1 %v2177_v25  ;;  %v36_v17 = vld [vmem:[%s2820_s0 + $0x50] sm:$0xff]  ;;  %v37_v19 = vld [vmem:[%s2820_s0 + $0x58] sm:$0xff]  ;;  %v2225_v37 = vld [vmem:[%s2819_s1 + $0x2e8] sm:$0xff]  }
  0x1b   :  { %v1771_v20 = vcombine.low %v28_v16, %v36_v17  ;;  %v1772_v21 = vcombine.high %v28_v16, %v36_v17  ;;  %v1773_v22 = vcombine.low %v29_v18, %v37_v19  ;;  %v1774_v23 = vcombine.high %v29_v18, %v37_v19  ;;  %v2216_v24 = vld [vmem:[%s2819_s1 + $0x278] sm:$0xff]   ;;  %v44_v32 = vld [vmem:[%s2820_s0 + $0x90] sm:$0xff]  ;;  %v2244_v60 = vld [vmem:[%s2819_s1 + $0x240] sm:$0xff]  }
  0x1c   :  { %1941 = vmatpush3.bf16.msra.mxu0 %v2178_v26  ;;  %v2217_v25 = vld [vmem:[%s2819_s1 + $0x2f8] sm:$0xff]   ;;  %v52_v33 = vld [vmem:[%s2820_s0 + $0xd0] sm:$0xff]  ;;  %v2245_v61 = vld [vmem:[%s2819_s1 + $0x2c0] sm:$0xff]  }
  0x1d   :  { %1969 = vmatpush3.bf16.msra.mxu1 %v2179_v27  ;;  %1942 = vmatprep.subr.bf16.mxu0 %v2180_v28  ;;  %v2218_v26 = vld [vmem:[%s2819_s1 + $0x238] sm:$0xff]   ;;  %v2220_v28 = vld [vmem:[%s2819_s1 + $0x270] sm:$0xff]   ;;  %v1788_v34 = vcombine.high %v44_v32, %v52_v33  ;;  %v2247_v63 = vld [vmem:[%s2819_s1 + $0x280] sm:$0xff]  }
  0x1e   :  { %1970 = vmatprep.subr.bf16.mxu1 %v2181_v29  ;;  %v2219_v27 = vld [vmem:[%s2819_s1 + $0x2b8] sm:$0xff]   ;;  %v2221_v29 = vld [vmem:[%s2819_s1 + $0x2f0] sm:$0xff]   ;;  %v30_v0 = vld [vmem:[%s2820_s0 + $0x20] sm:$0xff] }
  0x1f   :  { %v53_v39 = vld [vmem:[%s2820_s0 + $0xd8] sm:$0xff]  ;;  %v46_v16 = vld [vmem:[%s2820_s0 + $0xa0] sm:$0xff] }
  0x20   :  { %1943 = vmatpush3.bf16.msra.mxu0 %v2182_v30  ;;  %v2222_v30 = vld [vmem:[%s2819_s1 + $0x230] sm:$0xff]   ;;  %v54_v17 = vld [vmem:[%s2820_s0 + $0xe0] sm:$0xff] }
  0x21   :  { %1971 = vmatpush3.bf16.msra.mxu1 %v2183_v31  ;;  %1984 = vmatprep.subr.bf16.mxu0 %v2184_v40  ;;  %v2223_v31 = vld [vmem:[%s2819_s1 + $0x2b0] sm:$0xff]   ;;  %v1792_v18 = vcombine.high %v46_v16, %v54_v17  ;;  %v1791_v19 = vcombine.low %v46_v16, %v54_v17 }
  0x22   :  { %2012 = vmatprep.subr.bf16.mxu1 %v2185_v41  ;;  %v2226_v41 = vld [vmem:[%s2819_s1 + $0x228] sm:$0xff]  }
  0x23   :  { %1275 = vmatmul.mubr.bf16.vlgmr.msra.gmra.mxu0 %v1767_v35  ;;  %v1787_v35 = vcombine.low %v44_v32, %v52_v33  ;;  %v2264_v32 = vld [vmem:[%s2819_s1 + $0x358] sm:$0xff]  }
  0x24   :  { %1324 = vmatmul.mubr.bf16.vlgmr.msra.gmra.mxu1 %v1769_v38  ;;  %1985 = vmatpush3.bf16.msra.mxu0 %v2186_v42  ;;  %v45_v38 = vld [vmem:[%s2820_s0 + $0x98] sm:$0xff] }
  0x25   :  { %2013 = vmatpush3.bf16.msra.mxu1 %v2187_v43  ;;  %1986 = vmatprep.subr.bf16.mxu0 %v2188_v44  ;;  %v1790_v40 = vcombine.high %v45_v38, %v53_v39  ;;  %v1789_v42 = vcombine.low %v45_v38, %v53_v39  ;;  %v2227_v43 = vld [vmem:[%s2819_s1 + $0x2a8] sm:$0xff]   ;;  %v2228_v44 = vld [vmem:[%s2819_s1 + $0x260] sm:$0xff]   ;;  %v2265_v33 = vld [vmem:[%s2819_s1 + $0x3d8] sm:$0xff]  }
  0x26   :  { %2014 = vmatprep.subr.bf16.mxu1 %v2189_v45  ;;  %1282 = vmatprep.mubr.bf16.mxu0 %v1784_v62  ;;  %v2229_v45 = vld [vmem:[%s2819_s1 + $0x2e0] sm:$0xff]   ;;  %v2270_v38 = vld [vmem:[%s2819_s1 + $0x310] sm:$0xff]  }
  0x27   :  { %1331 = vmatprep.mubr.bf16.mxu1 %v1786_v2  ;;  %v2246_v62 = vld [vmem:[%s2819_s1 + $0x200] sm:$0xff]   ;;  %v2271_v39 = vld [vmem:[%s2819_s1 + $0x390] sm:$0xff]  }
  0x28   :  { %1987 = vmatpush3.bf16.msra.mxu0 %v2190_v46  ;;  %v2230_v46 = vld [vmem:[%s2819_s1 + $0x220] sm:$0xff]  }
  0x29   :  { %2015 = vmatpush3.bf16.msra.mxu1 %v2191_v47  ;;  %1988 = vmatprep.subr.bf16.mxu0 %v2192_v48  ;;  %v2231_v47 = vld [vmem:[%s2819_s1 + $0x2a0] sm:$0xff]   ;;  %v2232_v48 = vld [vmem:[%s2819_s1 + $0x258] sm:$0xff]  }
  0x2a   :  { %2016 = vmatprep.subr.bf16.mxu1 %v2193_v49  ;;  %v2233_v49 = vld [vmem:[%s2819_s1 + $0x2d8] sm:$0xff]  }
  0x2b   :  { %1283 = vmatmul.mubr.bf16.gmra.mxu0 %v1783_v1  ;;  %v38_v1 = vld [vmem:[%s2820_s0 + $0x60] sm:$0xff] }
  0x2c   :  { %1989 = vmatpush3.bf16.msra.mxu0 %v2194_v50  ;;  %1332 = vmatmul.mubr.bf16.gmra.mxu1 %v1785_v3  ;;  %v2234_v50 = vld [vmem:[%s2819_s1 + $0x218] sm:$0xff]   ;;  %v1775_v2 = vcombine.low %v30_v0, %v38_v1  ;;  %v1776_v3 = vcombine.high %v30_v0, %v38_v1 }
  0x2d   :  { %2017 = vmatpush3.bf16.msra.mxu1 %v2195_v51  ;;  %1990 = vmatprep.subr.bf16.mxu0 %v2196_v52  ;;  %v2235_v51 = vld [vmem:[%s2819_s1 + $0x298] sm:$0xff]   ;;  %v2236_v52 = vld [vmem:[%s2819_s1 + $0x250] sm:$0xff]  }
  0x2e   :  { %2018 = vmatprep.subr.bf16.mxu1 %v2197_v53  ;;  %1372 = vmatprep.mubr.bf16.mxu0 %v1772_v21  ;;  %v2237_v53 = vld [vmem:[%s2819_s1 + $0x2d0] sm:$0xff]   ;;  %v2257_v21 = vld [vmem:[%s2819_s1 + $0x3e8] sm:$0xff]  }
  0x2f   :  { %1421 = vmatprep.mubr.bf16.mxu1 %v1774_v23  ;;  %v55_v23 = vld [vmem:[%s2820_s0 + $0xe8] sm:$0xff] }
  0x30   :  { %1991 = vmatpush3.bf16.msra.mxu0 %v2198_v54  ;;  %v2238_v54 = vld [vmem:[%s2819_s1 + $0x210] sm:$0xff]  }
  0x31   :  { %2019 = vmatpush3.bf16.msra.mxu1 %v2199_v55  ;;  %1992 = vmatprep.subr.bf16.mxu0 %v2200_v56  ;;  %v2239_v55 = vld [vmem:[%s2819_s1 + $0x290] sm:$0xff]   ;;  %v2240_v56 = vld [vmem:[%s2819_s1 + $0x248] sm:$0xff]  }
  0x32   :  { %2020 = vmatprep.subr.bf16.mxu1 %v2201_v57  ;;  %v2241_v57 = vld [vmem:[%s2819_s1 + $0x2c8] sm:$0xff]  }
  0x34   :  { %1993 = vmatpush3.bf16.msra.mxu0 %v2202_v58  ;;  %v2242_v58 = vld [vmem:[%s2819_s1 + $0x208] sm:$0xff]  }
  0x35   :  { %2021 = vmatpush3.bf16.msra.mxu1 %v2203_v59  ;;  %1994 = vmatprep.subr.bf16.mxu0 %v2204_v4  ;;  %v2243_v59 = vld [vmem:[%s2819_s1 + $0x288] sm:$0xff]  }
  0x36   :  { %2022 = vmatprep.subr.bf16.mxu1 %v2205_v5  ;;  %v31_v4 = vld [vmem:[%s2820_s0 + $0x28] sm:$0xff] }
  0x37   :  { %v39_v5 = vld [vmem:[%s2820_s0 + $0x68] sm:$0xff] }
  0x38   :  { %1995 = vmatpush3.bf16.msra.mxu0 %v2206_v6  ;;  %v1777_v6 = vcombine.low %v31_v4, %v39_v5 }
  0x39   :  { %2023 = vmatpush3.bf16.msra.mxu1 %v2207_v7  ;;  %1996 = vmatprep.subr.bf16.mxu0 %v2208_v8  ;;  %v1778_v7 = vcombine.high %v31_v4, %v39_v5  ;;  %v2248_v8 = vld [vmem:[%s2819_s1 + $0x378] sm:$0xff]  }
  0x3a   :  { %2024 = vmatprep.subr.bf16.mxu1 %v2209_v9  ;;  %v2249_v9 = vld [vmem:[%s2819_s1 + $0x3f8] sm:$0xff]  }
  0x3c   :  { %1997 = vmatpush3.bf16.msra.mxu0 %v2210_v10  ;;  %v2250_v10 = vld [vmem:[%s2819_s1 + $0x338] sm:$0xff]  }
  0x3d   :  { %2025 = vmatpush3.bf16.msra.mxu1 %v2211_v11  ;;  %1998 = vmatprep.subr.bf16.mxu0 %v2212_v12  ;;  %v2251_v11 = vld [vmem:[%s2819_s1 + $0x3b8] sm:$0xff]   ;;  %v2252_v12 = vld [vmem:[%s2819_s1 + $0x370] sm:$0xff]  }
  0x3e   :  { %2026 = vmatprep.subr.bf16.mxu1 %v2213_v13  ;;  %v2253_v13 = vld [vmem:[%s2819_s1 + $0x3f0] sm:$0xff]  }
  0x40   :  { %1999 = vmatpush3.bf16.msra.mxu0 %v2214_v14  ;;  %v2254_v14 = vld [vmem:[%s2819_s1 + $0x330] sm:$0xff]  }
  0x41   :  { %2027 = vmatpush3.bf16.msra.mxu1 %v2215_v15  ;;  %2040 = vmatprep.subr.bf16.mxu0 %v2216_v24  ;;  %v2255_v15 = vld [vmem:[%s2819_s1 + $0x3b0] sm:$0xff]  }
  0x42   :  { %2068 = vmatprep.subr.bf16.mxu1 %v2217_v25  ;;  %v2258_v25 = vld [vmem:[%s2819_s1 + $0x328] sm:$0xff]  }
  0x43   :  { %1373 = vmatmul.mubr.bf16.vlgmr.msra.gmra.mxu0 %v1771_v20  ;;  %v2256_v20 = vld [vmem:[%s2819_s1 + $0x368] sm:$0xff]  }
  0x44   :  { %1422 = vmatmul.mubr.bf16.vlgmr.msra.gmra.mxu1 %v1773_v22  ;;  %2041 = vmatpush3.bf16.msra.mxu0 %v2218_v26  ;;  %v47_v22 = vld [vmem:[%s2820_s0 + $0xa8] sm:$0xff] }
  0x45   :  { %2069 = vmatpush3.bf16.msra.mxu1 %v2219_v27  ;;  %2042 = vmatprep.subr.bf16.mxu0 %v2220_v28  ;;  %v1794_v24 = vcombine.high %v47_v22, %v55_v23  ;;  %v1793_v26 = vcombine.low %v47_v22, %v55_v23  ;;  %v2259_v27 = vld [vmem:[%s2819_s1 + $0x3a8] sm:$0xff]   ;;  %v2260_v28 = vld [vmem:[%s2819_s1 + $0x360] sm:$0xff]  }
  0x46   :  { %2070 = vmatprep.subr.bf16.mxu1 %v2221_v29  ;;  %1380 = vmatprep.mubr.bf16.mxu0 %v1788_v34  ;;  %v2261_v29 = vld [vmem:[%s2819_s1 + $0x3e0] sm:$0xff]   ;;  %v2266_v34 = vld [vmem:[%s2819_s1 + $0x318] sm:$0xff]  }
  0x47   :  { %1429 = vmatprep.mubr.bf16.mxu1 %v1790_v40  ;;  %v2272_v40 = vld [vmem:[%s2819_s1 + $0x348] sm:$0xff]  }
  0x48   :  { %2043 = vmatpush3.bf16.msra.mxu0 %v2222_v30  ;;  %v2262_v30 = vld [vmem:[%s2819_s1 + $0x320] sm:$0xff]  }
  0x49   :  { %2071 = vmatpush3.bf16.msra.mxu1 %v2223_v31  ;;  %2044 = vmatprep.subr.bf16.mxu0 %v2224_v36  ;;  %v2263_v31 = vld [vmem:[%s2819_s1 + $0x3a0] sm:$0xff]   ;;  %v2268_v36 = vld [vmem:[%s2819_s1 + $0x350] sm:$0xff]  }
  0x4a   :  { %2072 = vmatprep.subr.bf16.mxu1 %v2225_v37  ;;  %v2269_v37 = vld [vmem:[%s2819_s1 + $0x3d0] sm:$0xff]  }
  0x4b   :  { %1381 = vmatmul.mubr.bf16.gmra.mxu0 %v1787_v35  ;;  %v2267_v35 = vld [vmem:[%s2819_s1 + $0x398] sm:$0xff]  }
  0x4c   :  { %2045 = vmatpush3.bf16.msra.mxu0 %v2226_v41  ;;  %1430 = vmatmul.mubr.bf16.gmra.mxu1 %v1789_v42  ;;  %v2273_v41 = vld [vmem:[%s2819_s1 + $0x3c8] sm:$0xff]  }
  0x4d   :  { %2073 = vmatpush3.bf16.msra.mxu1 %v2227_v43  ;;  %2046 = vmatprep.subr.bf16.mxu0 %v2228_v44  ;;  %v2274_v42 = vld [vmem:[%s2819_s1 + $0x308] sm:$0xff]   ;;  %v2276_v44 = vld [vmem:[%s2819_s1 + $0x340] sm:$0xff]  }
  0x4e   :  { %2074 = vmatprep.subr.bf16.mxu1 %v2229_v45  ;;  %1470 = vmatprep.mubr.bf16.mxu0 %v1776_v3  ;;  %v2275_v43 = vld [vmem:[%s2819_s1 + $0x388] sm:$0xff]   ;;  %v2277_v45 = vld [vmem:[%s2819_s1 + $0x3c0] sm:$0xff]  }
  0x4f   :  { %1519 = vmatprep.mubr.bf16.mxu1 %v1778_v7 }
  0x50   :  { %2047 = vmatpush3.bf16.msra.mxu0 %v2230_v46  ;;  %v2278_v46 = vld [vmem:[%s2819_s1 + $0x300] sm:$0xff]  }
  0x51   :  { %2075 = vmatpush3.bf16.msra.mxu1 %v2231_v47  ;;  %2048 = vmatprep.subr.bf16.mxu0 %v2232_v48  ;;  %v2279_v47 = vld [vmem:[%s2819_s1 + $0x380] sm:$0xff]   ;;  %v32_v48 = vld [vmem:[%s2820_s0 + $0x30] sm:$0xff] }
  0x52   :  { %2076 = vmatprep.subr.bf16.mxu1 %v2233_v49  ;;  %v40_v49 = vld [vmem:[%s2820_s0 + $0x70] sm:$0xff] }
  0x54   :  { %2049 = vmatpush3.bf16.msra.mxu0 %v2234_v50  ;;  %v33_v50 = vld [vmem:[%s2820_s0 + $0x38] sm:$0xff] }
  0x55   :  { %2077 = vmatpush3.bf16.msra.mxu1 %v2235_v51  ;;  %2050 = vmatprep.subr.bf16.mxu0 %v2236_v52  ;;  %v1779_v51 = vcombine.low %v32_v48, %v40_v49  ;;  %v1780_v52 = vcombine.high %v32_v48, %v40_v49 }
  0x56   :  { %2078 = vmatprep.subr.bf16.mxu1 %v2237_v53  ;;  %v41_v53 = vld [vmem:[%s2820_s0 + $0x78] sm:$0xff] }
  0x58   :  { %2051 = vmatpush3.bf16.msra.mxu0 %v2238_v54  ;;  %v48_v54 = vld [vmem:[%s2820_s0 + $0xb0] sm:$0xff] }
  0x59   :  { %2079 = vmatpush3.bf16.msra.mxu1 %v2239_v55  ;;  %2052 = vmatprep.subr.bf16.mxu0 %v2240_v56  ;;  %v56_v55 = vld [vmem:[%s2820_s0 + $0xf0] sm:$0xff]  ;;  %v1781_v56 = vcombine.low %v33_v50, %v41_v53 }
  0x5a   :  { %2080 = vmatprep.subr.bf16.mxu1 %v2241_v57  ;;  %v1782_v57 = vcombine.high %v33_v50, %v41_v53 }
  0x5c   :  { %2053 = vmatpush3.bf16.msra.mxu0 %v2242_v58  ;;  %v1796_v58 = vcombine.high %v48_v54, %v56_v55 }
  0x5d   :  { %2081 = vmatpush3.bf16.msra.mxu1 %v2243_v59  ;;  %2054 = vmatprep.subr.bf16.mxu0 %v2244_v60  ;;  %v49_v59 = vld [vmem:[%s2820_s0 + $0xb8] sm:$0xff] }
  0x5e   :  { %2082 = vmatprep.subr.bf16.mxu1 %v2245_v61  ;;  %v57_v60 = vld [vmem:[%s2820_s0 + $0xf8] sm:$0xff] }
  0x5f   :  { %v1798_v61 = vcombine.high %v49_v59, %v57_v60 }
  0x60   :  { %2055 = vmatpush3.bf16.msra.mxu0 %v2246_v62  ;;  %v1795_v62 = vcombine.low %v48_v54, %v56_v55 }
  0x61   :  { %2083 = vmatpush3.bf16.msra.mxu1 %v2247_v63  ;;  %2096 = vmatprep.subr.bf16.mxu0 %v2248_v8  ;;  %v1797_v63 = vcombine.low %v49_v59, %v57_v60 }
  0x62   :  { %2124 = vmatprep.subr.bf16.mxu1 %v2249_v9 }
  0x63   :  { %1471 = vmatmul.mubr.bf16.vlgmr.msra.gmra.mxu0 %v1775_v2 }
  0x64   :  { %1520 = vmatmul.mubr.bf16.vlgmr.msra.gmra.mxu1 %v1777_v6  ;;  %2097 = vmatpush3.bf16.msra.mxu0 %v2250_v10 }
  0x65   :  { %2125 = vmatpush3.bf16.msra.mxu1 %v2251_v11  ;;  %2098 = vmatprep.subr.bf16.mxu0 %v2252_v12 }
  0x66   :  { %2126 = vmatprep.subr.bf16.mxu1 %v2253_v13  ;;  %1478 = vmatprep.mubr.bf16.mxu0 %v1792_v18 }
  0x67   :  { %1527 = vmatprep.mubr.bf16.mxu1 %v1794_v24 }
  0x68   :  { %2099 = vmatpush3.bf16.msra.mxu0 %v2254_v14 }
  0x69   :  { %2127 = vmatpush3.bf16.msra.mxu1 %v2255_v15  ;;  %2100 = vmatprep.subr.bf16.mxu0 %v2256_v20 }
  0x6a   :  { %2128 = vmatprep.subr.bf16.mxu1 %v2257_v21 }
  0x6b   :  { %1479 = vmatmul.mubr.bf16.gmra.mxu0 %v1791_v19 }
  0x6c   :  { %2101 = vmatpush3.bf16.msra.mxu0 %v2258_v25  ;;  %1528 = vmatmul.mubr.bf16.gmra.mxu1 %v1793_v26 }
  0x6d   :  { %2129 = vmatpush3.bf16.msra.mxu1 %v2259_v27  ;;  %2102 = vmatprep.subr.bf16.mxu0 %v2260_v28 }
  0x6e   :  { %2130 = vmatprep.subr.bf16.mxu1 %v2261_v29  ;;  %1568 = vmatprep.mubr.bf16.mxu0 %v1780_v52 }
  0x6f   :  { %1617 = vmatprep.mubr.bf16.mxu1 %v1782_v57 }
  0x70   :  { %2103 = vmatpush3.bf16.msra.mxu0 %v2262_v30 }
  0x71   :  { %2131 = vmatpush3.bf16.msra.mxu1 %v2263_v31  ;;  %2104 = vmatprep.subr.bf16.mxu0 %v2264_v32 }
  0x72   :  { %2132 = vmatprep.subr.bf16.mxu1 %v2265_v33 }
  0x74   :  { %2105 = vmatpush3.bf16.msra.mxu0 %v2266_v34 }
  0x75   :  { %2133 = vmatpush3.bf16.msra.mxu1 %v2267_v35  ;;  %2106 = vmatprep.subr.bf16.mxu0 %v2268_v36 }
  0x76   :  { %2134 = vmatprep.subr.bf16.mxu1 %v2269_v37 }
  0x78   :  { %2107 = vmatpush3.bf16.msra.mxu0 %v2270_v38 }
  0x79   :  { %2135 = vmatpush3.bf16.msra.mxu1 %v2271_v39  ;;  %2108 = vmatprep.subr.bf16.mxu0 %v2272_v40 }
  0x7a   :  { %2136 = vmatprep.subr.bf16.mxu1 %v2273_v41 }
  0x7c   :  { %2109 = vmatpush3.bf16.msra.mxu0 %v2274_v42 }
  0x7d   :  { %2137 = vmatpush3.bf16.msra.mxu1 %v2275_v43  ;;  %2110 = vmatprep.subr.bf16.mxu0 %v2276_v44 }
  0x7e   :  { %2138 = vmatprep.subr.bf16.mxu1 %v2277_v45 }
  0x80   :  { %2111 = vmatpush3.bf16.msra.mxu0 %v2278_v46 }
  0x81   :  { %2139 = vmatpush3.bf16.msra.mxu1 %v2279_v47 }
  0x83   :  { %1569 = vmatmul.mubr.bf16.vlgmr.msra.gmra.mxu0 %v1779_v51 }
  0x84   :  { %1618 = vmatmul.mubr.bf16.vlgmr.msra.gmra.mxu1 %v1781_v56  ;;  %1576 = vmatprep.mubr.bf16.mxu0 %v1796_v58 }
  0x85   :  { %1625 = vmatprep.mubr.bf16.mxu1 %v1798_v61 }
  0x8b   :  { %1577 = vmatmul.mubr.bf16.gmra.mxu0 %v1795_v62 }
  0x8c   :  { %1626 = vmatmul.mubr.bf16.gmra.mxu1 %v1797_v63 }
  0xe3   :  { %v1944_v0 = vpop.f32.mrf.mxu0 }
  0xe4   :  { %v1972_v2 = vpop.f32.mrf.mxu1 }
  0xe5   :  { %v1945_v1 = vpop.f32.mrf.mxu0 }
  0xe6   :  { %v1973_v4 = vpop.f32.mrf.mxu1  ;;  %v1946_v42 = vadd.f32 %v1945_v1, %v1944_v0 }
  0xe7   :  { %v1947_v3 = vpop.f32.mrf.mxu0  ;;  %v1974_v43 = vadd.f32 %v1973_v4, %v1972_v2 }
  0xe8   :  { %v1975_v6 = vpop.f32.mrf.mxu1 }
  0xe9   :  { %v1948_v5 = vpop.f32.mrf.mxu0  ;;  %v1326_v50 = vadd.f32 %v1974_v43, %v1946_v42 }
  0xea   :  { %v1976_v8 = vpop.f32.mrf.mxu1  ;;  %v1949_v45 = vadd.f32 %v1948_v5, %v1947_v3 }
  0xeb   :  { %v1950_v7 = vpop.f32.mrf.mxu0  ;;  %v1977_v46 = vadd.f32 %v1976_v8, %v1975_v6 }
  0xec   :  { %v1978_v10 = vpop.f32.mrf.mxu1 }
  0xed   :  { %v1951_v9 = vpop.f32.mrf.mxu0  ;;  %v1329_v54 = vadd.f32 %v1977_v46, %v1949_v45 }
  0xee   :  { %v1979_v12 = vpop.f32.mrf.mxu1  ;;  %v1952_v51 = vadd.f32 %v1951_v9, %v1950_v7 }
  0xef   :  { %v1953_v11 = vpop.f32.mrf.mxu0  ;;  %v1980_v52 = vadd.f32 %v1979_v12, %v1978_v10 }
  0xf0   :  { %v1981_v14 = vpop.f32.mrf.mxu1 }
  0xf1   :  { %v1954_v13 = vpop.f32.mrf.mxu0  ;;  %v1334_v60 = vadd.f32 %v1980_v52, %v1952_v51 }
  0xf2   :  { %v1982_v16 = vpop.f32.mrf.mxu1  ;;  %v1955_v63 = vadd.f32 %v1954_v13, %v1953_v11 }
  0xf3   :  { %v1983_v0 = vadd.f32 %v1982_v16, %v1981_v14 }
 0x103   :  { %v2000_v15 = vpop.f32.mrf.mxu0 }
 0x104   :  { %v2028_v18 = vpop.f32.mrf.mxu1 }
 0x105   :  { %v2001_v17 = vpop.f32.mrf.mxu0 }
 0x106   :  { %v2029_v20 = vpop.f32.mrf.mxu1  ;;  %v2002_v48 = vadd.f32 %v2001_v17, %v2000_v15 }
 0x107   :  { %v2003_v19 = vpop.f32.mrf.mxu0  ;;  %v2030_v57 = vadd.f32 %v2029_v20, %v2028_v18 }
 0x108   :  { %v2031_v22 = vpop.f32.mrf.mxu1  ;;  %v1375_v56 = vadd.f32 %v2002_v48, %v1326_v50 }
 0x109   :  { %v2004_v21 = vpop.f32.mrf.mxu0 }
 0x10a   :  { %v2032_v24 = vpop.f32.mrf.mxu1  ;;  %v2005_v49 = vadd.f32 %v2004_v21, %v2003_v19  ;;  %v1424_v4 = vadd.f32 %v2030_v57, %v1375_v56  ;;  %v1337_v19 = vadd.f32 %v1983_v0, %v1955_v63 }
 0x10b   :  { %v2006_v23 = vpop.f32.mrf.mxu0  ;;  %v2033_v1 = vadd.f32 %v2032_v24, %v2031_v22 }
 0x10c   :  { %v2034_v25 = vpop.f32.mrf.mxu1  ;;  %v1378_v59 = vadd.f32 %v2005_v49, %v1329_v54 }
 0x10d   :  { %v2007_v26 = vpop.f32.mrf.mxu0 }
 0x10e   :  { %v2035_v27 = vpop.f32.mrf.mxu1  ;;  %v2008_v58 = vadd.f32 %v2007_v26, %v2006_v23  ;;  %v1427_v8 = vadd.f32 %v2033_v1, %v1378_v59 }
 0x10f   :  { %v2009_v28 = vpop.f32.mrf.mxu0  ;;  %v2036_v6 = vadd.f32 %v2035_v27, %v2034_v25 }
 0x110   :  { %v2037_v29 = vpop.f32.mrf.mxu1  ;;  %v1383_v5 = vadd.f32 %v2008_v58, %v1334_v60 }
 0x111   :  { %v2010_v30 = vpop.f32.mrf.mxu0 }
 0x112   :  { %v2038_v32 = vpop.f32.mrf.mxu1  ;;  %v2011_v9 = vadd.f32 %v2010_v30, %v2009_v28  ;;  %v1432_v23 = vadd.f32 %v2036_v6, %v1383_v5 }
 0x113   :  { %v2039_v16 = vadd.f32 %v2038_v32, %v2037_v29 }
 0x114   :  { %v1386_v14 = vadd.f32 %v2011_v9, %v1337_v19 }
 0x123   :  { %v2056_v31 = vpop.f32.mrf.mxu0 }
 0x124   :  { %v2084_v33 = vpop.f32.mrf.mxu1 }
 0x125   :  { %v2057_v34 = vpop.f32.mrf.mxu0 }
 0x126   :  { %v2085_v35 = vpop.f32.mrf.mxu1  ;;  %v2058_v61 = vadd.f32 %v2057_v34, %v2056_v31 }
 0x127   :  { %v2059_v36 = vpop.f32.mrf.mxu0  ;;  %v2086_v15 = vadd.f32 %v2085_v35, %v2084_v33 }
 0x128   :  { %v2087_v37 = vpop.f32.mrf.mxu1  ;;  %v1473_v12 = vadd.f32 %v2058_v61, %v1424_v4 }
 0x129   :  { %v2060_v38 = vpop.f32.mrf.mxu0 }
 0x12a   :  { %v2088_v39 = vpop.f32.mrf.mxu1  ;;  %v2061_v2 = vadd.f32 %v2060_v38, %v2059_v36  ;;  %v1522_v26 = vadd.f32 %v2086_v15, %v1473_v12  ;;  %v1435_v38 = vadd.f32 %v2039_v16, %v1386_v14 }
 0x12b   :  { %v2062_v40 = vpop.f32.mrf.mxu0  ;;  %v2089_v22 = vadd.f32 %v2088_v39, %v2087_v37 }
 0x12c   :  { %v2090_v41 = vpop.f32.mrf.mxu1  ;;  %v1476_v20 = vadd.f32 %v2061_v2, %v1427_v8 }
 0x12d   :  { %v2063_v44 = vpop.f32.mrf.mxu0 }
 0x12e   :  { %v2091_v47 = vpop.f32.mrf.mxu1  ;;  %v2064_v17 = vadd.f32 %v2063_v44, %v2062_v40  ;;  %v1525_v28 = vadd.f32 %v2089_v22, %v1476_v20 }
 0x12f   :  { %v2065_v53 = vpop.f32.mrf.mxu0  ;;  %v2092_v27 = vadd.f32 %v2091_v47, %v2090_v41 }
 0x130   :  { %v2093_v55 = vpop.f32.mrf.mxu1  ;;  %v1481_v25 = vadd.f32 %v2064_v17, %v1432_v23 }
 0x131   :  { %v2066_v62 = vpop.f32.mrf.mxu0 }
 0x132   :  { %v2094_v3 = vpop.f32.mrf.mxu1  ;;  %v2067_v30 = vadd.f32 %v2066_v62, %v2065_v53  ;;  %v1530_v44 = vadd.f32 %v2092_v27, %v1481_v25  ;;  %v1661_v25 = vld [vmem:[%s2821_s2] sm:$0x1] }
 0x133   :  { %v2095_v32 = vadd.f32 %v2094_v3, %v2093_v55 }
 0x134   :  { %v1484_v29 = vadd.f32 %v2067_v30, %v1435_v38  ;;  %v1665_v30 = vld [vmem:[%s2822_s3] sm:$0x1] }
 0x136   :  { %v1533_v53 = vadd.f32 %v2095_v32, %v1484_v29  ;;  %v1700_v32 = vld [vmem:[%s2823_s4] sm:$0xff] }
 0x143   :  { %v2112_v7 = vpop.f32.mrf.mxu0 }
 0x144   :  { %v2140_v10 = vpop.f32.mrf.mxu1 }
 0x145   :  { %v2113_v18 = vpop.f32.mrf.mxu0 }
 0x146   :  { %v2141_v21 = vpop.f32.mrf.mxu1  ;;  %v2114_v11 = vadd.f32 %v2113_v18, %v2112_v7 }
 0x147   :  { %v2115_v13 = vpop.f32.mrf.mxu0  ;;  %v2142_v45 = vadd.f32 %v2141_v21, %v2140_v10 }
 0x148   :  { %v2143_v24 = vpop.f32.mrf.mxu1  ;;  %v1571_v35 = vadd.f32 %v2114_v11, %v1522_v26 }
 0x149   :  { %v2116_v31 = vpop.f32.mrf.mxu0 }
 0x14a   :  { %v2117_v34 = vadd.f32 %v2116_v31, %v2115_v13  ;;  %v2144_v33 = vpop.f32.mrf.mxu1  ;;  %v1620_v41 = vadd.f32 %v2142_v45, %v1571_v35 }
 0x14b   :  { %v2118_v36 = vpop.f32.mrf.mxu0  ;;  %v2145_v42 = vadd.f32 %v2144_v33, %v2143_v24  ;;  %v1669_v24 = vlaneseq }
 0x14c   :  { %v1574_v40 = vadd.f32 %v2117_v34, %v1525_v28  ;;  %v2146_v43 = vpop.f32.mrf.mxu1  ;;  %v1643_v59 = vmul.f32 %v1620_v41, %v1620_v41 }
 0x14d   :  { %v2119_v46 = vpop.f32.mrf.mxu0  ;;  %v1670_v26 = vshrl.u32 %v1669_v24, 7 }
 0x14e   :  { %v1623_v37 = vadd.f32 %v2145_v42, %v1574_v40  ;;  %v2120_v39 = vadd.f32 %v2119_v46, %v2118_v36  ;;  %v2147_v48 = vpop.f32.mrf.mxu1 }
 0x14f   :  { %v2121_v47 = vpop.f32.mrf.mxu0  ;;  %v2148_v50 = vadd.f32 %v2147_v48, %v2146_v43  ;;  %v1671_v27 = vsub.s32 0, %v1670_v26 }
 0x150   :  { %v1579_v49 = vadd.f32 %v2120_v39, %v1530_v44  ;;  %v2149_v51 = vpop.f32.mrf.mxu1  ;;  %v1644_v54 = vmul.f32 %v1623_v37, %v1623_v37  ;;  %v1634_v60 = vadd.f32 %v1623_v37, %v1620_v41 }
 0x151   :  { %v2122_v52 = vpop.f32.mrf.mxu0 }
 0x152   :  { %v1628_v56 = vadd.f32 %v2148_v50, %v1579_v49  ;;  %v2123_v57 = vadd.f32 %v2122_v52, %v2121_v47  ;;  %v2150_v58 = vpop.f32.mrf.mxu1  ;;  %v1647_v55 = vadd.f32 %v1644_v54, %v1643_v59  ;;  %v1719_v59 = vand.u32 127, %v1669_v24 }
 0x153   :  { %v2151_v63 = vadd.f32 %v2150_v58, %v2149_v51  ;;  %v11_v58 = vstv %s2824_s5 }
 0x154   :  { %v1645_v61 = vmul.f32 %v1628_v56, %v1628_v56  ;;  %v1582_v62 = vadd.f32 %v2123_v57, %v1533_v53  ;;  %v1635_v0 = vadd.f32 %v1634_v60, %v1628_v56  ;;  %v1701_v53 = vld [vmem:[%s2823_s4 + $0x8] sm:$0xff]  ;;  %12 = vst [vmem:[#allocation2] sm:$0x1] %v11_v58  ;;  %v1724_v60 = vadd.s32 4294967288, %v1719_v59 }
 0x156   :  { %v1631_v1 = vadd.f32 %v2151_v63, %v1582_v62  ;;  %v1648_v2 = vadd.f32 %v1647_v55, %v1645_v61  ;;  %v1722_v63 = vsub.s32 %v1719_v59, %v1670_v26  ;;  %v1727_v55 = vsub.s32 %v1724_v60, %v1670_v26 }
 0x158   :  { %v1636_v3 = vadd.f32 %v1635_v0, %v1631_v1  ;;  %v1646_v4 = vmul.f32 %v1631_v1, %v1631_v1 }
 0x15a   :  { %v1637_v5 = vrot.slane %v1636_v3, 4  ;;  %v1649_v6 = vadd.f32 %v1648_v2, %v1646_v4 }
 0x15c   :  { %v1638_v7 = vadd.f32 %v1637_v5, %v1636_v3  ;;  %v1650_v8 = vrot.slane %v1649_v6, 4 }
 0x15e   :  { %v1639_v9 = vrot.slane %v1638_v7, 2  ;;  %v1651_v10 = vadd.f32 %v1650_v8, %v1649_v6 }
 0x160   :  { %v1640_v12 = vadd.f32 %v1639_v9, %v1638_v7  ;;  %v1652_v15 = vrot.slane %v1651_v10, 2 }
 0x162   :  { %v1641_v17 = vrot.slane %v1640_v12, 1  ;;  %v1653_v18 = vadd.f32 %v1652_v15, %v1651_v10  ;;  %v1927_v10 = vld [vmem:[#allocation2] ss:$0 sm:$0xff] }
 0x164   :  { %v1642_v19 = vadd.f32 %v1641_v17, %v1640_v12  ;;  %v1654_v20 = vrot.slane %v1653_v18, 1 }
 0x166   :  { %v1655_v21 = vadd.f32 %v1654_v20, %v1653_v18  ;;  %v1656_v23 = vmul.f32 0.03125, %v1642_v19 }
 0x168   :  { %v1657_v11 = vmul.f32 0.03125, %v1655_v21  ;;  %v1658_v13 = vmul.f32 %v1656_v23, %v1656_v23 }
 0x16a   :  { %v1659_v14 = vsub.f32 %v1657_v11, %v1658_v13 }
 0x16c   :  { %v1660_v16 = vmax.f32 %v1659_v14, 0.0 }
 0x16e   :  { %v1662_v22 = vadd.f32 1e-05, %v1660_v16 }
 0x170   :  { %2280 = vrsqrt.f32 %v1662_v22 }
 0x17d   :  { %v2281_v31 = vpop.eup %2280 }
 0x17e   :  { %v1664_v28 = vmul.f32 %v2281_v31, %v1661_v25 }
 0x180   :  { %v1666_v34 = vmul.f32 %v1664_v28, %v1656_v23  ;;  %v1672_v33 = vrot.slane %v1664_v28, %v1671_v27 }
 0x182   :  { %v1667_v35 = vsub.f32 %v1665_v30, %v1666_v34  ;;  %v1677_v36 = vmul.f32 %v1672_v33, %v1631_v1  ;;  %v1676_v38 = vmul.f32 %v1672_v33, %v1628_v56  ;;  %v1674_v42 = vmul.f32 %v1672_v33, %v1620_v41 }
 0x183   :  { %v1675_v43 = vmul.f32 %v1672_v33, %v1623_v37 }
 0x184   :  { %v1682_v40 = vrot.slane %v1667_v35, %v1671_v27 }
 0x186   :  { %v1686_v44 = vadd.f32 %v1682_v40, %v1676_v38  ;;  %v1684_v45 = vadd.f32 %v1682_v40, %v1674_v42  ;;  %v1687_v46 = vadd.f32 %v1682_v40, %v1677_v36  ;;  %v1685_v29 = vadd.f32 %v1682_v40, %v1675_v43 }
 0x188   :  { %vm1690_vm0 = vcmp.gt.f32.partialorder %v1686_v44, 0.0  ;;  %v1694_v39 = vmul.f32 0.2, %v1686_v44  ;;  %vm1688_vm1 = vcmp.gt.f32.partialorder %v1684_v45, 0.0  ;;  %v1692_v48 = vmul.f32 0.2, %v1684_v45 }
 0x189   :  { %vm1691_vm2 = vcmp.gt.f32.partialorder %v1687_v46, 0.0  ;;  %v1695_v47 = vmul.f32 0.2, %v1687_v46  ;;  %vm1689_vm3 = vcmp.gt.f32.partialorder %v1685_v29, 0.0  ;;  %v1693_v49 = vmul.f32 0.2, %v1685_v29 }
 0x18a   :  { %v1698_v50 = vsel %vm1690_vm0, %v1686_v44, %v1694_v39  ;;  %v1696_v51 = vsel %vm1688_vm1, %v1684_v45, %v1692_v48 }
 0x18b   :  { %v1704_v41 = vmul.f32 %v1700_v32, %v1698_v50  ;;  %v1702_v37 = vmul.f32 %v1700_v32, %v1696_v51  ;;  %v1699_v52 = vsel %vm1691_vm2, %v1687_v46, %v1695_v47  ;;  %v1697_v54 = vsel %vm1689_vm3, %v1685_v29, %v1693_v49 }
 0x18c   :  { %v1705_v56 = vmul.f32 %v1701_v53, %v1699_v52  ;;  %v1703_v57 = vmul.f32 %v1701_v53, %v1697_v54 }
 0x18d   :  { %1710 = vadd.xlane.f32.xlu1 %v1704_v41  ;;  %1706 = vadd.xlane.f32.xlu0 %v1702_v37 }
 0x191   :  { %1712 = vadd.xlane.f32.xlu1 %v1705_v56  ;;  %1708 = vadd.xlane.f32.xlu0 %v1703_v57 }
 0x216   :  { %v1711_v61 = vpop.xlane.xlu1 %1710  ;;  %v1707_v62 = vpop.xlane.xlu0 %1706 }
 0x217   :  { %v1734_v2 = vrot.slane %v1711_v61, %v1722_v63  ;;  %v1723_v3 = vrot.slane %v1707_v62, %v1722_v63 }
 0x21a   :  { %v1713_v0 = vpop.xlane.xlu1 %1712  ;;  %v1709_v1 = vpop.xlane.xlu0 %1708 }
 0x21b   :  { %v1738_v4 = vrot.slane %v1713_v0, %v1727_v55  ;;  %v1728_v5 = vrot.slane %v1709_v1, %v1727_v55 }
 0x21d   :  { %v1730_v6 = vsel %vm1729_vm4, %v1728_v5, %v1723_v3  ;;  %v1739_v7 = vsel %vm1729_vm4, %v1738_v4, %v1734_v2 }
 0x21e   :  { %v1741_v8 = vsel %vm1740_vm5, %v1739_v7, %v1730_v6 }
 0x21f   :  { %v1744_v9 = vsel %vm1743_vm6, %v1741_v8, 0.0 }
 0x220   :  { %1745 = vadd.xlane.f32.xlu0 %v1744_v9 }
 0x2a9   :  { %v1746_v12 = vpop.xlane.xlu0 %1745 }
 0x2aa   :  { %v1754_v15 = vadd.f32 %v1927_v10, %v1746_v12 }
 0x2ac   :  { %v1755_v17 = vsub.f32 0.0, %v1754_v15 }
 0x2ae   :  { %v1756_v18 = vmul.f32 1.442695, %v1755_v17 }
 0x2b0   :  { %2282 = vpow2.f32 %v1756_v18 }
 0x2bd   :  { %v2283_v19 = vpop.eup %2282 }
 0x2be   :  { %v1758_v20 = vadd.f32 1.0, %v2283_v19 }
 0x2c0   :  { %2284 = vrcp.f32 %v1758_v20 }
 0x2cd   :  { %v2285_v21 = vpop.eup %2284 }
 0x2ce   :  { %1762 = vst.msk [vmem:[%s2825_s6] sm:$0x3] %vm1761_vm7, %v2285_v21 }

</bundles_post_ra>
